<compile_context>
chip_gen: v7x
topology: tpu7x:2x2x1
jax: 0.10.0
libtpu: 0.0.40
codegen_flags: <defaults>
</compile_context>

<pallas_src>
import functools
import numpy as np

import jax
import jax.numpy as jnp
from jax import lax
from jax.experimental import pallas as pl
from jax.experimental.pallas import tpu as pltpu

NEG_INF = -1e9
LN_EPS = 1e-5
VMEM_LIMIT_BYTES = 32 * 1024 * 1024
WDTYPE = jnp.bfloat16        # matmul weights live in HBM as bf16


# ----------------------------------------------------------------------------
# In-kernel math helpers (traced inside Pallas kernels only)
# ----------------------------------------------------------------------------
def _mm(a, b):
    """MXU matmul: bf16 operands, f32 accumulation."""
    return jnp.dot(a.astype(jnp.bfloat16), b.astype(jnp.bfloat16),
                   preferred_element_type=jnp.float32)


def _mm_qkt(q, k):
    """q @ k^T (contract last dims) with bf16 operands, f32 accumulation."""
    return lax.dot_general(q.astype(jnp.bfloat16), k.astype(jnp.bfloat16),
                           (((1,), (1,)), ((), ())),
                           preferred_element_type=jnp.float32)


def _mish(y):
    # mish(y) = y * tanh(softplus(y)) = y * t(t+2) / (t(t+2)+2), t = exp(y)
    # -> single EUP transcendental + one approx reciprocal.
    t = jnp.exp(jnp.minimum(y, 20.0))
    u = t * (t + 2.0)
    return y * u * pl.reciprocal(u + 2.0, approx=True)


def _softmax_last(s):
    s = s - jnp.max(s, axis=-1, keepdims=True)
    e = jnp.exp(s)
    return e * pl.reciprocal(jnp.sum(e, axis=-1, keepdims=True), approx=True)


def _layer_norm(x):
    mu = jnp.mean(x, axis=-1, keepdims=True)
    d = x - mu
    var = jnp.mean(d * d, axis=-1, keepdims=True)
    return d * lax.rsqrt(var + LN_EPS)


def _saln(x, gb, keep):
    """Style-adaptive LN; gb = precomputed (1, 2d) gamma|beta (hoisted affine)."""
    d = x.shape[-1]
    return (_layer_norm(x) * gb[:, :d] + gb[:, d:]) * keep


def _mha_project(q_all, k_all, v_all, bias, wo, n_head, d_k, d_v, inv_temp):
    """Multi-head attention + output projection with NO concat:
    out = sum_h softmax(q_h k_h^T + bias) v_h @ Wo_h.
    TODO(synk): for production pad d_k/d_v to a lane multiple (128) so the
    per-head column slices are relayout-free and the MXU contraction is full."""
    out = None
    for h in range(n_head):
        q = q_all[:, h * d_k:(h + 1) * d_k]
        k = k_all[:, h * d_k:(h + 1) * d_k]
        v = v_all[:, h * d_v:(h + 1) * d_v]
        p = _softmax_last(_mm_qkt(q, k) * inv_temp + bias)
        hv = _mm(p, v)
        o = _mm(hv, wo[h * d_v:(h + 1) * d_v, :])
        out = o if out is None else out + o
    return out


def _conv1d_same(x, w_flat, b, k, c_in):
    """'same' 1-D conv over axis 0 as ONE im2col matmul (K = k*c_in).
    x: (T, c_in) f32, w_flat: (k*c_in, c_out) bf16, b: (1, c_out) f32."""
    t = x.shape[0]
    if k == 1:
        return _mm(x, w_flat) + b
    pad = (k - 1) // 2            # NOTE: matches PyTorch 'same' only for odd k.
    z = jnp.zeros((pad, c_in), jnp.float32)
    xp = jnp.concatenate([z, x, z], axis=0)
    cols = jnp.concatenate([xp[i:i + t, :] for i in range(k)], axis=1)
    return _mm(cols, w_flat) + b


def _pos_ffn(x, w1, b1, w2, b2, k1, k2):
    h = _mish(_conv1d_same(x, w1, b1, k1, x.shape[1]))
    return _conv1d_same(h, w2, b2, k2, h.shape[1]) + x


def _conv_glu(x, w_flat, b, k):
    c = x.shape[1]
    y = _conv1d_same(x, w_flat, b, k, c)
    return x + y[:, :c] * jax.nn.sigmoid(y[:, c:])


# ----------------------------------------------------------------------------
# BlockSpec / compiler-param helpers
# ----------------------------------------------------------------------------
def _bspec(d1, d2):                       # per-batch block, grid=(B,)
    return pl.BlockSpec((None, d1, d2), lambda b: (b, 0, 0))


def _bspec2(d1, d2):                      # per-batch block, grid=(B, L)
    return pl.BlockSpec((None, d1, d2), lambda b, l: (b, 0, 0))


def _wspec(a):                            # whole 2-D weight, grid=(B,)
    return pl.BlockSpec(a.shape, lambda b: (0, 0))


def _lspec(a):                            # stacked layer weight, grid=(B, L)
    return pl.BlockSpec((None,) + a.shape[1:], lambda b, l: (l, 0, 0))


def _gbspec(d):                           # (B, L, 1, d) gamma|beta, grid=(B, L)
    return pl.BlockSpec((None, None, 1, d), lambda b, l: (b, l, 0, 0))


def _cparams(*sem):
    return pltpu.CompilerParams(dimension_semantics=sem,
                                vmem_limit_bytes=VMEM_LIMIT_BYTES)


# ----------------------------------------------------------------------------
# Pallas kernels
# ----------------------------------------------------------------------------
def _fft_self_stack_kernel(x_ref, keep_ref, bias_ref, gb0_ref, gb1_ref,
                           wqkv_ref, bqkv_ref, wo_ref, bo_ref,
                           w1_ref, b1_ref, w2_ref, b2_ref,
                           o_ref, carry_ref,
                           *, n_head, d_k, d_v, inv_temp, k1, k2):
    """One grid step = one encoder FFT layer for one batch element; the
    activation is carried in a VMEM scratch across the layer grid axis."""
    l = pl.program_id(1)

    @pl.when(l == 0)
    def _():
        carry_ref[...] = x_ref[...]

    x = carry_ref[...]
    keep = keep_ref[...]
    bias = bias_ref[...]
    h_dk = n_head * d_k
    qkv = _mm(x, wqkv_ref[...]) + bqkv_ref[...]
    proj = _mha_project(qkv[:, :h_dk], qkv[:, h_dk:2 * h_dk], qkv[:, 2 * h_dk:],
                        bias, wo_ref[...], n_head, d_k, d_v, inv_temp)
    h = proj + bo_ref[...] + x                                   # residual
    h = _saln(h, gb0_ref[...], keep)
    h = _pos_ffn(h, w1_ref[...], b1_ref[...], w2_ref[...], b2_ref[...], k1, k2)
    h = _saln(h, gb1_ref[...], keep)
    carry_ref[...] = h
    o_ref[...] = h


def _fft_cross_stack_kernel(x_ref, s_ref, keep_ref, bias_ref, gb1_ref, gb2_ref,
                            wq_ref, bq_ref, wkv_ref, bkv_ref, wo_ref, bo_ref,
                            w1_ref, b1_ref, w2_ref, b2_ref,
                            hid_ref, carry_ref,
                            *, n_head, d_k, d_v, inv_temp, k1, k2):
    # NOTE: the reference FFTBlock_transformer also runs a self-attention branch
    # whose output is immediately overwritten by the cross-attention branch; it
    # contributes nothing to any returned tensor, so it is elided.
    l = pl.program_id(1)

    @pl.when(l == 0)
    def _():
        carry_ref[...] = x_ref[...]

    x = carry_ref[...]
    s = s_ref[...]
    keep = keep_ref[...]
    bias = bias_ref[...]
    h_dk = n_head * d_k
    q_all = _mm(x, wq_ref[...]) + bq_ref[...]
    kv = _mm(s, wkv_ref[...]) + bkv_ref[...]
    proj = _mha_project(q_all, kv[:, :h_dk], kv[:, h_dk:], bias,
                        wo_ref[...], n_head, d_k, d_v, inv_temp)
    h = proj + bo_ref[...] + x                                   # residual
    h = _saln(h, gb1_ref[...], keep)
    h = _pos_ffn(h, w1_ref[...], b1_ref[...], w2_ref[...], b2_ref[...], k1, k2)
    h = _saln(h, gb2_ref[...], keep)
    carry_ref[...] = h
    hid_ref[...] = h


def _cross_attn_kernel(x_ref, s_ref, wq_ref, bq_ref, wkv_ref, bkv_ref,
                       wo_ref, bo_ref, o_ref, *, n_head, d_k, d_v, inv_temp):
    x = x_ref[...]
    s = s_ref[...]
    h_dk = n_head * d_k
    q_all = _mm(x, wq_ref[...]) + bq_ref[...]
    kv = _mm(s, wkv_ref[...]) + bkv_ref[...]
    proj = _mha_project(q_all, kv[:, :h_dk], kv[:, h_dk:], 0.0,
                        wo_ref[...], n_head, d_k, d_v, inv_temp)
    o_ref[...] = proj + bo_ref[...] + x


def _style_encoder_kernel(mel_ref, keep_ref, bias_ref,
                          sp1w_ref, sp1b_ref, sp2w_ref, sp2b_ref,
                          t1w_ref, t1b_ref, t2w_ref, t2b_ref,
                          wqkv_ref, bqkv_ref, wo_ref, bo_ref,
                          fcw_ref, fcb_ref,
                          vec_ref, feat_ref,
                          *, n_head, d_k, d_v, inv_temp, ks):
    keep = keep_ref[...]
    bias = bias_ref[...]
    x = _mish(_mm(mel_ref[...], sp1w_ref[...]) + sp1b_ref[...])
    x = _mish(_mm(x, sp2w_ref[...]) + sp2b_ref[...])
    x = _conv_glu(x, t1w_ref[...], t1b_ref[...], ks)
    x = _conv_glu(x, t2w_ref[...], t2b_ref[...], ks)
    x = x * keep                                                  # masked_fill
    h_dk = n_head * d_k
    qkv = _mm(x, wqkv_ref[...]) + bqkv_ref[...]
    proj = _mha_project(qkv[:, :h_dk], qkv[:, h_dk:2 * h_dk], qkv[:, 2 * h_dk:],
                        bias, wo_ref[...], n_head, d_k, d_v, inv_temp)
    x = proj + bo_ref[...] + x                                    # residual
    x = _mm(x, fcw_ref[...]) + fcb_ref[...]
    feat_ref[...] = x                                             # style_attn
    n = jnp.maximum(jnp.sum(keep, axis=0, keepdims=True), 1.0)    # NaN guard
    vec_ref[...] = jnp.sum(x * keep, axis=0, keepdims=True) / n   # masked mean


def _enc_prenet_kernel(x_ref, keep_ref, pos_ref,
                       c1w_ref, c1b_ref, c2w_ref, c2b_ref, fcw_ref, fcb_ref,
                       o_ref, *, k):
    x = x_ref[...]
    keep = keep_ref[...]
    c = x.shape[1]
    h = _mish(_conv1d_same(x, c1w_ref[...], c1b_ref[...], k, c))
    h = _mish(_conv1d_same(h, c2w_ref[...], c2b_ref[...], k, c))
    h = _mm(h, fcw_ref[...]) + fcb_ref[...] + x
    o_ref[...] = h * keep + pos_ref[...]


def _dec_prenet_kernel(x_ref, pos_ref, w1_ref, b1_ref, w2_ref, b2_ref, o_ref):
    h = _mish(_mm(x_ref[...], w1_ref[...]) + b1_ref[...])
    o_ref[...] = _mm(h, w2_ref[...]) + b2_ref[...] + pos_ref[...]


def _mel_head_kernel(x_ref, w1_ref, b1_ref, w2_ref, b2_ref, o_ref):
    h = jnp.maximum(_mm(x_ref[...], w1_ref[...]) + b1_ref[...], 0.0)
    o_ref[...] = _mm(h, w2_ref[...]) + b2_ref[...]


def _var_adaptor_kernel(idx_ref, h_ref, valid_ref,
                        fcw_ref, fcb_ref, pw_ref, pb_ref,
                        reg_ref, pred_ref, enc_scr, *, t_mel):
    """Fused: encoder fc_out + duration/pitch/energy heads + length-regulation
    row gather (SMEM index table, one (1, D) row copy per mel frame)."""
    b = pl.program_id(0)
    enc = _mm(h_ref[...], fcw_ref[...]) + fcb_ref[...]            # (Ts, Dd)
    enc_scr[...] = enc
    pred_ref[...] = _mm(enc, pw_ref[...]) + pb_ref[...]           # (Ts, 3)

    def body(t, carry):
        src = idx_ref[b, t]                                       # SMEM scalar
        reg_ref[pl.ds(t, 1), :] = enc_scr[pl.ds(src, 1), :]
        return carry

    lax.fori_loop(0, t_mel, body, 0)
    reg_ref[...] = reg_ref[...] * valid_ref[...]
    # TODO(synk): for production Tm gather 8-row groups per copy to keep the
    # sublane stores dense.


# ----------------------------------------------------------------------------
# Pallas-call wrappers
# ----------------------------------------------------------------------------
def fused_self_fft_stack(x, keep, bias, gb0, gb1, sw, hp):
    B, T, D = x.shape
    L = gb0.shape[1]
    kern = functools.partial(
        _fft_self_stack_kernel, n_head=hp["n_head"], d_k=hp["d_k"],
        d_v=hp["d_v"], inv_temp=1.0 / float(np.sqrt(hp["d_k"])),
        k1=hp["k1"], k2=hp["k2"])
    weights = (sw["wqkv"], sw["bqkv"], sw["wo"], sw["bo"],
               sw["w1"], sw["b1"], sw["w2"], sw["b2"])
    return pl.pallas_call(
        kern, grid=(B, L),
        in_specs=[_bspec2(T, D), _bspec2(T, 1), _bspec2(1, T),
                  _gbspec(2 * D), _gbspec(2 * D)] + [_lspec(w) for w in weights],
        out_specs=pl.BlockSpec((None, T, D), lambda b, l: (b, 0, 0)),
        out_shape=jax.ShapeDtypeStruct((B, T, D), jnp.float32),
        scratch_shapes=[pltpu.VMEM((T, D), jnp.float32)],
        compiler_params=_cparams("parallel", "arbitrary"),
    )(x, keep, bias, gb0, gb1, *weights)


def fused_cross_fft_stack(x, s, keep, bias, gb1, gb2, sw, hp):
    B, T, D = x.shape
    Ts, S = s.shape[1], s.shape[2]
    L = gb1.shape[1]
    kern = functools.partial(
        _fft_cross_stack_kernel, n_head=hp["n_head"], d_k=hp["d_k"],
        d_v=hp["d_v"], inv_temp=1.0 / float(np.sqrt(hp["d_k"])),
        k1=hp["k1"], k2=hp["k2"])
    weights = (sw["wq"], sw["bq"], sw["wkv"], sw["bkv"], sw["wo"], sw["bo"],
               sw["w1"], sw["b1"], sw["w2"], sw["b2"])
    return pl.pallas_call(
        kern, grid=(B, L),
        in_specs=[_bspec2(T, D), _bspec2(Ts, S), _bspec2(T, 1), _bspec2(1, Ts),
                  _gbspec(2 * D), _gbspec(2 * D)] + [_lspec(w) for w in weights],
        out_specs=pl.BlockSpec((None, None, T, D), lambda b, l: (b, l, 0, 0)),
        out_shape=jax.ShapeDtypeStruct((B, L, T, D), jnp.float32),
        scratch_shapes=[pltpu.VMEM((T, D), jnp.float32)],
        compiler_params=_cparams("parallel", "arbitrary"),
    )(x, s, keep, bias, gb1, gb2, *weights)


def cross_attention_layer(x, s, p, hp):
    B, T, D = x.shape
    Ts, S = s.shape[1], s.shape[2]
    kern = functools.partial(
        _cross_attn_kernel, n_head=hp["n_head"], d_k=hp["d_k"], d_v=hp["d_v"],
        inv_temp=1.0 / float(np.sqrt(hp["d_k"])))
    weights = (p["wq"], p["bq"], p["wkv"], p["bkv"], p["wo"], p["bo"])
    return pl.pallas_call(
        kern, grid=(B,),
        in_specs=[_bspec(T, D), _bspec(Ts, S)] + [_wspec(w) for w in weights],
        out_specs=_bspec(T, D),
        out_shape=jax.ShapeDtypeStruct((B, T, D), jnp.float32),
        compiler_params=_cparams("parallel"),
    )(x, s, *weights)


def mel_style_encoder(mel, mel_mask, p, hp):
    B, T, nmel = mel.shape
    S = p["fc_w"].shape[1]
    keep, bias = _mask_aux(mel_mask)
    kern = functools.partial(
        _style_encoder_kernel, n_head=hp["n_head"], d_k=hp["d_k"], d_v=hp["d_v"],
        inv_temp=1.0 / float(np.sqrt(hp["d_k"])), ks=hp["ks"])
    weights = (p["sp1_w"], p["sp1_b"], p["sp2_w"], p["sp2_b"],
               p["t1_w"], p["t1_b"], p["t2_w"], p["t2_b"],
               p["wqkv"], p["bqkv"], p["wo"], p["bo"],
               p["fc_w"], p["fc_b"])
    vec, feat = pl.pallas_call(
        kern, grid=(B,),
        in_specs=[_bspec(T, nmel), _bspec(T, 1), _bspec(1, T)]
                 + [_wspec(w) for w in weights],
        out_specs=[_bspec(1, S), _bspec(T, S)],
        out_shape=[jax.ShapeDtypeStruct((B, 1, S), jnp.float32),
                   jax.ShapeDtypeStruct((B, T, S), jnp.float32)],
        compiler_params=_cparams("parallel"),
    )(mel, keep, bias, *weights)
    return vec[:, 0, :], feat


def encoder_prenet(x, keep, pos, p):
    B, T, D = x.shape
    weights = (p["c1_w"], p["c1_b"], p["c2_w"], p["c2_b"], p["fc_w"], p["fc_b"])
    return pl.pallas_call(
        functools.partial(_enc_prenet_kernel, k=3),
        grid=(B,),
        in_specs=[_bspec(T, D), _bspec(T, 1),
                  pl.BlockSpec((T, D), lambda b: (0, 0))]
                 + [_wspec(w) for w in weights],
        out_specs=_bspec(T, D),
        out_shape=jax.ShapeDtypeStruct((B, T, D), jnp.float32),
        compiler_params=_cparams("parallel"),
    )(x, keep, pos, *weights)


def decoder_prenet(x, pos, p):
    B, T, D = x.shape
    weights = (p["pre1_w"], p["pre1_b"], p["pre2_w"], p["pre2_b"])
    return pl.pallas_call(
        _dec_prenet_kernel, grid=(B,),
        in_specs=[_bspec(T, D), pl.BlockSpec((T, D), lambda b: (0, 0))]
                 + [_wspec(w) for w in weights],
        out_specs=_bspec(T, D),
        out_shape=jax.ShapeDtypeStruct((B, T, D), jnp.float32),
        compiler_params=_cparams("parallel"),
    )(x, pos, *weights)


def mel_head(x, p):
    B, T, D = x.shape
    nmel = p["fo2_w"].shape[1]
    weights = (p["fo1_w"], p["fo1_b"], p["fo2_w"], p["fo2_b"])
    return pl.pallas_call(
        _mel_head_kernel, grid=(B,),
        in_specs=[_bspec(T, D)] + [_wspec(w) for w in weights],
        out_specs=_bspec(T, nmel),
        out_shape=jax.ShapeDtypeStruct((B, T, nmel), jnp.float32),
        compiler_params=_cparams("parallel"),
    )(x, *weights)


def variance_adaptor(h_enc, d_target, max_mel_len, p):
    """Surrogate VarianceAdaptor (source not provided with the module):
    fused encoder fc_out + d/p/e linear heads + ground-truth-duration length
    regulation implemented as a scalar-prefetch row gather."""
    B, Ts, D = h_enc.shape
    Dd = p["fc_out_w"].shape[1]
    Tm = max_mel_len
    dt = d_target.astype(jnp.int32)
    cum = jnp.cumsum(dt, axis=1)                                    # (B, Ts)
    frames = jnp.arange(Tm, dtype=jnp.int32)
    idx = jnp.sum((frames[None, :, None] >= cum[:, None, :]).astype(jnp.int32),
                  axis=-1)
    idx = jnp.clip(idx, 0, Ts - 1).astype(jnp.int32)                # (B, Tm)
    valid = (frames[None, :] < cum[:, -1:]).astype(jnp.float32)[..., None]

    kern = functools.partial(_var_adaptor_kernel, t_mel=Tm)
    weights = (p["fc_out_w"], p["fc_out_b"], p["pred_w"], p["pred_b"])
    grid_spec = pltpu.PrefetchScalarGridSpec(
        num_scalar_prefetch=1, grid=(B,),
        in_specs=[pl.BlockSpec((None, Ts, D), lambda b, idx_ref: (b, 0, 0)),
                  pl.BlockSpec((None, Tm, 1), lambda b, idx_ref: (b, 0, 0))]
                 + [pl.BlockSpec(w.shape, lambda b, idx_ref: (0, 0))
                    for w in weights],
        out_specs=[pl.BlockSpec((None, Tm, Dd), lambda b, idx_ref: (b, 0, 0)),
                   pl.BlockSpec((None, Ts, 3), lambda b, idx_ref: (b, 0, 0))],
        scratch_shapes=[pltpu.VMEM((Ts, Dd), jnp.float32)])
    reg, preds = pl.pallas_call(
        kern, grid_spec=grid_spec,
        out_shape=[jax.ShapeDtypeStruct((B, Tm, Dd), jnp.float32),
                   jax.ShapeDtypeStruct((B, Ts, 3), jnp.float32)],
        compiler_params=_cparams("parallel"),
    )(idx, h_enc, valid, *weights)
    return reg, preds[..., 0], preds[..., 1], preds[..., 2]


# ----------------------------------------------------------------------------
# Model composition (glue in plain JAX)
# ----------------------------------------------------------------------------
def get_mask_from_lengths(lengths, max_len):
    ids = jnp.arange(max_len)
    return ids[None, :] >= lengths[:, None]          # True = padded


def _mask_aux(mask):
    keep = (~mask).astype(jnp.float32)[:, :, None]                  # (B,T,1)
    bias = (mask.astype(jnp.float32) * NEG_INF)[:, None, :]          # (B,1,T)
    return keep, bias


def _saln_gammabeta(style_vec, sa_w, sa_b):
    """Hoisted SALN affine: (B,S) x (L,S,2D) -> (B,L,1,2D) gamma|beta."""
    gb = jnp.einsum('bs,lsd->bld', style_vec, sa_w) + sa_b[None]
    return gb[:, :, None, :]


def encoder_fwd(src_seq, style_vec, src_mask, p, hp, pos_table):
    B, T = src_seq.shape
    keep, bias = _mask_aux(src_mask)
    src_embedded = jnp.take(p["emb"], src_seq, axis=0)   # embedding gather (glue)
    pos = pos_table[:T]
    h = encoder_prenet(src_embedded, keep, pos, p["prenet"])
    sw = p["layers"]
    gb0 = _saln_gammabeta(style_vec, sw["sa0_w"], sw["sa0_b"])
    gb1 = _saln_gammabeta(style_vec, sw["sa1_w"], sw["sa1_b"])
    h = fused_self_fft_stack(h, keep, bias, gb0, gb1, sw, hp)
    return h, src_embedded


def decoder_fwd(x, style_vec, style_attn, mel_mask, p, hp, pos_table):
    B, T, Dd = x.shape
    keep, bias = _mask_aux(mel_mask)
    pos = pos_table[:T]
    h0 = decoder_prenet(x, pos, p)
    sw = p["layers"]
    gb1 = _saln_gammabeta(style_vec, sw["sa1_w"], sw["sa1_b"])
    gb2 = _saln_gammabeta(style_vec, sw["sa2_w"], sw["sa2_b"])
    hid = fused_cross_fft_stack(h0, style_attn, keep, bias, gb1, gb2, sw, hp)
    L = hid.shape[1]
    lg = hp["lin_gen_layer"]
    # TODO(synk): reference fallback fc_out(fc_out(.)) when n_layers <
    # lin_gen_layer is shape-inconsistent; use the last hidden state instead.
    pick = lg if lg < L else L - 1
    final_output = mel_head(hid[:, pick], p)
    hidden_output = [hid[:, i] for i in range(L)]
    return final_output, hidden_output


def stylespeech_forward(params, src_seq, src_len, mel_target, mel_len, d_target,
                        *, hp, max_src_len, max_mel_len):
    src_mask = get_mask_from_lengths(src_len, max_src_len)
    mel_mask = get_mask_from_lengths(mel_len, max_mel_len)

    style_vector, style_attn = mel_style_encoder(
        mel_target, mel_mask, params["style_encoder"], hp["style"])

    enc_hidden, src_embedded = encoder_fwd(
        src_seq, style_vector, src_mask, params["encoder"], hp["enc"],
        params["pos_table_enc"])

    acoustic, d_pred, p_pred, e_pred = variance_adaptor(
        enc_hidden, d_target, max_mel_len, params["var_adaptor"])

    acoustic = cross_attention_layer(
        acoustic, style_attn, params["attn_layer"], hp["attn"])

    mel_prediction, hidden_output = decoder_fwd(
        acoustic, style_vector, style_attn, mel_mask, params["decoder"],
        hp["dec"], params["pos_table_dec"])

    return (mel_prediction, src_embedded, style_vector, d_pred, p_pred, e_pred,
            src_mask, mel_mask, mel_len, acoustic, hidden_output)


# ----------------------------------------------------------------------------
# Deterministic parameter construction
# ----------------------------------------------------------------------------
def get_sinusoid_encoding_table(n_position, d_hid):
    pos = np.arange(n_position)[:, None].astype(np.float64)
    i = np.arange(d_hid)[None, :]
    tab = pos / np.power(10000, 2 * (i // 2) / d_hid)
    tab[:, 0::2] = np.sin(tab[:, 0::2])
    tab[:, 1::2] = np.cos(tab[:, 1::2])
    return jnp.asarray(tab, dtype=jnp.float32)


def _dense_init(key, d_in, d_out, scale=0.1):
    w = (jax.random.normal(key, (d_in, d_out), jnp.float32) * scale).astype(WDTYPE)
    b = jnp.zeros((1, d_out), jnp.float32)
    return w, b


def _conv_init(key, k, c_in, c_out, scale=0.1):
    w = (jax.random.normal(key, (k * c_in, c_out), jnp.float32) * scale).astype(WDTYPE)
    b = jnp.zeros((1, c_out), jnp.float32)
    return w, b


def _saln_init(key, d_model, style_dim, scale=0.1):
    # f32: consumed by the hoisted XLA style-affine, not by the kernels.
    w = jax.random.normal(key, (style_dim, 2 * d_model), jnp.float32) * scale
    b = jnp.concatenate([jnp.ones((d_model,), jnp.float32),
                         jnp.zeros((d_model,), jnp.float32)], axis=-1)
    return w, b


def _stack_layers(layer_list):
    return jax.tree_util.tree_map(lambda *xs: jnp.stack(xs, axis=0), *layer_list)


def make_hparams(cfg):
    k1, k2 = cfg["fft_conv1d_kernel_size"]
    return dict(
        style=dict(n_head=cfg["style_head"],
                   d_k=cfg["style_hidden"] // cfg["style_head"],
                   d_v=cfg["style_hidden"] // cfg["style_head"],
                   ks=cfg["style_kernel_size"]),
        enc=dict(n_head=cfg["encoder_head"],
                 d_k=cfg["encoder_hidden"] // cfg["encoder_head"],
                 d_v=cfg["encoder_hidden"] // cfg["encoder_head"],
                 k1=k1, k2=k2),
        dec=dict(n_head=cfg["decoder_head"],
                 d_k=cfg["decoder_hidden"] // cfg["decoder_head"],
                 d_v=cfg["decoder_hidden"] // cfg["decoder_head"],
                 k1=k1, k2=k2, lin_gen_layer=3),
        attn=dict(n_head=cfg["encoder_head"],
                  d_k=cfg["style_hidden"] // cfg["encoder_head"],
                  d_v=cfg["style_hidden"] // cfg["encoder_head"]),
    )


def init_params(key, cfg):
    D = cfg["encoder_hidden"]
    Dd = cfg["decoder_hidden"]
    Hs = cfg["style_hidden"]
    S = cfg["style_vector_dim"]
    nmel = cfg["n_mel_channels"]
    d_inner = cfg["fft_conv1d_filter_size"]
    K1, K2 = cfg["fft_conv1d_kernel_size"]
    Ks = cfg["style_kernel_size"]
    keys = iter(jax.random.split(key, 256))
    nk = lambda: next(keys)

    dense = lambda di, do: _dense_init(nk(), di, do)
    conv = lambda k, ci, co: _conv_init(nk(), k, ci, co)

    def self_mha(d_model, n_head, d_k, d_v):
        wqkv, bqkv = dense(d_model, n_head * (2 * d_k + d_v))
        wo, bo = dense(n_head * d_v, d_model)
        return dict(wqkv=wqkv, bqkv=bqkv, wo=wo, bo=bo)

    def cross_mha(d_model, d_style, n_head, d_k, d_v):
        wq, bq = dense(d_model, n_head * d_k)
        wkv, bkv = dense(d_style, n_head * (d_k + d_v))
        wo, bo = dense(n_head * d_v, d_model)
        return dict(wq=wq, bq=bq, wkv=wkv, bkv=bkv, wo=wo, bo=bo)

    def self_block(d_model, n_head):
        dk = d_model // n_head
        p = self_mha(d_model, n_head, dk, dk)
        p["sa0_w"], p["sa0_b"] = _saln_init(nk(), d_model, S)
        p["w1"], p["b1"] = conv(K1, d_model, d_inner)
        p["w2"], p["b2"] = conv(K2, d_inner, d_model)
        p["sa1_w"], p["sa1_b"] = _saln_init(nk(), d_model, S)
        return p

    def cross_block(d_model, d_style, n_head):
        dk = d_model // n_head
        p = cross_mha(d_model, d_style, n_head, dk, dk)
        p["sa1_w"], p["sa1_b"] = _saln_init(nk(), d_model, S)
        p["w1"], p["b1"] = conv(K1, d_model, d_inner)
        p["w2"], p["b2"] = conv(K2, d_inner, d_model)
        p["sa2_w"], p["sa2_b"] = _saln_init(nk(), d_model, S)
        return p

    # --- MelStyleEncoder_attn ---
    se = {}
    se["sp1_w"], se["sp1_b"] = dense(nmel, Hs)
    se["sp2_w"], se["sp2_b"] = dense(Hs, Hs)
    se["t1_w"], se["t1_b"] = conv(Ks, Hs, 2 * Hs)
    se["t2_w"], se["t2_b"] = conv(Ks, Hs, 2 * Hs)
    se.update(self_mha(Hs, cfg["style_head"],
                       Hs // cfg["style_head"], Hs // cfg["style_head"]))
    se["fc_w"], se["fc_b"] = dense(Hs, S)

    # --- Encoder (layer weights stacked along a leading L axis) ---
    enc = {}
    emb = jax.random.normal(nk(), (cfg["n_src_vocab"], D), jnp.float32) * 0.1
    enc["emb"] = emb.at[0].set(0.0)                   # padding_idx = 0
    pr = {}
    pr["c1_w"], pr["c1_b"] = conv(3, D, D)
    pr["c2_w"], pr["c2_b"] = conv(3, D, D)
    pr["fc_w"], pr["fc_b"] = dense(D, D)
    enc["prenet"] = pr
    enc["layers"] = _stack_layers([self_block(D, cfg["encoder_head"])
                                   for _ in range(cfg["encoder_layer"])])

    # --- VarianceAdaptor surrogate (encoder fc_out fused here + d/p/e heads) ---
    va = {}
    va["fc_out_w"], va["fc_out_b"] = dense(D, Dd)
    va["pred_w"], va["pred_b"] = dense(Dd, 3)

    # --- top-level attn_layer (requires encoder_hidden == decoder_hidden) ---
    al = cross_mha(D, Hs, cfg["encoder_head"],
                   Hs // cfg["encoder_head"], Hs // cfg["encoder_head"])

    # --- Decoder_transformer (layer weights stacked along L) ---
    dec = {}
    dec["pre1_w"], dec["pre1_b"] = dense(Dd, Dd // 2)
    dec["pre2_w"], dec["pre2_b"] = dense(Dd // 2, Dd)
    dec["layers"] = _stack_layers([cross_block(Dd, S, cfg["decoder_head"])
                                   for _ in range(cfg["decoder_layer"])])
    dec["fo1_w"], dec["fo1_b"] = dense(Dd, Dd)
    dec["fo2_w"], dec["fo2_b"] = dense(Dd, nmel)

    return dict(
        style_encoder=se, encoder=enc, var_adaptor=va, attn_layer=al,
        decoder=dec,
        pos_table_enc=get_sinusoid_encoding_table(cfg["max_seq_len"] + 1, D),
        pos_table_dec=get_sinusoid_encoding_table(cfg["max_seq_len"] + 1, Dd),
    )


# ----------------------------------------------------------------------------
# Main
# ----------------------------------------------------------------------------
if __name__ == "__main__":
    cfg = dict(
        max_seq_len=32,
        encoder_layer=2, encoder_hidden=32, encoder_head=2,
        decoder_layer=4, decoder_hidden=32, decoder_head=2,
        fft_conv1d_filter_size=64, fft_conv1d_kernel_size=(9, 1),
        n_mel_channels=16,
        style_hidden=32, style_vector_dim=32, style_kernel_size=5, style_head=2,
        dropout=0.1,
        n_src_vocab=40,
    )

    B, Ts, Tm = 2, 8, 16
    key = jax.random.PRNGKey(0)
    k_par, k_txt, k_mel = jax.random.split(key, 3)

    src_len = jnp.array([8, 6], jnp.int32)
    mel_len = jnp.array([16, 12], jnp.int32)
    d_target = jnp.array([[2, 2, 2, 2, 2, 2, 2, 2],
                          [2, 2, 2, 2, 2, 2, 0, 0]], jnp.int32)
    src_seq = jax.random.randint(k_txt, (B, Ts), 1, cfg["n_src_vocab"])
    src_seq = jnp.where(jnp.arange(Ts)[None, :] >= src_len[:, None], 0, src_seq)
    mel_target = jax.random.normal(k_mel, (B, Tm, cfg["n_mel_channels"]),
                                   jnp.float32)

    params = init_params(k_par, cfg)
    hp = make_hparams(cfg)        # static hyper-params, kept OUT of the pytree

    fwd = jax.jit(functools.partial(stylespeech_forward, hp=hp,
                                    max_src_len=Ts, max_mel_len=Tm))
    outs = fwd(params, src_seq, src_len, mel_target, mel_len, d_target)
    outs = jax.block_until_ready(outs)

    mel_prediction, src_embedded, style_vector = outs[0], outs[1], outs[2]
    assert mel_prediction.shape == (B, Tm, cfg["n_mel_channels"])
    assert style_vector.shape == (B, cfg["style_vector_dim"])
    assert bool(jnp.all(jnp.isfinite(mel_prediction)))
    assert bool(jnp.all(jnp.isfinite(style_vector)))
    print("KERNEL_OK")
</pallas_src>

<mosaic_0001>
module attributes {stable_mosaic.version = 11 : i64} {
  func.func @_style_encoder_kernel(%arg0: i32, %arg1: memref<1x16x16xf32, #tpu.memory_space<vmem>>, %arg2: memref<1x16x1xf32, #tpu.memory_space<vmem>>, %arg3: memref<1x1x16xf32, #tpu.memory_space<vmem>>, %arg4: memref<16x32xbf16, #tpu.memory_space<vmem>>, %arg5: memref<1x32xf32, #tpu.memory_space<vmem>>, %arg6: memref<32x32xbf16, #tpu.memory_space<vmem>>, %arg7: memref<1x32xf32, #tpu.memory_space<vmem>>, %arg8: memref<160x64xbf16, #tpu.memory_space<vmem>>, %arg9: memref<1x64xf32, #tpu.memory_space<vmem>>, %arg10: memref<160x64xbf16, #tpu.memory_space<vmem>>, %arg11: memref<1x64xf32, #tpu.memory_space<vmem>>, %arg12: memref<32x96xbf16, #tpu.memory_space<vmem>>, %arg13: memref<1x96xf32, #tpu.memory_space<vmem>>, %arg14: memref<32x32xbf16, #tpu.memory_space<vmem>>, %arg15: memref<1x32xf32, #tpu.memory_space<vmem>>, %arg16: memref<32x32xbf16, #tpu.memory_space<vmem>>, %arg17: memref<1x32xf32, #tpu.memory_space<vmem>>, %arg18: memref<1x1x32xf32, #tpu.memory_space<vmem>>, %arg19: memref<1x16x32xf32, #tpu.memory_space<vmem>>) attributes {dimension_semantics = [#tpu.dimension_semantics<parallel>], iteration_bounds = array<i64: 2>, scalar_prefetch = 0 : i64, scratch_operands = 0 : i64, tpu.core_type = #tpu.core_type<tc>, window_params = [{transform_indices = @transform_0, window_bounds = array<i64: 1, 16, 16>}, {transform_indices = @transform_1, window_bounds = array<i64: 1, 16, 1>}, {transform_indices = @transform_2, window_bounds = array<i64: 1, 1, 16>}, {pipeline_mode = #tpu.pipeline_mode<synchronous>, transform_indices = @transform_3, window_bounds = array<i64: 16, 32>}, {pipeline_mode = #tpu.pipeline_mode<synchronous>, transform_indices = @transform_4, window_bounds = array<i64: 1, 32>}, {pipeline_mode = #tpu.pipeline_mode<synchronous>, transform_indices = @transform_5, window_bounds = array<i64: 32, 32>}, {pipeline_mode = #tpu.pipeline_mode<synchronous>, transform_indices = @transform_6, window_bounds = array<i64: 1, 32>}, {pipeline_mode = #tpu.pipeline_mode<synchronous>, transform_indices = @transform_7, window_bounds = array<i64: 160, 64>}, {pipeline_mode = #tpu.pipeline_mode<synchronous>, transform_indices = @transform_8, window_bounds = array<i64: 1, 64>}, {pipeline_mode = #tpu.pipeline_mode<synchronous>, transform_indices = @transform_9, window_bounds = array<i64: 160, 64>}, {pipeline_mode = #tpu.pipeline_mode<synchronous>, transform_indices = @transform_10, window_bounds = array<i64: 1, 64>}, {pipeline_mode = #tpu.pipeline_mode<synchronous>, transform_indices = @transform_11, window_bounds = array<i64: 32, 96>}, {pipeline_mode = #tpu.pipeline_mode<synchronous>, transform_indices = @transform_12, window_bounds = array<i64: 1, 96>}, {pipeline_mode = #tpu.pipeline_mode<synchronous>, transform_indices = @transform_13, window_bounds = array<i64: 32, 32>}, {pipeline_mode = #tpu.pipeline_mode<synchronous>, transform_indices = @transform_14, window_bounds = array<i64: 1, 32>}, {pipeline_mode = #tpu.pipeline_mode<synchronous>, transform_indices = @transform_15, window_bounds = array<i64: 32, 32>}, {pipeline_mode = #tpu.pipeline_mode<synchronous>, transform_indices = @transform_16, window_bounds = array<i64: 1, 32>}, {transform_indices = @transform_17, window_bounds = array<i64: 1, 1, 32>}, {transform_indices = @transform_18, window_bounds = array<i64: 1, 16, 32>}]} {
    %c0 = arith.constant 0 : index
    %c0_0 = arith.constant 0 : index
    %c0_1 = arith.constant 0 : index
    %0 = vector.load %arg2[%c0, %c0_0, %c0_1] : memref<1x16x1xf32, #tpu.memory_space<vmem>>, vector<1x16x1xf32>
    %1 = vector.shape_cast %0 : vector<1x16x1xf32> to vector<16x1xf32>
    %c0_2 = arith.constant 0 : index
    %c0_3 = arith.constant 0 : index
    %c0_4 = arith.constant 0 : index
    %2 = vector.load %arg3[%c0_2, %c0_3, %c0_4] : memref<1x1x16xf32, #tpu.memory_space<vmem>>, vector<1x1x16xf32>
    %3 = vector.shape_cast %2 : vector<1x1x16xf32> to vector<1x16xf32>
    %c0_5 = arith.constant 0 : index
    %c0_6 = arith.constant 0 : index
    %c0_7 = arith.constant 0 : index
    %4 = vector.load %arg1[%c0_5, %c0_6, %c0_7] : memref<1x16x16xf32, #tpu.memory_space<vmem>>, vector<1x16x16xf32>
    %5 = vector.shape_cast %4 : vector<1x16x16xf32> to vector<16x16xf32>
    %c0_8 = arith.constant 0 : index
    %c0_9 = arith.constant 0 : index
    %6 = vector.load %arg4[%c0_8, %c0_9] : memref<16x32xbf16, #tpu.memory_space<vmem>>, vector<16x32xbf16>
    %7 = arith.truncf %5 : vector<16x16xf32> to vector<16x16xbf16>
    %cst = arith.constant dense<0.000000e+00> : vector<16x32xf32>
    %8 = tpu.matmul %7, %6, %cst {dimension_numbers = #tpu.dot_dimension_numbers<[1], [0], [0], [1], [0, 0, 1, 1], [], []>} : vector<16x16xbf16>, vector<16x32xbf16>, vector<16x32xf32> -> vector<16x32xf32>
    %c0_10 = arith.constant 0 : index
    %c0_11 = arith.constant 0 : index
    %9 = vector.load %arg5[%c0_10, %c0_11] : memref<1x32xf32, #tpu.memory_space<vmem>>, vector<1x32xf32>
    %10 = vector.broadcast %9 : vector<1x32xf32> to vector<16x32xf32>
    %11 = arith.addf %8, %10 : vector<16x32xf32>
    %cst_12 = arith.constant 2.000000e+01 : f32
    %12 = vector.broadcast %cst_12 : f32 to vector<16x32xf32>
    %13 = arith.minimumf %11, %12 : vector<16x32xf32>
    %14 = math.exp %13 : vector<16x32xf32>
    %cst_13 = arith.constant 2.000000e+00 : f32
    %15 = vector.broadcast %cst_13 : f32 to vector<16x32xf32>
    %16 = arith.addf %14, %15 : vector<16x32xf32>
    %17 = arith.mulf %14, %16 : vector<16x32xf32>
    %18 = arith.mulf %11, %17 : vector<16x32xf32>
    %cst_14 = arith.constant 2.000000e+00 : f32
    %19 = vector.broadcast %cst_14 : f32 to vector<16x32xf32>
    %20 = arith.addf %17, %19 : vector<16x32xf32>
    %21 = tpu.reciprocal %20 {approx = true} : vector<16x32xf32> -> vector<16x32xf32>
    %22 = arith.mulf %18, %21 : vector<16x32xf32>
    %c0_15 = arith.constant 0 : index
    %c0_16 = arith.constant 0 : index
    %23 = vector.load %arg6[%c0_15, %c0_16] : memref<32x32xbf16, #tpu.memory_space<vmem>>, vector<32x32xbf16>
    %24 = arith.truncf %22 : vector<16x32xf32> to vector<16x32xbf16>
    %cst_17 = arith.constant dense<0.000000e+00> : vector<16x32xf32>
    %25 = tpu.matmul %24, %23, %cst_17 {dimension_numbers = #tpu.dot_dimension_numbers<[1], [0], [0], [1], [0, 0, 1, 1], [], []>} : vector<16x32xbf16>, vector<32x32xbf16>, vector<16x32xf32> -> vector<16x32xf32>
    %c0_18 = arith.constant 0 : index
    %c0_19 = arith.constant 0 : index
    %26 = vector.load %arg7[%c0_18, %c0_19] : memref<1x32xf32, #tpu.memory_space<vmem>>, vector<1x32xf32>
    %27 = vector.broadcast %26 : vector<1x32xf32> to vector<16x32xf32>
    %28 = arith.addf %25, %27 : vector<16x32xf32>
    %cst_20 = arith.constant 2.000000e+01 : f32
    %29 = vector.broadcast %cst_20 : f32 to vector<16x32xf32>
    %30 = arith.minimumf %28, %29 : vector<16x32xf32>
    %31 = math.exp %30 : vector<16x32xf32>
    %cst_21 = arith.constant 2.000000e+00 : f32
    %32 = vector.broadcast %cst_21 : f32 to vector<16x32xf32>
    %33 = arith.addf %31, %32 : vector<16x32xf32>
    %34 = arith.mulf %31, %33 : vector<16x32xf32>
    %35 = arith.mulf %28, %34 : vector<16x32xf32>
    %cst_22 = arith.constant 2.000000e+00 : f32
    %36 = vector.broadcast %cst_22 : f32 to vector<16x32xf32>
    %37 = arith.addf %34, %36 : vector<16x32xf32>
    %38 = tpu.reciprocal %37 {approx = true} : vector<16x32xf32> -> vector<16x32xf32>
    %39 = arith.mulf %35, %38 : vector<16x32xf32>
    %c0_23 = arith.constant 0 : index
    %c0_24 = arith.constant 0 : index
    %40 = vector.load %arg8[%c0_23, %c0_24] : memref<160x64xbf16, #tpu.memory_space<vmem>>, vector<160x64xbf16>
    %c0_25 = arith.constant 0 : index
    %c0_26 = arith.constant 0 : index
    %41 = vector.load %arg9[%c0_25, %c0_26] : memref<1x64xf32, #tpu.memory_space<vmem>>, vector<1x64xf32>
    %cst_27 = arith.constant 0.000000e+00 : f32
    %42 = vector.broadcast %cst_27 : f32 to vector<2x32xf32>
    %43 = tpu.concatenate %42, %39, %42 in 0 : vector<2x32xf32>, vector<16x32xf32>, vector<2x32xf32> -> vector<20x32xf32>
    %44 = vector.extract_strided_slice %43 {offsets = [0, 0], sizes = [16, 32], strides = [1, 1]} : vector<20x32xf32> to vector<16x32xf32>
    %45 = vector.extract_strided_slice %43 {offsets = [1, 0], sizes = [16, 32], strides = [1, 1]} : vector<20x32xf32> to vector<16x32xf32>
    %46 = vector.extract_strided_slice %43 {offsets = [2, 0], sizes = [16, 32], strides = [1, 1]} : vector<20x32xf32> to vector<16x32xf32>
    %47 = vector.extract_strided_slice %43 {offsets = [3, 0], sizes = [16, 32], strides = [1, 1]} : vector<20x32xf32> to vector<16x32xf32>
    %48 = vector.extract_strided_slice %43 {offsets = [4, 0], sizes = [16, 32], strides = [1, 1]} : vector<20x32xf32> to vector<16x32xf32>
    %49 = tpu.concatenate %44, %45, %46, %47, %48 in 1 : vector<16x32xf32>, vector<16x32xf32>, vector<16x32xf32>, vector<16x32xf32>, vector<16x32xf32> -> vector<16x160xf32>
    %50 = arith.truncf %49 : vector<16x160xf32> to vector<16x160xbf16>
    %cst_28 = arith.constant dense<0.000000e+00> : vector<16x64xf32>
    %51 = tpu.matmul %50, %40, %cst_28 {dimension_numbers = #tpu.dot_dimension_numbers<[1], [0], [0], [1], [0, 0, 1, 1], [], []>} : vector<16x160xbf16>, vector<160x64xbf16>, vector<16x64xf32> -> vector<16x64xf32>
    %52 = vector.broadcast %41 : vector<1x64xf32> to vector<16x64xf32>
    %53 = arith.addf %51, %52 : vector<16x64xf32>
    %54 = vector.extract_strided_slice %53 {offsets = [0, 0], sizes = [16, 32], strides = [1, 1]} : vector<16x64xf32> to vector<16x32xf32>
    %55 = vector.extract_strided_slice %53 {offsets = [0, 32], sizes = [16, 32], strides = [1, 1]} : vector<16x64xf32> to vector<16x32xf32>
    %56 = arith.negf %55 : vector<16x32xf32>
    %57 = math.exp %56 : vector<16x32xf32>
    %cst_29 = arith.constant 1.000000e+00 : f32
    %58 = vector.broadcast %cst_29 : f32 to vector<16x32xf32>
    %59 = arith.addf %58, %57 : vector<16x32xf32>
    %60 = arith.divf %58, %59 : vector<16x32xf32>
    %61 = arith.mulf %54, %60 : vector<16x32xf32>
    %62 = arith.addf %39, %61 : vector<16x32xf32>
    %c0_30 = arith.constant 0 : index
    %c0_31 = arith.constant 0 : index
    %63 = vector.load %arg10[%c0_30, %c0_31] : memref<160x64xbf16, #tpu.memory_space<vmem>>, vector<160x64xbf16>
    %c0_32 = arith.constant 0 : index
    %c0_33 = arith.constant 0 : index
    %64 = vector.load %arg11[%c0_32, %c0_33] : memref<1x64xf32, #tpu.memory_space<vmem>>, vector<1x64xf32>
    %cst_34 = arith.constant 0.000000e+00 : f32
    %65 = vector.broadcast %cst_34 : f32 to vector<2x32xf32>
    %66 = tpu.concatenate %65, %62, %65 in 0 : vector<2x32xf32>, vector<16x32xf32>, vector<2x32xf32> -> vector<20x32xf32>
    %67 = vector.extract_strided_slice %66 {offsets = [0, 0], sizes = [16, 32], strides = [1, 1]} : vector<20x32xf32> to vector<16x32xf32>
    %68 = vector.extract_strided_slice %66 {offsets = [1, 0], sizes = [16, 32], strides = [1, 1]} : vector<20x32xf32> to vector<16x32xf32>
    %69 = vector.extract_strided_slice %66 {offsets = [2, 0], sizes = [16, 32], strides = [1, 1]} : vector<20x32xf32> to vector<16x32xf32>
    %70 = vector.extract_strided_slice %66 {offsets = [3, 0], sizes = [16, 32], strides = [1, 1]} : vector<20x32xf32> to vector<16x32xf32>
    %71 = vector.extract_strided_slice %66 {offsets = [4, 0], sizes = [16, 32], strides = [1, 1]} : vector<20x32xf32> to vector<16x32xf32>
    %72 = tpu.concatenate %67, %68, %69, %70, %71 in 1 : vector<16x32xf32>, vector<16x32xf32>, vector<16x32xf32>, vector<16x32xf32>, vector<16x32xf32> -> vector<16x160xf32>
    %73 = arith.truncf %72 : vector<16x160xf32> to vector<16x160xbf16>
    %cst_35 = arith.constant dense<0.000000e+00> : vector<16x64xf32>
    %74 = tpu.matmul %73, %63, %cst_35 {dimension_numbers = #tpu.dot_dimension_numbers<[1], [0], [0], [1], [0, 0, 1, 1], [], []>} : vector<16x160xbf16>, vector<160x64xbf16>, vector<16x64xf32> -> vector<16x64xf32>
    %75 = vector.broadcast %64 : vector<1x64xf32> to vector<16x64xf32>
    %76 = arith.addf %74, %75 : vector<16x64xf32>
    %77 = vector.extract_strided_slice %76 {offsets = [0, 0], sizes = [16, 32], strides = [1, 1]} : vector<16x64xf32> to vector<16x32xf32>
    %78 = vector.extract_strided_slice %76 {offsets = [0, 32], sizes = [16, 32], strides = [1, 1]} : vector<16x64xf32> to vector<16x32xf32>
    %79 = arith.negf %78 : vector<16x32xf32>
    %80 = math.exp %79 : vector<16x32xf32>
    %cst_36 = arith.constant 1.000000e+00 : f32
    %81 = vector.broadcast %cst_36 : f32 to vector<16x32xf32>
    %82 = arith.addf %81, %80 : vector<16x32xf32>
    %83 = arith.divf %81, %82 : vector<16x32xf32>
    %84 = arith.mulf %77, %83 : vector<16x32xf32>
    %85 = arith.addf %62, %84 : vector<16x32xf32>
    %86 = vector.broadcast %1 : vector<16x1xf32> to vector<16x32xf32>
    %87 = arith.mulf %85, %86 : vector<16x32xf32>
    %c0_37 = arith.constant 0 : index
    %c0_38 = arith.constant 0 : index
    %88 = vector.load %arg12[%c0_37, %c0_38] : memref<32x96xbf16, #tpu.memory_space<vmem>>, vector<32x96xbf16>
    %89 = arith.truncf %87 : vector<16x32xf32> to vector<16x32xbf16>
    %cst_39 = arith.constant dense<0.000000e+00> : vector<16x96xf32>
    %90 = tpu.matmul %89, %88, %cst_39 {dimension_numbers = #tpu.dot_dimension_numbers<[1], [0], [0], [1], [0, 0, 1, 1], [], []>} : vector<16x32xbf16>, vector<32x96xbf16>, vector<16x96xf32> -> vector<16x96xf32>
    %c0_40 = arith.constant 0 : index
    %c0_41 = arith.constant 0 : index
    %91 = vector.load %arg13[%c0_40, %c0_41] : memref<1x96xf32, #tpu.memory_space<vmem>>, vector<1x96xf32>
    %92 = vector.broadcast %91 : vector<1x96xf32> to vector<16x96xf32>
    %93 = arith.addf %90, %92 : vector<16x96xf32>
    %94 = vector.extract_strided_slice %93 {offsets = [0, 0], sizes = [16, 32], strides = [1, 1]} : vector<16x96xf32> to vector<16x32xf32>
    %95 = vector.extract_strided_slice %93 {offsets = [0, 32], sizes = [16, 32], strides = [1, 1]} : vector<16x96xf32> to vector<16x32xf32>
    %96 = vector.extract_strided_slice %93 {offsets = [0, 64], sizes = [16, 32], strides = [1, 1]} : vector<16x96xf32> to vector<16x32xf32>
    %c0_42 = arith.constant 0 : index
    %c0_43 = arith.constant 0 : index
    %97 = vector.load %arg14[%c0_42, %c0_43] : memref<32x32xbf16, #tpu.memory_space<vmem>>, vector<32x32xbf16>
    %98 = vector.extract_strided_slice %94 {offsets = [0, 0], sizes = [16, 16], strides = [1, 1]} : vector<16x32xf32> to vector<16x16xf32>
    %99 = vector.extract_strided_slice %95 {offsets = [0, 0], sizes = [16, 16], strides = [1, 1]} : vector<16x32xf32> to vector<16x16xf32>
    %100 = vector.extract_strided_slice %96 {offsets = [0, 0], sizes = [16, 16], strides = [1, 1]} : vector<16x32xf32> to vector<16x16xf32>
    %101 = arith.truncf %98 : vector<16x16xf32> to vector<16x16xbf16>
    %102 = arith.truncf %99 : vector<16x16xf32> to vector<16x16xbf16>
    %cst_44 = arith.constant dense<0.000000e+00> : vector<16x16xf32>
    %103 = tpu.matmul %101, %102, %cst_44 {dimension_numbers = #tpu.dot_dimension_numbers<[1], [1], [0], [0], [0, 0, 1, 0], [], []>} : vector<16x16xbf16>, vector<16x16xbf16>, vector<16x16xf32> -> vector<16x16xf32>
    %cst_45 = arith.constant 2.500000e-01 : f32
    %104 = vector.broadcast %cst_45 : f32 to vector<16x16xf32>
    %105 = arith.mulf %103, %104 : vector<16x16xf32>
    %106 = vector.broadcast %3 : vector<1x16xf32> to vector<16x16xf32>
    %107 = arith.addf %105, %106 : vector<16x16xf32>
    %cst_46 = arith.constant dense<0xFF800000> : vector<16xf32>
    %108 = vector.multi_reduction <maximumf>, %107, %cst_46 [1] : vector<16x16xf32> to vector<16xf32>
    %109 = vector.shape_cast %108 : vector<16xf32> to vector<16x1xf32>
    %110 = vector.broadcast %109 : vector<16x1xf32> to vector<16x16xf32>
    %111 = arith.subf %107, %110 : vector<16x16xf32>
    %112 = math.exp %111 : vector<16x16xf32>
    %cst_47 = arith.constant dense<0.000000e+00> : vector<16xf32>
    %113 = vector.multi_reduction <add>, %112, %cst_47 [1] : vector<16x16xf32> to vector<16xf32>
    %114 = vector.shape_cast %113 : vector<16xf32> to vector<16x1xf32>
    %115 = tpu.reciprocal %114 {approx = true} : vector<16x1xf32> -> vector<16x1xf32>
    %116 = vector.broadcast %115 : vector<16x1xf32> to vector<16x16xf32>
    %117 = arith.mulf %112, %116 : vector<16x16xf32>
    %118 = arith.truncf %117 : vector<16x16xf32> to vector<16x16xbf16>
    %119 = arith.truncf %100 : vector<16x16xf32> to vector<16x16xbf16>
    %cst_48 = arith.constant dense<0.000000e+00> : vector<16x16xf32>
    %120 = tpu.matmul %118, %119, %cst_48 {dimension_numbers = #tpu.dot_dimension_numbers<[1], [0], [0], [1], [0, 0, 1, 1], [], []>} : vector<16x16xbf16>, vector<16x16xbf16>, vector<16x16xf32> -> vector<16x16xf32>
    %121 = vector.extract_strided_slice %97 {offsets = [0, 0], sizes = [16, 32], strides = [1, 1]} : vector<32x32xbf16> to vector<16x32xbf16>
    %122 = arith.truncf %120 : vector<16x16xf32> to vector<16x16xbf16>
    %cst_49 = arith.constant dense<0.000000e+00> : vector<16x32xf32>
    %123 = tpu.matmul %122, %121, %cst_49 {dimension_numbers = #tpu.dot_dimension_numbers<[1], [0], [0], [1], [0, 0, 1, 1], [], []>} : vector<16x16xbf16>, vector<16x32xbf16>, vector<16x32xf32> -> vector<16x32xf32>
    %124 = vector.extract_strided_slice %94 {offsets = [0, 16], sizes = [16, 16], strides = [1, 1]} : vector<16x32xf32> to vector<16x16xf32>
    %125 = vector.extract_strided_slice %95 {offsets = [0, 16], sizes = [16, 16], strides = [1, 1]} : vector<16x32xf32> to vector<16x16xf32>
    %126 = vector.extract_strided_slice %96 {offsets = [0, 16], sizes = [16, 16], strides = [1, 1]} : vector<16x32xf32> to vector<16x16xf32>
    %127 = arith.truncf %124 : vector<16x16xf32> to vector<16x16xbf16>
    %128 = arith.truncf %125 : vector<16x16xf32> to vector<16x16xbf16>
    %cst_50 = arith.constant dense<0.000000e+00> : vector<16x16xf32>
    %129 = tpu.matmul %127, %128, %cst_50 {dimension_numbers = #tpu.dot_dimension_numbers<[1], [1], [0], [0], [0, 0, 1, 0], [], []>} : vector<16x16xbf16>, vector<16x16xbf16>, vector<16x16xf32> -> vector<16x16xf32>
    %cst_51 = arith.constant 2.500000e-01 : f32
    %130 = vector.broadcast %cst_51 : f32 to vector<16x16xf32>
    %131 = arith.mulf %129, %130 : vector<16x16xf32>
    %132 = vector.broadcast %3 : vector<1x16xf32> to vector<16x16xf32>
    %133 = arith.addf %131, %132 : vector<16x16xf32>
    %cst_52 = arith.constant dense<0xFF800000> : vector<16xf32>
    %134 = vector.multi_reduction <maximumf>, %133, %cst_52 [1] : vector<16x16xf32> to vector<16xf32>
    %135 = vector.shape_cast %134 : vector<16xf32> to vector<16x1xf32>
    %136 = vector.broadcast %135 : vector<16x1xf32> to vector<16x16xf32>
    %137 = arith.subf %133, %136 : vector<16x16xf32>
    %138 = math.exp %137 : vector<16x16xf32>
    %cst_53 = arith.constant dense<0.000000e+00> : vector<16xf32>
    %139 = vector.multi_reduction <add>, %138, %cst_53 [1] : vector<16x16xf32> to vector<16xf32>
    %140 = vector.shape_cast %139 : vector<16xf32> to vector<16x1xf32>
    %141 = tpu.reciprocal %140 {approx = true} : vector<16x1xf32> -> vector<16x1xf32>
    %142 = vector.broadcast %141 : vector<16x1xf32> to vector<16x16xf32>
    %143 = arith.mulf %138, %142 : vector<16x16xf32>
    %144 = arith.truncf %143 : vector<16x16xf32> to vector<16x16xbf16>
    %145 = arith.truncf %126 : vector<16x16xf32> to vector<16x16xbf16>
    %cst_54 = arith.constant dense<0.000000e+00> : vector<16x16xf32>
    %146 = tpu.matmul %144, %145, %cst_54 {dimension_numbers = #tpu.dot_dimension_numbers<[1], [0], [0], [1], [0, 0, 1, 1], [], []>} : vector<16x16xbf16>, vector<16x16xbf16>, vector<16x16xf32> -> vector<16x16xf32>
    %147 = vector.extract_strided_slice %97 {offsets = [16, 0], sizes = [16, 32], strides = [1, 1]} : vector<32x32xbf16> to vector<16x32xbf16>
    %148 = arith.truncf %146 : vector<16x16xf32> to vector<16x16xbf16>
    %cst_55 = arith.constant dense<0.000000e+00> : vector<16x32xf32>
    %149 = tpu.matmul %148, %147, %cst_55 {dimension_numbers = #tpu.dot_dimension_numbers<[1], [0], [0], [1], [0, 0, 1, 1], [], []>} : vector<16x16xbf16>, vector<16x32xbf16>, vector<16x32xf32> -> vector<16x32xf32>
    %150 = arith.addf %123, %149 : vector<16x32xf32>
    %c0_56 = arith.constant 0 : index
    %c0_57 = arith.constant 0 : index
    %151 = vector.load %arg15[%c0_56, %c0_57] : memref<1x32xf32, #tpu.memory_space<vmem>>, vector<1x32xf32>
    %152 = vector.broadcast %151 : vector<1x32xf32> to vector<16x32xf32>
    %153 = arith.addf %150, %152 : vector<16x32xf32>
    %154 = arith.addf %153, %87 : vector<16x32xf32>
    %c0_58 = arith.constant 0 : index
    %c0_59 = arith.constant 0 : index
    %155 = vector.load %arg16[%c0_58, %c0_59] : memref<32x32xbf16, #tpu.memory_space<vmem>>, vector<32x32xbf16>
    %156 = arith.truncf %154 : vector<16x32xf32> to vector<16x32xbf16>
    %cst_60 = arith.constant dense<0.000000e+00> : vector<16x32xf32>
    %157 = tpu.matmul %156, %155, %cst_60 {dimension_numbers = #tpu.dot_dimension_numbers<[1], [0], [0], [1], [0, 0, 1, 1], [], []>} : vector<16x32xbf16>, vector<32x32xbf16>, vector<16x32xf32> -> vector<16x32xf32>
    %c0_61 = arith.constant 0 : index
    %c0_62 = arith.constant 0 : index
    %158 = vector.load %arg17[%c0_61, %c0_62] : memref<1x32xf32, #tpu.memory_space<vmem>>, vector<1x32xf32>
    %159 = vector.broadcast %158 : vector<1x32xf32> to vector<16x32xf32>
    %160 = arith.addf %157, %159 : vector<16x32xf32>
    %c0_63 = arith.constant 0 : index
    %c0_64 = arith.constant 0 : index
    %c0_65 = arith.constant 0 : index
    %161 = vector.load %arg19[%c0_63, %c0_64, %c0_65] : memref<1x16x32xf32, #tpu.memory_space<vmem>>, vector<1x16x32xf32>
    %162 = vector.shape_cast %161 : vector<1x16x32xf32> to vector<16x32xf32>
    %163 = vector.shape_cast %160 : vector<16x32xf32> to vector<1x16x32xf32>
    tpu.vector_store %arg19[%c0_63, %c0_64, %c0_65], %163 {strides = array<i32>} : memref<1x16x32xf32, #tpu.memory_space<vmem>>, vector<1x16x32xf32>,
    %cst_66 = arith.constant dense<0.000000e+00> : vector<1xf32>
    %164 = vector.multi_reduction <add>, %1, %cst_66 [0] : vector<16x1xf32> to vector<1xf32>
    %165 = vector.shape_cast %164 : vector<1xf32> to vector<1x1xf32>
    %cst_67 = arith.constant 1.000000e+00 : f32
    %166 = vector.broadcast %cst_67 : f32 to vector<1x1xf32>
    %167 = arith.maximumf %165, %166 : vector<1x1xf32>
    %168 = vector.broadcast %1 : vector<16x1xf32> to vector<16x32xf32>
    %169 = arith.mulf %160, %168 : vector<16x32xf32>
    %cst_68 = arith.constant dense<0.000000e+00> : vector<32xf32>
    %170 = vector.multi_reduction <add>, %169, %cst_68 [0] : vector<16x32xf32> to vector<32xf32>
    %171 = vector.shape_cast %170 : vector<32xf32> to vector<1x32xf32>
    %172 = vector.broadcast %167 : vector<1x1xf32> to vector<1x32xf32>
    %173 = arith.divf %171, %172 : vector<1x32xf32>
    %c0_69 = arith.constant 0 : index
    %c0_70 = arith.constant 0 : index
    %c0_71 = arith.constant 0 : index
    %174 = vector.load %arg18[%c0_69, %c0_70, %c0_71] : memref<1x1x32xf32, #tpu.memory_space<vmem>>, vector<1x1x32xf32>
    %175 = vector.shape_cast %174 : vector<1x1x32xf32> to vector<1x32xf32>
    %176 = vector.shape_cast %173 : vector<1x32xf32> to vector<1x1x32xf32>
    tpu.vector_store %arg18[%c0_69, %c0_70, %c0_71], %176 {strides = array<i32>} : memref<1x1x32xf32, #tpu.memory_space<vmem>>, vector<1x1x32xf32>,
    return
  }
  func.func @transform_0(%arg0: i32) -> (i32, i32, i32) {
    %c0_i32 = arith.constant 0 : i32
    %c0_i32_0 = arith.constant 0 : i32
    %c0_i32_1 = arith.constant 0 : i32
    return %arg0, %c0_i32, %c0_i32_0 : i32, i32, i32
  }
  func.func @transform_1(%arg0: i32) -> (i32, i32, i32) {
    %c0_i32 = arith.constant 0 : i32
    %c0_i32_0 = arith.constant 0 : i32
    %c0_i32_1 = arith.constant 0 : i32
    return %arg0, %c0_i32, %c0_i32_0 : i32, i32, i32
  }
  func.func @transform_2(%arg0: i32) -> (i32, i32, i32) {
    %c0_i32 = arith.constant 0 : i32
    %c0_i32_0 = arith.constant 0 : i32
    %c0_i32_1 = arith.constant 0 : i32
    return %arg0, %c0_i32, %c0_i32_0 : i32, i32, i32
  }
  func.func @transform_3(%arg0: i32) -> (i32, i32) {
    %c0_i32 = arith.constant 0 : i32
    %c0_i32_0 = arith.constant 0 : i32
    %c0_i32_1 = arith.constant 0 : i32
    return %c0_i32, %c0_i32_0 : i32, i32
  }
  func.func @transform_4(%arg0: i32) -> (i32, i32) {
    %c0_i32 = arith.constant 0 : i32
    %c0_i32_0 = arith.constant 0 : i32
    %c0_i32_1 = arith.constant 0 : i32
    return %c0_i32, %c0_i32_0 : i32, i32
  }
  func.func @transform_5(%arg0: i32) -> (i32, i32) {
    %c0_i32 = arith.constant 0 : i32
    %c0_i32_0 = arith.constant 0 : i32
    %c0_i32_1 = arith.constant 0 : i32
    return %c0_i32, %c0_i32_0 : i32, i32
  }
  func.func @transform_6(%arg0: i32) -> (i32, i32) {
    %c0_i32 = arith.constant 0 : i32
    %c0_i32_0 = arith.constant 0 : i32
    %c0_i32_1 = arith.constant 0 : i32
    return %c0_i32, %c0_i32_0 : i32, i32
  }
  func.func @transform_7(%arg0: i32) -> (i32, i32) {
    %c0_i32 = arith.constant 0 : i32
    %c0_i32_0 = arith.constant 0 : i32
    %c0_i32_1 = arith.constant 0 : i32
    return %c0_i32, %c0_i32_0 : i32, i32
  }
  func.func @transform_8(%arg0: i32) -> (i32, i32) {
    %c0_i32 = arith.constant 0 : i32
    %c0_i32_0 = arith.constant 0 : i32
    %c0_i32_1 = arith.constant 0 : i32
    return %c0_i32, %c0_i32_0 : i32, i32
  }
  func.func @transform_9(%arg0: i32) -> (i32, i32) {
    %c0_i32 = arith.constant 0 : i32
    %c0_i32_0 = arith.constant 0 : i32
    %c0_i32_1 = arith.constant 0 : i32
    return %c0_i32, %c0_i32_0 : i32, i32
  }
  func.func @transform_10(%arg0: i32) -> (i32, i32) {
    %c0_i32 = arith.constant 0 : i32
    %c0_i32_0 = arith.constant 0 : i32
    %c0_i32_1 = arith.constant 0 : i32
    return %c0_i32, %c0_i32_0 : i32, i32
  }
  func.func @transform_11(%arg0: i32) -> (i32, i32) {
    %c0_i32 = arith.constant 0 : i32
    %c0_i32_0 = arith.constant 0 : i32
    %c0_i32_1 = arith.constant 0 : i32
    return %c0_i32, %c0_i32_0 : i32, i32
  }
  func.func @transform_12(%arg0: i32) -> (i32, i32) {
    %c0_i32 = arith.constant 0 : i32
    %c0_i32_0 = arith.constant 0 : i32
    %c0_i32_1 = arith.constant 0 : i32
    return %c0_i32, %c0_i32_0 : i32, i32
  }
  func.func @transform_13(%arg0: i32) -> (i32, i32) {
    %c0_i32 = arith.constant 0 : i32
    %c0_i32_0 = arith.constant 0 : i32
    %c0_i32_1 = arith.constant 0 : i32
    return %c0_i32, %c0_i32_0 : i32, i32
  }
  func.func @transform_14(%arg0: i32) -> (i32, i32) {
    %c0_i32 = arith.constant 0 : i32
    %c0_i32_0 = arith.constant 0 : i32
    %c0_i32_1 = arith.constant 0 : i32
    return %c0_i32, %c0_i32_0 : i32, i32
  }
  func.func @transform_15(%arg0: i32) -> (i32, i32) {
    %c0_i32 = arith.constant 0 : i32
    %c0_i32_0 = arith.constant 0 : i32
    %c0_i32_1 = arith.constant 0 : i32
    return %c0_i32, %c0_i32_0 : i32, i32
  }
  func.func @transform_16(%arg0: i32) -> (i32, i32) {
    %c0_i32 = arith.constant 0 : i32
    %c0_i32_0 = arith.constant 0 : i32
    %c0_i32_1 = arith.constant 0 : i32
    return %c0_i32, %c0_i32_0 : i32, i32
  }
  func.func @transform_17(%arg0: i32) -> (i32, i32, i32) {
    %c0_i32 = arith.constant 0 : i32
    %c0_i32_0 = arith.constant 0 : i32
    %c0_i32_1 = arith.constant 0 : i32
    return %arg0, %c0_i32, %c0_i32_0 : i32, i32, i32
  }
  func.func @transform_18(%arg0: i32) -> (i32, i32, i32) {
    %c0_i32 = arith.constant 0 : i32
    %c0_i32_0 = arith.constant 0 : i32
    %c0_i32_1 = arith.constant 0 : i32
    return %arg0, %c0_i32, %c0_i32_0 : i32, i32, i32
  }
}

module attributes {stable_mosaic.version = 11 : i64} {
  func.func @_enc_prenet_kernel(%arg0: i32, %arg1: memref<1x8x32xf32, #tpu.memory_space<vmem>>, %arg2: memref<1x8x1xf32, #tpu.memory_space<vmem>>, %arg3: memref<8x32xf32, #tpu.memory_space<vmem>>, %arg4: memref<96x32xbf16, #tpu.memory_space<vmem>>, %arg5: memref<1x32xf32, #tpu.memory_space<vmem>>, %arg6: memref<96x32xbf16, #tpu.memory_space<vmem>>, %arg7: memref<1x32xf32, #tpu.memory_space<vmem>>, %arg8: memref<32x32xbf16, #tpu.memory_space<vmem>>, %arg9: memref<1x32xf32, #tpu.memory_space<vmem>>, %arg10: memref<1x8x32xf32, #tpu.memory_space<vmem>>) attributes {dimension_semantics = [#tpu.dimension_semantics<parallel>], iteration_bounds = array<i64: 2>, scalar_prefetch = 0 : i64, scratch_operands = 0 : i64, tpu.core_type = #tpu.core_type<tc>, window_params = [{transform_indices = @transform_0, window_bounds = array<i64: 1, 8, 32>}, {transform_indices = @transform_1, window_bounds = array<i64: 1, 8, 1>}, {pipeline_mode = #tpu.pipeline_mode<synchronous>, transform_indices = @transform_2, window_bounds = array<i64: 8, 32>}, {pipeline_mode = #tpu.pipeline_mode<synchronous>, transform_indices = @transform_3, window_bounds = array<i64: 96, 32>}, {pipeline_mode = #tpu.pipeline_mode<synchronous>, transform_indices = @transform_4, window_bounds = array<i64: 1, 32>}, {pipeline_mode = #tpu.pipeline_mode<synchronous>, transform_indices = @transform_5, window_bounds = array<i64: 96, 32>}, {pipeline_mode = #tpu.pipeline_mode<synchronous>, transform_indices = @transform_6, window_bounds = array<i64: 1, 32>}, {pipeline_mode = #tpu.pipeline_mode<synchronous>, transform_indices = @transform_7, window_bounds = array<i64: 32, 32>}, {pipeline_mode = #tpu.pipeline_mode<synchronous>, transform_indices = @transform_8, window_bounds = array<i64: 1, 32>}, {transform_indices = @transform_9, window_bounds = array<i64: 1, 8, 32>}]} {
    %c0 = arith.constant 0 : index
    %c0_0 = arith.constant 0 : index
    %c0_1 = arith.constant 0 : index
    %0 = vector.load %arg1[%c0, %c0_0, %c0_1] : memref<1x8x32xf32, #tpu.memory_space<vmem>>, vector<1x8x32xf32>
    %1 = vector.shape_cast %0 : vector<1x8x32xf32> to vector<8x32xf32>
    %c0_2 = arith.constant 0 : index
    %c0_3 = arith.constant 0 : index
    %c0_4 = arith.constant 0 : index
    %2 = vector.load %arg2[%c0_2, %c0_3, %c0_4] : memref<1x8x1xf32, #tpu.memory_space<vmem>>, vector<1x8x1xf32>
    %3 = vector.shape_cast %2 : vector<1x8x1xf32> to vector<8x1xf32>
    %c0_5 = arith.constant 0 : index
    %c0_6 = arith.constant 0 : index
    %4 = vector.load %arg4[%c0_5, %c0_6] : memref<96x32xbf16, #tpu.memory_space<vmem>>, vector<96x32xbf16>
    %c0_7 = arith.constant 0 : index
    %c0_8 = arith.constant 0 : index
    %5 = vector.load %arg5[%c0_7, %c0_8] : memref<1x32xf32, #tpu.memory_space<vmem>>, vector<1x32xf32>
    %cst = arith.constant 0.000000e+00 : f32
    %6 = vector.broadcast %cst : f32 to vector<1x32xf32>
    %7 = tpu.concatenate %6, %1, %6 in 0 : vector<1x32xf32>, vector<8x32xf32>, vector<1x32xf32> -> vector<10x32xf32>
    %8 = vector.extract_strided_slice %7 {offsets = [0, 0], sizes = [8, 32], strides = [1, 1]} : vector<10x32xf32> to vector<8x32xf32>
    %9 = vector.extract_strided_slice %7 {offsets = [1, 0], sizes = [8, 32], strides = [1, 1]} : vector<10x32xf32> to vector<8x32xf32>
    %10 = vector.extract_strided_slice %7 {offsets = [2, 0], sizes = [8, 32], strides = [1, 1]} : vector<10x32xf32> to vector<8x32xf32>
    %11 = tpu.concatenate %8, %9, %10 in 1 : vector<8x32xf32>, vector<8x32xf32>, vector<8x32xf32> -> vector<8x96xf32>
    %12 = arith.truncf %11 : vector<8x96xf32> to vector<8x96xbf16>
    %cst_9 = arith.constant dense<0.000000e+00> : vector<8x32xf32>
    %13 = tpu.matmul %12, %4, %cst_9 {dimension_numbers = #tpu.dot_dimension_numbers<[1], [0], [0], [1], [0, 0, 1, 1], [], []>} : vector<8x96xbf16>, vector<96x32xbf16>, vector<8x32xf32> -> vector<8x32xf32>
    %14 = vector.broadcast %5 : vector<1x32xf32> to vector<8x32xf32>
    %15 = arith.addf %13, %14 : vector<8x32xf32>
    %cst_10 = arith.constant 2.000000e+01 : f32
    %16 = vector.broadcast %cst_10 : f32 to vector<8x32xf32>
    %17 = arith.minimumf %15, %16 : vector<8x32xf32>
    %18 = math.exp %17 : vector<8x32xf32>
    %cst_11 = arith.constant 2.000000e+00 : f32
    %19 = vector.broadcast %cst_11 : f32 to vector<8x32xf32>
    %20 = arith.addf %18, %19 : vector<8x32xf32>
    %21 = arith.mulf %18, %20 : vector<8x32xf32>
    %22 = arith.mulf %15, %21 : vector<8x32xf32>
    %cst_12 = arith.constant 2.000000e+00 : f32
    %23 = vector.broadcast %cst_12 : f32 to vector<8x32xf32>
    %24 = arith.addf %21, %23 : vector<8x32xf32>
    %25 = tpu.reciprocal %24 {approx = true} : vector<8x32xf32> -> vector<8x32xf32>
    %26 = arith.mulf %22, %25 : vector<8x32xf32>
    %c0_13 = arith.constant 0 : index
    %c0_14 = arith.constant 0 : index
    %27 = vector.load %arg6[%c0_13, %c0_14] : memref<96x32xbf16, #tpu.memory_space<vmem>>, vector<96x32xbf16>
    %c0_15 = arith.constant 0 : index
    %c0_16 = arith.constant 0 : index
    %28 = vector.load %arg7[%c0_15, %c0_16] : memref<1x32xf32, #tpu.memory_space<vmem>>, vector<1x32xf32>
    %cst_17 = arith.constant 0.000000e+00 : f32
    %29 = vector.broadcast %cst_17 : f32 to vector<1x32xf32>
    %30 = tpu.concatenate %29, %26, %29 in 0 : vector<1x32xf32>, vector<8x32xf32>, vector<1x32xf32> -> vector<10x32xf32>
    %31 = vector.extract_strided_slice %30 {offsets = [0, 0], sizes = [8, 32], strides = [1, 1]} : vector<10x32xf32> to vector<8x32xf32>
    %32 = vector.extract_strided_slice %30 {offsets = [1, 0], sizes = [8, 32], strides = [1, 1]} : vector<10x32xf32> to vector<8x32xf32>
    %33 = vector.extract_strided_slice %30 {offsets = [2, 0], sizes = [8, 32], strides = [1, 1]} : vector<10x32xf32> to vector<8x32xf32>
    %34 = tpu.concatenate %31, %32, %33 in 1 : vector<8x32xf32>, vector<8x32xf32>, vector<8x32xf32> -> vector<8x96xf32>
    %35 = arith.truncf %34 : vector<8x96xf32> to vector<8x96xbf16>
    %cst_18 = arith.constant dense<0.000000e+00> : vector<8x32xf32>
    %36 = tpu.matmul %35, %27, %cst_18 {dimension_numbers = #tpu.dot_dimension_numbers<[1], [0], [0], [1], [0, 0, 1, 1], [], []>} : vector<8x96xbf16>, vector<96x32xbf16>, vector<8x32xf32> -> vector<8x32xf32>
    %37 = vector.broadcast %28 : vector<1x32xf32> to vector<8x32xf32>
    %38 = arith.addf %36, %37 : vector<8x32xf32>
    %cst_19 = arith.constant 2.000000e+01 : f32
    %39 = vector.broadcast %cst_19 : f32 to vector<8x32xf32>
    %40 = arith.minimumf %38, %39 : vector<8x32xf32>
    %41 = math.exp %40 : vector<8x32xf32>
    %cst_20 = arith.constant 2.000000e+00 : f32
    %42 = vector.broadcast %cst_20 : f32 to vector<8x32xf32>
    %43 = arith.addf %41, %42 : vector<8x32xf32>
    %44 = arith.mulf %41, %43 : vector<8x32xf32>
    %45 = arith.mulf %38, %44 : vector<8x32xf32>
    %cst_21 = arith.constant 2.000000e+00 : f32
    %46 = vector.broadcast %cst_21 : f32 to vector<8x32xf32>
    %47 = arith.addf %44, %46 : vector<8x32xf32>
    %48 = tpu.reciprocal %47 {approx = true} : vector<8x32xf32> -> vector<8x32xf32>
    %49 = arith.mulf %45, %48 : vector<8x32xf32>
    %c0_22 = arith.constant 0 : index
    %c0_23 = arith.constant 0 : index
    %50 = vector.load %arg8[%c0_22, %c0_23] : memref<32x32xbf16, #tpu.memory_space<vmem>>, vector<32x32xbf16>
    %51 = arith.truncf %49 : vector<8x32xf32> to vector<8x32xbf16>
    %cst_24 = arith.constant dense<0.000000e+00> : vector<8x32xf32>
    %52 = tpu.matmul %51, %50, %cst_24 {dimension_numbers = #tpu.dot_dimension_numbers<[1], [0], [0], [1], [0, 0, 1, 1], [], []>} : vector<8x32xbf16>, vector<32x32xbf16>, vector<8x32xf32> -> vector<8x32xf32>
    %c0_25 = arith.constant 0 : index
    %c0_26 = arith.constant 0 : index
    %53 = vector.load %arg9[%c0_25, %c0_26] : memref<1x32xf32, #tpu.memory_space<vmem>>, vector<1x32xf32>
    %54 = vector.broadcast %53 : vector<1x32xf32> to vector<8x32xf32>
    %55 = arith.addf %52, %54 : vector<8x32xf32>
    %56 = arith.addf %55, %1 : vector<8x32xf32>
    %57 = vector.broadcast %3 : vector<8x1xf32> to vector<8x32xf32>
    %58 = arith.mulf %56, %57 : vector<8x32xf32>
    %c0_27 = arith.constant 0 : index
    %c0_28 = arith.constant 0 : index
    %59 = vector.load %arg3[%c0_27, %c0_28] : memref<8x32xf32, #tpu.memory_space<vmem>>, vector<8x32xf32>
    %60 = arith.addf %58, %59 : vector<8x32xf32>
    %c0_29 = arith.constant 0 : index
    %c0_30 = arith.constant 0 : index
    %c0_31 = arith.constant 0 : index
    %61 = vector.load %arg10[%c0_29, %c0_30, %c0_31] : memref<1x8x32xf32, #tpu.memory_space<vmem>>, vector<1x8x32xf32>
    %62 = vector.shape_cast %61 : vector<1x8x32xf32> to vector<8x32xf32>
    %63 = vector.shape_cast %60 : vector<8x32xf32> to vector<1x8x32xf32>
    tpu.vector_store %arg10[%c0_29, %c0_30, %c0_31], %63 {strides = array<i32>} : memref<1x8x32xf32, #tpu.memory_space<vmem>>, vector<1x8x32xf32>,
    return
  }
  func.func @transform_0(%arg0: i32) -> (i32, i32, i32) {
    %c0_i32 = arith.constant 0 : i32
    %c0_i32_0 = arith.constant 0 : i32
    %c0_i32_1 = arith.constant 0 : i32
    return %arg0, %c0_i32, %c0_i32_0 : i32, i32, i32
  }
  func.func @transform_1(%arg0: i32) -> (i32, i32, i32) {
    %c0_i32 = arith.constant 0 : i32
    %c0_i32_0 = arith.constant 0 : i32
    %c0_i32_1 = arith.constant 0 : i32
    return %arg0, %c0_i32, %c0_i32_0 : i32, i32, i32
  }
  func.func @transform_2(%arg0: i32) -> (i32, i32) {
    %c0_i32 = arith.constant 0 : i32
    %c0_i32_0 = arith.constant 0 : i32
    %c0_i32_1 = arith.constant 0 : i32
    return %c0_i32, %c0_i32_0 : i32, i32
  }
  func.func @transform_3(%arg0: i32) -> (i32, i32) {
    %c0_i32 = arith.constant 0 : i32
    %c0_i32_0 = arith.constant 0 : i32
    %c0_i32_1 = arith.constant 0 : i32
    return %c0_i32, %c0_i32_0 : i32, i32
  }
  func.func @transform_4(%arg0: i32) -> (i32, i32) {
    %c0_i32 = arith.constant 0 : i32
    %c0_i32_0 = arith.constant 0 : i32
    %c0_i32_1 = arith.constant 0 : i32
    return %c0_i32, %c0_i32_0 : i32, i32
  }
  func.func @transform_5(%arg0: i32) -> (i32, i32) {
    %c0_i32 = arith.constant 0 : i32
    %c0_i32_0 = arith.constant 0 : i32
    %c0_i32_1 = arith.constant 0 : i32
    return %c0_i32, %c0_i32_0 : i32, i32
  }
  func.func @transform_6(%arg0: i32) -> (i32, i32) {
    %c0_i32 = arith.constant 0 : i32
    %c0_i32_0 = arith.constant 0 : i32
    %c0_i32_1 = arith.constant 0 : i32
    return %c0_i32, %c0_i32_0 : i32, i32
  }
  func.func @transform_7(%arg0: i32) -> (i32, i32) {
    %c0_i32 = arith.constant 0 : i32
    %c0_i32_0 = arith.constant 0 : i32
    %c0_i32_1 = arith.constant 0 : i32
    return %c0_i32, %c0_i32_0 : i32, i32
  }
  func.func @transform_8(%arg0: i32) -> (i32, i32) {
    %c0_i32 = arith.constant 0 : i32
    %c0_i32_0 = arith.constant 0 : i32
    %c0_i32_1 = arith.constant 0 : i32
    return %c0_i32, %c0_i32_0 : i32, i32
  }
  func.func @transform_9(%arg0: i32) -> (i32, i32, i32) {
    %c0_i32 = arith.constant 0 : i32
    %c0_i32_0 = arith.constant 0 : i32
    %c0_i32_1 = arith.constant 0 : i32
    return %arg0, %c0_i32, %c0_i32_0 : i32, i32, i32
  }
}

module attributes {stable_mosaic.version = 11 : i64} {
  func.func @_fft_self_stack_kernel(%arg0: i32, %arg1: i32, %arg2: memref<1x8x32xf32, #tpu.memory_space<vmem>>, %arg3: memref<1x8x1xf32, #tpu.memory_space<vmem>>, %arg4: memref<1x1x8xf32, #tpu.memory_space<vmem>>, %arg5: memref<1x1x1x64xf32, #tpu.memory_space<vmem>>, %arg6: memref<1x1x1x64xf32, #tpu.memory_space<vmem>>, %arg7: memref<1x32x96xbf16, #tpu.memory_space<vmem>>, %arg8: memref<1x1x96xf32, #tpu.memory_space<vmem>>, %arg9: memref<1x32x32xbf16, #tpu.memory_space<vmem>>, %arg10: memref<1x1x32xf32, #tpu.memory_space<vmem>>, %arg11: memref<1x288x64xbf16, #tpu.memory_space<vmem>>, %arg12: memref<1x1x64xf32, #tpu.memory_space<vmem>>, %arg13: memref<1x64x32xbf16, #tpu.memory_space<vmem>>, %arg14: memref<1x1x32xf32, #tpu.memory_space<vmem>>, %arg15: memref<1x8x32xf32, #tpu.memory_space<vmem>>, %arg16: memref<8x32xf32, #tpu.memory_space<vmem>>) attributes {dimension_semantics = [#tpu.dimension_semantics<parallel>, #tpu.dimension_semantics<arbitrary>], iteration_bounds = array<i64: 2, 2>, scalar_prefetch = 0 : i64, scratch_operands = 1 : i64, tpu.core_type = #tpu.core_type<tc>, window_params = [{transform_indices = @transform_0, window_bounds = array<i64: 1, 8, 32>}, {transform_indices = @transform_1, window_bounds = array<i64: 1, 8, 1>}, {transform_indices = @transform_2, window_bounds = array<i64: 1, 1, 8>}, {transform_indices = @transform_3, window_bounds = array<i64: 1, 1, 1, 64>}, {transform_indices = @transform_4, window_bounds = array<i64: 1, 1, 1, 64>}, {transform_indices = @transform_5, window_bounds = array<i64: 1, 32, 96>}, {transform_indices = @transform_6, window_bounds = array<i64: 1, 1, 96>}, {transform_indices = @transform_7, window_bounds = array<i64: 1, 32, 32>}, {transform_indices = @transform_8, window_bounds = array<i64: 1, 1, 32>}, {transform_indices = @transform_9, window_bounds = array<i64: 1, 288, 64>}, {transform_indices = @transform_10, window_bounds = array<i64: 1, 1, 64>}, {transform_indices = @transform_11, window_bounds = array<i64: 1, 64, 32>}, {transform_indices = @transform_12, window_bounds = array<i64: 1, 1, 32>}, {transform_indices = @transform_13, window_bounds = array<i64: 1, 8, 32>}]} {
    %c0_i32 = arith.constant 0 : i32
    %0 = arith.cmpi eq, %arg1, %c0_i32 : i32
    %1 = arith.extui %0 : i1 to i32
    %c0_i32_0 = arith.constant 0 : i32
    %2 = arith.cmpi ne, %1, %c0_i32_0 : i32
    scf.if %2 {
      %c0_73 = arith.constant 0 : index
      %c0_74 = arith.constant 0 : index
      %c0_75 = arith.constant 0 : index
      %175 = vector.load %arg2[%c0_73, %c0_74, %c0_75] : memref<1x8x32xf32, #tpu.memory_space<vmem>>, vector<1x8x32xf32>
      %176 = vector.shape_cast %175 : vector<1x8x32xf32> to vector<8x32xf32>
      %c0_76 = arith.constant 0 : index
      %c0_77 = arith.constant 0 : index
      %177 = vector.load %arg16[%c0_76, %c0_77] : memref<8x32xf32, #tpu.memory_space<vmem>>, vector<8x32xf32>
      tpu.vector_store %arg16[%c0_76, %c0_77], %176 {strides = array<i32>} : memref<8x32xf32, #tpu.memory_space<vmem>>, vector<8x32xf32>,
    } else {
    }
    %c0 = arith.constant 0 : index
    %c0_1 = arith.constant 0 : index
    %3 = vector.load %arg16[%c0, %c0_1] : memref<8x32xf32, #tpu.memory_space<vmem>>, vector<8x32xf32>
    %c0_2 = arith.constant 0 : index
    %c0_3 = arith.constant 0 : index
    %c0_4 = arith.constant 0 : index
    %4 = vector.load %arg3[%c0_2, %c0_3, %c0_4] : memref<1x8x1xf32, #tpu.memory_space<vmem>>, vector<1x8x1xf32>
    %5 = vector.shape_cast %4 : vector<1x8x1xf32> to vector<8x1xf32>
    %c0_5 = arith.constant 0 : index
    %c0_6 = arith.constant 0 : index
    %c0_7 = arith.constant 0 : index
    %6 = vector.load %arg4[%c0_5, %c0_6, %c0_7] : memref<1x1x8xf32, #tpu.memory_space<vmem>>, vector<1x1x8xf32>
    %7 = vector.shape_cast %6 : vector<1x1x8xf32> to vector<1x8xf32>
    %c0_8 = arith.constant 0 : index
    %c0_9 = arith.constant 0 : index
    %c0_10 = arith.constant 0 : index
    %8 = vector.load %arg7[%c0_8, %c0_9, %c0_10] : memref<1x32x96xbf16, #tpu.memory_space<vmem>>, vector<1x32x96xbf16>
    %9 = vector.shape_cast %8 : vector<1x32x96xbf16> to vector<32x96xbf16>
    %10 = arith.truncf %3 : vector<8x32xf32> to vector<8x32xbf16>
    %cst = arith.constant dense<0.000000e+00> : vector<8x96xf32>
    %11 = tpu.matmul %10, %9, %cst {dimension_numbers = #tpu.dot_dimension_numbers<[1], [0], [0], [1], [0, 0, 1, 1], [], []>} : vector<8x32xbf16>, vector<32x96xbf16>, vector<8x96xf32> -> vector<8x96xf32>
    %c0_11 = arith.constant 0 : index
    %c0_12 = arith.constant 0 : index
    %c0_13 = arith.constant 0 : index
    %12 = vector.load %arg8[%c0_11, %c0_12, %c0_13] : memref<1x1x96xf32, #tpu.memory_space<vmem>>, vector<1x1x96xf32>
    %13 = vector.shape_cast %12 : vector<1x1x96xf32> to vector<1x96xf32>
    %14 = vector.broadcast %13 : vector<1x96xf32> to vector<8x96xf32>
    %15 = arith.addf %11, %14 : vector<8x96xf32>
    %16 = vector.extract_strided_slice %15 {offsets = [0, 0], sizes = [8, 32], strides = [1, 1]} : vector<8x96xf32> to vector<8x32xf32>
    %17 = vector.extract_strided_slice %15 {offsets = [0, 32], sizes = [8, 32], strides = [1, 1]} : vector<8x96xf32> to vector<8x32xf32>
    %18 = vector.extract_strided_slice %15 {offsets = [0, 64], sizes = [8, 32], strides = [1, 1]} : vector<8x96xf32> to vector<8x32xf32>
    %c0_14 = arith.constant 0 : index
    %c0_15 = arith.constant 0 : index
    %c0_16 = arith.constant 0 : index
    %19 = vector.load %arg9[%c0_14, %c0_15, %c0_16] : memref<1x32x32xbf16, #tpu.memory_space<vmem>>, vector<1x32x32xbf16>
    %20 = vector.shape_cast %19 : vector<1x32x32xbf16> to vector<32x32xbf16>
    %21 = vector.extract_strided_slice %16 {offsets = [0, 0], sizes = [8, 16], strides = [1, 1]} : vector<8x32xf32> to vector<8x16xf32>
    %22 = vector.extract_strided_slice %17 {offsets = [0, 0], sizes = [8, 16], strides = [1, 1]} : vector<8x32xf32> to vector<8x16xf32>
    %23 = vector.extract_strided_slice %18 {offsets = [0, 0], sizes = [8, 16], strides = [1, 1]} : vector<8x32xf32> to vector<8x16xf32>
    %24 = arith.truncf %21 : vector<8x16xf32> to vector<8x16xbf16>
    %25 = arith.truncf %22 : vector<8x16xf32> to vector<8x16xbf16>
    %cst_17 = arith.constant dense<0.000000e+00> : vector<8x8xf32>
    %26 = tpu.matmul %24, %25, %cst_17 {dimension_numbers = #tpu.dot_dimension_numbers<[1], [1], [0], [0], [0, 0, 1, 0], [], []>} : vector<8x16xbf16>, vector<8x16xbf16>, vector<8x8xf32> -> vector<8x8xf32>
    %cst_18 = arith.constant 2.500000e-01 : f32
    %27 = vector.broadcast %cst_18 : f32 to vector<8x8xf32>
    %28 = arith.mulf %26, %27 : vector<8x8xf32>
    %29 = vector.broadcast %7 : vector<1x8xf32> to vector<8x8xf32>
    %30 = arith.addf %28, %29 : vector<8x8xf32>
    %cst_19 = arith.constant dense<0xFF800000> : vector<8xf32>
    %31 = vector.multi_reduction <maximumf>, %30, %cst_19 [1] : vector<8x8xf32> to vector<8xf32>
    %32 = vector.shape_cast %31 : vector<8xf32> to vector<8x1xf32>
    %33 = vector.broadcast %32 : vector<8x1xf32> to vector<8x8xf32>
    %34 = arith.subf %30, %33 : vector<8x8xf32>
    %35 = math.exp %34 : vector<8x8xf32>
    %cst_20 = arith.constant dense<0.000000e+00> : vector<8xf32>
    %36 = vector.multi_reduction <add>, %35, %cst_20 [1] : vector<8x8xf32> to vector<8xf32>
    %37 = vector.shape_cast %36 : vector<8xf32> to vector<8x1xf32>
    %38 = tpu.reciprocal %37 {approx = true} : vector<8x1xf32> -> vector<8x1xf32>
    %39 = vector.broadcast %38 : vector<8x1xf32> to vector<8x8xf32>
    %40 = arith.mulf %35, %39 : vector<8x8xf32>
    %41 = arith.truncf %40 : vector<8x8xf32> to vector<8x8xbf16>
    %42 = arith.truncf %23 : vector<8x16xf32> to vector<8x16xbf16>
    %cst_21 = arith.constant dense<0.000000e+00> : vector<8x16xf32>
    %43 = tpu.matmul %41, %42, %cst_21 {dimension_numbers = #tpu.dot_dimension_numbers<[1], [0], [0], [1], [0, 0, 1, 1], [], []>} : vector<8x8xbf16>, vector<8x16xbf16>, vector<8x16xf32> -> vector<8x16xf32>
    %44 = vector.extract_strided_slice %20 {offsets = [0, 0], sizes = [16, 32], strides = [1, 1]} : vector<32x32xbf16> to vector<16x32xbf16>
    %45 = arith.truncf %43 : vector<8x16xf32> to vector<8x16xbf16>
    %cst_22 = arith.constant dense<0.000000e+00> : vector<8x32xf32>
    %46 = tpu.matmul %45, %44, %cst_22 {dimension_numbers = #tpu.dot_dimension_numbers<[1], [0], [0], [1], [0, 0, 1, 1], [], []>} : vector<8x16xbf16>, vector<16x32xbf16>, vector<8x32xf32> -> vector<8x32xf32>
    %47 = vector.extract_strided_slice %16 {offsets = [0, 16], sizes = [8, 16], strides = [1, 1]} : vector<8x32xf32> to vector<8x16xf32>
    %48 = vector.extract_strided_slice %17 {offsets = [0, 16], sizes = [8, 16], strides = [1, 1]} : vector<8x32xf32> to vector<8x16xf32>
    %49 = vector.extract_strided_slice %18 {offsets = [0, 16], sizes = [8, 16], strides = [1, 1]} : vector<8x32xf32> to vector<8x16xf32>
    %50 = arith.truncf %47 : vector<8x16xf32> to vector<8x16xbf16>
    %51 = arith.truncf %48 : vector<8x16xf32> to vector<8x16xbf16>
    %cst_23 = arith.constant dense<0.000000e+00> : vector<8x8xf32>
    %52 = tpu.matmul %50, %51, %cst_23 {dimension_numbers = #tpu.dot_dimension_numbers<[1], [1], [0], [0], [0, 0, 1, 0], [], []>} : vector<8x16xbf16>, vector<8x16xbf16>, vector<8x8xf32> -> vector<8x8xf32>
    %cst_24 = arith.constant 2.500000e-01 : f32
    %53 = vector.broadcast %cst_24 : f32 to vector<8x8xf32>
    %54 = arith.mulf %52, %53 : vector<8x8xf32>
    %55 = vector.broadcast %7 : vector<1x8xf32> to vector<8x8xf32>
    %56 = arith.addf %54, %55 : vector<8x8xf32>
    %cst_25 = arith.constant dense<0xFF800000> : vector<8xf32>
    %57 = vector.multi_reduction <maximumf>, %56, %cst_25 [1] : vector<8x8xf32> to vector<8xf32>
    %58 = vector.shape_cast %57 : vector<8xf32> to vector<8x1xf32>
    %59 = vector.broadcast %58 : vector<8x1xf32> to vector<8x8xf32>
    %60 = arith.subf %56, %59 : vector<8x8xf32>
    %61 = math.exp %60 : vector<8x8xf32>
    %cst_26 = arith.constant dense<0.000000e+00> : vector<8xf32>
    %62 = vector.multi_reduction <add>, %61, %cst_26 [1] : vector<8x8xf32> to vector<8xf32>
    %63 = vector.shape_cast %62 : vector<8xf32> to vector<8x1xf32>
    %64 = tpu.reciprocal %63 {approx = true} : vector<8x1xf32> -> vector<8x1xf32>
    %65 = vector.broadcast %64 : vector<8x1xf32> to vector<8x8xf32>
    %66 = arith.mulf %61, %65 : vector<8x8xf32>
    %67 = arith.truncf %66 : vector<8x8xf32> to vector<8x8xbf16>
    %68 = arith.truncf %49 : vector<8x16xf32> to vector<8x16xbf16>
    %cst_27 = arith.constant dense<0.000000e+00> : vector<8x16xf32>
    %69 = tpu.matmul %67, %68, %cst_27 {dimension_numbers = #tpu.dot_dimension_numbers<[1], [0], [0], [1], [0, 0, 1, 1], [], []>} : vector<8x8xbf16>, vector<8x16xbf16>, vector<8x16xf32> -> vector<8x16xf32>
    %70 = vector.extract_strided_slice %20 {offsets = [16, 0], sizes = [16, 32], strides = [1, 1]} : vector<32x32xbf16> to vector<16x32xbf16>
    %71 = arith.truncf %69 : vector<8x16xf32> to vector<8x16xbf16>
    %cst_28 = arith.constant dense<0.000000e+00> : vector<8x32xf32>
    %72 = tpu.matmul %71, %70, %cst_28 {dimension_numbers = #tpu.dot_dimension_numbers<[1], [0], [0], [1], [0, 0, 1, 1], [], []>} : vector<8x16xbf16>, vector<16x32xbf16>, vector<8x32xf32> -> vector<8x32xf32>
    %73 = arith.addf %46, %72 : vector<8x32xf32>
    %c0_29 = arith.constant 0 : index
    %c0_30 = arith.constant 0 : index
    %c0_31 = arith.constant 0 : index
    %74 = vector.load %arg10[%c0_29, %c0_30, %c0_31] : memref<1x1x32xf32, #tpu.memory_space<vmem>>, vector<1x1x32xf32>
    %75 = vector.shape_cast %74 : vector<1x1x32xf32> to vector<1x32xf32>
    %76 = vector.broadcast %75 : vector<1x32xf32> to vector<8x32xf32>
    %77 = arith.addf %73, %76 : vector<8x32xf32>
    %78 = arith.addf %77, %3 : vector<8x32xf32>
    %c0_32 = arith.constant 0 : index
    %c0_33 = arith.constant 0 : index
    %c0_34 = arith.constant 0 : index
    %c0_35 = arith.constant 0 : index
    %79 = vector.load %arg5[%c0_32, %c0_33, %c0_34, %c0_35] : memref<1x1x1x64xf32, #tpu.memory_space<vmem>>, vector<1x1x1x64xf32>
    %80 = vector.shape_cast %79 : vector<1x1x1x64xf32> to vector<1x64xf32>
    %cst_36 = arith.constant dense<0.000000e+00> : vector<8xf32>
    %81 = vector.multi_reduction <add>, %78, %cst_36 [1] : vector<8x32xf32> to vector<8xf32>
    %82 = vector.shape_cast %81 : vector<8xf32> to vector<8x1xf32>
    %cst_37 = arith.constant 3.200000e+01 : f32
    %83 = vector.broadcast %cst_37 : f32 to vector<8x1xf32>
    %84 = arith.divf %82, %83 : vector<8x1xf32>
    %85 = vector.broadcast %84 : vector<8x1xf32> to vector<8x32xf32>
    %86 = arith.subf %78, %85 : vector<8x32xf32>
    %87 = arith.mulf %86, %86 : vector<8x32xf32>
    %cst_38 = arith.constant dense<0.000000e+00> : vector<8xf32>
    %88 = vector.multi_reduction <add>, %87, %cst_38 [1] : vector<8x32xf32> to vector<8xf32>
    %89 = vector.shape_cast %88 : vector<8xf32> to vector<8x1xf32>
    %cst_39 = arith.constant 3.200000e+01 : f32
    %90 = vector.broadcast %cst_39 : f32 to vector<8x1xf32>
    %91 = arith.divf %89, %90 : vector<8x1xf32>
    %cst_40 = arith.constant 9.99999974E-6 : f32
    %92 = vector.broadcast %cst_40 : f32 to vector<8x1xf32>
    %93 = arith.addf %91, %92 : vector<8x1xf32>
    %94 = math.rsqrt %93 : vector<8x1xf32>
    %95 = vector.broadcast %94 : vector<8x1xf32> to vector<8x32xf32>
    %96 = arith.mulf %86, %95 : vector<8x32xf32>
    %97 = vector.extract_strided_slice %80 {offsets = [0, 0], sizes = [1, 32], strides = [1, 1]} : vector<1x64xf32> to vector<1x32xf32>
    %98 = vector.broadcast %97 : vector<1x32xf32> to vector<8x32xf32>
    %99 = arith.mulf %96, %98 : vector<8x32xf32>
    %100 = vector.extract_strided_slice %80 {offsets = [0, 32], sizes = [1, 32], strides = [1, 1]} : vector<1x64xf32> to vector<1x32xf32>
    %101 = vector.broadcast %100 : vector<1x32xf32> to vector<8x32xf32>
    %102 = arith.addf %99, %101 : vector<8x32xf32>
    %103 = vector.broadcast %5 : vector<8x1xf32> to vector<8x32xf32>
    %104 = arith.mulf %102, %103 : vector<8x32xf32>
    %c0_41 = arith.constant 0 : index
    %c0_42 = arith.constant 0 : index
    %c0_43 = arith.constant 0 : index
    %105 = vector.load %arg11[%c0_41, %c0_42, %c0_43] : memref<1x288x64xbf16, #tpu.memory_space<vmem>>, vector<1x288x64xbf16>
    %106 = vector.shape_cast %105 : vector<1x288x64xbf16> to vector<288x64xbf16>
    %c0_44 = arith.constant 0 : index
    %c0_45 = arith.constant 0 : index
    %c0_46 = arith.constant 0 : index
    %107 = vector.load %arg12[%c0_44, %c0_45, %c0_46] : memref<1x1x64xf32, #tpu.memory_space<vmem>>, vector<1x1x64xf32>
    %108 = vector.shape_cast %107 : vector<1x1x64xf32> to vector<1x64xf32>
    %c0_47 = arith.constant 0 : index
    %c0_48 = arith.constant 0 : index
    %c0_49 = arith.constant 0 : index
    %109 = vector.load %arg13[%c0_47, %c0_48, %c0_49] : memref<1x64x32xbf16, #tpu.memory_space<vmem>>, vector<1x64x32xbf16>
    %110 = vector.shape_cast %109 : vector<1x64x32xbf16> to vector<64x32xbf16>
    %c0_50 = arith.constant 0 : index
    %c0_51 = arith.constant 0 : index
    %c0_52 = arith.constant 0 : index
    %111 = vector.load %arg14[%c0_50, %c0_51, %c0_52] : memref<1x1x32xf32, #tpu.memory_space<vmem>>, vector<1x1x32xf32>
    %112 = vector.shape_cast %111 : vector<1x1x32xf32> to vector<1x32xf32>
    %cst_53 = arith.constant 0.000000e+00 : f32
    %113 = vector.broadcast %cst_53 : f32 to vector<4x32xf32>
    %114 = tpu.concatenate %113, %104, %113 in 0 : vector<4x32xf32>, vector<8x32xf32>, vector<4x32xf32> -> vector<16x32xf32>
    %115 = vector.extract_strided_slice %114 {offsets = [0, 0], sizes = [8, 32], strides = [1, 1]} : vector<16x32xf32> to vector<8x32xf32>
    %116 = vector.extract_strided_slice %114 {offsets = [1, 0], sizes = [8, 32], strides = [1, 1]} : vector<16x32xf32> to vector<8x32xf32>
    %117 = vector.extract_strided_slice %114 {offsets = [2, 0], sizes = [8, 32], strides = [1, 1]} : vector<16x32xf32> to vector<8x32xf32>
    %118 = vector.extract_strided_slice %114 {offsets = [3, 0], sizes = [8, 32], strides = [1, 1]} : vector<16x32xf32> to vector<8x32xf32>
    %119 = vector.extract_strided_slice %114 {offsets = [4, 0], sizes = [8, 32], strides = [1, 1]} : vector<16x32xf32> to vector<8x32xf32>
    %120 = vector.extract_strided_slice %114 {offsets = [5, 0], sizes = [8, 32], strides = [1, 1]} : vector<16x32xf32> to vector<8x32xf32>
    %121 = vector.extract_strided_slice %114 {offsets = [6, 0], sizes = [8, 32], strides = [1, 1]} : vector<16x32xf32> to vector<8x32xf32>
    %122 = vector.extract_strided_slice %114 {offsets = [7, 0], sizes = [8, 32], strides = [1, 1]} : vector<16x32xf32> to vector<8x32xf32>
    %123 = vector.extract_strided_slice %114 {offsets = [8, 0], sizes = [8, 32], strides = [1, 1]} : vector<16x32xf32> to vector<8x32xf32>
    %124 = tpu.concatenate %115, %116, %117, %118, %119, %120, %121, %122, %123 in 1 : vector<8x32xf32>, vector<8x32xf32>, vector<8x32xf32>, vector<8x32xf32>, vector<8x32xf32>, vector<8x32xf32>, vector<8x32xf32>, vector<8x32xf32>, vector<8x32xf32> -> vector<8x288xf32>
    %125 = arith.truncf %124 : vector<8x288xf32> to vector<8x288xbf16>
    %cst_54 = arith.constant dense<0.000000e+00> : vector<8x64xf32>
    %126 = tpu.matmul %125, %106, %cst_54 {dimension_numbers = #tpu.dot_dimension_numbers<[1], [0], [0], [1], [0, 0, 1, 1], [], []>} : vector<8x288xbf16>, vector<288x64xbf16>, vector<8x64xf32> -> vector<8x64xf32>
    %127 = vector.broadcast %108 : vector<1x64xf32> to vector<8x64xf32>
    %128 = arith.addf %126, %127 : vector<8x64xf32>
    %cst_55 = arith.constant 2.000000e+01 : f32
    %129 = vector.broadcast %cst_55 : f32 to vector<8x64xf32>
    %130 = arith.minimumf %128, %129 : vector<8x64xf32>
    %131 = math.exp %130 : vector<8x64xf32>
    %cst_56 = arith.constant 2.000000e+00 : f32
    %132 = vector.broadcast %cst_56 : f32 to vector<8x64xf32>
    %133 = arith.addf %131, %132 : vector<8x64xf32>
    %134 = arith.mulf %131, %133 : vector<8x64xf32>
    %135 = arith.mulf %128, %134 : vector<8x64xf32>
    %cst_57 = arith.constant 2.000000e+00 : f32
    %136 = vector.broadcast %cst_57 : f32 to vector<8x64xf32>
    %137 = arith.addf %134, %136 : vector<8x64xf32>
    %138 = tpu.reciprocal %137 {approx = true} : vector<8x64xf32> -> vector<8x64xf32>
    %139 = arith.mulf %135, %138 : vector<8x64xf32>
    %140 = arith.truncf %139 : vector<8x64xf32> to vector<8x64xbf16>
    %cst_58 = arith.constant dense<0.000000e+00> : vector<8x32xf32>
    %141 = tpu.matmul %140, %110, %cst_58 {dimension_numbers = #tpu.dot_dimension_numbers<[1], [0], [0], [1], [0, 0, 1, 1], [], []>} : vector<8x64xbf16>, vector<64x32xbf16>, vector<8x32xf32> -> vector<8x32xf32>
    %142 = vector.broadcast %112 : vector<1x32xf32> to vector<8x32xf32>
    %143 = arith.addf %141, %142 : vector<8x32xf32>
    %144 = arith.addf %143, %104 : vector<8x32xf32>
    %c0_59 = arith.constant 0 : index
    %c0_60 = arith.constant 0 : index
    %c0_61 = arith.constant 0 : index
    %c0_62 = arith.constant 0 : index
    %145 = vector.load %arg6[%c0_59, %c0_60, %c0_61, %c0_62] : memref<1x1x1x64xf32, #tpu.memory_space<vmem>>, vector<1x1x1x64xf32>
    %146 = vector.shape_cast %145 : vector<1x1x1x64xf32> to vector<1x64xf32>
    %cst_63 = arith.constant dense<0.000000e+00> : vector<8xf32>
    %147 = vector.multi_reduction <add>, %144, %cst_63 [1] : vector<8x32xf32> to vector<8xf32>
    %148 = vector.shape_cast %147 : vector<8xf32> to vector<8x1xf32>
    %cst_64 = arith.constant 3.200000e+01 : f32
    %149 = vector.broadcast %cst_64 : f32 to vector<8x1xf32>
    %150 = arith.divf %148, %149 : vector<8x1xf32>
    %151 = vector.broadcast %150 : vector<8x1xf32> to vector<8x32xf32>
    %152 = arith.subf %144, %151 : vector<8x32xf32>
    %153 = arith.mulf %152, %152 : vector<8x32xf32>
    %cst_65 = arith.constant dense<0.000000e+00> : vector<8xf32>
    %154 = vector.multi_reduction <add>, %153, %cst_65 [1] : vector<8x32xf32> to vector<8xf32>
    %155 = vector.shape_cast %154 : vector<8xf32> to vector<8x1xf32>
    %cst_66 = arith.constant 3.200000e+01 : f32
    %156 = vector.broadcast %cst_66 : f32 to vector<8x1xf32>
    %157 = arith.divf %155, %156 : vector<8x1xf32>
    %cst_67 = arith.constant 9.99999974E-6 : f32
    %158 = vector.broadcast %cst_67 : f32 to vector<8x1xf32>
    %159 = arith.addf %157, %158 : vector<8x1xf32>
    %160 = math.rsqrt %159 : vector<8x1xf32>
    %161 = vector.broadcast %160 : vector<8x1xf32> to vector<8x32xf32>
    %162 = arith.mulf %152, %161 : vector<8x32xf32>
    %163 = vector.extract_strided_slice %146 {offsets = [0, 0], sizes = [1, 32], strides = [1, 1]} : vector<1x64xf32> to vector<1x32xf32>
    %164 = vector.broadcast %163 : vector<1x32xf32> to vector<8x32xf32>
    %165 = arith.mulf %162, %164 : vector<8x32xf32>
    %166 = vector.extract_strided_slice %146 {offsets = [0, 32], sizes = [1, 32], strides = [1, 1]} : vector<1x64xf32> to vector<1x32xf32>
    %167 = vector.broadcast %166 : vector<1x32xf32> to vector<8x32xf32>
    %168 = arith.addf %165, %167 : vector<8x32xf32>
    %169 = vector.broadcast %5 : vector<8x1xf32> to vector<8x32xf32>
    %170 = arith.mulf %168, %169 : vector<8x32xf32>
    %c0_68 = arith.constant 0 : index
    %c0_69 = arith.constant 0 : index
    %171 = vector.load %arg16[%c0_68, %c0_69] : memref<8x32xf32, #tpu.memory_space<vmem>>, vector<8x32xf32>
    tpu.vector_store %arg16[%c0_68, %c0_69], %170 {strides = array<i32>} : memref<8x32xf32, #tpu.memory_space<vmem>>, vector<8x32xf32>,
    %c0_70 = arith.constant 0 : index
    %c0_71 = arith.constant 0 : index
    %c0_72 = arith.constant 0 : index
    %172 = vector.load %arg15[%c0_70, %c0_71, %c0_72] : memref<1x8x32xf32, #tpu.memory_space<vmem>>, vector<1x8x32xf32>
    %173 = vector.shape_cast %172 : vector<1x8x32xf32> to vector<8x32xf32>
    %174 = vector.shape_cast %170 : vector<8x32xf32> to vector<1x8x32xf32>
    tpu.vector_store %arg15[%c0_70, %c0_71, %c0_72], %174 {strides = array<i32>} : memref<1x8x32xf32, #tpu.memory_space<vmem>>, vector<1x8x32xf32>,
    return
  }
  func.func @transform_0(%arg0: i32, %arg1: i32) -> (i32, i32, i32) {
    %c0_i32 = arith.constant 0 : i32
    %c0_i32_0 = arith.constant 0 : i32
    %c0_i32_1 = arith.constant 0 : i32
    return %arg0, %c0_i32, %c0_i32_0 : i32, i32, i32
  }
  func.func @transform_1(%arg0: i32, %arg1: i32) -> (i32, i32, i32) {
    %c0_i32 = arith.constant 0 : i32
    %c0_i32_0 = arith.constant 0 : i32
    %c0_i32_1 = arith.constant 0 : i32
    return %arg0, %c0_i32, %c0_i32_0 : i32, i32, i32
  }
  func.func @transform_2(%arg0: i32, %arg1: i32) -> (i32, i32, i32) {
    %c0_i32 = arith.constant 0 : i32
    %c0_i32_0 = arith.constant 0 : i32
    %c0_i32_1 = arith.constant 0 : i32
    return %arg0, %c0_i32, %c0_i32_0 : i32, i32, i32
  }
  func.func @transform_3(%arg0: i32, %arg1: i32) -> (i32, i32, i32, i32) {
    %c0_i32 = arith.constant 0 : i32
    %c0_i32_0 = arith.constant 0 : i32
    %c0_i32_1 = arith.constant 0 : i32
    return %arg0, %arg1, %c0_i32, %c0_i32_0 : i32, i32, i32, i32
  }
  func.func @transform_4(%arg0: i32, %arg1: i32) -> (i32, i32, i32, i32) {
    %c0_i32 = arith.constant 0 : i32
    %c0_i32_0 = arith.constant 0 : i32
    %c0_i32_1 = arith.constant 0 : i32
    return %arg0, %arg1, %c0_i32, %c0_i32_0 : i32, i32, i32, i32
  }
  func.func @transform_5(%arg0: i32, %arg1: i32) -> (i32, i32, i32) {
    %c0_i32 = arith.constant 0 : i32
    %c0_i32_0 = arith.constant 0 : i32
    %c0_i32_1 = arith.constant 0 : i32
    return %arg1, %c0_i32, %c0_i32_0 : i32, i32, i32
  }
  func.func @transform_6(%arg0: i32, %arg1: i32) -> (i32, i32, i32) {
    %c0_i32 = arith.constant 0 : i32
    %c0_i32_0 = arith.constant 0 : i32
    %c0_i32_1 = arith.constant 0 : i32
    return %arg1, %c0_i32, %c0_i32_0 : i32, i32, i32
  }
  func.func @transform_7(%arg0: i32, %arg1: i32) -> (i32, i32, i32) {
    %c0_i32 = arith.constant 0 : i32
    %c0_i32_0 = arith.constant 0 : i32
    %c0_i32_1 = arith.constant 0 : i32
    return %arg1, %c0_i32, %c0_i32_0 : i32, i32, i32
  }
  func.func @transform_8(%arg0: i32, %arg1: i32) -> (i32, i32, i32) {
    %c0_i32 = arith.constant 0 : i32
    %c0_i32_0 = arith.constant 0 : i32
    %c0_i32_1 = arith.constant 0 : i32
    return %arg1, %c0_i32, %c0_i32_0 : i32, i32, i32
  }
  func.func @transform_9(%arg0: i32, %arg1: i32) -> (i32, i32, i32) {
    %c0_i32 = arith.constant 0 : i32
    %c0_i32_0 = arith.constant 0 : i32
    %c0_i32_1 = arith.constant 0 : i32
    return %arg1, %c0_i32, %c0_i32_0 : i32, i32, i32
  }
  func.func @transform_10(%arg0: i32, %arg1: i32) -> (i32, i32, i32) {
    %c0_i32 = arith.constant 0 : i32
    %c0_i32_0 = arith.constant 0 : i32
    %c0_i32_1 = arith.constant 0 : i32
    return %arg1, %c0_i32, %c0_i32_0 : i32, i32, i32
  }
  func.func @transform_11(%arg0: i32, %arg1: i32) -> (i32, i32, i32) {
    %c0_i32 = arith.constant 0 : i32
    %c0_i32_0 = arith.constant 0 : i32
    %c0_i32_1 = arith.constant 0 : i32
    return %arg1, %c0_i32, %c0_i32_0 : i32, i32, i32
  }
  func.func @transform_12(%arg0: i32, %arg1: i32) -> (i32, i32, i32) {
    %c0_i32 = arith.constant 0 : i32
    %c0_i32_0 = arith.constant 0 : i32
    %c0_i32_1 = arith.constant 0 : i32
    return %arg1, %c0_i32, %c0_i32_0 : i32, i32, i32
  }
  func.func @transform_13(%arg0: i32, %arg1: i32) -> (i32, i32, i32) {
    %c0_i32 = arith.constant 0 : i32
    %c0_i32_0 = arith.constant 0 : i32
    %c0_i32_1 = arith.constant 0 : i32
    return %arg0, %c0_i32, %c0_i32_0 : i32, i32, i32
  }
}

module attributes {stable_mosaic.version = 11 : i64} {
  func.func @_var_adaptor_kernel(%arg0: i32, %arg1: memref<2x16xi32, #tpu.memory_space<smem>>, %arg2: memref<1x8x32xf32, #tpu.memory_space<vmem>>, %arg3: memref<1x16x1xf32, #tpu.memory_space<vmem>>, %arg4: memref<32x32xbf16, #tpu.memory_space<vmem>>, %arg5: memref<1x32xf32, #tpu.memory_space<vmem>>, %arg6: memref<32x3xbf16, #tpu.memory_space<vmem>>, %arg7: memref<1x3xf32, #tpu.memory_space<vmem>>, %arg8: memref<1x16x32xf32, #tpu.memory_space<vmem>>, %arg9: memref<1x8x3xf32, #tpu.memory_space<vmem>>, %arg10: memref<8x32xf32, #tpu.memory_space<vmem>>) attributes {dimension_semantics = [#tpu.dimension_semantics<parallel>], iteration_bounds = array<i64: 2>, scalar_prefetch = 1 : i64, scratch_operands = 1 : i64, tpu.core_type = #tpu.core_type<tc>, window_params = [{transform_indices = @transform_0, window_bounds = array<i64: 1, 8, 32>}, {transform_indices = @transform_1, window_bounds = array<i64: 1, 16, 1>}, {pipeline_mode = #tpu.pipeline_mode<synchronous>, transform_indices = @transform_2, window_bounds = array<i64: 32, 32>}, {pipeline_mode = #tpu.pipeline_mode<synchronous>, transform_indices = @transform_3, window_bounds = array<i64: 1, 32>}, {pipeline_mode = #tpu.pipeline_mode<synchronous>, transform_indices = @transform_4, window_bounds = array<i64: 32, 3>}, {pipeline_mode = #tpu.pipeline_mode<synchronous>, transform_indices = @transform_5, window_bounds = array<i64: 1, 3>}, {transform_indices = @transform_6, window_bounds = array<i64: 1, 16, 32>}, {transform_indices = @transform_7, window_bounds = array<i64: 1, 8, 3>}]} {
    %c0 = arith.constant 0 : index
    %c0_0 = arith.constant 0 : index
    %c0_1 = arith.constant 0 : index
    %0 = vector.load %arg2[%c0, %c0_0, %c0_1] : memref<1x8x32xf32, #tpu.memory_space<vmem>>, vector<1x8x32xf32>
    %1 = vector.shape_cast %0 : vector<1x8x32xf32> to vector<8x32xf32>
    %c0_2 = arith.constant 0 : index
    %c0_3 = arith.constant 0 : index
    %2 = vector.load %arg4[%c0_2, %c0_3] : memref<32x32xbf16, #tpu.memory_space<vmem>>, vector<32x32xbf16>
    %3 = arith.truncf %1 : vector<8x32xf32> to vector<8x32xbf16>
    %cst = arith.constant dense<0.000000e+00> : vector<8x32xf32>
    %4 = tpu.matmul %3, %2, %cst {dimension_numbers = #tpu.dot_dimension_numbers<[1], [0], [0], [1], [0, 0, 1, 1], [], []>} : vector<8x32xbf16>, vector<32x32xbf16>, vector<8x32xf32> -> vector<8x32xf32>
    %c0_4 = arith.constant 0 : index
    %c0_5 = arith.constant 0 : index
    %5 = vector.load %arg5[%c0_4, %c0_5] : memref<1x32xf32, #tpu.memory_space<vmem>>, vector<1x32xf32>
    %6 = vector.broadcast %5 : vector<1x32xf32> to vector<8x32xf32>
    %7 = arith.addf %4, %6 : vector<8x32xf32>
    %c0_6 = arith.constant 0 : index
    %c0_7 = arith.constant 0 : index
    %8 = vector.load %arg10[%c0_6, %c0_7] : memref<8x32xf32, #tpu.memory_space<vmem>>, vector<8x32xf32>
    tpu.vector_store %arg10[%c0_6, %c0_7], %7 {strides = array<i32>} : memref<8x32xf32, #tpu.memory_space<vmem>>, vector<8x32xf32>,
    %c0_8 = arith.constant 0 : index
    %c0_9 = arith.constant 0 : index
    %9 = vector.load %arg6[%c0_8, %c0_9] : memref<32x3xbf16, #tpu.memory_space<vmem>>, vector<32x3xbf16>
    %10 = arith.truncf %7 : vector<8x32xf32> to vector<8x32xbf16>
    %cst_10 = arith.constant dense<0.000000e+00> : vector<8x3xf32>
    %11 = tpu.matmul %10, %9, %cst_10 {dimension_numbers = #tpu.dot_dimension_numbers<[1], [0], [0], [1], [0, 0, 1, 1], [], []>} : vector<8x32xbf16>, vector<32x3xbf16>, vector<8x3xf32> -> vector<8x3xf32>
    %c0_11 = arith.constant 0 : index
    %c0_12 = arith.constant 0 : index
    %12 = vector.load %arg7[%c0_11, %c0_12] : memref<1x3xf32, #tpu.memory_space<vmem>>, vector<1x3xf32>
    %13 = vector.broadcast %12 : vector<1x3xf32> to vector<8x3xf32>
    %14 = arith.addf %11, %13 : vector<8x3xf32>
    %c0_13 = arith.constant 0 : index
    %c0_14 = arith.constant 0 : index
    %c0_15 = arith.constant 0 : index
    %15 = vector.load %arg9[%c0_13, %c0_14, %c0_15] : memref<1x8x3xf32, #tpu.memory_space<vmem>>, vector<1x8x3xf32>
    %16 = vector.shape_cast %15 : vector<1x8x3xf32> to vector<8x3xf32>
    %17 = vector.shape_cast %14 : vector<8x3xf32> to vector<1x8x3xf32>
    tpu.vector_store %arg9[%c0_13, %c0_14, %c0_15], %17 {strides = array<i32>} : memref<1x8x3xf32, #tpu.memory_space<vmem>>, vector<1x8x3xf32>,
    %c0_i32 = arith.constant 0 : i32
    %c16_i32 = arith.constant 16 : i32
    %18 = arith.addi %c0_i32, %c16_i32 : i32
    %c1_i32 = arith.constant 1 : i32
    scf.for %arg11 = %c0_i32 to %18 step %c1_i32  : i32 {
      %28 = arith.index_cast %arg0 : i32 to index
      %29 = arith.index_cast %arg11 : i32 to index
      %30 = memref.load %arg1[%28, %29] : memref<2x16xi32, #tpu.memory_space<smem>>
      %31 = arith.index_cast %30 : i32 to index
      %c0_26 = arith.constant 0 : index
      %32 = vector.load %arg10[%31, %c0_26] : memref<8x32xf32, #tpu.memory_space<vmem>>, vector<1x32xf32>
      %c0_27 = arith.constant 0 : index
      %33 = arith.index_cast %arg11 : i32 to index
      %c0_28 = arith.constant 0 : index
      %34 = vector.load %arg8[%c0_27, %33, %c0_28] : memref<1x16x32xf32, #tpu.memory_space<vmem>>, vector<1x1x32xf32>
      %35 = vector.shape_cast %34 : vector<1x1x32xf32> to vector<1x32xf32>
      %36 = vector.shape_cast %32 : vector<1x32xf32> to vector<1x1x32xf32>
      tpu.vector_store %arg8[%c0_27, %33, %c0_28], %36 {strides = array<i32>} : memref<1x16x32xf32, #tpu.memory_space<vmem>>, vector<1x1x32xf32>,
    }
    %c16_i32_16 = arith.constant 16 : i32
    %c0_17 = arith.constant 0 : index
    %c0_18 = arith.constant 0 : index
    %c0_19 = arith.constant 0 : index
    %19 = vector.load %arg8[%c0_17, %c0_18, %c0_19] : memref<1x16x32xf32, #tpu.memory_space<vmem>>, vector<1x16x32xf32>
    %20 = vector.shape_cast %19 : vector<1x16x32xf32> to vector<16x32xf32>
    %c0_20 = arith.constant 0 : index
    %c0_21 = arith.constant 0 : index
    %c0_22 = arith.constant 0 : index
    %21 = vector.load %arg3[%c0_20, %c0_21, %c0_22] : memref<1x16x1xf32, #tpu.memory_space<vmem>>, vector<1x16x1xf32>
    %22 = vector.shape_cast %21 : vector<1x16x1xf32> to vector<16x1xf32>
    %23 = vector.broadcast %22 : vector<16x1xf32> to vector<16x32xf32>
    %24 = arith.mulf %20, %23 : vector<16x32xf32>
    %c0_23 = arith.constant 0 : index
    %c0_24 = arith.constant 0 : index
    %c0_25 = arith.constant 0 : index
    %25 = vector.load %arg8[%c0_23, %c0_24, %c0_25] : memref<1x16x32xf32, #tpu.memory_space<vmem>>, vector<1x16x32xf32>
    %26 = vector.shape_cast %25 : vector<1x16x32xf32> to vector<16x32xf32>
    %27 = vector.shape_cast %24 : vector<16x32xf32> to vector<1x16x32xf32>
    tpu.vector_store %arg8[%c0_23, %c0_24, %c0_25], %27 {strides = array<i32>} : memref<1x16x32xf32, #tpu.memory_space<vmem>>, vector<1x16x32xf32>,
    return
  }
  func.func @transform_0(%arg0: i32, %arg1: memref<2x16xi32, #tpu.memory_space<smem>>) -> (i32, i32, i32) {
    %c0_i32 = arith.constant 0 : i32
    %c0_i32_0 = arith.constant 0 : i32
    %c0_i32_1 = arith.constant 0 : i32
    return %arg0, %c0_i32, %c0_i32_0 : i32, i32, i32
  }
  func.func @transform_1(%arg0: i32, %arg1: memref<2x16xi32, #tpu.memory_space<smem>>) -> (i32, i32, i32) {
    %c0_i32 = arith.constant 0 : i32
    %c0_i32_0 = arith.constant 0 : i32
    %c0_i32_1 = arith.constant 0 : i32
    return %arg0, %c0_i32, %c0_i32_0 : i32, i32, i32
  }
  func.func @transform_2(%arg0: i32, %arg1: memref<2x16xi32, #tpu.memory_space<smem>>) -> (i32, i32) {
    %c0_i32 = arith.constant 0 : i32
    %c0_i32_0 = arith.constant 0 : i32
    %c0_i32_1 = arith.constant 0 : i32
    return %c0_i32, %c0_i32_0 : i32, i32
  }
  func.func @transform_3(%arg0: i32, %arg1: memref<2x16xi32, #tpu.memory_space<smem>>) -> (i32, i32) {
    %c0_i32 = arith.constant 0 : i32
    %c0_i32_0 = arith.constant 0 : i32
    %c0_i32_1 = arith.constant 0 : i32
    return %c0_i32, %c0_i32_0 : i32, i32
  }
  func.func @transform_4(%arg0: i32, %arg1: memref<2x16xi32, #tpu.memory_space<smem>>) -> (i32, i32) {
    %c0_i32 = arith.constant 0 : i32
    %c0_i32_0 = arith.constant 0 : i32
    %c0_i32_1 = arith.constant 0 : i32
    return %c0_i32, %c0_i32_0 : i32, i32
  }
  func.func @transform_5(%arg0: i32, %arg1: memref<2x16xi32, #tpu.memory_space<smem>>) -> (i32, i32) {
    %c0_i32 = arith.constant 0 : i32
    %c0_i32_0 = arith.constant 0 : i32
    %c0_i32_1 = arith.constant 0 : i32
    return %c0_i32, %c0_i32_0 : i32, i32
  }
  func.func @transform_6(%arg0: i32, %arg1: memref<2x16xi32, #tpu.memory_space<smem>>) -> (i32, i32, i32) {
    %c0_i32 = arith.constant 0 : i32
    %c0_i32_0 = arith.constant 0 : i32
    %c0_i32_1 = arith.constant 0 : i32
    return %arg0, %c0_i32, %c0_i32_0 : i32, i32, i32
  }
  func.func @transform_7(%arg0: i32, %arg1: memref<2x16xi32, #tpu.memory_space<smem>>) -> (i32, i32, i32) {
    %c0_i32 = arith.constant 0 : i32
    %c0_i32_0 = arith.constant 0 : i32
    %c0_i32_1 = arith.constant 0 : i32
    return %arg0, %c0_i32, %c0_i32_0 : i32, i32, i32
  }
}

module attributes {stable_mosaic.version = 11 : i64} {
  func.func @_cross_attn_kernel(%arg0: i32, %arg1: memref<1x16x32xf32, #tpu.memory_space<vmem>>, %arg2: memref<1x16x32xf32, #tpu.memory_space<vmem>>, %arg3: memref<32x32xbf16, #tpu.memory_space<vmem>>, %arg4: memref<1x32xf32, #tpu.memory_space<vmem>>, %arg5: memref<32x64xbf16, #tpu.memory_space<vmem>>, %arg6: memref<1x64xf32, #tpu.memory_space<vmem>>, %arg7: memref<32x32xbf16, #tpu.memory_space<vmem>>, %arg8: memref<1x32xf32, #tpu.memory_space<vmem>>, %arg9: memref<1x16x32xf32, #tpu.memory_space<vmem>>) attributes {dimension_semantics = [#tpu.dimension_semantics<parallel>], iteration_bounds = array<i64: 2>, scalar_prefetch = 0 : i64, scratch_operands = 0 : i64, tpu.core_type = #tpu.core_type<tc>, window_params = [{transform_indices = @transform_0, window_bounds = array<i64: 1, 16, 32>}, {transform_indices = @transform_1, window_bounds = array<i64: 1, 16, 32>}, {pipeline_mode = #tpu.pipeline_mode<synchronous>, transform_indices = @transform_2, window_bounds = array<i64: 32, 32>}, {pipeline_mode = #tpu.pipeline_mode<synchronous>, transform_indices = @transform_3, window_bounds = array<i64: 1, 32>}, {pipeline_mode = #tpu.pipeline_mode<synchronous>, transform_indices = @transform_4, window_bounds = array<i64: 32, 64>}, {pipeline_mode = #tpu.pipeline_mode<synchronous>, transform_indices = @transform_5, window_bounds = array<i64: 1, 64>}, {pipeline_mode = #tpu.pipeline_mode<synchronous>, transform_indices = @transform_6, window_bounds = array<i64: 32, 32>}, {pipeline_mode = #tpu.pipeline_mode<synchronous>, transform_indices = @transform_7, window_bounds = array<i64: 1, 32>}, {transform_indices = @transform_8, window_bounds = array<i64: 1, 16, 32>}]} {
    %c0 = arith.constant 0 : index
    %c0_0 = arith.constant 0 : index
    %c0_1 = arith.constant 0 : index
    %0 = vector.load %arg1[%c0, %c0_0, %c0_1] : memref<1x16x32xf32, #tpu.memory_space<vmem>>, vector<1x16x32xf32>
    %1 = vector.shape_cast %0 : vector<1x16x32xf32> to vector<16x32xf32>
    %c0_2 = arith.constant 0 : index
    %c0_3 = arith.constant 0 : index
    %c0_4 = arith.constant 0 : index
    %2 = vector.load %arg2[%c0_2, %c0_3, %c0_4] : memref<1x16x32xf32, #tpu.memory_space<vmem>>, vector<1x16x32xf32>
    %3 = vector.shape_cast %2 : vector<1x16x32xf32> to vector<16x32xf32>
    %c0_5 = arith.constant 0 : index
    %c0_6 = arith.constant 0 : index
    %4 = vector.load %arg3[%c0_5, %c0_6] : memref<32x32xbf16, #tpu.memory_space<vmem>>, vector<32x32xbf16>
    %5 = arith.truncf %1 : vector<16x32xf32> to vector<16x32xbf16>
    %cst = arith.constant dense<0.000000e+00> : vector<16x32xf32>
    %6 = tpu.matmul %5, %4, %cst {dimension_numbers = #tpu.dot_dimension_numbers<[1], [0], [0], [1], [0, 0, 1, 1], [], []>} : vector<16x32xbf16>, vector<32x32xbf16>, vector<16x32xf32> -> vector<16x32xf32>
    %c0_7 = arith.constant 0 : index
    %c0_8 = arith.constant 0 : index
    %7 = vector.load %arg4[%c0_7, %c0_8] : memref<1x32xf32, #tpu.memory_space<vmem>>, vector<1x32xf32>
    %8 = vector.broadcast %7 : vector<1x32xf32> to vector<16x32xf32>
    %9 = arith.addf %6, %8 : vector<16x32xf32>
    %c0_9 = arith.constant 0 : index
    %c0_10 = arith.constant 0 : index
    %10 = vector.load %arg5[%c0_9, %c0_10] : memref<32x64xbf16, #tpu.memory_space<vmem>>, vector<32x64xbf16>
    %11 = arith.truncf %3 : vector<16x32xf32> to vector<16x32xbf16>
    %cst_11 = arith.constant dense<0.000000e+00> : vector<16x64xf32>
    %12 = tpu.matmul %11, %10, %cst_11 {dimension_numbers = #tpu.dot_dimension_numbers<[1], [0], [0], [1], [0, 0, 1, 1], [], []>} : vector<16x32xbf16>, vector<32x64xbf16>, vector<16x64xf32> -> vector<16x64xf32>
    %c0_12 = arith.constant 0 : index
    %c0_13 = arith.constant 0 : index
    %13 = vector.load %arg6[%c0_12, %c0_13] : memref<1x64xf32, #tpu.memory_space<vmem>>, vector<1x64xf32>
    %14 = vector.broadcast %13 : vector<1x64xf32> to vector<16x64xf32>
    %15 = arith.addf %12, %14 : vector<16x64xf32>
    %16 = vector.extract_strided_slice %15 {offsets = [0, 0], sizes = [16, 32], strides = [1, 1]} : vector<16x64xf32> to vector<16x32xf32>
    %17 = vector.extract_strided_slice %15 {offsets = [0, 32], sizes = [16, 32], strides = [1, 1]} : vector<16x64xf32> to vector<16x32xf32>
    %c0_14 = arith.constant 0 : index
    %c0_15 = arith.constant 0 : index
    %18 = vector.load %arg7[%c0_14, %c0_15] : memref<32x32xbf16, #tpu.memory_space<vmem>>, vector<32x32xbf16>
    %19 = vector.extract_strided_slice %9 {offsets = [0, 0], sizes = [16, 16], strides = [1, 1]} : vector<16x32xf32> to vector<16x16xf32>
    %20 = vector.extract_strided_slice %16 {offsets = [0, 0], sizes = [16, 16], strides = [1, 1]} : vector<16x32xf32> to vector<16x16xf32>
    %21 = vector.extract_strided_slice %17 {offsets = [0, 0], sizes = [16, 16], strides = [1, 1]} : vector<16x32xf32> to vector<16x16xf32>
    %22 = arith.truncf %19 : vector<16x16xf32> to vector<16x16xbf16>
    %23 = arith.truncf %20 : vector<16x16xf32> to vector<16x16xbf16>
    %cst_16 = arith.constant dense<0.000000e+00> : vector<16x16xf32>
    %24 = tpu.matmul %22, %23, %cst_16 {dimension_numbers = #tpu.dot_dimension_numbers<[1], [1], [0], [0], [0, 0, 1, 0], [], []>} : vector<16x16xbf16>, vector<16x16xbf16>, vector<16x16xf32> -> vector<16x16xf32>
    %cst_17 = arith.constant 2.500000e-01 : f32
    %25 = vector.broadcast %cst_17 : f32 to vector<16x16xf32>
    %26 = arith.mulf %24, %25 : vector<16x16xf32>
    %cst_18 = arith.constant 0.000000e+00 : f32
    %27 = vector.broadcast %cst_18 : f32 to vector<16x16xf32>
    %28 = arith.addf %26, %27 : vector<16x16xf32>
    %cst_19 = arith.constant dense<0xFF800000> : vector<16xf32>
    %29 = vector.multi_reduction <maximumf>, %28, %cst_19 [1] : vector<16x16xf32> to vector<16xf32>
    %30 = vector.shape_cast %29 : vector<16xf32> to vector<16x1xf32>
    %31 = vector.broadcast %30 : vector<16x1xf32> to vector<16x16xf32>
    %32 = arith.subf %28, %31 : vector<16x16xf32>
    %33 = math.exp %32 : vector<16x16xf32>
    %cst_20 = arith.constant dense<0.000000e+00> : vector<16xf32>
    %34 = vector.multi_reduction <add>, %33, %cst_20 [1] : vector<16x16xf32> to vector<16xf32>
    %35 = vector.shape_cast %34 : vector<16xf32> to vector<16x1xf32>
    %36 = tpu.reciprocal %35 {approx = true} : vector<16x1xf32> -> vector<16x1xf32>
    %37 = vector.broadcast %36 : vector<16x1xf32> to vector<16x16xf32>
    %38 = arith.mulf %33, %37 : vector<16x16xf32>
    %39 = arith.truncf %38 : vector<16x16xf32> to vector<16x16xbf16>
    %40 = arith.truncf %21 : vector<16x16xf32> to vector<16x16xbf16>
    %cst_21 = arith.constant dense<0.000000e+00> : vector<16x16xf32>
    %41 = tpu.matmul %39, %40, %cst_21 {dimension_numbers = #tpu.dot_dimension_numbers<[1], [0], [0], [1], [0, 0, 1, 1], [], []>} : vector<16x16xbf16>, vector<16x16xbf16>, vector<16x16xf32> -> vector<16x16xf32>
    %42 = vector.extract_strided_slice %18 {offsets = [0, 0], sizes = [16, 32], strides = [1, 1]} : vector<32x32xbf16> to vector<16x32xbf16>
    %43 = arith.truncf %41 : vector<16x16xf32> to vector<16x16xbf16>
    %cst_22 = arith.constant dense<0.000000e+00> : vector<16x32xf32>
    %44 = tpu.matmul %43, %42, %cst_22 {dimension_numbers = #tpu.dot_dimension_numbers<[1], [0], [0], [1], [0, 0, 1, 1], [], []>} : vector<16x16xbf16>, vector<16x32xbf16>, vector<16x32xf32> -> vector<16x32xf32>
    %45 = vector.extract_strided_slice %9 {offsets = [0, 16], sizes = [16, 16], strides = [1, 1]} : vector<16x32xf32> to vector<16x16xf32>
    %46 = vector.extract_strided_slice %16 {offsets = [0, 16], sizes = [16, 16], strides = [1, 1]} : vector<16x32xf32> to vector<16x16xf32>
    %47 = vector.extract_strided_slice %17 {offsets = [0, 16], sizes = [16, 16], strides = [1, 1]} : vector<16x32xf32> to vector<16x16xf32>
    %48 = arith.truncf %45 : vector<16x16xf32> to vector<16x16xbf16>
    %49 = arith.truncf %46 : vector<16x16xf32> to vector<16x16xbf16>
    %cst_23 = arith.constant dense<0.000000e+00> : vector<16x16xf32>
    %50 = tpu.matmul %48, %49, %cst_23 {dimension_numbers = #tpu.dot_dimension_numbers<[1], [1], [0], [0], [0, 0, 1, 0], [], []>} : vector<16x16xbf16>, vector<16x16xbf16>, vector<16x16xf32> -> vector<16x16xf32>
    %cst_24 = arith.constant 2.500000e-01 : f32
    %51 = vector.broadcast %cst_24 : f32 to vector<16x16xf32>
    %52 = arith.mulf %50, %51 : vector<16x16xf32>
    %cst_25 = arith.constant 0.000000e+00 : f32
    %53 = vector.broadcast %cst_25 : f32 to vector<16x16xf32>
    %54 = arith.addf %52, %53 : vector<16x16xf32>
    %cst_26 = arith.constant dense<0xFF800000> : vector<16xf32>
    %55 = vector.multi_reduction <maximumf>, %54, %cst_26 [1] : vector<16x16xf32> to vector<16xf32>
    %56 = vector.shape_cast %55 : vector<16xf32> to vector<16x1xf32>
    %57 = vector.broadcast %56 : vector<16x1xf32> to vector<16x16xf32>
    %58 = arith.subf %54, %57 : vector<16x16xf32>
    %59 = math.exp %58 : vector<16x16xf32>
    %cst_27 = arith.constant dense<0.000000e+00> : vector<16xf32>
    %60 = vector.multi_reduction <add>, %59, %cst_27 [1] : vector<16x16xf32> to vector<16xf32>
    %61 = vector.shape_cast %60 : vector<16xf32> to vector<16x1xf32>
    %62 = tpu.reciprocal %61 {approx = true} : vector<16x1xf32> -> vector<16x1xf32>
    %63 = vector.broadcast %62 : vector<16x1xf32> to vector<16x16xf32>
    %64 = arith.mulf %59, %63 : vector<16x16xf32>
    %65 = arith.truncf %64 : vector<16x16xf32> to vector<16x16xbf16>
    %66 = arith.truncf %47 : vector<16x16xf32> to vector<16x16xbf16>
    %cst_28 = arith.constant dense<0.000000e+00> : vector<16x16xf32>
    %67 = tpu.matmul %65, %66, %cst_28 {dimension_numbers = #tpu.dot_dimension_numbers<[1], [0], [0], [1], [0, 0, 1, 1], [], []>} : vector<16x16xbf16>, vector<16x16xbf16>, vector<16x16xf32> -> vector<16x16xf32>
    %68 = vector.extract_strided_slice %18 {offsets = [16, 0], sizes = [16, 32], strides = [1, 1]} : vector<32x32xbf16> to vector<16x32xbf16>
    %69 = arith.truncf %67 : vector<16x16xf32> to vector<16x16xbf16>
    %cst_29 = arith.constant dense<0.000000e+00> : vector<16x32xf32>
    %70 = tpu.matmul %69, %68, %cst_29 {dimension_numbers = #tpu.dot_dimension_numbers<[1], [0], [0], [1], [0, 0, 1, 1], [], []>} : vector<16x16xbf16>, vector<16x32xbf16>, vector<16x32xf32> -> vector<16x32xf32>
    %71 = arith.addf %44, %70 : vector<16x32xf32>
    %c0_30 = arith.constant 0 : index
    %c0_31 = arith.constant 0 : index
    %72 = vector.load %arg8[%c0_30, %c0_31] : memref<1x32xf32, #tpu.memory_space<vmem>>, vector<1x32xf32>
    %73 = vector.broadcast %72 : vector<1x32xf32> to vector<16x32xf32>
    %74 = arith.addf %71, %73 : vector<16x32xf32>
    %75 = arith.addf %74, %1 : vector<16x32xf32>
    %c0_32 = arith.constant 0 : index
    %c0_33 = arith.constant 0 : index
    %c0_34 = arith.constant 0 : index
    %76 = vector.load %arg9[%c0_32, %c0_33, %c0_34] : memref<1x16x32xf32, #tpu.memory_space<vmem>>, vector<1x16x32xf32>
    %77 = vector.shape_cast %76 : vector<1x16x32xf32> to vector<16x32xf32>
    %78 = vector.shape_cast %75 : vector<16x32xf32> to vector<1x16x32xf32>
    tpu.vector_store %arg9[%c0_32, %c0_33, %c0_34], %78 {strides = array<i32>} : memref<1x16x32xf32, #tpu.memory_space<vmem>>, vector<1x16x32xf32>,
    return
  }
  func.func @transform_0(%arg0: i32) -> (i32, i32, i32) {
    %c0_i32 = arith.constant 0 : i32
    %c0_i32_0 = arith.constant 0 : i32
    %c0_i32_1 = arith.constant 0 : i32
    return %arg0, %c0_i32, %c0_i32_0 : i32, i32, i32
  }
  func.func @transform_1(%arg0: i32) -> (i32, i32, i32) {
    %c0_i32 = arith.constant 0 : i32
    %c0_i32_0 = arith.constant 0 : i32
    %c0_i32_1 = arith.constant 0 : i32
    return %arg0, %c0_i32, %c0_i32_0 : i32, i32, i32
  }
  func.func @transform_2(%arg0: i32) -> (i32, i32) {
    %c0_i32 = arith.constant 0 : i32
    %c0_i32_0 = arith.constant 0 : i32
    %c0_i32_1 = arith.constant 0 : i32
    return %c0_i32, %c0_i32_0 : i32, i32
  }
  func.func @transform_3(%arg0: i32) -> (i32, i32) {
    %c0_i32 = arith.constant 0 : i32
    %c0_i32_0 = arith.constant 0 : i32
    %c0_i32_1 = arith.constant 0 : i32
    return %c0_i32, %c0_i32_0 : i32, i32
  }
  func.func @transform_4(%arg0: i32) -> (i32, i32) {
    %c0_i32 = arith.constant 0 : i32
    %c0_i32_0 = arith.constant 0 : i32
    %c0_i32_1 = arith.constant 0 : i32
    return %c0_i32, %c0_i32_0 : i32, i32
  }
  func.func @transform_5(%arg0: i32) -> (i32, i32) {
    %c0_i32 = arith.constant 0 : i32
    %c0_i32_0 = arith.constant 0 : i32
    %c0_i32_1 = arith.constant 0 : i32
    return %c0_i32, %c0_i32_0 : i32, i32
  }
  func.func @transform_6(%arg0: i32) -> (i32, i32) {
    %c0_i32 = arith.constant 0 : i32
    %c0_i32_0 = arith.constant 0 : i32
    %c0_i32_1 = arith.constant 0 : i32
    return %c0_i32, %c0_i32_0 : i32, i32
  }
  func.func @transform_7(%arg0: i32) -> (i32, i32) {
    %c0_i32 = arith.constant 0 : i32
    %c0_i32_0 = arith.constant 0 : i32
    %c0_i32_1 = arith.constant 0 : i32
    return %c0_i32, %c0_i32_0 : i32, i32
  }
  func.func @transform_8(%arg0: i32) -> (i32, i32, i32) {
    %c0_i32 = arith.constant 0 : i32
    %c0_i32_0 = arith.constant 0 : i32
    %c0_i32_1 = arith.constant 0 : i32
    return %arg0, %c0_i32, %c0_i32_0 : i32, i32, i32
  }
}

module attributes {stable_mosaic.version = 11 : i64} {
  func.func @_dec_prenet_kernel(%arg0: i32, %arg1: memref<1x16x32xf32, #tpu.memory_space<vmem>>, %arg2: memref<16x32xf32, #tpu.memory_space<vmem>>, %arg3: memref<32x16xbf16, #tpu.memory_space<vmem>>, %arg4: memref<1x16xf32, #tpu.memory_space<vmem>>, %arg5: memref<16x32xbf16, #tpu.memory_space<vmem>>, %arg6: memref<1x32xf32, #tpu.memory_space<vmem>>, %arg7: memref<1x16x32xf32, #tpu.memory_space<vmem>>) attributes {dimension_semantics = [#tpu.dimension_semantics<parallel>], iteration_bounds = array<i64: 2>, scalar_prefetch = 0 : i64, scratch_operands = 0 : i64, tpu.core_type = #tpu.core_type<tc>, window_params = [{transform_indices = @transform_0, window_bounds = array<i64: 1, 16, 32>}, {pipeline_mode = #tpu.pipeline_mode<synchronous>, transform_indices = @transform_1, window_bounds = array<i64: 16, 32>}, {pipeline_mode = #tpu.pipeline_mode<synchronous>, transform_indices = @transform_2, window_bounds = array<i64: 32, 16>}, {pipeline_mode = #tpu.pipeline_mode<synchronous>, transform_indices = @transform_3, window_bounds = array<i64: 1, 16>}, {pipeline_mode = #tpu.pipeline_mode<synchronous>, transform_indices = @transform_4, window_bounds = array<i64: 16, 32>}, {pipeline_mode = #tpu.pipeline_mode<synchronous>, transform_indices = @transform_5, window_bounds = array<i64: 1, 32>}, {transform_indices = @transform_6, window_bounds = array<i64: 1, 16, 32>}]} {
    %c0 = arith.constant 0 : index
    %c0_0 = arith.constant 0 : index
    %c0_1 = arith.constant 0 : index
    %0 = vector.load %arg1[%c0, %c0_0, %c0_1] : memref<1x16x32xf32, #tpu.memory_space<vmem>>, vector<1x16x32xf32>
    %1 = vector.shape_cast %0 : vector<1x16x32xf32> to vector<16x32xf32>
    %c0_2 = arith.constant 0 : index
    %c0_3 = arith.constant 0 : index
    %2 = vector.load %arg3[%c0_2, %c0_3] : memref<32x16xbf16, #tpu.memory_space<vmem>>, vector<32x16xbf16>
    %3 = arith.truncf %1 : vector<16x32xf32> to vector<16x32xbf16>
    %cst = arith.constant dense<0.000000e+00> : vector<16x16xf32>
    %4 = tpu.matmul %3, %2, %cst {dimension_numbers = #tpu.dot_dimension_numbers<[1], [0], [0], [1], [0, 0, 1, 1], [], []>} : vector<16x32xbf16>, vector<32x16xbf16>, vector<16x16xf32> -> vector<16x16xf32>
    %c0_4 = arith.constant 0 : index
    %c0_5 = arith.constant 0 : index
    %5 = vector.load %arg4[%c0_4, %c0_5] : memref<1x16xf32, #tpu.memory_space<vmem>>, vector<1x16xf32>
    %6 = vector.broadcast %5 : vector<1x16xf32> to vector<16x16xf32>
    %7 = arith.addf %4, %6 : vector<16x16xf32>
    %cst_6 = arith.constant 2.000000e+01 : f32
    %8 = vector.broadcast %cst_6 : f32 to vector<16x16xf32>
    %9 = arith.minimumf %7, %8 : vector<16x16xf32>
    %10 = math.exp %9 : vector<16x16xf32>
    %cst_7 = arith.constant 2.000000e+00 : f32
    %11 = vector.broadcast %cst_7 : f32 to vector<16x16xf32>
    %12 = arith.addf %10, %11 : vector<16x16xf32>
    %13 = arith.mulf %10, %12 : vector<16x16xf32>
    %14 = arith.mulf %7, %13 : vector<16x16xf32>
    %cst_8 = arith.constant 2.000000e+00 : f32
    %15 = vector.broadcast %cst_8 : f32 to vector<16x16xf32>
    %16 = arith.addf %13, %15 : vector<16x16xf32>
    %17 = tpu.reciprocal %16 {approx = true} : vector<16x16xf32> -> vector<16x16xf32>
    %18 = arith.mulf %14, %17 : vector<16x16xf32>
    %c0_9 = arith.constant 0 : index
    %c0_10 = arith.constant 0 : index
    %19 = vector.load %arg5[%c0_9, %c0_10] : memref<16x32xbf16, #tpu.memory_space<vmem>>, vector<16x32xbf16>
    %20 = arith.truncf %18 : vector<16x16xf32> to vector<16x16xbf16>
    %cst_11 = arith.constant dense<0.000000e+00> : vector<16x32xf32>
    %21 = tpu.matmul %20, %19, %cst_11 {dimension_numbers = #tpu.dot_dimension_numbers<[1], [0], [0], [1], [0, 0, 1, 1], [], []>} : vector<16x16xbf16>, vector<16x32xbf16>, vector<16x32xf32> -> vector<16x32xf32>
    %c0_12 = arith.constant 0 : index
    %c0_13 = arith.constant 0 : index
    %22 = vector.load %arg6[%c0_12, %c0_13] : memref<1x32xf32, #tpu.memory_space<vmem>>, vector<1x32xf32>
    %23 = vector.broadcast %22 : vector<1x32xf32> to vector<16x32xf32>
    %24 = arith.addf %21, %23 : vector<16x32xf32>
    %c0_14 = arith.constant 0 : index
    %c0_15 = arith.constant 0 : index
    %25 = vector.load %arg2[%c0_14, %c0_15] : memref<16x32xf32, #tpu.memory_space<vmem>>, vector<16x32xf32>
    %26 = arith.addf %24, %25 : vector<16x32xf32>
    %c0_16 = arith.constant 0 : index
    %c0_17 = arith.constant 0 : index
    %c0_18 = arith.constant 0 : index
    %27 = vector.load %arg7[%c0_16, %c0_17, %c0_18] : memref<1x16x32xf32, #tpu.memory_space<vmem>>, vector<1x16x32xf32>
    %28 = vector.shape_cast %27 : vector<1x16x32xf32> to vector<16x32xf32>
    %29 = vector.shape_cast %26 : vector<16x32xf32> to vector<1x16x32xf32>
    tpu.vector_store %arg7[%c0_16, %c0_17, %c0_18], %29 {strides = array<i32>} : memref<1x16x32xf32, #tpu.memory_space<vmem>>, vector<1x16x32xf32>,
    return
  }
  func.func @transform_0(%arg0: i32) -> (i32, i32, i32) {
    %c0_i32 = arith.constant 0 : i32
    %c0_i32_0 = arith.constant 0 : i32
    %c0_i32_1 = arith.constant 0 : i32
    return %arg0, %c0_i32, %c0_i32_0 : i32, i32, i32
  }
  func.func @transform_1(%arg0: i32) -> (i32, i32) {
    %c0_i32 = arith.constant 0 : i32
    %c0_i32_0 = arith.constant 0 : i32
    %c0_i32_1 = arith.constant 0 : i32
    return %c0_i32, %c0_i32_0 : i32, i32
  }
  func.func @transform_2(%arg0: i32) -> (i32, i32) {
    %c0_i32 = arith.constant 0 : i32
    %c0_i32_0 = arith.constant 0 : i32
    %c0_i32_1 = arith.constant 0 : i32
    return %c0_i32, %c0_i32_0 : i32, i32
  }
  func.func @transform_3(%arg0: i32) -> (i32, i32) {
    %c0_i32 = arith.constant 0 : i32
    %c0_i32_0 = arith.constant 0 : i32
    %c0_i32_1 = arith.constant 0 : i32
    return %c0_i32, %c0_i32_0 : i32, i32
  }
  func.func @transform_4(%arg0: i32) -> (i32, i32) {
    %c0_i32 = arith.constant 0 : i32
    %c0_i32_0 = arith.constant 0 : i32
    %c0_i32_1 = arith.constant 0 : i32
    return %c0_i32, %c0_i32_0 : i32, i32
  }
  func.func @transform_5(%arg0: i32) -> (i32, i32) {
    %c0_i32 = arith.constant 0 : i32
    %c0_i32_0 = arith.constant 0 : i32
    %c0_i32_1 = arith.constant 0 : i32
    return %c0_i32, %c0_i32_0 : i32, i32
  }
  func.func @transform_6(%arg0: i32) -> (i32, i32, i32) {
    %c0_i32 = arith.constant 0 : i32
    %c0_i32_0 = arith.constant 0 : i32
    %c0_i32_1 = arith.constant 0 : i32
    return %arg0, %c0_i32, %c0_i32_0 : i32, i32, i32
  }
}

module attributes {stable_mosaic.version = 11 : i64} {
  func.func @_mel_head_kernel(%arg0: i32, %arg1: memref<1x16x32xf32, #tpu.memory_space<vmem>>, %arg2: memref<32x32xbf16, #tpu.memory_space<vmem>>, %arg3: memref<1x32xf32, #tpu.memory_space<vmem>>, %arg4: memref<32x16xbf16, #tpu.memory_space<vmem>>, %arg5: memref<1x16xf32, #tpu.memory_space<vmem>>, %arg6: memref<1x16x16xf32, #tpu.memory_space<vmem>>) attributes {dimension_semantics = [#tpu.dimension_semantics<parallel>], iteration_bounds = array<i64: 2>, scalar_prefetch = 0 : i64, scratch_operands = 0 : i64, tpu.core_type = #tpu.core_type<tc>, window_params = [{transform_indices = @transform_0, window_bounds = array<i64: 1, 16, 32>}, {pipeline_mode = #tpu.pipeline_mode<synchronous>, transform_indices = @transform_1, window_bounds = array<i64: 32, 32>}, {pipeline_mode = #tpu.pipeline_mode<synchronous>, transform_indices = @transform_2, window_bounds = array<i64: 1, 32>}, {pipeline_mode = #tpu.pipeline_mode<synchronous>, transform_indices = @transform_3, window_bounds = array<i64: 32, 16>}, {pipeline_mode = #tpu.pipeline_mode<synchronous>, transform_indices = @transform_4, window_bounds = array<i64: 1, 16>}, {transform_indices = @transform_5, window_bounds = array<i64: 1, 16, 16>}]} {
    %c0 = arith.constant 0 : index
    %c0_0 = arith.constant 0 : index
    %c0_1 = arith.constant 0 : index
    %0 = vector.load %arg1[%c0, %c0_0, %c0_1] : memref<1x16x32xf32, #tpu.memory_space<vmem>>, vector<1x16x32xf32>
    %1 = vector.shape_cast %0 : vector<1x16x32xf32> to vector<16x32xf32>
    %c0_2 = arith.constant 0 : index
    %c0_3 = arith.constant 0 : index
    %2 = vector.load %arg2[%c0_2, %c0_3] : memref<32x32xbf16, #tpu.memory_space<vmem>>, vector<32x32xbf16>
    %3 = arith.truncf %1 : vector<16x32xf32> to vector<16x32xbf16>
    %cst = arith.constant dense<0.000000e+00> : vector<16x32xf32>
    %4 = tpu.matmul %3, %2, %cst {dimension_numbers = #tpu.dot_dimension_numbers<[1], [0], [0], [1], [0, 0, 1, 1], [], []>} : vector<16x32xbf16>, vector<32x32xbf16>, vector<16x32xf32> -> vector<16x32xf32>
    %c0_4 = arith.constant 0 : index
    %c0_5 = arith.constant 0 : index
    %5 = vector.load %arg3[%c0_4, %c0_5] : memref<1x32xf32, #tpu.memory_space<vmem>>, vector<1x32xf32>
    %6 = vector.broadcast %5 : vector<1x32xf32> to vector<16x32xf32>
    %7 = arith.addf %4, %6 : vector<16x32xf32>
    %cst_6 = arith.constant 0.000000e+00 : f32
    %8 = vector.broadcast %cst_6 : f32 to vector<16x32xf32>
    %9 = arith.maximumf %7, %8 : vector<16x32xf32>
    %c0_7 = arith.constant 0 : index
    %c0_8 = arith.constant 0 : index
    %10 = vector.load %arg4[%c0_7, %c0_8] : memref<32x16xbf16, #tpu.memory_space<vmem>>, vector<32x16xbf16>
    %11 = arith.truncf %9 : vector<16x32xf32> to vector<16x32xbf16>
    %cst_9 = arith.constant dense<0.000000e+00> : vector<16x16xf32>
    %12 = tpu.matmul %11, %10, %cst_9 {dimension_numbers = #tpu.dot_dimension_numbers<[1], [0], [0], [1], [0, 0, 1, 1], [], []>} : vector<16x32xbf16>, vector<32x16xbf16>, vector<16x16xf32> -> vector<16x16xf32>
    %c0_10 = arith.constant 0 : index
    %c0_11 = arith.constant 0 : index
    %13 = vector.load %arg5[%c0_10, %c0_11] : memref<1x16xf32, #tpu.memory_space<vmem>>, vector<1x16xf32>
    %14 = vector.broadcast %13 : vector<1x16xf32> to vector<16x16xf32>
    %15 = arith.addf %12, %14 : vector<16x16xf32>
    %c0_12 = arith.constant 0 : index
    %c0_13 = arith.constant 0 : index
    %c0_14 = arith.constant 0 : index
    %16 = vector.load %arg6[%c0_12, %c0_13, %c0_14] : memref<1x16x16xf32, #tpu.memory_space<vmem>>, vector<1x16x16xf32>
    %17 = vector.shape_cast %16 : vector<1x16x16xf32> to vector<16x16xf32>
    %18 = vector.shape_cast %15 : vector<16x16xf32> to vector<1x16x16xf32>
    tpu.vector_store %arg6[%c0_12, %c0_13, %c0_14], %18 {strides = array<i32>} : memref<1x16x16xf32, #tpu.memory_space<vmem>>, vector<1x16x16xf32>,
    return
  }
  func.func @transform_0(%arg0: i32) -> (i32, i32, i32) {
    %c0_i32 = arith.constant 0 : i32
    %c0_i32_0 = arith.constant 0 : i32
    %c0_i32_1 = arith.constant 0 : i32
    return %arg0, %c0_i32, %c0_i32_0 : i32, i32, i32
  }
  func.func @transform_1(%arg0: i32) -> (i32, i32) {
    %c0_i32 = arith.constant 0 : i32
    %c0_i32_0 = arith.constant 0 : i32
    %c0_i32_1 = arith.constant 0 : i32
    return %c0_i32, %c0_i32_0 : i32, i32
  }
  func.func @transform_2(%arg0: i32) -> (i32, i32) {
    %c0_i32 = arith.constant 0 : i32
    %c0_i32_0 = arith.constant 0 : i32
    %c0_i32_1 = arith.constant 0 : i32
    return %c0_i32, %c0_i32_0 : i32, i32
  }
  func.func @transform_3(%arg0: i32) -> (i32, i32) {
    %c0_i32 = arith.constant 0 : i32
    %c0_i32_0 = arith.constant 0 : i32
    %c0_i32_1 = arith.constant 0 : i32
    return %c0_i32, %c0_i32_0 : i32, i32
  }
  func.func @transform_4(%arg0: i32) -> (i32, i32) {
    %c0_i32 = arith.constant 0 : i32
    %c0_i32_0 = arith.constant 0 : i32
    %c0_i32_1 = arith.constant 0 : i32
    return %c0_i32, %c0_i32_0 : i32, i32
  }
  func.func @transform_5(%arg0: i32) -> (i32, i32, i32) {
    %c0_i32 = arith.constant 0 : i32
    %c0_i32_0 = arith.constant 0 : i32
    %c0_i32_1 = arith.constant 0 : i32
    return %arg0, %c0_i32, %c0_i32_0 : i32, i32, i32
  }
}

module attributes {stable_mosaic.version = 11 : i64} {
  func.func @_fft_cross_stack_kernel(%arg0: i32, %arg1: i32, %arg2: memref<1x16x32xf32, #tpu.memory_space<vmem>>, %arg3: memref<1x16x32xf32, #tpu.memory_space<vmem>>, %arg4: memref<1x16x1xf32, #tpu.memory_space<vmem>>, %arg5: memref<1x1x16xf32, #tpu.memory_space<vmem>>, %arg6: memref<1x1x1x64xf32, #tpu.memory_space<vmem>>, %arg7: memref<1x1x1x64xf32, #tpu.memory_space<vmem>>, %arg8: memref<1x32x32xbf16, #tpu.memory_space<vmem>>, %arg9: memref<1x1x32xf32, #tpu.memory_space<vmem>>, %arg10: memref<1x32x64xbf16, #tpu.memory_space<vmem>>, %arg11: memref<1x1x64xf32, #tpu.memory_space<vmem>>, %arg12: memref<1x32x32xbf16, #tpu.memory_space<vmem>>, %arg13: memref<1x1x32xf32, #tpu.memory_space<vmem>>, %arg14: memref<1x288x64xbf16, #tpu.memory_space<vmem>>, %arg15: memref<1x1x64xf32, #tpu.memory_space<vmem>>, %arg16: memref<1x64x32xbf16, #tpu.memory_space<vmem>>, %arg17: memref<1x1x32xf32, #tpu.memory_space<vmem>>, %arg18: memref<1x1x16x32xf32, #tpu.memory_space<vmem>>, %arg19: memref<16x32xf32, #tpu.memory_space<vmem>>) attributes {dimension_semantics = [#tpu.dimension_semantics<parallel>, #tpu.dimension_semantics<arbitrary>], iteration_bounds = array<i64: 2, 4>, scalar_prefetch = 0 : i64, scratch_operands = 1 : i64, tpu.core_type = #tpu.core_type<tc>, window_params = [{transform_indices = @transform_0, window_bounds = array<i64: 1, 16, 32>}, {transform_indices = @transform_1, window_bounds = array<i64: 1, 16, 32>}, {transform_indices = @transform_2, window_bounds = array<i64: 1, 16, 1>}, {transform_indices = @transform_3, window_bounds = array<i64: 1, 1, 16>}, {transform_indices = @transform_4, window_bounds = array<i64: 1, 1, 1, 64>}, {transform_indices = @transform_5, window_bounds = array<i64: 1, 1, 1, 64>}, {transform_indices = @transform_6, window_bounds = array<i64: 1, 32, 32>}, {transform_indices = @transform_7, window_bounds = array<i64: 1, 1, 32>}, {transform_indices = @transform_8, window_bounds = array<i64: 1, 32, 64>}, {transform_indices = @transform_9, window_bounds = array<i64: 1, 1, 64>}, {transform_indices = @transform_10, window_bounds = array<i64: 1, 32, 32>}, {transform_indices = @transform_11, window_bounds = array<i64: 1, 1, 32>}, {transform_indices = @transform_12, window_bounds = array<i64: 1, 288, 64>}, {transform_indices = @transform_13, window_bounds = array<i64: 1, 1, 64>}, {transform_indices = @transform_14, window_bounds = array<i64: 1, 64, 32>}, {transform_indices = @transform_15, window_bounds = array<i64: 1, 1, 32>}, {transform_indices = @transform_16, window_bounds = array<i64: 1, 1, 16, 32>}]} {
    %c0_i32 = arith.constant 0 : i32
    %0 = arith.cmpi eq, %arg1, %c0_i32 : i32
    %1 = arith.extui %0 : i1 to i32
    %c0_i32_0 = arith.constant 0 : i32
    %2 = arith.cmpi ne, %1, %c0_i32_0 : i32
    scf.if %2 {
      %c0_84 = arith.constant 0 : index
      %c0_85 = arith.constant 0 : index
      %c0_86 = arith.constant 0 : index
      %184 = vector.load %arg2[%c0_84, %c0_85, %c0_86] : memref<1x16x32xf32, #tpu.memory_space<vmem>>, vector<1x16x32xf32>
      %185 = vector.shape_cast %184 : vector<1x16x32xf32> to vector<16x32xf32>
      %c0_87 = arith.constant 0 : index
      %c0_88 = arith.constant 0 : index
      %186 = vector.load %arg19[%c0_87, %c0_88] : memref<16x32xf32, #tpu.memory_space<vmem>>, vector<16x32xf32>
      tpu.vector_store %arg19[%c0_87, %c0_88], %185 {strides = array<i32>} : memref<16x32xf32, #tpu.memory_space<vmem>>, vector<16x32xf32>,
    } else {
    }
    %c0 = arith.constant 0 : index
    %c0_1 = arith.constant 0 : index
    %3 = vector.load %arg19[%c0, %c0_1] : memref<16x32xf32, #tpu.memory_space<vmem>>, vector<16x32xf32>
    %c0_2 = arith.constant 0 : index
    %c0_3 = arith.constant 0 : index
    %c0_4 = arith.constant 0 : index
    %4 = vector.load %arg3[%c0_2, %c0_3, %c0_4] : memref<1x16x32xf32, #tpu.memory_space<vmem>>, vector<1x16x32xf32>
    %5 = vector.shape_cast %4 : vector<1x16x32xf32> to vector<16x32xf32>
    %c0_5 = arith.constant 0 : index
    %c0_6 = arith.constant 0 : index
    %c0_7 = arith.constant 0 : index
    %6 = vector.load %arg4[%c0_5, %c0_6, %c0_7] : memref<1x16x1xf32, #tpu.memory_space<vmem>>, vector<1x16x1xf32>
    %7 = vector.shape_cast %6 : vector<1x16x1xf32> to vector<16x1xf32>
    %c0_8 = arith.constant 0 : index
    %c0_9 = arith.constant 0 : index
    %c0_10 = arith.constant 0 : index
    %8 = vector.load %arg5[%c0_8, %c0_9, %c0_10] : memref<1x1x16xf32, #tpu.memory_space<vmem>>, vector<1x1x16xf32>
    %9 = vector.shape_cast %8 : vector<1x1x16xf32> to vector<1x16xf32>
    %c0_11 = arith.constant 0 : index
    %c0_12 = arith.constant 0 : index
    %c0_13 = arith.constant 0 : index
    %10 = vector.load %arg8[%c0_11, %c0_12, %c0_13] : memref<1x32x32xbf16, #tpu.memory_space<vmem>>, vector<1x32x32xbf16>
    %11 = vector.shape_cast %10 : vector<1x32x32xbf16> to vector<32x32xbf16>
    %12 = arith.truncf %3 : vector<16x32xf32> to vector<16x32xbf16>
    %cst = arith.constant dense<0.000000e+00> : vector<16x32xf32>
    %13 = tpu.matmul %12, %11, %cst {dimension_numbers = #tpu.dot_dimension_numbers<[1], [0], [0], [1], [0, 0, 1, 1], [], []>} : vector<16x32xbf16>, vector<32x32xbf16>, vector<16x32xf32> -> vector<16x32xf32>
    %c0_14 = arith.constant 0 : index
    %c0_15 = arith.constant 0 : index
    %c0_16 = arith.constant 0 : index
    %14 = vector.load %arg9[%c0_14, %c0_15, %c0_16] : memref<1x1x32xf32, #tpu.memory_space<vmem>>, vector<1x1x32xf32>
    %15 = vector.shape_cast %14 : vector<1x1x32xf32> to vector<1x32xf32>
    %16 = vector.broadcast %15 : vector<1x32xf32> to vector<16x32xf32>
    %17 = arith.addf %13, %16 : vector<16x32xf32>
    %c0_17 = arith.constant 0 : index
    %c0_18 = arith.constant 0 : index
    %c0_19 = arith.constant 0 : index
    %18 = vector.load %arg10[%c0_17, %c0_18, %c0_19] : memref<1x32x64xbf16, #tpu.memory_space<vmem>>, vector<1x32x64xbf16>
    %19 = vector.shape_cast %18 : vector<1x32x64xbf16> to vector<32x64xbf16>
    %20 = arith.truncf %5 : vector<16x32xf32> to vector<16x32xbf16>
    %cst_20 = arith.constant dense<0.000000e+00> : vector<16x64xf32>
    %21 = tpu.matmul %20, %19, %cst_20 {dimension_numbers = #tpu.dot_dimension_numbers<[1], [0], [0], [1], [0, 0, 1, 1], [], []>} : vector<16x32xbf16>, vector<32x64xbf16>, vector<16x64xf32> -> vector<16x64xf32>
    %c0_21 = arith.constant 0 : index
    %c0_22 = arith.constant 0 : index
    %c0_23 = arith.constant 0 : index
    %22 = vector.load %arg11[%c0_21, %c0_22, %c0_23] : memref<1x1x64xf32, #tpu.memory_space<vmem>>, vector<1x1x64xf32>
    %23 = vector.shape_cast %22 : vector<1x1x64xf32> to vector<1x64xf32>
    %24 = vector.broadcast %23 : vector<1x64xf32> to vector<16x64xf32>
    %25 = arith.addf %21, %24 : vector<16x64xf32>
    %26 = vector.extract_strided_slice %25 {offsets = [0, 0], sizes = [16, 32], strides = [1, 1]} : vector<16x64xf32> to vector<16x32xf32>
    %27 = vector.extract_strided_slice %25 {offsets = [0, 32], sizes = [16, 32], strides = [1, 1]} : vector<16x64xf32> to vector<16x32xf32>
    %c0_24 = arith.constant 0 : index
    %c0_25 = arith.constant 0 : index
    %c0_26 = arith.constant 0 : index
    %28 = vector.load %arg12[%c0_24, %c0_25, %c0_26] : memref<1x32x32xbf16, #tpu.memory_space<vmem>>, vector<1x32x32xbf16>
    %29 = vector.shape_cast %28 : vector<1x32x32xbf16> to vector<32x32xbf16>
    %30 = vector.extract_strided_slice %17 {offsets = [0, 0], sizes = [16, 16], strides = [1, 1]} : vector<16x32xf32> to vector<16x16xf32>
    %31 = vector.extract_strided_slice %26 {offsets = [0, 0], sizes = [16, 16], strides = [1, 1]} : vector<16x32xf32> to vector<16x16xf32>
    %32 = vector.extract_strided_slice %27 {offsets = [0, 0], sizes = [16, 16], strides = [1, 1]} : vector<16x32xf32> to vector<16x16xf32>
    %33 = arith.truncf %30 : vector<16x16xf32> to vector<16x16xbf16>
    %34 = arith.truncf %31 : vector<16x16xf32> to vector<16x16xbf16>
    %cst_27 = arith.constant dense<0.000000e+00> : vector<16x16xf32>
    %35 = tpu.matmul %33, %34, %cst_27 {dimension_numbers = #tpu.dot_dimension_numbers<[1], [1], [0], [0], [0, 0, 1, 0], [], []>} : vector<16x16xbf16>, vector<16x16xbf16>, vector<16x16xf32> -> vector<16x16xf32>
    %cst_28 = arith.constant 2.500000e-01 : f32
    %36 = vector.broadcast %cst_28 : f32 to vector<16x16xf32>
    %37 = arith.mulf %35, %36 : vector<16x16xf32>
    %38 = vector.broadcast %9 : vector<1x16xf32> to vector<16x16xf32>
    %39 = arith.addf %37, %38 : vector<16x16xf32>
    %cst_29 = arith.constant dense<0xFF800000> : vector<16xf32>
    %40 = vector.multi_reduction <maximumf>, %39, %cst_29 [1] : vector<16x16xf32> to vector<16xf32>
    %41 = vector.shape_cast %40 : vector<16xf32> to vector<16x1xf32>
    %42 = vector.broadcast %41 : vector<16x1xf32> to vector<16x16xf32>
    %43 = arith.subf %39, %42 : vector<16x16xf32>
    %44 = math.exp %43 : vector<16x16xf32>
    %cst_30 = arith.constant dense<0.000000e+00> : vector<16xf32>
    %45 = vector.multi_reduction <add>, %44, %cst_30 [1] : vector<16x16xf32> to vector<16xf32>
    %46 = vector.shape_cast %45 : vector<16xf32> to vector<16x1xf32>
    %47 = tpu.reciprocal %46 {approx = true} : vector<16x1xf32> -> vector<16x1xf32>
    %48 = vector.broadcast %47 : vector<16x1xf32> to vector<16x16xf32>
    %49 = arith.mulf %44, %48 : vector<16x16xf32>
    %50 = arith.truncf %49 : vector<16x16xf32> to vector<16x16xbf16>
    %51 = arith.truncf %32 : vector<16x16xf32> to vector<16x16xbf16>
    %cst_31 = arith.constant dense<0.000000e+00> : vector<16x16xf32>
    %52 = tpu.matmul %50, %51, %cst_31 {dimension_numbers = #tpu.dot_dimension_numbers<[1], [0], [0], [1], [0, 0, 1, 1], [], []>} : vector<16x16xbf16>, vector<16x16xbf16>, vector<16x16xf32> -> vector<16x16xf32>
    %53 = vector.extract_strided_slice %29 {offsets = [0, 0], sizes = [16, 32], strides = [1, 1]} : vector<32x32xbf16> to vector<16x32xbf16>
    %54 = arith.truncf %52 : vector<16x16xf32> to vector<16x16xbf16>
    %cst_32 = arith.constant dense<0.000000e+00> : vector<16x32xf32>
    %55 = tpu.matmul %54, %53, %cst_32 {dimension_numbers = #tpu.dot_dimension_numbers<[1], [0], [0], [1], [0, 0, 1, 1], [], []>} : vector<16x16xbf16>, vector<16x32xbf16>, vector<16x32xf32> -> vector<16x32xf32>
    %56 = vector.extract_strided_slice %17 {offsets = [0, 16], sizes = [16, 16], strides = [1, 1]} : vector<16x32xf32> to vector<16x16xf32>
    %57 = vector.extract_strided_slice %26 {offsets = [0, 16], sizes = [16, 16], strides = [1, 1]} : vector<16x32xf32> to vector<16x16xf32>
    %58 = vector.extract_strided_slice %27 {offsets = [0, 16], sizes = [16, 16], strides = [1, 1]} : vector<16x32xf32> to vector<16x16xf32>
    %59 = arith.truncf %56 : vector<16x16xf32> to vector<16x16xbf16>
    %60 = arith.truncf %57 : vector<16x16xf32> to vector<16x16xbf16>
    %cst_33 = arith.constant dense<0.000000e+00> : vector<16x16xf32>
    %61 = tpu.matmul %59, %60, %cst_33 {dimension_numbers = #tpu.dot_dimension_numbers<[1], [1], [0], [0], [0, 0, 1, 0], [], []>} : vector<16x16xbf16>, vector<16x16xbf16>, vector<16x16xf32> -> vector<16x16xf32>
    %cst_34 = arith.constant 2.500000e-01 : f32
    %62 = vector.broadcast %cst_34 : f32 to vector<16x16xf32>
    %63 = arith.mulf %61, %62 : vector<16x16xf32>
    %64 = vector.broadcast %9 : vector<1x16xf32> to vector<16x16xf32>
    %65 = arith.addf %63, %64 : vector<16x16xf32>
    %cst_35 = arith.constant dense<0xFF800000> : vector<16xf32>
    %66 = vector.multi_reduction <maximumf>, %65, %cst_35 [1] : vector<16x16xf32> to vector<16xf32>
    %67 = vector.shape_cast %66 : vector<16xf32> to vector<16x1xf32>
    %68 = vector.broadcast %67 : vector<16x1xf32> to vector<16x16xf32>
    %69 = arith.subf %65, %68 : vector<16x16xf32>
    %70 = math.exp %69 : vector<16x16xf32>
    %cst_36 = arith.constant dense<0.000000e+00> : vector<16xf32>
    %71 = vector.multi_reduction <add>, %70, %cst_36 [1] : vector<16x16xf32> to vector<16xf32>
    %72 = vector.shape_cast %71 : vector<16xf32> to vector<16x1xf32>
    %73 = tpu.reciprocal %72 {approx = true} : vector<16x1xf32> -> vector<16x1xf32>
    %74 = vector.broadcast %73 : vector<16x1xf32> to vector<16x16xf32>
    %75 = arith.mulf %70, %74 : vector<16x16xf32>
    %76 = arith.truncf %75 : vector<16x16xf32> to vector<16x16xbf16>
    %77 = arith.truncf %58 : vector<16x16xf32> to vector<16x16xbf16>
    %cst_37 = arith.constant dense<0.000000e+00> : vector<16x16xf32>
    %78 = tpu.matmul %76, %77, %cst_37 {dimension_numbers = #tpu.dot_dimension_numbers<[1], [0], [0], [1], [0, 0, 1, 1], [], []>} : vector<16x16xbf16>, vector<16x16xbf16>, vector<16x16xf32> -> vector<16x16xf32>
    %79 = vector.extract_strided_slice %29 {offsets = [16, 0], sizes = [16, 32], strides = [1, 1]} : vector<32x32xbf16> to vector<16x32xbf16>
    %80 = arith.truncf %78 : vector<16x16xf32> to vector<16x16xbf16>
    %cst_38 = arith.constant dense<0.000000e+00> : vector<16x32xf32>
    %81 = tpu.matmul %80, %79, %cst_38 {dimension_numbers = #tpu.dot_dimension_numbers<[1], [0], [0], [1], [0, 0, 1, 1], [], []>} : vector<16x16xbf16>, vector<16x32xbf16>, vector<16x32xf32> -> vector<16x32xf32>
    %82 = arith.addf %55, %81 : vector<16x32xf32>
    %c0_39 = arith.constant 0 : index
    %c0_40 = arith.constant 0 : index
    %c0_41 = arith.constant 0 : index
    %83 = vector.load %arg13[%c0_39, %c0_40, %c0_41] : memref<1x1x32xf32, #tpu.memory_space<vmem>>, vector<1x1x32xf32>
    %84 = vector.shape_cast %83 : vector<1x1x32xf32> to vector<1x32xf32>
    %85 = vector.broadcast %84 : vector<1x32xf32> to vector<16x32xf32>
    %86 = arith.addf %82, %85 : vector<16x32xf32>
    %87 = arith.addf %86, %3 : vector<16x32xf32>
    %c0_42 = arith.constant 0 : index
    %c0_43 = arith.constant 0 : index
    %c0_44 = arith.constant 0 : index
    %c0_45 = arith.constant 0 : index
    %88 = vector.load %arg6[%c0_42, %c0_43, %c0_44, %c0_45] : memref<1x1x1x64xf32, #tpu.memory_space<vmem>>, vector<1x1x1x64xf32>
    %89 = vector.shape_cast %88 : vector<1x1x1x64xf32> to vector<1x64xf32>
    %cst_46 = arith.constant dense<0.000000e+00> : vector<16xf32>
    %90 = vector.multi_reduction <add>, %87, %cst_46 [1] : vector<16x32xf32> to vector<16xf32>
    %91 = vector.shape_cast %90 : vector<16xf32> to vector<16x1xf32>
    %cst_47 = arith.constant 3.200000e+01 : f32
    %92 = vector.broadcast %cst_47 : f32 to vector<16x1xf32>
    %93 = arith.divf %91, %92 : vector<16x1xf32>
    %94 = vector.broadcast %93 : vector<16x1xf32> to vector<16x32xf32>
    %95 = arith.subf %87, %94 : vector<16x32xf32>
    %96 = arith.mulf %95, %95 : vector<16x32xf32>
    %cst_48 = arith.constant dense<0.000000e+00> : vector<16xf32>
    %97 = vector.multi_reduction <add>, %96, %cst_48 [1] : vector<16x32xf32> to vector<16xf32>
    %98 = vector.shape_cast %97 : vector<16xf32> to vector<16x1xf32>
    %cst_49 = arith.constant 3.200000e+01 : f32
    %99 = vector.broadcast %cst_49 : f32 to vector<16x1xf32>
    %100 = arith.divf %98, %99 : vector<16x1xf32>
    %cst_50 = arith.constant 9.99999974E-6 : f32
    %101 = vector.broadcast %cst_50 : f32 to vector<16x1xf32>
    %102 = arith.addf %100, %101 : vector<16x1xf32>
    %103 = math.rsqrt %102 : vector<16x1xf32>
    %104 = vector.broadcast %103 : vector<16x1xf32> to vector<16x32xf32>
    %105 = arith.mulf %95, %104 : vector<16x32xf32>
    %106 = vector.extract_strided_slice %89 {offsets = [0, 0], sizes = [1, 32], strides = [1, 1]} : vector<1x64xf32> to vector<1x32xf32>
    %107 = vector.broadcast %106 : vector<1x32xf32> to vector<16x32xf32>
    %108 = arith.mulf %105, %107 : vector<16x32xf32>
    %109 = vector.extract_strided_slice %89 {offsets = [0, 32], sizes = [1, 32], strides = [1, 1]} : vector<1x64xf32> to vector<1x32xf32>
    %110 = vector.broadcast %109 : vector<1x32xf32> to vector<16x32xf32>
    %111 = arith.addf %108, %110 : vector<16x32xf32>
    %112 = vector.broadcast %7 : vector<16x1xf32> to vector<16x32xf32>
    %113 = arith.mulf %111, %112 : vector<16x32xf32>
    %c0_51 = arith.constant 0 : index
    %c0_52 = arith.constant 0 : index
    %c0_53 = arith.constant 0 : index
    %114 = vector.load %arg14[%c0_51, %c0_52, %c0_53] : memref<1x288x64xbf16, #tpu.memory_space<vmem>>, vector<1x288x64xbf16>
    %115 = vector.shape_cast %114 : vector<1x288x64xbf16> to vector<288x64xbf16>
    %c0_54 = arith.constant 0 : index
    %c0_55 = arith.constant 0 : index
    %c0_56 = arith.constant 0 : index
    %116 = vector.load %arg15[%c0_54, %c0_55, %c0_56] : memref<1x1x64xf32, #tpu.memory_space<vmem>>, vector<1x1x64xf32>
    %117 = vector.shape_cast %116 : vector<1x1x64xf32> to vector<1x64xf32>
    %c0_57 = arith.constant 0 : index
    %c0_58 = arith.constant 0 : index
    %c0_59 = arith.constant 0 : index
    %118 = vector.load %arg16[%c0_57, %c0_58, %c0_59] : memref<1x64x32xbf16, #tpu.memory_space<vmem>>, vector<1x64x32xbf16>
    %119 = vector.shape_cast %118 : vector<1x64x32xbf16> to vector<64x32xbf16>
    %c0_60 = arith.constant 0 : index
    %c0_61 = arith.constant 0 : index
    %c0_62 = arith.constant 0 : index
    %120 = vector.load %arg17[%c0_60, %c0_61, %c0_62] : memref<1x1x32xf32, #tpu.memory_space<vmem>>, vector<1x1x32xf32>
    %121 = vector.shape_cast %120 : vector<1x1x32xf32> to vector<1x32xf32>
    %cst_63 = arith.constant 0.000000e+00 : f32
    %122 = vector.broadcast %cst_63 : f32 to vector<4x32xf32>
    %123 = tpu.concatenate %122, %113, %122 in 0 : vector<4x32xf32>, vector<16x32xf32>, vector<4x32xf32> -> vector<24x32xf32>
    %124 = vector.extract_strided_slice %123 {offsets = [0, 0], sizes = [16, 32], strides = [1, 1]} : vector<24x32xf32> to vector<16x32xf32>
    %125 = vector.extract_strided_slice %123 {offsets = [1, 0], sizes = [16, 32], strides = [1, 1]} : vector<24x32xf32> to vector<16x32xf32>
    %126 = vector.extract_strided_slice %123 {offsets = [2, 0], sizes = [16, 32], strides = [1, 1]} : vector<24x32xf32> to vector<16x32xf32>
    %127 = vector.extract_strided_slice %123 {offsets = [3, 0], sizes = [16, 32], strides = [1, 1]} : vector<24x32xf32> to vector<16x32xf32>
    %128 = vector.extract_strided_slice %123 {offsets = [4, 0], sizes = [16, 32], strides = [1, 1]} : vector<24x32xf32> to vector<16x32xf32>
    %129 = vector.extract_strided_slice %123 {offsets = [5, 0], sizes = [16, 32], strides = [1, 1]} : vector<24x32xf32> to vector<16x32xf32>
    %130 = vector.extract_strided_slice %123 {offsets = [6, 0], sizes = [16, 32], strides = [1, 1]} : vector<24x32xf32> to vector<16x32xf32>
    %131 = vector.extract_strided_slice %123 {offsets = [7, 0], sizes = [16, 32], strides = [1, 1]} : vector<24x32xf32> to vector<16x32xf32>
    %132 = vector.extract_strided_slice %123 {offsets = [8, 0], sizes = [16, 32], strides = [1, 1]} : vector<24x32xf32> to vector<16x32xf32>
    %133 = tpu.concatenate %124, %125, %126, %127, %128, %129, %130, %131, %132 in 1 : vector<16x32xf32>, vector<16x32xf32>, vector<16x32xf32>, vector<16x32xf32>, vector<16x32xf32>, vector<16x32xf32>, vector<16x32xf32>, vector<16x32xf32>, vector<16x32xf32> -> vector<16x288xf32>
    %134 = arith.truncf %133 : vector<16x288xf32> to vector<16x288xbf16>
    %cst_64 = arith.constant dense<0.000000e+00> : vector<16x64xf32>
    %135 = tpu.matmul %134, %115, %cst_64 {dimension_numbers = #tpu.dot_dimension_numbers<[1], [0], [0], [1], [0, 0, 1, 1], [], []>} : vector<16x288xbf16>, vector<288x64xbf16>, vector<16x64xf32> -> vector<16x64xf32>
    %136 = vector.broadcast %117 : vector<1x64xf32> to vector<16x64xf32>
    %137 = arith.addf %135, %136 : vector<16x64xf32>
    %cst_65 = arith.constant 2.000000e+01 : f32
    %138 = vector.broadcast %cst_65 : f32 to vector<16x64xf32>
    %139 = arith.minimumf %137, %138 : vector<16x64xf32>
    %140 = math.exp %139 : vector<16x64xf32>
    %cst_66 = arith.constant 2.000000e+00 : f32
    %141 = vector.broadcast %cst_66 : f32 to vector<16x64xf32>
    %142 = arith.addf %140, %141 : vector<16x64xf32>
    %143 = arith.mulf %140, %142 : vector<16x64xf32>
    %144 = arith.mulf %137, %143 : vector<16x64xf32>
    %cst_67 = arith.constant 2.000000e+00 : f32
    %145 = vector.broadcast %cst_67 : f32 to vector<16x64xf32>
    %146 = arith.addf %143, %145 : vector<16x64xf32>
    %147 = tpu.reciprocal %146 {approx = true} : vector<16x64xf32> -> vector<16x64xf32>
    %148 = arith.mulf %144, %147 : vector<16x64xf32>
    %149 = arith.truncf %148 : vector<16x64xf32> to vector<16x64xbf16>
    %cst_68 = arith.constant dense<0.000000e+00> : vector<16x32xf32>
    %150 = tpu.matmul %149, %119, %cst_68 {dimension_numbers = #tpu.dot_dimension_numbers<[1], [0], [0], [1], [0, 0, 1, 1], [], []>} : vector<16x64xbf16>, vector<64x32xbf16>, vector<16x32xf32> -> vector<16x32xf32>
    %151 = vector.broadcast %121 : vector<1x32xf32> to vector<16x32xf32>
    %152 = arith.addf %150, %151 : vector<16x32xf32>
    %153 = arith.addf %152, %113 : vector<16x32xf32>
    %c0_69 = arith.constant 0 : index
    %c0_70 = arith.constant 0 : index
    %c0_71 = arith.constant 0 : index
    %c0_72 = arith.constant 0 : index
    %154 = vector.load %arg7[%c0_69, %c0_70, %c0_71, %c0_72] : memref<1x1x1x64xf32, #tpu.memory_space<vmem>>, vector<1x1x1x64xf32>
    %155 = vector.shape_cast %154 : vector<1x1x1x64xf32> to vector<1x64xf32>
    %cst_73 = arith.constant dense<0.000000e+00> : vector<16xf32>
    %156 = vector.multi_reduction <add>, %153, %cst_73 [1] : vector<16x32xf32> to vector<16xf32>
    %157 = vector.shape_cast %156 : vector<16xf32> to vector<16x1xf32>
    %cst_74 = arith.constant 3.200000e+01 : f32
    %158 = vector.broadcast %cst_74 : f32 to vector<16x1xf32>
    %159 = arith.divf %157, %158 : vector<16x1xf32>
    %160 = vector.broadcast %159 : vector<16x1xf32> to vector<16x32xf32>
    %161 = arith.subf %153, %160 : vector<16x32xf32>
    %162 = arith.mulf %161, %161 : vector<16x32xf32>
    %cst_75 = arith.constant dense<0.000000e+00> : vector<16xf32>
    %163 = vector.multi_reduction <add>, %162, %cst_75 [1] : vector<16x32xf32> to vector<16xf32>
    %164 = vector.shape_cast %163 : vector<16xf32> to vector<16x1xf32>
    %cst_76 = arith.constant 3.200000e+01 : f32
    %165 = vector.broadcast %cst_76 : f32 to vector<16x1xf32>
    %166 = arith.divf %164, %165 : vector<16x1xf32>
    %cst_77 = arith.constant 9.99999974E-6 : f32
    %167 = vector.broadcast %cst_77 : f32 to vector<16x1xf32>
    %168 = arith.addf %166, %167 : vector<16x1xf32>
    %169 = math.rsqrt %168 : vector<16x1xf32>
    %170 = vector.broadcast %169 : vector<16x1xf32> to vector<16x32xf32>
    %171 = arith.mulf %161, %170 : vector<16x32xf32>
    %172 = vector.extract_strided_slice %155 {offsets = [0, 0], sizes = [1, 32], strides = [1, 1]} : vector<1x64xf32> to vector<1x32xf32>
    %173 = vector.broadcast %172 : vector<1x32xf32> to vector<16x32xf32>
    %174 = arith.mulf %171, %173 : vector<16x32xf32>
    %175 = vector.extract_strided_slice %155 {offsets = [0, 32], sizes = [1, 32], strides = [1, 1]} : vector<1x64xf32> to vector<1x32xf32>
    %176 = vector.broadcast %175 : vector<1x32xf32> to vector<16x32xf32>
    %177 = arith.addf %174, %176 : vector<16x32xf32>
    %178 = vector.broadcast %7 : vector<16x1xf32> to vector<16x32xf32>
    %179 = arith.mulf %177, %178 : vector<16x32xf32>
    %c0_78 = arith.constant 0 : index
    %c0_79 = arith.constant 0 : index
    %180 = vector.load %arg19[%c0_78, %c0_79] : memref<16x32xf32, #tpu.memory_space<vmem>>, vector<16x32xf32>
    tpu.vector_store %arg19[%c0_78, %c0_79], %179 {strides = array<i32>} : memref<16x32xf32, #tpu.memory_space<vmem>>, vector<16x32xf32>,
    %c0_80 = arith.constant 0 : index
    %c0_81 = arith.constant 0 : index
    %c0_82 = arith.constant 0 : index
    %c0_83 = arith.constant 0 : index
    %181 = vector.load %arg18[%c0_80, %c0_81, %c0_82, %c0_83] : memref<1x1x16x32xf32, #tpu.memory_space<vmem>>, vector<1x1x16x32xf32>
    %182 = vector.shape_cast %181 : vector<1x1x16x32xf32> to vector<16x32xf32>
    %183 = vector.shape_cast %179 : vector<16x32xf32> to vector<1x1x16x32xf32>
    tpu.vector_store %arg18[%c0_80, %c0_81, %c0_82, %c0_83], %183 {strides = array<i32>} : memref<1x1x16x32xf32, #tpu.memory_space<vmem>>, vector<1x1x16x32xf32>,
    return
  }
  func.func @transform_0(%arg0: i32, %arg1: i32) -> (i32, i32, i32) {
    %c0_i32 = arith.constant 0 : i32
    %c0_i32_0 = arith.constant 0 : i32
    %c0_i32_1 = arith.constant 0 : i32
    return %arg0, %c0_i32, %c0_i32_0 : i32, i32, i32
  }
  func.func @transform_1(%arg0: i32, %arg1: i32) -> (i32, i32, i32) {
    %c0_i32 = arith.constant 0 : i32
    %c0_i32_0 = arith.constant 0 : i32
    %c0_i32_1 = arith.constant 0 : i32
    return %arg0, %c0_i32, %c0_i32_0 : i32, i32, i32
  }
  func.func @transform_2(%arg0: i32, %arg1: i32) -> (i32, i32, i32) {
    %c0_i32 = arith.constant 0 : i32
    %c0_i32_0 = arith.constant 0 : i32
    %c0_i32_1 = arith.constant 0 : i32
    return %arg0, %c0_i32, %c0_i32_0 : i32, i32, i32
  }
  func.func @transform_3(%arg0: i32, %arg1: i32) -> (i32, i32, i32) {
    %c0_i32 = arith.constant 0 : i32
    %c0_i32_0 = arith.constant 0 : i32
    %c0_i32_1 = arith.constant 0 : i32
    return %arg0, %c0_i32, %c0_i32_0 : i32, i32, i32
  }
  func.func @transform_4(%arg0: i32, %arg1: i32) -> (i32, i32, i32, i32) {
    %c0_i32 = arith.constant 0 : i32
    %c0_i32_0 = arith.constant 0 : i32
    %c0_i32_1 = arith.constant 0 : i32
    return %arg0, %arg1, %c0_i32, %c0_i32_0 : i32, i32, i32, i32
  }
  func.func @transform_5(%arg0: i32, %arg1: i32) -> (i32, i32, i32, i32) {
    %c0_i32 = arith.constant 0 : i32
    %c0_i32_0 = arith.constant 0 : i32
    %c0_i32_1 = arith.constant 0 : i32
    return %arg0, %arg1, %c0_i32, %c0_i32_0 : i32, i32, i32, i32
  }
  func.func @transform_6(%arg0: i32, %arg1: i32) -> (i32, i32, i32) {
    %c0_i32 = arith.constant 0 : i32
    %c0_i32_0 = arith.constant 0 : i32
    %c0_i32_1 = arith.constant 0 : i32
    return %arg1, %c0_i32, %c0_i32_0 : i32, i32, i32
  }
  func.func @transform_7(%arg0: i32, %arg1: i32) -> (i32, i32, i32) {
    %c0_i32 = arith.constant 0 : i32
    %c0_i32_0 = arith.constant 0 : i32
    %c0_i32_1 = arith.constant 0 : i32
    return %arg1, %c0_i32, %c0_i32_0 : i32, i32, i32
  }
  func.func @transform_8(%arg0: i32, %arg1: i32) -> (i32, i32, i32) {
    %c0_i32 = arith.constant 0 : i32
    %c0_i32_0 = arith.constant 0 : i32
    %c0_i32_1 = arith.constant 0 : i32
    return %arg1, %c0_i32, %c0_i32_0 : i32, i32, i32
  }
  func.func @transform_9(%arg0: i32, %arg1: i32) -> (i32, i32, i32) {
    %c0_i32 = arith.constant 0 : i32
    %c0_i32_0 = arith.constant 0 : i32
    %c0_i32_1 = arith.constant 0 : i32
    return %arg1, %c0_i32, %c0_i32_0 : i32, i32, i32
  }
  func.func @transform_10(%arg0: i32, %arg1: i32) -> (i32, i32, i32) {
    %c0_i32 = arith.constant 0 : i32
    %c0_i32_0 = arith.constant 0 : i32
    %c0_i32_1 = arith.constant 0 : i32
    return %arg1, %c0_i32, %c0_i32_0 : i32, i32, i32
  }
  func.func @transform_11(%arg0: i32, %arg1: i32) -> (i32, i32, i32) {
    %c0_i32 = arith.constant 0 : i32
    %c0_i32_0 = arith.constant 0 : i32
    %c0_i32_1 = arith.constant 0 : i32
    return %arg1, %c0_i32, %c0_i32_0 : i32, i32, i32
  }
  func.func @transform_12(%arg0: i32, %arg1: i32) -> (i32, i32, i32) {
    %c0_i32 = arith.constant 0 : i32
    %c0_i32_0 = arith.constant 0 : i32
    %c0_i32_1 = arith.constant 0 : i32
    return %arg1, %c0_i32, %c0_i32_0 : i32, i32, i32
  }
  func.func @transform_13(%arg0: i32, %arg1: i32) -> (i32, i32, i32) {
    %c0_i32 = arith.constant 0 : i32
    %c0_i32_0 = arith.constant 0 : i32
    %c0_i32_1 = arith.constant 0 : i32
    return %arg1, %c0_i32, %c0_i32_0 : i32, i32, i32
  }
  func.func @transform_14(%arg0: i32, %arg1: i32) -> (i32, i32, i32) {
    %c0_i32 = arith.constant 0 : i32
    %c0_i32_0 = arith.constant 0 : i32
    %c0_i32_1 = arith.constant 0 : i32
    return %arg1, %c0_i32, %c0_i32_0 : i32, i32, i32
  }
  func.func @transform_15(%arg0: i32, %arg1: i32) -> (i32, i32, i32) {
    %c0_i32 = arith.constant 0 : i32
    %c0_i32_0 = arith.constant 0 : i32
    %c0_i32_1 = arith.constant 0 : i32
    return %arg1, %c0_i32, %c0_i32_0 : i32, i32, i32
  }
  func.func @transform_16(%arg0: i32, %arg1: i32) -> (i32, i32, i32, i32) {
    %c0_i32 = arith.constant 0 : i32
    %c0_i32_0 = arith.constant 0 : i32
    %c0_i32_1 = arith.constant 0 : i32
    return %arg0, %arg1, %c0_i32, %c0_i32_0 : i32, i32, i32, i32
  }
}

</mosaic_0001>

<bundles_post_ra>
// kernel: stylespeech_forward.9
= control target key start
LH: loop header
LB: loop body
LE: loop exit
PB: predicated region body
PF: predicated region fallthrough
CT: control target
= control target key end

     0   :  { %s940_s30 = smov 0   ;;  %s1063_s0 = inlined_call_operand.vmem [shape: f32[2,8,32], index: 0, kind: input, shape index: {}]   ;;  %s1064_s1 = inlined_call_operand.vmem [shape: f32[2,8,1], index: 1, kind: input, shape index: {}]   ;;  %s1065_s2 = inlined_call_operand.vmem [shape: f32[8,32], index: 2, kind: input, shape index: {}]   ;;  %s1066_s3 = inlined_call_operand.vmem [shape: bf16[96,32], index: 3, kind: input, shape index: {}]   ;;  %s1067_s4 = inlined_call_operand.vmem [shape: f32[1,32], index: 4, kind: input, shape index: {}]   ;;  %s1068_s5 = inlined_call_operand.vmem [shape: bf16[96,32], index: 5, kind: input, shape index: {}]   ;;  %s1069_s6 = inlined_call_operand.vmem [shape: f32[1,32], index: 6, kind: input, shape index: {}]   ;;  %s1070_s7 = inlined_call_operand.vmem [shape: bf16[32,32], index: 7, kind: input, shape index: {}]   ;;  %s1071_s8 = inlined_call_operand.vmem [shape: f32[1,32], index: 8, kind: input, shape index: {}]   ;;  %s1072_s9 = inlined_call_operand.vmem [shape: f32[2,8,32], index: 9, kind: output, shape index: {}]  }
   0x1 LB: > { %s754_s10 = sadd.s32 4294967295, %s883_s30   ;;  %p758_p0 = scmp.ge.s32.totalorder %s883_s30, 1  ;;  %s883_s30 = sphi %s940_s30, %s19_s30  }
   0x2   : > { %p295_p1 = scmp.lt.s32.totalorder %s883_s30, 3 }
   0x4   : > { %p296_p2 = pnand %p758_p0, %p295_p1 }
   0x5   : > { %p333_p3 = scmp.lt.s32.totalorder (!%p296_p2), %s754_s10, 1  ;;  %v885_v0 = vmov (!%p296_p2), 0.0   ;;  %v855_v1 = vld [vmem:[%s1066_s3] sm:$0xff] (!%p296_p2)   ;;  %v856_v2 = vld [vmem:[%s1066_s3 + $0x8] sm:$0xff] (!%p296_p2)   ;;  %vm364_vm0 = vcmask (!%p296_p2), 1040384   ;;  %vm369_vm1 = vcmask (!%p296_p2), 1046528  }
   0x6   : > { %299 = sbr.rel (%p296_p2) target bundleno = 992 (0x3e0), region = 56  ;;  %801 = vmatprep.subr.bf16.mxu0 (!%p296_p2), %v885_v0  ;;  %817 = vmatprep.subr.bf16.mxu1 (!%p296_p2), %v885_v0  ;;  %vm376_vm2 = vcmask (!%p296_p2), 1045504   ;;  %v857_v5 = vld [vmem:[%s1066_s3 + $0x10] sm:$0xff] (!%p296_p2)   ;;  %vm886_vm3 = vmmov (!%p296_p2), 0   ;;  %v858_v8 = vld [vmem:[%s1066_s3 + $0x18] sm:$0xff] (!%p296_p2)   ;;  %s887_s23 = smov (!%p296_p2), 32  }
   0x7   : > { %802 = vmatpush3.bf16.msra.mxu0 (!%p296_p2), %v855_v1  ;;  %813 = vmatprep.mubr.msk.bf16.mxu0 (!%p296_p2), %vm886_vm3, %v885_v0  ;;  %v859_v15 = vld [vmem:[%s1066_s3 + $0x20] sm:$0xff] (!%p296_p2)   ;;  %s888_s26 = smov (!%p296_p2), 64   ;;  %v860_v16 = vld [vmem:[%s1066_s3 + $0x28] sm:$0xff] (!%p296_p2)   ;;  %vm383_vm4 = vcmask (!%p296_p2), 261120   ;;  %vm385_vm5 = vcmask (!%p296_p2), 523264   ;;  %vm430_vm6 = vcmask (!%p296_p2), 785408  }
   0x8   : > { %803 = vmatprep.subr.bf16.mxu0 (!%p296_p2), %v885_v0  ;;  %829 = vmatprep.mubr.msk.bf16.mxu1 (!%p296_p2), %vm886_vm3, %v885_v0  ;;  %v861_v22 = vld [vmem:[%s1068_s5] sm:$0xff] (!%p296_p2)   ;;  %v862_v23 = vld [vmem:[%s1068_s5 + $0x8] sm:$0xff] (!%p296_p2)   ;;  %v863_v24 = vld [vmem:[%s1068_s5 + $0x10] sm:$0xff] (!%p296_p2)   ;;  %v889_v59 = vmov (!%p296_p2), 0  }
   0x9   : > { %818 = vmatpush3.bf16.msra.mxu1 (!%p296_p2), %v861_v22  ;;  %v864_v25 = vld [vmem:[%s1068_s5 + $0x18] sm:$0xff] (!%p296_p2)   ;;  %v762_v26 = vld [vmem:[%s1067_s4] ss:$0 sm:$0xff] (!%p296_p2)  ;;  %v866_v39 = vld [vmem:[%s1068_s5 + $0x28] sm:$0xff] (!%p296_p2)   ;;  %854 = vset.pattern.permute.xlu0 (!%p296_p2), %v889_v59 }
   0xa   : > { %819 = vmatprep.subr.bf16.mxu1 (!%p296_p2), %v885_v0  ;;  %v865_v38 = vld [vmem:[%s1068_s5 + $0x20] sm:$0xff] (!%p296_p2)   ;;  %v868_v58 = vld [vmem:[%s1070_s7 + $0x8] sm:$0xff] (!%p296_p2)  }
   0xb   : > { %804 = vmatpush3.bf16.msra.mxu0 (!%p296_p2), %v856_v2  ;;  %v867_v57 = vld [vmem:[%s1070_s7] sm:$0xff] (!%p296_p2)  }
   0xc   : > { %805 = vmatprep.subr.bf16.mxu0 (!%p296_p2), %v885_v0  ;;  %v770_v61 = vld [vmem:[%s1069_s6] ss:$0 sm:$0xff] (!%p296_p2) }
   0xd   : > { %s1074_s10 = smov (!%p333_p3, %s754_s10), 1  ;;  %820 = vmatpush3.bf16.msra.mxu1 %v862_v23  ;;  %v686_v22 = vld [vmem:[%s1065_s2] sm:$0xff] }
   0xe   : > { %s956_s15 = sshll.u32 %s1074_s10, 3  ;;  %821 = vmatprep.subr.bf16.mxu1 %v885_v0 }
   0xf   : > { %s336_s18 = scalar_lea.vmem %s1063_s0, %s956_s15  ;;  %806 = vmatpush3.bf16.msra.mxu0 %v857_v5  ;;  %s340_s10 = scalar_lea.vmem %s1064_s1, %s956_s15 }
  0x10   : > { %v963_v3 = vld [vmem:[%s336_s18] sm:$0xff]  ;;  %807 = vmatprep.subr.bf16.mxu0 %v885_v0  ;;  %s344_s20 = scalar_lea.vmem %s1072_s9, %s956_s15 }
  0x11   : > { %v362_v4 = vrot.slane %v963_v3, 7  ;;  %822 = vmatpush3.bf16.msra.mxu1 %v863_v24  ;;  %v347_v60 = vld [vmem:[%s340_s10] sm:$0xff] }
  0x12   : > { %823 = vmatprep.subr.bf16.mxu1 %v885_v0 }
  0x13   : > { %v365_v6 = vsel %vm364_vm0, 0.0, %v362_v4  ;;  %v366_v7 = vsel %vm364_vm0, %v362_v4, 0.0  ;;  %808 = vmatpush3.bf16.msra.mxu0 %v858_v8 }
  0x14   : > { %v370_v9 = vrot.slane %v365_v6, 1  ;;  %v371_v10 = vrot.slane %v366_v7, 1  ;;  %v377_v11 = vrot.slane %v365_v6, 2  ;;  %v378_v12 = vrot.slane %v366_v7, 2  ;;  %809 = vmatprep.subr.bf16.mxu0 %v885_v0 }
  0x15   : > { %824 = vmatpush3.bf16.msra.mxu1 %v864_v25 }
  0x16   : > { %v372_v13 = vsel %vm369_vm1, %v370_v9, %v371_v10  ;;  %v379_v14 = vsel %vm376_vm2, %v377_v11, %v378_v12  ;;  %825 = vmatprep.subr.bf16.mxu1 %v885_v0 }
  0x17   : > { %373 = vrot.lane.b32.xlu0 %v372_v13, %s887_s23  ;;  %810 = vmatpush3.bf16.msra.mxu0 %v859_v15 }
  0x18   : > { %811 = vmatprep.subr.bf16.mxu0 %v885_v0 }
  0x19   : > { %826 = vmatpush3.bf16.msra.mxu1 %v865_v38 }
  0x1a   : > { %827 = vmatprep.subr.bf16.mxu1 %v885_v0 }
  0x1b   : > { %380 = vrot.lane.b32.xlu0 %v379_v14, %s888_s26  ;;  %812 = vmatpush3.bf16.msra.mxu0 %v860_v16  ;;  %v778_v14 = vld [vmem:[%s1071_s8] ss:$0 sm:$0xff] }
  0x1c   : > { %833 = vmatprep.subr.bf16.mxu0 %v885_v0 }
  0x1d   : > { %828 = vmatpush3.bf16.msra.mxu1 %v866_v39 }
  0x1f   : > { %682 = vperm.xlu0 %854, %v347_v60  }
  0x89   : > { %v374_v17 = vpop.permute.xlu0 %373 }
  0x8a   : > { %v384_v18 = vsel %vm383_vm4, %v365_v6, %v374_v17 }
  0x8d   : > { %v381_v19 = vpop.permute.xlu0 %380 }
  0x8e   : > { %v386_v20 = vsel %vm385_vm5, %v384_v18, %v381_v19 }
  0x8f   : > { %v387_v21 = vpack.c.bf16 %v386_v20, %v386_v20 }
  0x91   : > { %814 = vmatmul.mubr.msk.bf16.vlgmr.msra.gmra.mrb[0].mxu0 %vm430_vm6, %v387_v21 }
  0x92   : > { %837 = vmatprep.mubr.msk.bf16.mxu0 %vm886_vm3, %v885_v0  ;;  %834 = vmatpush3.bf16.msra.mxu0 %v867_v57 }
  0x93   : > { %835 = vmatprep.subr.bf16.mxu0 %v885_v0 }
  0x96   : > { %836 = vmatpush3.bf16.msra.mxu0 %v868_v58 }
  0x9e   : > { %v683_v19 = vpop.permute.xlu0 %682 }
 0x164   : > { %v468_v27 = vpop.f32.mrb[0].mxu0 }
 0x165   : > { %v469_v28 = vadd.f32 %v762_v26, %v468_v27  ;;  %v815_v29 = vpop.f32.mrb[1].mxu0 }
 0x166   : > { %v471_v30 = vpop.f32.mrb[2].mxu0 }
 0x167   : > { %v474_v31 = vmin.f32 %v469_v28, 20.0  ;;  %v816_v32 = vpop.f32.mrb[3].mxu0 }
 0x169   : > { %v475_v33 = vmul.f32 1.442695, %v474_v31 }
 0x16b   : > { %869 = vpow2.f32 %v475_v33 }
 0x175   : > { %v870_v34 = vpop.eup %869 }
 0x176   : > { %v477_v35 = vadd.f32 2.0, %v870_v34 }
 0x178   : > { %v478_v36 = vmul.f32 %v870_v34, %v477_v35 }
 0x17a   : > { %v480_v37 = vadd.f32 2.0, %v478_v36  ;;  %v479_v40 = vmul.f32 %v478_v36, %v469_v28 }
 0x17c   : > { %871 = vrcp.f32 %v480_v37 }
 0x186   : > { %v872_v41 = vpop.eup %871 }
 0x187   : > { %v482_v42 = vmul.f32 %v872_v41, %v479_v40 }
 0x189   : > { %v497_v43 = vrot.slane %v482_v42, 7 }
 0x18b   : > { %v499_v44 = vsel %vm364_vm0, 0.0, %v497_v43  ;;  %v500_v45 = vsel %vm364_vm0, %v497_v43, 0.0 }
 0x18c   : > { %v503_v46 = vrot.slane %v499_v44, 1  ;;  %v504_v47 = vrot.slane %v500_v45, 1  ;;  %v509_v49 = vrot.slane %v499_v44, 2  ;;  %v510_v50 = vrot.slane %v500_v45, 2 }
 0x18e   : > { %v505_v48 = vsel %vm369_vm1, %v503_v46, %v504_v47  ;;  %v511_v51 = vsel %vm376_vm2, %v509_v49, %v510_v50 }
 0x18f   : > { %506 = vrot.lane.b32.xlu1 %v505_v48, %s887_s23 }
 0x193   : > { %512 = vrot.lane.b32.xlu1 %v511_v51, %s888_s26 }
 0x201   : > { %v507_v52 = vpop.permute.xlu1 %506 }
 0x202   : > { %v515_v53 = vsel %vm383_vm4, %v499_v44, %v507_v52 }
 0x205   : > { %v513_v54 = vpop.permute.xlu1 %512 }
 0x206   : > { %v516_v55 = vsel %vm385_vm5, %v515_v53, %v513_v54 }
 0x207   : > { %v517_v56 = vpack.c.bf16 %v516_v55, %v516_v55 }
 0x209   : > { %830 = vmatmul.mubr.msk.bf16.vlgmr.msra.gmra.mrb[0].mxu1 %vm430_vm6, %v517_v56 }
 0x2dc   : > { %v597_v62 = vpop.f32.mrb[0].mxu1 }
 0x2dd   : > { %v598_v63 = vadd.f32 %v770_v61, %v597_v62  ;;  %v831_v0 = vpop.f32.mrb[1].mxu1 }
 0x2de   : > { %v600_v1 = vpop.f32.mrb[2].mxu1 }
 0x2df   : > { %v603_v2 = vmin.f32 %v598_v63, 20.0  ;;  %v832_v4 = vpop.f32.mrb[3].mxu1 }
 0x2e1   : > { %v604_v5 = vmul.f32 1.442695, %v603_v2 }
 0x2e3   : > { %873 = vpow2.f32 %v604_v5 }
 0x2ed   : > { %v874_v6 = vpop.eup %873 }
 0x2ee   : > { %v606_v7 = vadd.f32 2.0, %v874_v6 }
 0x2f0   : > { %v607_v8 = vmul.f32 %v874_v6, %v606_v7 }
 0x2f2   : > { %v609_v9 = vadd.f32 2.0, %v607_v8  ;;  %v608_v10 = vmul.f32 %v607_v8, %v598_v63 }
 0x2f4   : > { %875 = vrcp.f32 %v609_v9 }
 0x2fe   : > { %v876_v11 = vpop.eup %875 }
 0x2ff   : > { %v611_v12 = vmul.f32 %v876_v11, %v608_v10 }
 0x301   : > { %v616_v13 = vpack.c.bf16 %v611_v12, %v611_v12 }
 0x303   : > { %838 = vmatmul.mubr.msk.bf16.vlgmr.msra.gmra.mrb[4].mxu0 %vm383_vm4, %v616_v13 }
 0x3d6   : > { %v673_v15 = vpop.f32.mrb[4].mxu0 }
 0x3d7   : > { %v674_v16 = vadd.f32 %v778_v14, %v673_v15  ;;  %v839_v17 = vpop.f32.mrb[5].mxu0 }
 0x3d8   : > { %v676_v18 = vpop.f32.mrb[6].mxu0 }
 0x3d9   : > { %v840_v20 = vpop.f32.mrb[7].mxu0  ;;  %v679_v21 = vadd.f32 %v674_v16, %v963_v3 }
 0x3db   : > { %v685_v23 = vmul.f32 %v683_v19, %v679_v21 }
 0x3dd   : > { %v687_v24 = vadd.f32 %v686_v22, %v685_v23 }
 0x3df   : > { %688 = vst.msk [vmem:[%s344_s20] sm:$0xff] %vm383_vm4, %v687_v24 }
 0x3e0 PF: > { %s19_s30 = sadd.s32 1, %s883_s30  }
 0x3e1   : > { %p16_p4 = scmp.ge.s32.totalorder %s19_s30, 4  }
 0x3e3   :  { %18 = sbr.rel (!%p16_p4) target bundleno = 1 (0x1), region = 89 }

// kernel: stylespeech_forward.8
= control target key start
LH: loop header
LB: loop body
LE: loop exit
PB: predicated region body
PF: predicated region fallthrough
CT: control target
= control target key end

     0   :  { %s2281_s27 = smov 0   ;;  %s2596_s0 = inlined_call_operand.vmem [shape: f32[2,16,16], index: 0, kind: input, shape index: {}]   ;;  %s2597_s1 = inlined_call_operand.vmem [shape: f32[2,16,1], index: 1, kind: input, shape index: {}]   ;;  %s2598_s2 = inlined_call_operand.vmem [shape: f32[2,1,16], index: 2, kind: input, shape index: {}]   ;;  %s2599_s3 = inlined_call_operand.vmem [shape: bf16[16,32], index: 3, kind: input, shape index: {}]   ;;  %s2600_s4 = inlined_call_operand.vmem [shape: f32[1,32], index: 4, kind: input, shape index: {}]   ;;  %s2601_s5 = inlined_call_operand.vmem [shape: bf16[32,32], index: 5, kind: input, shape index: {}]   ;;  %s2602_s6 = inlined_call_operand.vmem [shape: f32[1,32], index: 6, kind: input, shape index: {}]   ;;  %s2603_s7 = inlined_call_operand.vmem [shape: bf16[160,64], index: 7, kind: input, shape index: {}]   ;;  %s2604_s8 = inlined_call_operand.vmem [shape: f32[1,64], index: 8, kind: input, shape index: {}]   ;;  %s2605_s9 = inlined_call_operand.vmem [shape: bf16[160,64], index: 9, kind: input, shape index: {}]   ;;  %s2606_s10 = inlined_call_operand.vmem [shape: f32[1,64], index: 10, kind: input, shape index: {}]   ;;  %s2607_s11 = inlined_call_operand.vmem [shape: bf16[32,96], index: 11, kind: input, shape index: {}]   ;;  %s2608_s12 = inlined_call_operand.vmem [shape: f32[1,96], index: 12, kind: input, shape index: {}]   ;;  %s2609_s13 = inlined_call_operand.vmem [shape: bf16[32,32], index: 13, kind: input, shape index: {}]   ;;  %s2610_s14 = inlined_call_operand.vmem [shape: f32[1,32], index: 14, kind: input, shape index: {}]   ;;  %s2611_s15 = inlined_call_operand.vmem [shape: bf16[32,32], index: 15, kind: input, shape index: {}]   ;;  %s2612_s16 = inlined_call_operand.vmem [shape: f32[1,32], index: 16, kind: input, shape index: {}]   ;;  %s2613_s17 = inlined_call_operand.vmem [shape: f32[2,1,32], index: 17, kind: output, shape index: {0}]   ;;  %s2614_s18 = inlined_call_operand.vmem [shape: f32[2,16,32], index: 18, kind: output, shape index: {1}]  }
   0x1   :  { %2615 = sst [smem:[#allocation2_spill]] %s2596_s0 }
   0x2   :  { %2616 = sst [smem:[#allocation3_spill]] %s2597_s1 }
   0x3   :  { %2617 = sst [smem:[#allocation4_spill]] %s2598_s2 }
   0x4 LB: > { %s1883_s28 = sadd.s32 4294967295, %s2175_s27   ;;  %p1887_p0 = scmp.ge.s32.totalorder %s2175_s27, 1  ;;  %s2175_s27 = sphi %s2281_s27, %s29_s27  }
   0x5   : > { %p533_p1 = scmp.lt.s32.totalorder %s2175_s27, 3 }
   0x7   : > { %p534_p2 = pnand %p1887_p0, %p533_p1 }
   0x8   : > { %v2090_v0 = vld [vmem:[%s2599_s3] sm:$0xff] (!%p534_p2)   ;;  %v2177_v1 = vmov (!%p534_p2), 0.0   ;;  %p598_p3 = scmp.lt.s32.totalorder (!%p534_p2), %s1883_s28, 1  ;;  %vm2178_vm0 = vmmov (!%p534_p2), 0   ;;  %s2618_s20 = sld [smem:[#allocation2_spill]] (!%p534_p2)  ;;  %vm641_vm1 = vcmask (!%p534_p2), 130048  }
   0x9   : > { %537 = sbr.rel (%p534_p2) target bundleno = 3076 (0xc04), region = 88  ;;  %1975 = vmatprep.subr.bf16.mxu0 (!%p534_p2), %v2177_v1  ;;  %1981 = vmatprep.subr.bf16.mxu1 (!%p534_p2), %v2177_v1  ;;  %v2091_v5 = vld [vmem:[%s2601_s5] sm:$0xff] (!%p534_p2)   ;;  %v2092_v6 = vld [vmem:[%s2601_s5 + $0x8] sm:$0xff] (!%p534_p2)   ;;  %vm728_vm2 = vcmask (!%p534_p2), 261120   ;;  %v2179_v34 = vmov (!%p534_p2), 0   ;;  %v2095_v36 = vld [vmem:[%s2603_s7 + $0x10] sm:$0xff] (!%p534_p2)  }
   0xa   : > { %1976 = vmatpush3.bf16.msra.mxu0 (!%p534_p2), %v2090_v0  ;;  %1977 = vmatprep.mubr.msk.bf16.mxu0 (!%p534_p2), %vm2178_vm0, %v2177_v1  ;;  %v1894_v7 = vld [vmem:[%s2600_s4] ss:$0 sm:$0xff] (!%p534_p2)  ;;  %v2094_v35 = vld [vmem:[%s2603_s7 + $0x8] sm:$0xff] (!%p534_p2)   ;;  %v2096_v37 = vld [vmem:[%s2603_s7 + $0x18] sm:$0xff] (!%p534_p2)   ;;  %vm814_vm3 = vcmask (!%p534_p2), 1041408   ;;  %vm861_vm4 = vcmask (!%p534_p2), 1043456  }
   0xb   : > { %1985 = vmatprep.mubr.msk.bf16.mxu1 (!%p534_p2), %vm2178_vm0, %v2177_v1  ;;  %1982 = vmatpush3.bf16.msra.mxu1 (!%p534_p2), %v2091_v5  ;;  %v2093_v33 = vld [vmem:[%s2603_s7] sm:$0xff] (!%p534_p2)   ;;  %v2098_v39 = vld [vmem:[%s2603_s7 + $0x28] sm:$0xff] (!%p534_p2)   ;;  %v2099_v40 = vld [vmem:[%s2603_s7 + $0x30] sm:$0xff] (!%p534_p2)   ;;  %vm849_vm5 = vcmask (!%p534_p2), 1044480   ;;  %vm825_vm6 = vcmask (!%p534_p2), 1046528   ;;  %vm837_vm7 = vcmask (!%p534_p2), 1045504  }
   0xc   : > { %1983 = vmatprep.subr.bf16.mxu1 (!%p534_p2), %v2177_v1  ;;  %948 = vmatprep.subr.bf16.mxu0 (!%p534_p2), %v2179_v34  ;;  %v2097_v38 = vld [vmem:[%s2603_s7 + $0x20] sm:$0xff] (!%p534_p2)   ;;  %v2100_v41 = vld [vmem:[%s2603_s7 + $0x38] sm:$0xff] (!%p534_p2)   ;;  %s2180_s25 = smov (!%p534_p2), 96   ;;  %s2181_s26 = smov (!%p534_p2), 32   ;;  %vm871_vm8 = vcmask (!%p534_p2), 523264   ;;  %vm874_vm9 = vcmask (!%p534_p2), 785408  }
   0xd   : > { %2089 = vset.pattern.permute.xlu1 (!%p534_p2), %v2179_v34  ;;  %2088 = vset.pattern.permute.xlu0 (!%p534_p2), %v2179_v34  ;;  %v1897_v42 = vld [vmem:[%s2602_s6] ss:$0 sm:$0xff] (!%p534_p2)  ;;  %s2182_s29 = smov (!%p534_p2), 64   ;;  %s2619_s22 = sld [smem:[#allocation3_spill]] (!%p534_p2)  ;;  %vm1751_vm10 = vcmask (!%p534_p2), 7168   ;;  %vm1780_vm11 = vcmask (!%p534_p2), 253952  }
   0xe   : > { %v2101_v5 = vld [vmem:[%s2603_s7 + $0x40] sm:$0xff] (!%p534_p2)   ;;  %s2620_s24 = sld [smem:[#allocation4_spill]] (!%p534_p2)  ;;  %s2185_s19 = smov (!%p534_p2), 48  }
   0xf   : > { %1984 = vmatpush3.bf16.msra.mxu1 (!%p534_p2), %v2092_v6 }
  0x10   : > { %s2622_s28 = smov (!%p598_p3, %s1883_s28), 1  ;;  %1163 = vmatprep.subr.bf16.mxu1 %v2179_v34 }
  0x11   : > { %s2301_s0 = sshll.u32 %s2622_s28, 4 }
  0x12   : > { %s602_s21 = scalar_lea.vmem %s2618_s20, %s2301_s0  ;;  %s618_s20 = scalar_lea.vmem %s2614_s18, %s2301_s0 }
  0x13   : > { %v623_v2 = vld [vmem:[%s602_s21] sm:$0xff]  ;;  %v624_v3 = vld [vmem:[%s602_s21 + $0x8] sm:$0xff]  ;;  %s607_s2 = scalar_lea.vmem %s2619_s22, %s2301_s0  ;;  %s2183_s22 = smov 80  }
  0x14   : > { %v627_v4 = vpack.c.bf16 %v624_v3, %v623_v2  ;;  %s610_s30 = scalar_lea.vmem %s2620_s24, %s2622_s28  ;;  %s613_s21 = scalar_lea.vmem %s2613_s17, %s2622_s28 }
  0x16   : > { %1978 = vmatmul.mubr.msk.bf16.vlgmr.msra.gmra.mrb[0].mxu0 %vm641_vm1, %v627_v4 }
  0x17   : > { %949 = vmatpush1.bf16.msra.mxu0 %v2093_v33 }
  0x18   : > { %950 = vmatprep.subr.bf16.mxu0 %v2179_v34 }
  0x1b   : > { %951 = vmatpush1.bf16.msra.mxu0 %v2094_v35 }
  0x1c   : > { %952 = vmatprep.subr.bf16.mxu0 %v2179_v34 }
  0x1f   : > { %953 = vmatpush1.bf16.msra.mxu0 %v2095_v36 }
  0x20   : > { %954 = vmatprep.subr.bf16.mxu0 %v2179_v34 }
  0x23   : > { %955 = vmatpush1.bf16.msra.mxu0 %v2096_v37 }
  0x24   : > { %956 = vmatprep.subr.bf16.mxu0 %v2179_v34 }
  0x27   : > { %957 = vmatpush1.bf16.msra.mxu0 %v2097_v38 }
  0x28   : > { %958 = vmatprep.subr.bf16.mxu0 %v2179_v34 }
  0x2b   : > { %959 = vmatpush1.bf16.msra.mxu0 %v2098_v39 }
  0x2c   : > { %960 = vmatprep.subr.bf16.mxu0 %v2179_v34 }
  0x2f   : > { %961 = vmatpush1.bf16.msra.mxu0 %v2099_v40 }
  0x30   : > { %962 = vmatprep.subr.bf16.mxu0 %v2179_v34 }
  0x33   : > { %963 = vmatpush1.bf16.msra.mxu0 %v2100_v41 }
  0x34   : > { %964 = vmatprep.subr.bf16.mxu0 %v2179_v34 }
  0x37   : > { %965 = vmatpush1.bf16.msra.mxu0 %v2101_v5 }
  0x38   : > { %966 = vmatprep.subr.bf16.mxu0 %v2179_v34 }
  0xe9   : > { %v679_v8 = vpop.f32.mrb[0].mxu0 }
  0xea   : > { %v680_v9 = vadd.f32 %v1894_v7, %v679_v8  ;;  %v1979_v10 = vpop.f32.mrb[1].mxu0 }
  0xeb   : > { %v682_v11 = vpop.f32.mrb[2].mxu0 }
  0xec   : > { %v686_v12 = vmin.f32 %v680_v9, 20.0  ;;  %v683_v13 = vadd.f32 %v1894_v7, %v682_v11  ;;  %v1980_v14 = vpop.f32.mrb[3].mxu0 }
  0xed   : > { %v2102_v14 = vld [vmem:[%s2603_s7 + $0x48] sm:$0xff]  }
  0xee   : > { %v688_v15 = vmul.f32 1.442695, %v686_v12  ;;  %v687_v16 = vmin.f32 %v683_v13, 20.0  ;;  %967 = vmatpush1.bf16.msra.mxu0 %v2102_v14 }
  0xef   : > { %1989 = vmatprep.subr.bf16.mxu0 %v2177_v1 }
  0xf0   : > { %2119 = vpow2.f32 %v688_v15  ;;  %v690_v17 = vmul.f32 1.442695, %v687_v16 }
  0xf2   : > { %2121 = vpow2.f32 %v690_v17 }
  0xfa   : > { %v2120_v18 = vpop.eup %2119 }
  0xfb   : > { %v692_v19 = vadd.f32 2.0, %v2120_v18 }
  0xfc   : > { %v2122_v20 = vpop.eup %2121 }
  0xfd   : > { %v694_v21 = vmul.f32 %v2120_v18, %v692_v19  ;;  %v693_v22 = vadd.f32 2.0, %v2122_v20 }
  0xff   : > { %v698_v23 = vadd.f32 2.0, %v694_v21  ;;  %v695_v24 = vmul.f32 %v2122_v20, %v693_v22  ;;  %v696_v27 = vmul.f32 %v694_v21, %v680_v9 }
 0x101   : > { %2123 = vrcp.f32 %v698_v23  ;;  %v699_v25 = vadd.f32 2.0, %v695_v24  ;;  %v697_v28 = vmul.f32 %v695_v24, %v683_v13 }
 0x103   : > { %2125 = vrcp.f32 %v699_v25 }
 0x10b   : > { %v2124_v26 = vpop.eup %2123 }
 0x10c   : > { %v702_v30 = vmul.f32 %v2124_v26, %v696_v27 }
 0x10d   : > { %v2126_v29 = vpop.eup %2125 }
 0x10e   : > { %v703_v31 = vmul.f32 %v2126_v29, %v697_v28 }
 0x110   : > { %v708_v32 = vpack.c.bf16 %v703_v31, %v702_v30 }
 0x112   : > { %1986 = vmatmul.mubr.msk.bf16.vlgmr.msra.gmra.mrb[0].mxu1 %vm728_vm2, %v708_v32 }
 0x1e5   : > { %v766_v43 = vpop.f32.mrb[0].mxu1 }
 0x1e6   : > { %v767_v44 = vadd.f32 %v1897_v42, %v766_v43  ;;  %v1987_v45 = vpop.f32.mrb[1].mxu1 }
 0x1e7   : > { %v769_v46 = vpop.f32.mrb[2].mxu1 }
 0x1e8   : > { %v773_v47 = vmin.f32 %v767_v44, 20.0  ;;  %v770_v48 = vadd.f32 %v1897_v42, %v769_v46  ;;  %v1988_v49 = vpop.f32.mrb[3].mxu1 }
 0x1ea   : > { %v775_v50 = vmul.f32 1.442695, %v773_v47  ;;  %v774_v51 = vmin.f32 %v770_v48, 20.0 }
 0x1ec   : > { %2127 = vpow2.f32 %v775_v50  ;;  %v777_v52 = vmul.f32 1.442695, %v774_v51 }
 0x1ee   : > { %2129 = vpow2.f32 %v777_v52  ;;  %v1901_v52 = vld [vmem:[%s2604_s8] ss:$0 sm:$0xff] }
 0x1f6   : > { %v2128_v53 = vpop.eup %2127 }
 0x1f7   : > { %v779_v54 = vadd.f32 2.0, %v2128_v53 }
 0x1f8   : > { %v2130_v55 = vpop.eup %2129 }
 0x1f9   : > { %v781_v56 = vmul.f32 %v2128_v53, %v779_v54  ;;  %v780_v57 = vadd.f32 2.0, %v2130_v55 }
 0x1fb   : > { %v785_v58 = vadd.f32 2.0, %v781_v56  ;;  %v782_v59 = vmul.f32 %v2130_v55, %v780_v57  ;;  %v783_v61 = vmul.f32 %v781_v56, %v767_v44 }
 0x1fd   : > { %2131 = vrcp.f32 %v785_v58  ;;  %v786_v60 = vadd.f32 2.0, %v782_v59  ;;  %v784_v0 = vmul.f32 %v782_v59, %v770_v48 }
 0x1ff   : > { %2133 = vrcp.f32 %v786_v60 }
 0x207   : > { %v2132_v62 = vpop.eup %2131 }
 0x208   : > { %v2358_v63 = vmul.f32 %v2132_v62, %v783_v61 }
 0x209   : > { %v2134_v2 = vpop.eup %2133 }
 0x20a   : > { %v815_v3 = vrot.slane %v2358_v63, 6  ;;  %v2361_v4 = vmul.f32 %v2134_v2, %v784_v0 }
 0x20c   : > { %v821_v6 = vsel %vm814_vm3, 0.0, %v815_v3  ;;  %v816_v7 = vrot.slane %v2361_v4, 6 }
 0x20d   : > { %v862_v8 = vrot.slane %v821_v6, 4  ;;  %v850_v9 = vrot.slane %v821_v6, 3  ;;  %v826_v12 = vrot.slane %v821_v6, 1  ;;  %v838_v13 = vrot.slane %v821_v6, 2 }
 0x20e   : > { %v817_v10 = vsel %vm814_vm3, %v815_v3, %v816_v7  ;;  %v822_v11 = vsel %vm814_vm3, %v816_v7, 0.0  ;;  %v2104_v7 = vld [vmem:[%s2605_s9 + $0x8] sm:$0xff]  }
 0x20f   : > { %v865_v15 = vrot.slane %v822_v11, 4  ;;  %v863_v16 = vrot.slane %v817_v10, 4  ;;  %v851_v17 = vrot.slane %v817_v10, 3  ;;  %v853_v18 = vrot.slane %v822_v11, 3 }
 0x210   : > { %v827_v19 = vrot.slane %v817_v10, 1  ;;  %v829_v20 = vrot.slane %v822_v11, 1  ;;  %v839_v21 = vrot.slane %v817_v10, 2  ;;  %v841_v22 = vrot.slane %v822_v11, 2  ;;  %v2108_v11 = vld [vmem:[%s2605_s9 + $0x28] sm:$0xff]  }
 0x211   : > { %v864_v23 = vsel %vm861_vm4, %v862_v8, %v863_v16  ;;  %v866_v24 = vsel %vm861_vm4, %v863_v16, %v865_v15  ;;  %v852_v25 = vsel %vm849_vm5, %v850_v9, %v851_v17  ;;  %v854_v26 = vsel %vm849_vm5, %v851_v17, %v853_v18  ;;  %v2105_v8 = vld [vmem:[%s2605_s9 + $0x10] sm:$0xff]   ;;  %v2106_v9 = vld [vmem:[%s2605_s9 + $0x18] sm:$0xff]  }
 0x212   : > { %v878_v27 = vpack.c.bf16 %v866_v24, %v864_v23  ;;  %v2068_v28 = vpack.i.bf16 %v854_v26, %v852_v25  ;;  %v828_v29 = vsel %vm825_vm6, %v826_v12, %v827_v19  ;;  %v830_v30 = vsel %vm825_vm6, %v827_v19, %v829_v20  ;;  %v2109_v12 = vld [vmem:[%s2605_s9 + $0x30] sm:$0xff]   ;;  %v2111_v19 = vld [vmem:[%s2605_s9 + $0x40] sm:$0xff]   ;;  %v2112_v25 = vld [vmem:[%s2605_s9 + $0x48] sm:$0xff]  }
 0x213   : > { %v2058_v31 = vpack.i.bf16 %v830_v30, %v828_v29  ;;  %v840_v32 = vsel %vm837_vm7, %v838_v13, %v839_v21  ;;  %v842_v33 = vsel %vm837_vm7, %v839_v21, %v841_v22  ;;  %v2110_v13 = vld [vmem:[%s2605_s9 + $0x38] sm:$0xff]  }
 0x214   : > { %1912 = vmatprep.mubr.msk.bf16.mxu0 %vm728_vm2, %v878_v27  ;;  %2069 = vrot.lane.b32.xlu1 %v2068_v28, %s2180_s25  ;;  %v2063_v35 = vpack.i.bf16 %v842_v33, %v840_v32 }
 0x215   : > { %2059 = vrot.lane.b32.xlu0 %v2058_v31, %s2181_s26 }
 0x219   : > { %2064 = vrot.lane.b32.xlu0 %v2063_v35, %s2182_s29 }
 0x286   : > { %v2070_v39 = vpop.permute.xlu1 %2069 }
 0x287   : > { %v2060_v36 = vpop.permute.xlu0 %2059  ;;  %v2072_v43 = vunpack.i.h.bf16 %v2070_v39  ;;  %v2071_v44 = vunpack.i.l.bf16 %v2070_v39 }
 0x288   : > { %v2062_v37 = vunpack.i.h.bf16 %v2060_v36  ;;  %v2061_v38 = vunpack.i.l.bf16 %v2060_v36 }
 0x28a   : > { %v870_v45 = vsel %vm728_vm2, %v817_v10, %v2062_v37  ;;  %v869_v46 = vsel %vm728_vm2, %v821_v6, %v2061_v38  ;;  %v2103_v6 = vld [vmem:[%s2605_s9] sm:$0xff]  }
 0x28b   : > { %v2065_v40 = vpop.permute.xlu0 %2064  ;;  %1164 = vmatpush1.bf16.msra.mxu1 %v2103_v6  ;;  %v2107_v10 = vld [vmem:[%s2605_s9 + $0x20] sm:$0xff]  }
 0x28c   : > { %v2067_v41 = vunpack.i.h.bf16 %v2065_v40  ;;  %v2066_v42 = vunpack.i.l.bf16 %v2065_v40  ;;  %1165 = vmatprep.subr.bf16.mxu1 %v2179_v34 }
 0x28e   : > { %v872_v47 = vsel %vm871_vm8, %v869_v46, %v2066_v42  ;;  %v873_v48 = vsel %vm871_vm8, %v870_v45, %v2067_v41 }
 0x28f   : > { %v875_v49 = vsel %vm874_vm9, %v872_v47, %v2071_v44  ;;  %v876_v50 = vsel %vm874_vm9, %v873_v48, %v2072_v43  ;;  %1166 = vmatpush1.bf16.msra.mxu1 %v2104_v7 }
 0x290   : > { %v877_v51 = vpack.c.bf16 %v876_v50, %v875_v49  ;;  %1167 = vmatprep.subr.bf16.mxu1 %v2179_v34 }
 0x292   : > { %981 = vmatmul.mubr.bf16.vlgmr.msra.gmra.mrb[4].mxu0 %v877_v51 }
 0x293   : > { %1993 = vmatprep.mubr.msk.bf16.mxu0 %vm2178_vm0, %v2177_v1  ;;  %1168 = vmatpush1.bf16.msra.mxu1 %v2105_v8 }
 0x294   : > { %1169 = vmatprep.subr.bf16.mxu1 %v2179_v34 }
 0x297   : > { %1170 = vmatpush1.bf16.msra.mxu1 %v2106_v9  ;;  %v1915_v9 = vld [vmem:[%s2606_s10] ss:$0 sm:$0xff] }
 0x298   : > { %1171 = vmatprep.subr.bf16.mxu1 %v2179_v34 }
 0x29b   : > { %1172 = vmatpush1.bf16.msra.mxu1 %v2107_v10 }
 0x29c   : > { %1173 = vmatprep.subr.bf16.mxu1 %v2179_v34 }
 0x29f   : > { %1174 = vmatpush1.bf16.msra.mxu1 %v2108_v11 }
 0x2a0   : > { %1175 = vmatprep.subr.bf16.mxu1 %v2179_v34 }
 0x2a3   : > { %1176 = vmatpush1.bf16.msra.mxu1 %v2109_v12 }
 0x2a4   : > { %1177 = vmatprep.subr.bf16.mxu1 %v2179_v34 }
 0x2a7   : > { %1178 = vmatpush1.bf16.msra.mxu1 %v2110_v13 }
 0x2a8   : > { %1179 = vmatprep.subr.bf16.mxu1 %v2179_v34 }
 0x2ab   : > { %1180 = vmatpush1.bf16.msra.mxu1 %v2111_v19 }
 0x2ac   : > { %1181 = vmatprep.subr.bf16.mxu1 %v2179_v34 }
 0x2af   : > { %1182 = vmatpush1.bf16.msra.mxu1 %v2112_v25 }
 0x2b0   : > { %1997 = vmatprep.subr.bf16.mxu1 %v2177_v1 }
 0x365   : > { %v982_v53 = vpop.f32.mrb[4].mxu0 }
 0x366   : > { %v983_v54 = vadd.f32 %v1901_v52, %v982_v53  ;;  %v984_v55 = vpop.f32.mrb[5].mxu0 }
 0x367   : > { %v985_v56 = vpop.f32.mrb[6].mxu0 }
 0x368   : > { %v1913_v57 = vmul.f32 -1.442695, %v983_v54  ;;  %v986_v58 = vadd.f32 %v1901_v52, %v985_v56  ;;  %v987_v59 = vpop.f32.mrb[7].mxu0 }
 0x36a   : > { %2135 = vpow2.f32 %v1913_v57  ;;  %v1914_v60 = vmul.f32 -1.442695, %v986_v58 }
 0x36c   : > { %2137 = vpow2.f32 %v1914_v60 }
 0x374   : > { %v2136_v61 = vpop.eup %2135 }
 0x375   : > { %v995_v62 = vadd.f32 1.0, %v2136_v61 }
 0x376   : > { %v2138_v0 = vpop.eup %2137 }
 0x377   : > { %2139 = vrcp.f32 %v995_v62  ;;  %v996_v2 = vadd.f32 1.0, %v2138_v0 }
 0x379   : > { %2141 = vrcp.f32 %v996_v2 }
 0x381   : > { %v2140_v3 = vpop.eup %2139 }
 0x382   : > { %1003 = vrot.lane.b32.xlu1 %v2140_v3, %s2180_s25  ;;  %v621_v3 = vld [vmem:[%s607_s2 + $0x8] sm:$0xff] }
 0x383   : > { %v2142_v5 = vpop.eup %2141  ;;  %v1753_v6 = vsel %vm1751_vm10, %v621_v3, 0.0 }
 0x384   : > { %1005 = vrot.lane.b32.xlu0 %v2142_v5, %s2180_s25  ;;  %v620_v5 = vld [vmem:[%s607_s2] sm:$0xff]  ;;  %s2184_s2 = smov 112  }
 0x385   : > { %v1752_v7 = vsel %vm1751_vm10, %v620_v5, 0.0 }
 0x386   : > { %v2475_v8 = vadd.f32 %v1753_v6, %v1752_v7 }
 0x3f4   : > { %v1004_v14 = vpop.permute.xlu1 %1003 }
 0x3f5   : > { %v1009_v15 = vmul.f32 %v1004_v14, %v983_v54 }
 0x3f6   : > { %v1006_v16 = vpop.permute.xlu0 %1005 }
 0x3f7   : > { %v2433_v17 = vadd.f32 %v1009_v15, %v2358_v63  ;;  %v1010_v18 = vmul.f32 %v1006_v16, %v986_v58 }
 0x3f9   : > { %v1036_v20 = vrot.slane %v2433_v17, 6  ;;  %v2440_v21 = vadd.f32 %v1010_v18, %v2361_v4 }
 0x3fb   : > { %v1042_v22 = vsel %vm814_vm3, 0.0, %v1036_v20  ;;  %v1037_v23 = vrot.slane %v2440_v21, 6 }
 0x3fc   : > { %v1079_v24 = vrot.slane %v1042_v22, 4  ;;  %v1057_v63 = vrot.slane %v1042_v22, 2  ;;  %v1046_v28 = vrot.slane %v1042_v22, 1  ;;  %v1068_v4 = vrot.slane %v1042_v22, 3 }
 0x3fd   : > { %v1038_v26 = vsel %vm814_vm3, %v1036_v20, %v1037_v23  ;;  %v1043_v27 = vsel %vm814_vm3, %v1037_v23, 0.0 }
 0x3fe   : > { %v1082_v29 = vrot.slane %v1043_v27, 4  ;;  %v1080_v30 = vrot.slane %v1038_v26, 4  ;;  %v1058_v31 = vrot.slane %v1038_v26, 2  ;;  %v1060_v32 = vrot.slane %v1043_v27, 2 }
 0x3ff   : > { %v1047_v33 = vrot.slane %v1038_v26, 1  ;;  %v1049_v35 = vrot.slane %v1043_v27, 1  ;;  %v1069_v34 = vrot.slane %v1038_v26, 3  ;;  %v1071_v36 = vrot.slane %v1043_v27, 3 }
 0x400   : > { %v1081_v37 = vsel %vm861_vm4, %v1079_v24, %v1080_v30  ;;  %v1083_v38 = vsel %vm861_vm4, %v1080_v30, %v1082_v29  ;;  %v1059_v39 = vsel %vm837_vm7, %v1057_v63, %v1058_v31  ;;  %v1061_v40 = vsel %vm837_vm7, %v1058_v31, %v1060_v32  ;;  %v2113_v24 = vld [vmem:[%s2607_s11] sm:$0xff]   ;;  %v2114_v63 = vld [vmem:[%s2607_s11 + $0x8] sm:$0xff]  }
 0x401   : > { %v1093_v41 = vpack.c.bf16 %v1083_v38, %v1081_v37  ;;  %v2078_v42 = vpack.i.bf16 %v1061_v40, %v1059_v39  ;;  %v1048_v43 = vsel %vm825_vm6, %v1046_v28, %v1047_v33  ;;  %v1050_v44 = vsel %vm825_vm6, %v1047_v33, %v1049_v35  ;;  %1990 = vmatpush3.bf16.msra.mxu0 %v2113_v24 }
 0x402   : > { %v2073_v45 = vpack.i.bf16 %v1050_v44, %v1048_v43  ;;  %v1070_v46 = vsel %vm849_vm5, %v1068_v4, %v1069_v34  ;;  %v1072_v47 = vsel %vm849_vm5, %v1069_v34, %v1071_v36  ;;  %1991 = vmatprep.subr.bf16.mxu0 %v2177_v1 }
 0x403   : > { %1926 = vmatprep.mubr.msk.bf16.mxu1 %vm728_vm2, %v1093_v41  ;;  %2079 = vrot.lane.b32.xlu0 %v2078_v42, %s2182_s29  ;;  %v2083_v48 = vpack.i.bf16 %v1072_v47, %v1070_v46 }
 0x404   : > { %2074 = vrot.lane.b32.xlu1 %v2073_v45, %s2181_s26 }
 0x405   : > { %1992 = vmatpush3.bf16.msra.mxu0 %v2114_v63 }
 0x406   : > { %2003 = vmatprep.subr.bf16.mxu0 %v2177_v1 }
 0x407   : > { %1230 = vperm.xlu0 %2088, %v620_v5  }
 0x408   : > { %2084 = vrot.lane.b32.xlu1 %v2083_v48, %s2180_s25 }
 0x40c   : > { %1235 = vperm.xlu1 %2089, %v621_v3  }
 0x475   : > { %v2080_v49 = vpop.permute.xlu0 %2079 }
 0x476   : > { %v2075_v50 = vpop.permute.xlu1 %2074  ;;  %v2082_v53 = vunpack.i.h.bf16 %v2080_v49  ;;  %v2081_v54 = vunpack.i.l.bf16 %v2080_v49  ;;  %v1934_v49 = vld [vmem:[%s610_s30] ss:$0 sm:$0xff] }
 0x477   : > { %v2077_v51 = vunpack.i.h.bf16 %v2075_v50  ;;  %v2076_v52 = vunpack.i.l.bf16 %v2075_v50 }
 0x479   : > { %v1087_v55 = vsel %vm728_vm2, %v1038_v26, %v2077_v51  ;;  %v1086_v56 = vsel %vm728_vm2, %v1042_v22, %v2076_v52 }
 0x47a   : > { %v2085_v57 = vpop.permute.xlu1 %2084  ;;  %v1088_v60 = vsel %vm871_vm8, %v1086_v56, %v2081_v54  ;;  %v1089_v61 = vsel %vm871_vm8, %v1087_v55, %v2082_v53 }
 0x47b   : > { %v2087_v58 = vunpack.i.h.bf16 %v2085_v57  ;;  %v2086_v59 = vunpack.i.l.bf16 %v2085_v57 }
 0x47d   : > { %v1090_v62 = vsel %vm874_vm9, %v1088_v60, %v2086_v59  ;;  %v1091_v0 = vsel %vm874_vm9, %v1089_v61, %v2087_v58 }
 0x47e   : > { %v1092_v2 = vpack.c.bf16 %v1091_v0, %v1090_v62 }
 0x480   : > { %1196 = vmatmul.mubr.bf16.vlgmr.msra.gmra.mrb[4].mxu1 %v1092_v2 }
 0x481   : > { %1999 = vmatprep.mubr.msk.bf16.mxu1 %vm2178_vm0, %v2177_v1 }
 0x486   : > { %v2492_v28 = vpop.permute.xlu0 %1230 }
 0x48b   : > { %v2490_v27 = vpop.permute.xlu1 %1235 }
 0x553   : > { %v1197_v10 = vpop.f32.mrb[4].mxu1 }
 0x554   : > { %v1198_v11 = vadd.f32 %v1915_v9, %v1197_v10  ;;  %v1199_v12 = vpop.f32.mrb[5].mxu1 }
 0x555   : > { %v1200_v13 = vpop.f32.mrb[6].mxu1 }
 0x556   : > { %v1927_v14 = vmul.f32 -1.442695, %v1198_v11  ;;  %v1201_v15 = vadd.f32 %v1915_v9, %v1200_v13  ;;  %v1202_v16 = vpop.f32.mrb[7].mxu1 }
 0x558   : > { %2143 = vpow2.f32 %v1927_v14  ;;  %v1928_v18 = vmul.f32 -1.442695, %v1201_v15 }
 0x55a   : > { %2145 = vpow2.f32 %v1928_v18 }
 0x562   : > { %v2144_v19 = vpop.eup %2143 }
 0x563   : > { %v1210_v20 = vadd.f32 1.0, %v2144_v19 }
 0x564   : > { %v2146_v22 = vpop.eup %2145 }
 0x565   : > { %2147 = vrcp.f32 %v1210_v20  ;;  %v1211_v23 = vadd.f32 1.0, %v2146_v22 }
 0x567   : > { %2149 = vrcp.f32 %v1211_v23 }
 0x56f   : > { %v2148_v25 = vpop.eup %2147 }
 0x570   : > { %1218 = vrot.lane.b32.xlu1 %v2148_v25, %s2180_s25  ;;  %v1755_v25 = vrot.slane %v2475_v8, 4 }
 0x571   : > { %v2150_v26 = vpop.eup %2149 }
 0x572   : > { %1220 = vrot.lane.b32.xlu0 %v2150_v26, %s2180_s25 }
 0x5e2   : > { %v1219_v4 = vpop.permute.xlu1 %1218 }
 0x5e3   : > { %v1224_v29 = vmul.f32 %v1219_v4, %v1198_v11  ;;  %v1756_v4 = vadd.f32 %v1755_v25, %v2475_v8 }
 0x5e4   : > { %v1221_v30 = vpop.permute.xlu0 %1220 }
 0x5e5   : > { %v1226_v31 = vadd.f32 %v1224_v29, %v2433_v17  ;;  %v1225_v32 = vmul.f32 %v1221_v30, %v1201_v15  ;;  %v1929_v17 = vld [vmem:[%s2608_s12] ss:$0 sm:$0xff] }
 0x5e7   : > { %v1227_v33 = vadd.f32 %v1225_v32, %v2440_v21  ;;  %v2497_v35 = vmul.f32 %v2492_v28, %v1226_v31  ;;  %v1757_v31 = vrot.slane %v1756_v4, 2 }
 0x5e9   : > { %v2500_v34 = vmul.f32 %v2490_v27, %v1227_v33 }
 0x5eb   : > { %v1244_v36 = vpack.c.bf16 %v2500_v34, %v2497_v35 }
 0x5ed   : > { %1994 = vmatmul.mubr.msk.bf16.vlgmr.msra.gmra.mrb[8].mxu0 %vm728_vm2, %v1244_v36  ;;  %v1758_v36 = vadd.f32 %v1757_v31, %v1756_v4 }
 0x5ee   : > { %2005 = vmatprep.mubr.msk.bf16.mxu0 %vm2178_vm0, %v2177_v1 }
 0x6c0   : > { %v1301_v37 = vpop.f32.mrb[8].mxu0 }
 0x6c1   : > { %v1995_v21 = vpop.f32.mrb[9].mxu0  ;;  %v1302_v39 = vadd.f32 %v1929_v17, %v1301_v37 }
 0x6c2   : > { %v1304_v38 = vpop.f32.mrb[10].mxu0 }
 0x6c3   : > { %v1305_v40 = vadd.f32 %v1929_v17, %v1304_v38  ;;  %v1996_v41 = vpop.f32.mrb[11].mxu0  ;;  %v1759_v17 = vrot.slane %v1758_v36, 1 }
 0x6c5   : > { %v2510_v42 = vpack.c.bf16 %v1305_v40, %v1302_v39  ;;  %v1760_v37 = vadd.f32 %v1759_v17, %v1758_v36 }
 0x6c7   : > { %1446 = vrot.lane.b32.xlu0 %v2510_v42, %s2183_s22  ;;  %1314 = vrot.lane.b32.xlu1 %v2510_v42, %s2180_s25  ;;  %v1761_v21 = vmax.f32 %v1760_v37, 1.0 }
 0x6cb   : > { %1444 = vrot.lane.b32.xlu1 %v2510_v42, %s2184_s2 }
 0x739   : > { %v1315_v43 = vpop.permute.xlu1 %1314  ;;  %v1447_v45 = vpop.permute.xlu0 %1446 }
 0x73a   : > { %v1320_v44 = vsel %vm641_vm1, %v1315_v43, 0  ;;  %v1452_v46 = vsel %vm641_vm1, %v1447_v45, 0 }
 0x73b   : > { %1998 = vmatpush3.bf16.xpose.msra.mxu1 %v1320_v44 }
 0x73c   : > { %2009 = vmatprep.subr.bf16.mxu1 %v2177_v1 }
 0x73d   : > { %v1445_v47 = vpop.permute.xlu1 %1444 }
 0x742   : > { %2000 = vmatmul.mubr.msk.bf16.vlgmr.msra.gmra.mrb[8].mxu1 %vm641_vm1, %v2510_v42 }
 0x743   : > { %2010 = vmatpush3.bf16.xpose.msra.mxu1 %v1452_v46  ;;  %2011 = vmatprep.mubr.msk.bf16.mxu1 %vm2178_vm0, %v2177_v1 }
 0x744   : > { %2021 = vmatprep.subr.bf16.mxu1 %v2177_v1 }
 0x74a   : > { %2012 = vmatmul.mubr.msk.bf16.vlgmr.msra.gmra.mrb[12].mxu1 %vm641_vm1, %v1445_v47 }
 0x74b   : > { %2023 = vmatprep.mubr.msk.bf16.mxu1 %vm2178_vm0, %v2177_v1 }
 0x815   : > { %v1356_v48 = vpop.f32.mrb[8].mxu1 }
 0x816   : > { %v1363_v50 = vmul.f32 0.25, %v1356_v48  ;;  %v2001_v51 = vpop.f32.mrb[9].mxu1 }
 0x817   : > { %v1359_v52 = vpop.f32.mrb[10].mxu1 }
 0x818   : > { %v1364_v53 = vmul.f32 0.25, %v1359_v52  ;;  %v2002_v54 = vpop.f32.mrb[11].mxu1  ;;  %v1371_v55 = vadd.f32 %v1934_v49, %v1363_v50 }
 0x819   : > { %v2116_v54 = vld [vmem:[%s2609_s13 + $0x8] sm:$0xff]  }
 0x81a   : > { %v1373_v56 = vsel %vm641_vm1, %v1371_v55, -inf  ;;  %v1372_v57 = vadd.f32 %v1934_v49, %v1364_v53  ;;  %v2115_v53 = vld [vmem:[%s2609_s13] sm:$0xff]   ;;  %2022 = vmatpush3.bf16.msra.mxu1 %v2116_v54 }
 0x81b   : > { %1374 = vmax.xlane.f32.xlu0 %v1373_v56  ;;  %2033 = vmatprep.subr.bf16.mxu1 %v2177_v1 }
 0x81c   : > { %v1376_v58 = vsel %vm641_vm1, %v1372_v57, -inf }
 0x81d   : > { %1377 = vmax.xlane.f32.xlu1 %v1376_v58  ;;  %v1488_v59 = vpop.f32.mrb[12].mxu1 }
 0x81e   : > { %v1495_v60 = vmul.f32 0.25, %v1488_v59  ;;  %v2013_v61 = vpop.f32.mrb[13].mxu1 }
 0x81f   : > { %v1491_v62 = vpop.f32.mrb[14].mxu1 }
 0x820   : > { %v1496_v0 = vmul.f32 0.25, %v1491_v62  ;;  %v2014_v2 = vpop.f32.mrb[15].mxu1  ;;  %v1497_v3 = vadd.f32 %v1934_v49, %v1495_v60 }
 0x822   : > { %v1499_v5 = vsel %vm641_vm1, %v1497_v3, -inf  ;;  %v1498_v6 = vadd.f32 %v1934_v49, %v1496_v0 }
 0x823   : > { %1500 = vmax.xlane.f32.xlu0 %v1499_v5  ;;  %v2118_v5 = vld [vmem:[%s2611_s15 + $0x8] sm:$0xff]  }
 0x824   : > { %v1502_v7 = vsel %vm641_vm1, %v1498_v6, -inf }
 0x827   : > { %1503 = vmax.xlane.f32.xlu0 %v1502_v7 }
 0x8a8   : > { %v1375_v9 = vpop.xlane.xlu0 %1374 }
 0x8a9   : > { %v1379_v10 = vsub.f32 %v1371_v55, %v1375_v9 }
 0x8aa   : > { %v1378_v11 = vpop.xlane.xlu1 %1377 }
 0x8ab   : > { %v1381_v12 = vmul.f32 1.442695, %v1379_v10  ;;  %v1380_v13 = vsub.f32 %v1372_v57, %v1378_v11 }
 0x8ad   : > { %2151 = vpow2.f32 %v1381_v12  ;;  %v1383_v14 = vmul.f32 1.442695, %v1380_v13  ;;  %v1942_v12 = vld [vmem:[%s2610_s14] ss:$0 sm:$0xff] }
 0x8af   : > { %2153 = vpow2.f32 %v1383_v14 }
 0x8b0   : > { %v1501_v15 = vpop.xlane.xlu0 %1500 }
 0x8b1   : > { %v1505_v16 = vsub.f32 %v1497_v3, %v1501_v15  ;;  %v2117_v3 = vld [vmem:[%s2611_s15] sm:$0xff]  }
 0x8b3   : > { %v1507_v18 = vmul.f32 1.442695, %v1505_v16 }
 0x8b4   : > { %v1504_v19 = vpop.xlane.xlu0 %1503 }
 0x8b5   : > { %2155 = vpow2.f32 %v1507_v18  ;;  %v1506_v20 = vsub.f32 %v1498_v6, %v1504_v19 }
 0x8b7   : > { %v2152_v22 = vpop.eup %2151  ;;  %v1509_v23 = vmul.f32 1.442695, %v1506_v20 }
 0x8b8   : > { %v1385_v24 = vsel %vm641_vm1, %v2152_v22, 0.0 }
 0x8b9   : > { %v2154_v63 = vpop.eup %2153  ;;  %2157 = vpow2.f32 %v1509_v23  ;;  %1386 = vadd.xlane.f32.xlu1 %v1385_v24  ;;  %v1943_v24 = vld [vmem:[%s2612_s16] ss:$0 sm:$0xff] }
 0x8ba   : > { %v1388_v26 = vsel %vm641_vm1, %v2154_v63, 0.0 }
 0x8bb   : > { %1389 = vadd.xlane.f32.xlu0 %v1388_v26 }
 0x8bf   : > { %v2156_v29 = vpop.eup %2155 }
 0x8c0   : > { %v1511_v30 = vsel %vm641_vm1, %v2156_v29, 0.0 }
 0x8c1   : > { %1512 = vadd.xlane.f32.xlu1 %v1511_v30 }
 0x8c3   : > { %v2158_v32 = vpop.eup %2157 }
 0x8c4   : > { %v1514_v33 = vsel %vm641_vm1, %v2158_v32, 0.0 }
 0x8c5   : > { %1515 = vadd.xlane.f32.xlu0 %v1514_v33 }
 0x8d2   : > { %1396 = vrot.lane.b32.xlu1 %v2510_v42, %s2182_s29 }
 0x8d6   : > { %1775 = vperm.xlu1 %2089, %v1761_v21  }
 0x8db   : > { %1522 = vrot.lane.b32.xlu0 %v2510_v42, %s2185_s19 }
 0x946   : > { %v1387_v8 = vpop.xlane.xlu1 %1386 }
 0x947   : > { %2159 = vrcp.f32 %v1387_v8 }
 0x948   : > { %v1390_v38 = vpop.xlane.xlu0 %1389 }
 0x949   : > { %2161 = vrcp.f32 %v1390_v38 }
 0x94e   : > { %v1513_v39 = vpop.xlane.xlu1 %1512 }
 0x94f   : > { %2163 = vrcp.f32 %v1513_v39 }
 0x951   : > { %v2160_v40 = vpop.eup %2159 }
 0x952   : > { %v1516_v41 = vpop.xlane.xlu0 %1515  ;;  %v1397_v43 = vpop.permute.xlu1 %1396  ;;  %v1393_v45 = vmul.f32 %v2160_v40, %v2152_v22 }
 0x953   : > { %v2162_v44 = vpop.eup %2161  ;;  %2165 = vrcp.f32 %v1516_v41  ;;  %2004 = vmatpush3.bf16.msra.mxu0 %v1397_v43 }
 0x954   : > { %v1394_v46 = vmul.f32 %v2162_v44, %v2154_v63  ;;  %2015 = vmatprep.subr.bf16.mxu0 %v2177_v1 }
 0x956   : > { %v1523_v47 = vpop.permute.xlu0 %1522  ;;  %v1395_v48 = vpack.c.bf16 %v1394_v46, %v1393_v45  ;;  %v1776_v33 = vpop.permute.xlu1 %1775 }
 0x957   : > { %2167 = vrcp.f32 %v1776_v33 }
 0x958   : > { %2006 = vmatmul.mubr.msk.bf16.vlgmr.msra.gmra.mrb[12].mxu0 %vm641_vm1, %v1395_v48 }
 0x959   : > { %2016 = vmatpush3.bf16.msra.mxu0 %v1523_v47  ;;  %2017 = vmatprep.mubr.msk.bf16.mxu0 %vm2178_vm0, %v2177_v1  ;;  %v2164_v42 = vpop.eup %2163 }
 0x95a   : > { %2027 = vmatprep.subr.bf16.mxu0 %v2177_v1  ;;  %v1519_v50 = vmul.f32 %v2164_v42, %v2156_v29 }
 0x95d   : > { %v2166_v49 = vpop.eup %2165 }
 0x95e   : > { %v1520_v51 = vmul.f32 %v2166_v49, %v2158_v32 }
 0x960   : > { %v1521_v52 = vpack.c.bf16 %v1520_v51, %v1519_v50 }
 0x961   : > { %v2168_v39 = vpop.eup %2167 }
 0x962   : > { %2018 = vmatmul.mubr.msk.bf16.vlgmr.msra.gmra.mrb[16].mxu0 %vm641_vm1, %v1521_v52 }
 0x963   : > { %2029 = vmatprep.mubr.msk.bf16.mxu0 %vm2178_vm0, %v2177_v1  ;;  %2028 = vmatpush3.bf16.msra.mxu0 %v2115_v53 }
 0xa2b   : > { %v1436_v55 = vpop.f32.mrb[12].mxu0 }
 0xa2c   : > { %v2007_v56 = vpop.f32.mrb[13].mxu0 }
 0xa2d   : > { %v1439_v57 = vpop.f32.mrb[14].mxu0 }
 0xa2e   : > { %v1443_v58 = vpack.c.bf16 %v1439_v57, %v1436_v55  ;;  %v2008_v59 = vpop.f32.mrb[15].mxu0 }
 0xa30   : > { %2030 = vmatmul.mubr.msk.bf16.vlgmr.msra.gmra.mrb[20].mxu0 %vm641_vm1, %v1443_v58 }
 0xa35   : > { %v1562_v60 = vpop.f32.mrb[16].mxu0 }
 0xa36   : > { %v2019_v61 = vpop.f32.mrb[17].mxu0 }
 0xa37   : > { %v1565_v62 = vpop.f32.mrb[18].mxu0 }
 0xa38   : > { %v1569_v0 = vpack.c.bf16 %v1565_v62, %v1562_v60  ;;  %v2020_v2 = vpop.f32.mrb[19].mxu0 }
 0xa3a   : > { %2024 = vmatmul.mubr.msk.bf16.vlgmr.msra.gmra.mrb[16].mxu1 %vm641_vm1, %v1569_v0 }
 0xa3b   : > { %2037 = vmatprep.mubr.msk.bf16.mxu1 %vm2178_vm0, %v2177_v1  ;;  %2034 = vmatpush3.bf16.msra.mxu1 %v2117_v3 }
 0xa3c   : > { %2035 = vmatprep.subr.bf16.mxu1 %v2177_v1 }
 0xa3f   : > { %2036 = vmatpush3.bf16.msra.mxu1 %v2118_v5 }
 0xb03   : > { %v1663_v6 = vpop.f32.mrb[20].mxu0 }
 0xb04   : > { %v2031_v7 = vpop.f32.mrb[21].mxu0 }
 0xb05   : > { %v1666_v9 = vpop.f32.mrb[22].mxu0 }
 0xb06   : > { %v2032_v10 = vpop.f32.mrb[23].mxu0 }
 0xb0d   : > { %v1613_v11 = vpop.f32.mrb[16].mxu1 }
 0xb0e   : > { %v1664_v13 = vadd.f32 %v1663_v6, %v1613_v11  ;;  %v2025_v14 = vpop.f32.mrb[17].mxu1 }
 0xb0f   : > { %v1616_v15 = vpop.f32.mrb[18].mxu1 }
 0xb10   : > { %v1677_v16 = vadd.f32 %v1942_v12, %v1664_v13  ;;  %v1667_v1 = vadd.f32 %v1666_v9, %v1616_v15  ;;  %v2026_v18 = vpop.f32.mrb[19].mxu1 }
 0xb12   : > { %v1678_v19 = vadd.f32 %v1942_v12, %v1667_v1  ;;  %v1679_v20 = vadd.f32 %v1677_v16, %v2497_v35 }
 0xb14   : > { %v1680_v22 = vadd.f32 %v1678_v19, %v2500_v34 }
 0xb16   : > { %v1685_v23 = vpack.c.bf16 %v1680_v22, %v1679_v20 }
 0xb18   : > { %2038 = vmatmul.mubr.msk.bf16.vlgmr.msra.gmra.mrb[20].mxu1 %vm728_vm2, %v1685_v23 }
 0xbeb   : > { %v1742_v63 = vpop.f32.mrb[20].mxu1 }
 0xbec   : > { %v1743_v25 = vadd.f32 %v1943_v24, %v1742_v63  ;;  %v2039_v26 = vpop.f32.mrb[21].mxu1 }
 0xbed   : > { %v1745_v4 = vpop.f32.mrb[22].mxu1 }
 0xbee   : > { %1749 = vst.msk [vmem:[%s618_s20] sm:$0xff] %vm728_vm2, %v1743_v25  ;;  %v1762_v35 = vmul.f32 %v1743_v25, %v2492_v28  ;;  %v1746_v34 = vadd.f32 %v1943_v24, %v1745_v4  ;;  %v2040_v29 = vpop.f32.mrb[23].mxu1 }
 0xbf0   : > { %1750 = vst.msk [vmem:[%s618_s20 + $0x8] sm:$0xff] %vm728_vm2, %v1746_v34  ;;  %v1763_v30 = vmul.f32 %v1746_v34, %v2490_v27  ;;  %v1764_v31 = vsel %vm728_vm2, %v1762_v35, 0.0 }
 0xbf2   : > { %v1765_v32 = vsel %vm728_vm2, %v1763_v30, 0.0 }
 0xbf3   : > { %v1766_v36 = vadd.f32 %v1765_v32, %v1764_v31 }
 0xbf5   : > { %v1767_v17 = vrot.slane %v1766_v36, 4 }
 0xbf7   : > { %v1768_v37 = vadd.f32 %v1767_v17, %v1766_v36 }
 0xbf9   : > { %v1769_v21 = vrot.slane %v1768_v37, 2 }
 0xbfb   : > { %v1770_v8 = vadd.f32 %v1769_v21, %v1768_v37 }
 0xbfd   : > { %v1771_v38 = vrot.slane %v1770_v8, 1 }
 0xbff   : > { %v1772_v28 = vadd.f32 %v1771_v38, %v1770_v8 }
 0xc01   : > { %v1779_v27 = vmul.f32 %v2168_v39, %v1772_v28 }
 0xc03   : > { %1781 = vst.msk [vmem:[%s613_s21] sm:$0x1] %vm1780_vm11, %v1779_v27 }
 0xc04 PF: > { %s29_s27 = sadd.s32 1, %s2175_s27  }
 0xc05   : > { %p26_p4 = scmp.ge.s32.totalorder %s29_s27, 4  }
 0xc07   :  { %28 = sbr.rel (!%p26_p4) target bundleno = 4 (0x4), region = 136 }

// kernel: stylespeech_forward.10
= control target key start
LH: loop header
LB: loop body
LE: loop exit
PB: predicated region body
PF: predicated region fallthrough
CT: control target
= control target key end

     0   :  { %s2147_s25 = smov 0   ;;  %s2149_s26 = smov 0   ;;  %s2420_s0 = inlined_call_operand.vmem [shape: f32[2,8,32], index: 0, kind: input, shape index: {}]   ;;  %s2421_s1 = inlined_call_operand.vmem [shape: f32[2,8,1], index: 1, kind: input, shape index: {}]   ;;  %s2422_s2 = inlined_call_operand.vmem [shape: f32[2,1,8], index: 2, kind: input, shape index: {}]   ;;  %s2423_s3 = inlined_call_operand.vmem [shape: f32[2,2,1,64], index: 3, kind: input, shape index: {}]   ;;  %s2424_s4 = inlined_call_operand.vmem [shape: f32[2,2,1,64], index: 4, kind: input, shape index: {}]   ;;  %s2425_s5 = inlined_call_operand.vmem [shape: bf16[2,32,96], index: 5, kind: input, shape index: {}]   ;;  %s2426_s6 = inlined_call_operand.vmem [shape: f32[2,1,96], index: 6, kind: input, shape index: {}]   ;;  %s2427_s7 = inlined_call_operand.vmem [shape: bf16[2,32,32], index: 7, kind: input, shape index: {}]   ;;  %s2428_s8 = inlined_call_operand.vmem [shape: f32[2,1,32], index: 8, kind: input, shape index: {}]   ;;  %s2429_s9 = inlined_call_operand.vmem [shape: bf16[2,288,64], index: 9, kind: input, shape index: {}]   ;;  %s2430_s10 = inlined_call_operand.vmem [shape: f32[2,1,64], index: 10, kind: input, shape index: {}]   ;;  %s2431_s11 = inlined_call_operand.vmem [shape: bf16[2,64,32], index: 11, kind: input, shape index: {}]   ;;  %s2432_s12 = inlined_call_operand.vmem [shape: f32[2,1,32], index: 12, kind: input, shape index: {}]   ;;  %s2433_s13 = inlined_call_operand.vmem [shape: f32[2,8,32], index: 13, kind: output, shape index: {}]  }
   0x1   :  { %2439 = sst [smem:[#allocation10_spill]] %s2420_s0  ;;  %s2151_s27 = smov 0  }
   0x2   :  { %2440 = sst [smem:[#allocation11_spill]] %s2421_s1  ;;  %s2153_s28 = smov 0  }
   0x3   :  { %2441 = sst [smem:[#allocation12_spill]] %s2422_s2  ;;  %s2155_s29 = smov 0  }
   0x4   :  { %2442 = sst [smem:[#allocation13_spill]] %s2425_s5 }
   0x5   :  { %2443 = sst [smem:[#allocation14_spill]] %s2427_s7 }
   0x6   :  { %2444 = sst [smem:[#allocation15_spill]] %s2433_s13 }
   0x7 LB: > { %2445 = sst [smem:[#allocation3_spill]] %s2050_s25  ;;  %s32_s30 = sadd.s32 1, %s2058_s27  ;;  %s2066_s29 = sphi %s2155_s29, %s23_s29   ;;  %s2062_s28 = sphi %s2153_s28, %s2473_s28   ;;  %s2058_s27 = sphi %s2151_s27, %s2472_s27   ;;  %s2054_s26 = sphi %s2149_s26, %s2471_s26   ;;  %s2050_s25 = sphi %s2147_s25, %s2470_s25  }
   0x8   : > { %2446 = sst [smem:[#allocation4_spill]] %s2058_s27  ;;  %s35_s14 = sadd.s32 1, %s2062_s28 }
   0x9   : > { %2447 = sst [smem:[#allocation5_spill]] %s2062_s28  ;;  %p33_p0 = scmp.ge.s32.totalorder %s32_s30, 2 }
   0xa   : > { %2448 = sst [smem:[#allocation6_spill]] %s2066_s29  ;;  %p1750_p1 = scmp.ge.s32.totalorder %s2066_s29, 1 }
   0xb   : > { %p515_p2 = scmp.lt.s32.totalorder %s2066_s29, 5  ;;  %s2475_s30 = smov (%p33_p0, %s32_s30), 0 }
   0xc   : > { %2449 = sst [smem:[#allocation7_spill]] %s2475_s30  ;;  %s2477_s14 = smov (!%p33_p0, %s35_s14), %s2062_s28 }
   0xd   : > { %p516_p3 = pnand %p1750_p1, %p515_p2  ;;  %p37_p4 = scmp.ge.s32.totalorder %s2477_s14, 2 }
   0xf   : > { %s2479_s14 = smov (%p37_p4, %s2477_s14), 0  ;;  %519 = sbr.rel (%p516_p3) target bundleno = 2603 (0xa2b), region = 72 }
  0x10   : > { %2450 = sst [smem:[#allocation8_spill]] %s2479_s14 }
  0x16   : > { %p610_p5 = scmp.lt.s32.totalorder %s2054_s26, 1  ;;  %p623_p6 = scmp.lt.s32.totalorder %s2050_s25, 1 }
  0x17   : > { %s2453_s0 = sld [smem:[#allocation10_spill]]  ;;  %s2455_s5 = sld [smem:[#allocation13_spill]] }
  0x18   : > { %s2481_s26 = smov (!%p610_p5, %s2054_s26), 1  ;;  %s2456_s7 = sld [smem:[#allocation14_spill]] }
  0x19   : > { %2451 = sst [smem:[#allocation9_spill]] %s2481_s26  ;;  %s2186_s16 = sshll.u32 %s2481_s26, 3 }
  0x1a   : > { %s2183_s15 = scalar_select %p623_p6, %s2050_s25, 1 }
  0x1b   : > { %s1753_s30 = sshll.u32 %s2481_s26, 1  ;;  %s2458_s18 = sld [smem:[#allocation3_spill]] }
  0x1c   : > { %s1808_s28 = sshll.u32 %s2183_s15, 4  ;;  %s2203_s27 = sadd.s32 %s1753_s30, %s2183_s15 }
  0x1d   : > { %s613_s22 = scalar_lea.vmem %s2453_s0, %s2186_s16  ;;  %s639_s17 = scalar_lea.vmem %s2455_s5, %s1808_s28 }
  0x1e   : > { %s2223_s26 = scalar_lea.vmem %s2456_s7, %s1808_s28  ;;  %s1920_s13 = smul.u32 144, %s2183_s15 }
  0x1f   : > { %s658_s20 = scalar_lea.vmem %s2430_s10, %s2183_s15  ;;  %s1810_s0 = sshll.u32 %s2183_s15, 5 }
  0x20   : > { %s2238_s14 = scalar_lea.vmem %s2429_s9, %s1920_s13  ;;  %s2243_s2 = scalar_lea.vmem %s2431_s11, %s1810_s0 }
  0x21   : > { %s666_s25 = scalar_lea.vmem %s2432_s12, %s2183_s15  ;;  %s2457_s7 = sld [smem:[#allocation15_spill]] }
  0x22   : > { %p1763_p7 = scmp.ne.s32.totalorder %s2458_s18, 0 }
  0x23   : > { %v676_v0 = vld [vmem:[%s613_s22] sm:$0xff] (!%p1763_p7)  ;;  %vm677_vm0 = vcmask (!%p1763_p7), 261120  }
  0x24   : > { %675 = sbr.rel (%p1763_p7) target bundleno = 43 (0x2b), region = 76  ;;  %678 = vst.msk [vmem:[#allocation2] sm:$0xff] (!%p1763_p7), %vm677_vm0, %v676_v0 }
  0x27   : > { %s670_s19 = scalar_lea.vmem %s2457_s7, %s2186_s16 }
  0x2b PF: > { %v1986_v1 = vld [vmem:[%s639_s17] sm:$0xff]   ;;  %v2068_v2 = vmov 0.0   ;;  %v1987_v3 = vld [vmem:[%s639_s17 + $0x8] sm:$0xff]   ;;  %vm2069_vm1 = vmmov 0   ;;  %vm706_vm2 = vcmask 261120   ;;  %s2459_s7 = scalar_lea.vmem %s2426_s6, %s2183_s15  ;;  %s2070_s13 = smov 112  }
  0x2c   : > { %1856 = vmatprep.subr.bf16.mxu0 %v2068_v2  ;;  %1864 = vmatprep.subr.bf16.mxu1 %v2068_v2  ;;  %v2258_v4 = vld [vmem:[#allocation2] sm:$0xff]  ;;  %s2071_s22 = smov 96   ;;  %s2072_s17 = smov 80   ;;  %vm758_vm3 = vcmask 130048   ;;  %vm813_vm4 = vcmask 64512   ;;  %vm831_vm5 = vcmask 1043456  }
  0x2d   : > { %1857 = vmatpush3.bf16.msra.mxu0 %v1986_v1  ;;  %1860 = vmatprep.mubr.msk.bf16.mxu0 %vm2069_vm1, %v2068_v2  ;;  %v686_v5 = vpack.c.bf16 %v2258_v4, %v2258_v4  ;;  %v1764_v6 = vld [vmem:[%s2459_s7] ss:$0 sm:$0xff]  ;;  %s2460_s23 = sld [smem:[#allocation9_spill]]  ;;  %s2461_s24 = sld [smem:[#allocation12_spill]]  ;;  %v1989_v56 = vld [vmem:[%s2223_s26 + $0x8] sm:$0xff]   ;;  %vm1181_vm6 = vcmask 1046528  }
  0x2e   : > { %1858 = vmatprep.subr.bf16.mxu0 %v2068_v2  ;;  %1866 = vmatprep.mubr.msk.bf16.mxu1 %vm2069_vm1, %v2068_v2  ;;  %s2073_s30 = smov 64   ;;  %s2074_s29 = smov 48   ;;  %v1988_v55 = vld [vmem:[%s2223_s26] sm:$0xff]   ;;  %vm1206_vm7 = vcmask 1042432   ;;  %vm1188_vm8 = vcmask 1045504   ;;  %vm1213_vm9 = vcmask 1041408  }
  0x2f   : > { %s2463_s1 = scalar_lea.vmem %s2428_s8, %s2183_s15  ;;  %s2465_s0 = sld [smem:[#allocation11_spill]]  ;;  %vm1195_vm10 = vcmask 1044480   ;;  %vm1220_vm11 = vcmask 1040384   ;;  %vm1228_vm12 = vcmask 523264   ;;  %vm1230_vm13 = vcmask 785408  }
  0x30   : > { %s2467_s26 = scalar_lea.vmem %s2424_s4, %s2203_s27 }
  0x31   : > { %1859 = vmatpush3.bf16.msra.mxu0 %v1987_v3 }
  0x32   : > { %1870 = vmatprep.subr.bf16.mxu0 %v2068_v2 }
  0x33   : > { %s2462_s28 = scalar_lea.vmem %s2461_s24, %s2460_s23  ;;  %s2076_s24 = smov 32  }
  0x34   : > { %1861 = vmatmul.mubr.msk.bf16.vlgmr.msra.gmra.mrb[0].mxu0 %vm706_vm2, %v686_v5  ;;  %v1769_v19 = vld [vmem:[%s2462_s28] ss:$0 sm:$0xff] }
  0x35   : > { %1872 = vmatprep.mubr.msk.bf16.mxu0 %vm2069_vm1, %v2068_v2  ;;  %s2466_s21 = scalar_lea.vmem %s2465_s0, %s2186_s16 }
 0x107   : > { %v744_v7 = vpop.f32.mrb[0].mxu0 }
 0x108   : > { %v745_v8 = vadd.f32 %v1764_v6, %v744_v7  ;;  %v1862_v9 = vpop.f32.mrb[1].mxu0 }
 0x109   : > { %v747_v10 = vpop.f32.mrb[2].mxu0 }
 0x10a   : > { %v754_v11 = vpack.c.bf16 %v745_v8, %v745_v8  ;;  %v1863_v12 = vpop.f32.mrb[3].mxu0  ;;  %v1777_v10 = vld [vmem:[%s2463_s1] ss:$0 sm:$0xff] }
 0x10c   : > { %876 = vrot.lane.b32.xlu1 %v754_v11, %s2070_s13  ;;  %756 = vrot.lane.b32.xlu0 %v754_v11, %s2071_s22  ;;  %s2464_s13 = scalar_lea.vmem %s2423_s3, %s2203_s27 }
 0x110   : > { %878 = vrot.lane.b32.xlu0 %v754_v11, %s2072_s17 }
 0x17e   : > { %v757_v13 = vpop.permute.xlu0 %756  ;;  %v877_v17 = vpop.permute.xlu1 %876 }
 0x17f   : > { %v763_v14 = vsel %vm758_vm3, %v757_v13, 0 }
 0x180   : > { %1865 = vmatpush3.bf16.xpose.msra.mxu1 %v763_v14 }
 0x181   : > { %1876 = vmatprep.subr.bf16.mxu1 %v2068_v2 }
 0x182   : > { %v879_v15 = vpop.permute.xlu0 %878 }
 0x183   : > { %v884_v16 = vsel %vm758_vm3, %v879_v15, 0 }
 0x187   : > { %1867 = vmatmul.mubr.msk.bf16.vlgmr.msra.gmra.mrb[0].mxu1 %vm758_vm3, %v754_v11 }
 0x188   : > { %1877 = vmatpush3.bf16.xpose.msra.mxu1 %v884_v16  ;;  %1878 = vmatprep.mubr.msk.bf16.mxu1 %vm2069_vm1, %v2068_v2 }
 0x189   : > { %1888 = vmatprep.subr.bf16.mxu1 %v2068_v2 }
 0x18f   : > { %1879 = vmatmul.mubr.msk.bf16.vlgmr.msra.gmra.mrb[4].mxu1 %vm758_vm3, %v877_v17 }
 0x190   : > { %1890 = vmatprep.mubr.msk.bf16.mxu1 %vm2069_vm1, %v2068_v2  ;;  %1889 = vmatpush3.bf16.msra.mxu1 %v1989_v56 }
 0x25a   : > { %v799_v18 = vpop.f32.mrb[0].mxu1 }
 0x25b   : > { %v805_v20 = vmul.f32 0.25, %v799_v18  ;;  %v1868_v21 = vpop.f32.mrb[1].mxu1  ;;  %v2075_v18 = vmov 0  }
 0x25c   : > { %v802_v22 = vpop.f32.mrb[2].mxu1  ;;  %1970 = vset.pattern.permute.xlu0 %v2075_v18 }
 0x25d   : > { %v1869_v23 = vpop.f32.mrb[3].mxu1  ;;  %v812_v24 = vadd.f32 %v1769_v19, %v805_v20 }
 0x25f   : > { %v814_v25 = vsel %vm813_vm4, %v812_v24, -inf }
 0x260   : > { %815 = vmax.xlane.f32.xlu1 %v814_v25  ;;  %v1990_v25 = vld [vmem:[%s2238_s14 + $0x80] sm:$0xff]  }
 0x262   : > { %v920_v26 = vpop.f32.mrb[4].mxu1 }
 0x263   : > { %v926_v27 = vmul.f32 0.25, %v920_v26  ;;  %v1880_v28 = vpop.f32.mrb[5].mxu1  ;;  %v1991_v26 = vld [vmem:[%s2238_s14 + $0x88] sm:$0xff]  }
 0x264   : > { %v923_v29 = vpop.f32.mrb[6].mxu1  ;;  %v1993_v28 = vld [vmem:[%s2238_s14] sm:$0xff]  }
 0x265   : > { %v1881_v30 = vpop.f32.mrb[7].mxu1  ;;  %v927_v31 = vadd.f32 %v1769_v19, %v926_v27  ;;  %v1778_v19 = vld [vmem:[%s2464_s13] ss:$0 sm:$0xff]  ;;  %v1994_v29 = vld [vmem:[%s2238_s14 + $0x48] sm:$0xff]  }
 0x266   : > { %v1992_v27 = vld [vmem:[%s2238_s14 + $0x40] sm:$0xff]   ;;  %v1995_v30 = vld [vmem:[%s2238_s14 + $0x8] sm:$0xff]  }
 0x267   : > { %v928_v32 = vsel %vm813_vm4, %v927_v31, -inf  ;;  %1826 = vmatprep.subr.bf16.mxu1 %v1992_v27 }
 0x268   : > { %929 = vmax.xlane.f32.xlu0 %v928_v32  ;;  %v1997_v32 = vld [vmem:[%s2238_s14 + $0x10] sm:$0xff]  }
 0x2ed   : > { %v816_v33 = vpop.xlane.xlu1 %815 }
 0x2ee   : > { %v817_v34 = vsub.f32 %v812_v24, %v816_v33  ;;  %v680_v24 = vld [vmem:[%s2466_s21] sm:$0xff]  ;;  %v1998_v33 = vld [vmem:[%s2238_s14 + $0x58] sm:$0xff]  }
 0x2f0   : > { %v818_v35 = vmul.f32 1.442695, %v817_v34  ;;  %v1999_v34 = vld [vmem:[%s2238_s14 + $0x18] sm:$0xff]  }
 0x2f2   : > { %2012 = vpow2.f32 %v818_v35  ;;  %v2000_v35 = vld [vmem:[%s2238_s14 + $0x60] sm:$0xff]  }
 0x2f5   : > { %v930_v36 = vpop.xlane.xlu0 %929 }
 0x2f6   : > { %v931_v37 = vsub.f32 %v927_v31, %v930_v36  ;;  %v1996_v31 = vld [vmem:[%s2238_s14 + $0x50] sm:$0xff]   ;;  %v2001_v36 = vld [vmem:[%s2238_s14 + $0x20] sm:$0xff]  }
 0x2f8   : > { %v932_v38 = vmul.f32 1.442695, %v931_v37 }
 0x2fa   : > { %2014 = vpow2.f32 %v932_v38 }
 0x2fc   : > { %v2013_v39 = vpop.eup %2012 }
 0x2fd   : > { %v820_v40 = vsel %vm813_vm4, %v2013_v39, 0.0 }
 0x2fe   : > { %821 = vadd.xlane.f32.xlu0 %v820_v40 }
 0x304   : > { %v2015_v41 = vpop.eup %2014 }
 0x305   : > { %v934_v42 = vsel %vm813_vm4, %v2015_v41, 0.0 }
 0x306   : > { %935 = vadd.xlane.f32.xlu1 %v934_v42 }
 0x314   : > { %826 = vrot.lane.b32.xlu0 %v754_v11, %s2073_s30 }
 0x317   : > { %940 = vrot.lane.b32.xlu1 %v754_v11, %s2074_s29 }
 0x38b   : > { %v822_v43 = vpop.xlane.xlu0 %821 }
 0x38c   : > { %2016 = vrcp.f32 %v822_v43 }
 0x38f   : > { %v827_v44 = vpop.permute.xlu0 %826 }
 0x390   : > { %v833_v45 = vsel %vm831_vm5, %v827_v44, 0 }
 0x391   : > { %1871 = vmatpush3.bf16.msra.mxu0 %v833_v45 }
 0x392   : > { %1882 = vmatprep.subr.bf16.mxu0 %v2068_v2 }
 0x393   : > { %v936_v46 = vpop.xlane.xlu1 %935 }
 0x394   : > { %2018 = vrcp.f32 %v936_v46 }
 0x396   : > { %v2017_v47 = vpop.eup %2016 }
 0x397   : > { %v824_v48 = vmul.f32 %v2017_v47, %v2013_v39  ;;  %v941_v49 = vpop.permute.xlu1 %940  ;;  %v2002_v47 = vld [vmem:[%s2238_s14 + $0x68] sm:$0xff]  }
 0x398   : > { %v946_v51 = vsel %vm831_vm5, %v941_v49, 0 }
 0x399   : > { %v825_v50 = vpack.c.bf16 %v824_v48, %v824_v48  ;;  %v2003_v48 = vld [vmem:[%s2238_s14 + $0x28] sm:$0xff]  }
 0x39b   : > { %1873 = vmatmul.mubr.msk.bf16.vlgmr.msra.gmra.mrb[4].mxu0 %vm813_vm4, %v825_v50 }
 0x39c   : > { %1883 = vmatpush3.bf16.msra.mxu0 %v946_v51  ;;  %1884 = vmatprep.mubr.msk.bf16.mxu0 %vm2069_vm1, %v2068_v2 }
 0x39d   : > { %1894 = vmatprep.subr.bf16.mxu0 %v2068_v2 }
 0x39e   : > { %v2019_v52 = vpop.eup %2018 }
 0x39f   : > { %v938_v53 = vmul.f32 %v2019_v52, %v2015_v41  ;;  %v2004_v52 = vld [vmem:[%s2238_s14 + $0x70] sm:$0xff]  }
 0x3a1   : > { %v939_v54 = vpack.c.bf16 %v938_v53, %v938_v53  ;;  %v2005_v53 = vld [vmem:[%s2238_s14 + $0x30] sm:$0xff]  }
 0x3a3   : > { %1885 = vmatmul.mubr.msk.bf16.vlgmr.msra.gmra.mrb[8].mxu0 %vm813_vm4, %v939_v54 }
 0x3a4   : > { %1896 = vmatprep.mubr.msk.bf16.mxu0 %vm2069_vm1, %v2068_v2  ;;  %1895 = vmatpush3.bf16.msra.mxu0 %v1988_v55 }
 0x3a5   : > { %1900 = vmatprep.subr.bf16.mxu0 %v2068_v2 }
 0x46e   : > { %v869_v57 = vpop.f32.mrb[4].mxu0 }
 0x46f   : > { %v875_v58 = vpack.c.bf16 %v869_v57, %v869_v57  ;;  %v1874_v59 = vpop.f32.mrb[5].mxu0 }
 0x470   : > { %v872_v60 = vpop.f32.mrb[6].mxu0 }
 0x471   : > { %v1875_v61 = vpop.f32.mrb[7].mxu0  ;;  %1897 = vmatmul.mubr.msk.bf16.vlgmr.msra.gmra.mrb[12].mxu0 %vm758_vm3, %v875_v58 }
 0x472   : > { %1904 = vmatprep.mubr.msk.bf16.mxu0 %vm2069_vm1, %v2068_v2  ;;  %1901 = vmatpush3.bf16.msra.mxu0 %v1990_v25 }
 0x473   : > { %1902 = vmatprep.subr.bf16.mxu0 %v2068_v2 }
 0x476   : > { %v982_v62 = vpop.f32.mrb[8].mxu0  ;;  %1903 = vmatpush3.bf16.msra.mxu0 %v1991_v26 }
 0x477   : > { %v988_v63 = vpack.c.bf16 %v982_v62, %v982_v62  ;;  %v1886_v0 = vpop.f32.mrb[9].mxu0  ;;  %1908 = vmatprep.subr.bf16.mxu0 %v2068_v2 }
 0x478   : > { %v985_v1 = vpop.f32.mrb[10].mxu0 }
 0x479   : > { %v1887_v3 = vpop.f32.mrb[11].mxu0  ;;  %1891 = vmatmul.mubr.msk.bf16.vlgmr.msra.gmra.mrb[8].mxu1 %vm758_vm3, %v988_v63 }
 0x47a   : > { %1827 = vmatpush3.bf16.msra.mxu1 %v1993_v28 }
 0x47b   : > { %1828 = vmatprep.subr.bf16.mxu1 %v1994_v29 }
 0x47e   : > { %1829 = vmatpush3.bf16.msra.mxu1 %v1995_v30 }
 0x47f   : > { %1830 = vmatprep.subr.bf16.mxu1 %v1996_v31 }
 0x482   : > { %1831 = vmatpush3.bf16.msra.mxu1 %v1997_v32 }
 0x483   : > { %1832 = vmatprep.subr.bf16.mxu1 %v1998_v33 }
 0x486   : > { %1833 = vmatpush3.bf16.msra.mxu1 %v1999_v34 }
 0x487   : > { %1834 = vmatprep.subr.bf16.mxu1 %v2000_v35 }
 0x48a   : > { %1835 = vmatpush3.bf16.msra.mxu1 %v2001_v36 }
 0x48b   : > { %1836 = vmatprep.subr.bf16.mxu1 %v2002_v47 }
 0x48e   : > { %1837 = vmatpush3.bf16.msra.mxu1 %v2003_v48 }
 0x48f   : > { %1838 = vmatprep.subr.bf16.mxu1 %v2004_v52 }
 0x492   : > { %1839 = vmatpush3.bf16.msra.mxu1 %v2005_v53 }
 0x544   : > { %v1081_v5 = vpop.f32.mrb[12].mxu0 }
 0x545   : > { %v1898_v6 = vpop.f32.mrb[13].mxu0 }
 0x546   : > { %v1084_v7 = vpop.f32.mrb[14].mxu0  ;;  %v2006_v6 = vld [vmem:[%s2238_s14 + $0x78] sm:$0xff]  }
 0x547   : > { %v1899_v8 = vpop.f32.mrb[15].mxu0  ;;  %v2007_v7 = vld [vmem:[%s2238_s14 + $0x38] sm:$0xff]   ;;  %1840 = vmatprep.subr.bf16.mxu1 %v2006_v6 }
 0x548   : > { %1841 = vmatpush3.bf16.msra.mxu1 %v2007_v7 }
 0x54c   : > { %v1032_v9 = vpop.f32.mrb[8].mxu1 }
 0x54d   : > { %v1082_v11 = vadd.f32 %v1081_v5, %v1032_v9  ;;  %v1892_v12 = vpop.f32.mrb[9].mxu1 }
 0x54e   : > { %v1035_v13 = vpop.f32.mrb[10].mxu1 }
 0x54f   : > { %v1094_v14 = vadd.f32 %v1777_v10, %v1082_v11  ;;  %v1893_v15 = vpop.f32.mrb[11].mxu1 }
 0x551   : > { %v1095_v16 = vadd.f32 %v1094_v14, %v2258_v4 }
 0x553   : > { %v1097_v17 = vsel %vm706_vm2, %v1095_v16, 0.0 }
 0x554   : > { %1098 = vadd.xlane.f32.xlu1 %v1097_v17 }
 0x565   : > { %1118 = vrot.lane.b32.xlu1 %v1778_v19, %s2071_s22 }
 0x5e1   : > { %v1099_v20 = vpop.xlane.xlu1 %1098 }
 0x5e2   : > { %v1101_v21 = vmul.f32 0.03125, %v1099_v20 }
 0x5e4   : > { %v1102_v22 = vsub.f32 %v1095_v16, %v1101_v21 }
 0x5e5   : > { %v1119_v42 = vpop.permute.xlu1 %1118 }
 0x5e6   : > { %v1103_v4 = vmul.f32 %v1102_v22, %v1102_v22 }
 0x5e8   : > { %v1104_v23 = vsel %vm706_vm2, %v1103_v4, 0.0 }
 0x5e9   : > { %1105 = vadd.xlane.f32.xlu0 %v1104_v23 }
 0x5ff   : > { %1124 = vperm.xlu0 %1970, %v680_v24  }
 0x676   : > { %v1106_v37 = vpop.xlane.xlu0 %1105 }
 0x677   : > { %v1107_v38 = vmul.f32 0.03125, %v1106_v37 }
 0x679   : > { %v1108_v39 = vadd.f32 1e-05, %v1107_v38 }
 0x67b   : > { %2020 = vrsqrt.f32 %v1108_v39  ;;  %v2008_v39 = vld [vmem:[%s2243_s2] sm:$0xff]  }
 0x67e   : > { %v2345_v44 = vpop.permute.xlu0 %1124 }
 0x685   : > { %v2021_v40 = vpop.eup %2020 }
 0x686   : > { %v1110_v41 = vmul.f32 %v2021_v40, %v1102_v22  ;;  %v2009_v40 = vld [vmem:[%s2243_s2 + $0x8] sm:$0xff]  }
 0x688   : > { %v1117_v43 = vmul.f32 %v1778_v19, %v1110_v41  ;;  %v2010_v41 = vld [vmem:[%s2243_s2 + $0x10] sm:$0xff]  }
 0x68a   : > { %v1121_v45 = vadd.f32 %v1119_v42, %v1117_v43  ;;  %v2011_v42 = vld [vmem:[%s2243_s2 + $0x18] sm:$0xff]  }
 0x68c   : > { %v2348_v46 = vmul.f32 %v2345_v44, %v1121_v45  ;;  %v1779_v45 = vld [vmem:[%s658_s20] ss:$0 sm:$0xff] }
 0x68e   : > { %v1175_v49 = vrot.slane %v2348_v46, 4 }
 0x690   : > { %v1177_v50 = vsel %vm831_vm5, 0.0, %v1175_v49  ;;  %v1178_v51 = vsel %vm831_vm5, %v1175_v49, 0.0 }
 0x691   : > { %v1237_v54 = vpack.c.bf16 %v1178_v51, %v1178_v51  ;;  %v1182_v55 = vrot.slane %v1177_v50, 1  ;;  %v1183_v56 = vrot.slane %v1178_v51, 1  ;;  %v1207_v57 = vrot.slane %v1177_v50, 5 }
 0x692   : > { %v1208_v58 = vrot.slane %v1178_v51, 5  ;;  %v1189_v59 = vrot.slane %v1177_v50, 2  ;;  %v1190_v60 = vrot.slane %v1178_v51, 2  ;;  %v1214_v61 = vrot.slane %v1177_v50, 6 }
 0x693   : > { %1905 = vmatmul.mubr.msk.bf16.vlgmr.msra.gmra.mrb[16].mxu0 %vm706_vm2, %v1237_v54  ;;  %v1184_v62 = vsel %vm1181_vm6, %v1182_v55, %v1183_v56  ;;  %v1215_v63 = vrot.slane %v1178_v51, 6  ;;  %v1196_v3 = vrot.slane %v1177_v50, 3  ;;  %v1197_v5 = vrot.slane %v1178_v51, 3 }
 0x694   : > { %v1209_v0 = vsel %vm1206_vm7, %v1207_v57, %v1208_v58  ;;  %1916 = vmatprep.mubr.msk.bf16.mxu0 %vm2069_vm1, %v2068_v2  ;;  %v1191_v8 = vsel %vm1188_vm8, %v1189_v59, %v1190_v60  ;;  %v1221_v10 = vrot.slane %v1177_v50, 7  ;;  %v1222_v11 = vrot.slane %v1178_v51, 7  ;;  %1909 = vmatpush3.bf16.msra.mxu0 %v2008_v39 }
 0x695   : > { %v1971_v1 = vpack.i.bf16 %v1184_v62, %v1209_v0  ;;  %v1216_v9 = vsel %vm1213_vm9, %v1214_v61, %v1215_v63  ;;  %v1198_v13 = vsel %vm1195_vm10, %v1196_v3, %v1197_v5  ;;  %v1202_v17 = vrot.slane %v1177_v50, 4  ;;  %1910 = vmatprep.subr.bf16.mxu0 %v2068_v2  ;;  %v1799_v62 = vld [vmem:[%s666_s25] ss:$0 sm:$0xff] }
 0x696   : > { %v1976_v12 = vpack.i.bf16 %v1191_v8, %v1216_v9  ;;  %v1223_v14 = vsel %vm1220_vm11, %v1221_v10, %v1222_v11  ;;  %v1203_v18 = vrot.slane %v1178_v51, 4  ;;  %v1805_v8 = vld [vmem:[%s2467_s26] ss:$0 sm:$0xff] }
 0x697   : > { %1972 = vrot.lane.b32.xlu1 %v1971_v1, %s2076_s24  ;;  %v1981_v15 = vpack.i.bf16 %v1198_v13, %v1223_v14 }
 0x698   : > { %v1204_v23 = vsel %vm831_vm5, %v1202_v17, %v1203_v18  ;;  %1911 = vmatpush3.bf16.msra.mxu0 %v2009_v40 }
 0x699   : > { %1912 = vmatprep.subr.bf16.mxu0 %v2068_v2 }
 0x69b   : > { %1977 = vrot.lane.b32.xlu1 %v1976_v12, %s2073_s30 }
 0x69c   : > { %1913 = vmatpush3.bf16.msra.mxu0 %v2010_v41 }
 0x69d   : > { %1914 = vmatprep.subr.bf16.mxu0 %v2068_v2 }
 0x69f   : > { %1982 = vrot.lane.b32.xlu1 %v1981_v15, %s2071_s22 }
 0x6a0   : > { %1915 = vmatpush3.bf16.msra.mxu0 %v2011_v42 }
 0x709   : > { %v1973_v16 = vpop.permute.xlu1 %1972 }
 0x70a   : > { %v1975_v20 = vunpack.i.h.bf16 %v1973_v16  ;;  %v1974_v21 = vunpack.i.l.bf16 %v1973_v16 }
 0x70c   : > { %v1227_v25 = vsel %vm706_vm2, %v1177_v50, %v1975_v20  ;;  %v1232_v26 = vsel %vm706_vm2, %v1204_v23, %v1974_v21 }
 0x70d   : > { %v1978_v19 = vpop.permute.xlu1 %1977 }
 0x70e   : > { %v1980_v22 = vunpack.i.h.bf16 %v1978_v19  ;;  %v1979_v4 = vunpack.i.l.bf16 %v1978_v19 }
 0x710   : > { %v1229_v29 = vsel %vm1228_vm12, %v1227_v25, %v1980_v22  ;;  %v1233_v30 = vsel %vm1228_vm12, %v1232_v26, %v1979_v4 }
 0x711   : > { %v1983_v24 = vpop.permute.xlu1 %1982 }
 0x712   : > { %v1985_v27 = vunpack.i.h.bf16 %v1983_v24  ;;  %v1984_v28 = vunpack.i.l.bf16 %v1983_v24 }
 0x714   : > { %v1231_v31 = vsel %vm1230_vm13, %v1229_v29, %v1985_v27  ;;  %v1234_v32 = vsel %vm1230_vm13, %v1233_v30, %v1984_v28 }
 0x715   : > { %v1235_v33 = vpack.c.bf16 %v1231_v31, %v1231_v31  ;;  %v1236_v34 = vpack.c.bf16 %v1234_v32, %v1234_v32 }
 0x717   : > { %1387 = vmatprep.mubr.bf16.mxu1 %v1236_v34 }
 0x718   : > { %1388 = vmatmul.mubr.bf16.vlgmr.msra.gmra.mrb[12].mxu1 %v1235_v33 }
 0x766   : > { %v1429_v35 = vpop.f32.mrb[16].mxu0 }
 0x767   : > { %v1906_v36 = vpop.f32.mrb[17].mxu0 }
 0x768   : > { %v1432_v37 = vpop.f32.mrb[18].mxu0 }
 0x769   : > { %v1907_v38 = vpop.f32.mrb[19].mxu0 }
 0x7eb   : > { %v1842_v43 = vpop.f32.mrb[12].mxu1 }
 0x7ec   : > { %v1843_v47 = vpop.f32.mrb[13].mxu1 }
 0x7ed   : > { %v1844_v48 = vadd.f32 %v1843_v47, %v1842_v43  ;;  %v1845_v49 = vpop.f32.mrb[14].mxu1 }
 0x7ee   : > { %v1846_v50 = vpop.f32.mrb[15].mxu1 }
 0x7ef   : > { %v1390_v51 = vadd.f32 %v1844_v48, %v1779_v45 }
 0x7f1   : > { %v1430_v52 = vadd.f32 %v1429_v35, %v1390_v51 }
 0x7f3   : > { %v1435_v53 = vmin.f32 %v1430_v52, 20.0 }
 0x7f5   : > { %v1436_v54 = vmul.f32 1.442695, %v1435_v53 }
 0x7f7   : > { %2022 = vpow2.f32 %v1436_v54 }
 0x801   : > { %v2023_v55 = vpop.eup %2022 }
 0x802   : > { %v1438_v2 = vadd.f32 2.0, %v2023_v55 }
 0x804   : > { %v1439_v56 = vmul.f32 %v2023_v55, %v1438_v2 }
 0x806   : > { %v1441_v57 = vadd.f32 2.0, %v1439_v56  ;;  %v1440_v58 = vmul.f32 %v1439_v56, %v1430_v52 }
 0x808   : > { %2024 = vrcp.f32 %v1441_v57 }
 0x812   : > { %v2025_v59 = vpop.eup %2024 }
 0x813   : > { %v1443_v60 = vmul.f32 %v2025_v59, %v1440_v58 }
 0x815   : > { %v1444_v61 = vpack.c.bf16 %v1443_v60, %v1443_v60 }
 0x817   : > { %1917 = vmatmul.mubr.msk.bf16.vlgmr.msra.gmra.mrb[20].mxu0 %vm1228_vm12, %v1444_v61 }
 0x8ea   : > { %v1512_v63 = vpop.f32.mrb[20].mxu0 }
 0x8eb   : > { %v1513_v0 = vadd.f32 %v1799_v62, %v1512_v63  ;;  %v1918_v1 = vpop.f32.mrb[21].mxu0 }
 0x8ec   : > { %v1515_v3 = vpop.f32.mrb[22].mxu0 }
 0x8ed   : > { %v1919_v5 = vpop.f32.mrb[23].mxu0  ;;  %v1518_v6 = vadd.f32 %v1513_v0, %v2348_v46 }
 0x8ef   : > { %v1520_v7 = vsel %vm706_vm2, %v1518_v6, 0.0 }
 0x8f0   : > { %1521 = vadd.xlane.f32.xlu1 %v1520_v7 }
 0x901   : > { %1540 = vrot.lane.b32.xlu1 %v1805_v8, %s2071_s22 }
 0x97d   : > { %v1522_v9 = vpop.xlane.xlu1 %1521 }
 0x97e   : > { %v1523_v10 = vmul.f32 0.03125, %v1522_v9 }
 0x980   : > { %v1524_v11 = vsub.f32 %v1518_v6, %v1523_v10 }
 0x981   : > { %v1541_v18 = vpop.permute.xlu1 %1540 }
 0x982   : > { %v1525_v12 = vmul.f32 %v1524_v11, %v1524_v11 }
 0x984   : > { %v1526_v13 = vsel %vm706_vm2, %v1525_v12, 0.0 }
 0x985   : > { %1527 = vadd.xlane.f32.xlu0 %v1526_v13 }
 0xa12   : > { %v1528_v14 = vpop.xlane.xlu0 %1527 }
 0xa13   : > { %v1529_v46 = vmul.f32 0.03125, %v1528_v14 }
 0xa15   : > { %v1530_v15 = vadd.f32 1e-05, %v1529_v46 }
 0xa17   : > { %2026 = vrsqrt.f32 %v1530_v15 }
 0xa21   : > { %v2027_v16 = vpop.eup %2026 }
 0xa22   : > { %v1532_v17 = vmul.f32 %v2027_v16, %v1524_v11 }
 0xa24   : > { %v1539_v19 = vmul.f32 %v1805_v8, %v1532_v17 }
 0xa26   : > { %v1543_v20 = vadd.f32 %v1541_v18, %v1539_v19 }
 0xa28   : > { %v1544_v21 = vmul.f32 %v1543_v20, %v2345_v44 }
 0xa2a   : > { %1545 = vst.msk [vmem:[#allocation2] sm:$0xff] %vm706_vm2, %v1544_v21  ;;  %1546 = vst.msk [vmem:[%s670_s19] sm:$0xff] %vm706_vm2, %v1544_v21 }
 0xa2b PF: > { %s2469_s22 = sld [smem:[#allocation6_spill]]  ;;  %s2470_s25 = sld [smem:[#allocation4_spill]] }
 0xa2c   : > { %s2471_s26 = sld [smem:[#allocation5_spill]]  ;;  %s2472_s27 = sld [smem:[#allocation7_spill]] }
 0xa2d   : > { %s2473_s28 = sld [smem:[#allocation8_spill]] }
 0xa31   : > { %s23_s29 = sadd.s32 1, %s2469_s22  }
 0xa32   : > { %p20_p8 = scmp.ge.s32.totalorder %s23_s29, 6  }
 0xa34   :  { %22 = sbr.rel (!%p20_p8) target bundleno = 7 (0x7), region = 142 }

// kernel: stylespeech_forward.11
= control target key start
LH: loop header
LB: loop body
LE: loop exit
PB: predicated region body
PF: predicated region fallthrough
CT: control target
= control target key end

     0   :  { %s811_s0 = inlined_call_operand.vmem [shape: s32[2,16], index: 0, kind: input, shape index: {}]   ;;  %s812_s1 = inlined_call_operand.vmem [shape: f32[2,8,32], index: 1, kind: input, shape index: {}]   ;;  %s813_s2 = inlined_call_operand.vmem [shape: f32[2,16,1], index: 2, kind: input, shape index: {}]   ;;  %s814_s3 = inlined_call_operand.vmem [shape: bf16[32,32], index: 3, kind: input, shape index: {}]   ;;  %s815_s4 = inlined_call_operand.vmem [shape: f32[1,32], index: 4, kind: input, shape index: {}]   ;;  %s816_s5 = inlined_call_operand.vmem [shape: bf16[32,3], index: 5, kind: input, shape index: {}]   ;;  %s817_s6 = inlined_call_operand.vmem [shape: f32[1,3], index: 6, kind: input, shape index: {}]   ;;  %s818_s7 = inlined_call_operand.vmem [shape: f32[2,16,32], index: 7, kind: output, shape index: {0}]   ;;  %s819_s8 = inlined_call_operand.vmem [shape: f32[2,8,3], index: 8, kind: output, shape index: {1}]  }
   0x1   :  { %s14_s29 = sshll.u32 %s811_s0, 4  ;;  %s15_s29 = int_to_ptr.vmem [resolvable:$true] %s14_s29 }
   0x2   :  { %s667_s30 = scalar_lea.vmem %s15_s29, 32  ;;  %p672_p1 = scmp.lt.s32.totalorder %s15_s29, %s15_s29 }
   0x3   :  { %p668_p0 = scmp.ne.s32.totalorder %s15_s29, %s667_s30  ;;  %p673_p2 = scmp.lt.s32.totalorder %s667_s30, %s667_s30 }
   0x5   :  { %p674_p3 = por %p673_p2, %p672_p1 }
   0x7   :  { %p675_p4 = pnand %p674_p3, %p668_p0 }
   0x9   :  { %678 = shalt.err (!%p675_p4)  }
   0xa   :  { %s697_s9 = smov [#allocation4]  }
   0xb   :  { %17 = dma.vmem_to_smem %s15_s29, 32, %s697_s9, [#allocation3] }
   0xc   :  { %687 = dma.done.wait [#allocation3], 32 }
   0xd   :  { %688 = vsyncadd [#allocation3], 4294967264 }
   0xe   :  { %19 = sfence }
   0xf   :  { %s749_s10 = smov 0  }
  0x10 LB: > { %s755_s0 = sadd.s32 4294967295, %s691_s10   ;;  %p600_p5 = scmp.ge.s32.totalorder %s691_s10, 1  ;;  %s691_s10 = sphi %s749_s10, %s25_s10  }
  0x11   : > { %p256_p6 = scmp.lt.s32.totalorder %s691_s10, 3 }
  0x13   : > { %p257_p7 = pnand %p600_p5, %p256_p6 }
  0x14   : > { %v662_v0 = vld [vmem:[%s814_s3] sm:$0xff] (!%p257_p7)   ;;  %v698_v1 = vmov (!%p257_p7), 0.0   ;;  %v663_v2 = vld [vmem:[%s814_s3 + $0x8] sm:$0xff] (!%p257_p7)   ;;  %vm699_vm0 = vmmov (!%p257_p7), 0   ;;  %p296_p8 = scmp.lt.s32.totalorder (!%p257_p7), %s755_s0, 1  ;;  %vm340_vm1 = vcmask (!%p257_p7), 261120  }
  0x15   : > { %260 = sbr.rel (%p257_p7) target bundleno = 607 (0x25f), region = 44  ;;  %626 = vmatprep.subr.bf16.mxu0 (!%p257_p7), %v698_v1  ;;  %634 = vmatprep.subr.bf16.mxu1 (!%p257_p7), %v698_v1  ;;  %v664_v3 = vld [vmem:[%s816_s5] sm:$0xff] (!%p257_p7)   ;;  %v665_v6 = vld [vmem:[%s816_s5 + $0x8] sm:$0xff] (!%p257_p7)   ;;  %vm452_vm2 = vcmask (!%p257_p7), 23552  }
  0x16   : > { %627 = vmatpush3.bf16.msra.mxu0 (!%p257_p7), %v662_v0  ;;  %630 = vmatprep.mubr.msk.bf16.mxu0 (!%p257_p7), %vm699_vm0, %v698_v1  ;;  %v607_v7 = vld [vmem:[%s815_s4] ss:$0 sm:$0xff] (!%p257_p7) }
  0x17   : > { %628 = vmatprep.subr.bf16.mxu0 (!%p257_p7), %v698_v1  ;;  %638 = vmatprep.mubr.msk.bf16.mxu1 (!%p257_p7), %vm699_vm0, %v698_v1  ;;  %v611_v14 = vld [vmem:[%s817_s6] ss:$0 sm:$0xff] (!%p257_p7) }
  0x18   : > { %635 = vmatpush3.bf16.msra.mxu1 (!%p257_p7), %v664_v3 }
  0x19   : > { %636 = vmatprep.subr.bf16.mxu1 (!%p257_p7), %v698_v1 }
  0x1a   : > { %629 = vmatpush3.bf16.msra.mxu0 (!%p257_p7), %v663_v2 }
  0x1c   : > { %s297_s17 = scalar_select %p296_p8, %s755_s0, 1  ;;  %637 = vmatpush3.bf16.msra.mxu1 %v665_v6 }
  0x1e   : > { %s601_s18 = sshll.u32 %s297_s17, 3  ;;  %s618_s19 = sshll.u32 %s297_s17, 4 }
  0x1f   : > { %s299_s22 = scalar_lea.vmem %s812_s1, %s601_s18  ;;  %s776_s25 = scalar_lea.vmem %s813_s2, %s618_s19 }
  0x20   : > { %s781_s28 = scalar_lea.vmem %s818_s7, %s618_s19  ;;  %v315_v4 = vld [vmem:[%s299_s22] sm:$0xff]  ;;  %s313_s16 = scalar_lea.vmem %s819_s8, %s601_s18 }
  0x21   : > { %v320_v5 = vpack.c.bf16 %v315_v4, %v315_v4  ;;  %s693_s17 = smov 0  }
  0x23   : > { %631 = vmatmul.mubr.msk.bf16.vlgmr.msra.gmra.mrb[0].mxu0 %vm340_vm1, %v320_v5 }
  0xf6   : > { %v378_v8 = vpop.f32.mrb[0].mxu0 }
  0xf7   : > { %v379_v9 = vadd.f32 %v607_v7, %v378_v8  ;;  %v632_v10 = vpop.f32.mrb[1].mxu0 }
  0xf8   : > { %v381_v11 = vpop.f32.mrb[2].mxu0 }
  0xf9   : > { %384 = vst.msk [vmem:[#allocation2] sm:$0xff] %vm340_vm1, %v379_v9  ;;  %v389_v12 = vpack.c.bf16 %v379_v9, %v379_v9  ;;  %v633_v13 = vpop.f32.mrb[3].mxu0 }
  0xfb   : > { %639 = vmatmul.mubr.msk.bf16.vlgmr.msra.gmra.mrb[0].mxu1 %vm340_vm1, %v389_v12 }
 0x1ce   : > { %v446_v15 = vpop.f32.mrb[0].mxu1 }
 0x1cf   : > { %v447_v16 = vadd.f32 %v611_v14, %v446_v15  ;;  %v640_v17 = vpop.f32.mrb[1].mxu1 }
 0x1d0   : > { %v449_v18 = vpop.f32.mrb[2].mxu1 }
 0x1d1   : > { %453 = vst.msk [vmem:[%s313_s16] sm:$0xff] %vm452_vm2, %v447_v16  ;;  %v641_v19 = vpop.f32.mrb[3].mxu1 }
 0x1d2 LB: >> { %s460_s19 = sshra.s32 %s695_s17, 7  ;;  %s465_s20 = sand.u32 127, %s695_s17  ;;  %vm471_vm3 = vcmask 253952   ;;  %s695_s17 = sphi %s693_s17, %s459_s17  }
 0x1d3   : >> { %s462_s21 = sadd.s32 %s755_s0, %s460_s19  ;;  %s470_s18 = scalar_lea.vmem %s781_s28, %s695_s17 }
 0x1d4   : >> { %s615_s22 = sshll.u32 %s462_s21, 7  ;;  %s459_s17 = sadd.s32 1, %s695_s17  }
 0x1d5   : >> { %s466_s23 = sadd.s32 %s615_s22, %s465_s20  ;;  %p456_p9 = scmp.ge.s32.totalorder %s459_s17, 16  }
 0x1d6   : >> { %s467_s24 = sld [smem:[#allocation4 + %s466_s23]]  ;;  %v475_v21 = vld [vmem:[%s776_s25] sm:$0xff] (%p456_p9)  ;;  %v700_v22 = vmov (%p456_p9), 0   ;;  %v476_v23 = vld [vmem:[%s776_s25 + $0x8] sm:$0xff] (%p456_p9) }
 0x1d7   : > { %666 = vset.pattern.permute.xlu0 (%p456_p9), %v700_v22 }
 0x1d8   : > { %458 = sbr.rel (!%p456_p9) target bundleno = 466 (0x1d2), region = 98  ;;  %479 = vperm.xlu0 (%p456_p9), %666, %v475_v21  }
 0x1dc   : >> { %s468_s26 = scalar_lea.vmem [#allocation2], %s467_s24  ;;  %484 = vperm.xlu0 (%p456_p9), %666, %v476_v23  }
 0x1dd   : >> { %v469_v20 = vld [vmem:[%s468_s26] sm:$0x1] }
 0x1de   : >> { %472 = vst.msk [vmem:[%s470_s18] sm:$0x1] %vm471_vm3, %v469_v20 }
 0x1e5   : > { %v473_v24 = vld [vmem:[%s781_s28] sm:$0xff]  ;;  %v474_v27 = vld [vmem:[%s781_s28 + $0x8] sm:$0xff] }
 0x257   : > { %v480_v25 = vpop.permute.xlu0 %479 }
 0x258   : > { %v487_v26 = vmul.f32 %v480_v25, %v473_v24 }
 0x25a   : > { %489 = vst.msk [vmem:[%s781_s28] sm:$0xff] %vm340_vm1, %v487_v26 }
 0x25b   : > { %v485_v28 = vpop.permute.xlu0 %484 }
 0x25c   : > { %v488_v29 = vmul.f32 %v485_v28, %v474_v27 }
 0x25e   : > { %490 = vst.msk [vmem:[%s781_s28 + $0x8] sm:$0xff] %vm340_vm1, %v488_v29 }
 0x25f PF: > { %s25_s10 = sadd.s32 1, %s691_s10  }
 0x260   : > { %p22_p10 = scmp.ge.s32.totalorder %s25_s10, 4  }
 0x262   :  { %24 = sbr.rel (!%p22_p10) target bundleno = 16 (0x10), region = 109 }

// kernel: stylespeech_forward.12
= control target key start
LH: loop header
LB: loop body
LE: loop exit
PB: predicated region body
PF: predicated region fallthrough
CT: control target
= control target key end

     0   :  { %s1101_s27 = smov 0   ;;  %s1213_s0 = inlined_call_operand.vmem [shape: f32[2,16,32], index: 0, kind: input, shape index: {}]   ;;  %s1214_s1 = inlined_call_operand.vmem [shape: f32[2,16,32], index: 1, kind: input, shape index: {}]   ;;  %s1215_s2 = inlined_call_operand.vmem [shape: bf16[32,32], index: 2, kind: input, shape index: {}]   ;;  %s1216_s3 = inlined_call_operand.vmem [shape: f32[1,32], index: 3, kind: input, shape index: {}]   ;;  %s1217_s4 = inlined_call_operand.vmem [shape: bf16[32,64], index: 4, kind: input, shape index: {}]   ;;  %s1218_s5 = inlined_call_operand.vmem [shape: f32[1,64], index: 5, kind: input, shape index: {}]   ;;  %s1219_s6 = inlined_call_operand.vmem [shape: bf16[32,32], index: 6, kind: input, shape index: {}]   ;;  %s1220_s7 = inlined_call_operand.vmem [shape: f32[1,32], index: 7, kind: input, shape index: {}]   ;;  %s1221_s8 = inlined_call_operand.vmem [shape: f32[2,16,32], index: 8, kind: output, shape index: {}]  }
   0x1 LB: > { %s905_s28 = sadd.s32 4294967295, %s1049_s27   ;;  %p909_p0 = scmp.ge.s32.totalorder %s1049_s27, 1  ;;  %s1049_s27 = sphi %s1101_s27, %s18_s27  }
   0x2   : > { %p272_p1 = scmp.lt.s32.totalorder %s1049_s27, 3 }
   0x4   : > { %p273_p2 = pnand %p909_p0, %p272_p1 }
   0x5   : > { %v1021_v0 = vld [vmem:[%s1217_s4] sm:$0xff] (!%p273_p2)   ;;  %v1051_v1 = vmov (!%p273_p2), 0.0   ;;  %v1022_v2 = vld [vmem:[%s1217_s4 + $0x8] sm:$0xff] (!%p273_p2)   ;;  %vm1052_vm0 = vmmov (!%p273_p2), 0   ;;  %p311_p3 = scmp.lt.s32.totalorder (!%p273_p2), %s905_s28, 1  ;;  %vm355_vm1 = vcmask (!%p273_p2), 261120  }
   0x6   : > { %276 = sbr.rel (%p273_p2) target bundleno = 1331 (0x533), region = 52  ;;  %964 = vmatprep.subr.bf16.mxu1 (!%p273_p2), %v1051_v1  ;;  %956 = vmatprep.subr.bf16.mxu0 (!%p273_p2), %v1051_v1  ;;  %v1023_v3 = vld [vmem:[%s1215_s2] sm:$0xff] (!%p273_p2)   ;;  %v1024_v4 = vld [vmem:[%s1215_s2 + $0x8] sm:$0xff] (!%p273_p2)   ;;  %vm474_vm2 = vcmask (!%p273_p2), 130048   ;;  %s1053_s26 = smov (!%p273_p2), 112  }
   0x7   : > { %965 = vmatpush3.bf16.msra.mxu1 (!%p273_p2), %v1021_v0  ;;  %968 = vmatprep.mubr.msk.bf16.mxu1 (!%p273_p2), %vm1052_vm0, %v1051_v1  ;;  %v916_v11 = vld [vmem:[%s1216_s3] ss:$0 sm:$0xff] (!%p273_p2)  ;;  %s1055_s29 = smov (!%p273_p2), 96  }
   0x8   : > { %966 = vmatprep.subr.bf16.mxu1 (!%p273_p2), %v1051_v1  ;;  %960 = vmatprep.mubr.msk.bf16.mxu0 (!%p273_p2), %vm1052_vm0, %v1051_v1  ;;  %v920_v12 = vld [vmem:[%s1218_s5] ss:$0 sm:$0xff] (!%p273_p2) }
   0x9   : > { %957 = vmatpush3.bf16.msra.mxu0 (!%p273_p2), %v1023_v3 }
   0xa   : > { %958 = vmatprep.subr.bf16.mxu0 (!%p273_p2), %v1051_v1 }
   0xb   : > { %967 = vmatpush3.bf16.msra.mxu1 (!%p273_p2), %v1022_v2 }
   0xc   : > { %978 = vmatprep.subr.bf16.mxu1 (!%p273_p2), %v1051_v1 }
   0xd   : > { %s1223_s28 = smov (!%p311_p3, %s905_s28), 1  ;;  %959 = vmatpush3.bf16.msra.mxu0 %v1024_v4 }
   0xe   : > { %s1129_s15 = sshll.u32 %s1223_s28, 4  ;;  %972 = vmatprep.subr.bf16.mxu0 %v1051_v1  ;;  %s1054_s28 = smov 80  }
   0xf   : > { %s320_s18 = scalar_lea.vmem %s1214_s1, %s1129_s15  ;;  %s315_s21 = scalar_lea.vmem %s1213_s0, %s1129_s15 }
  0x10   : > { %v329_v5 = vld [vmem:[%s320_s18] sm:$0xff]  ;;  %v330_v6 = vld [vmem:[%s320_s18 + $0x8] sm:$0xff]  ;;  %s325_s17 = scalar_lea.vmem %s1221_s8, %s1129_s15 }
  0x11   : > { %v1140_v7 = vld [vmem:[%s315_s21] sm:$0xff]  ;;  %v404_v8 = vpack.c.bf16 %v330_v6, %v329_v5  ;;  %v1142_v9 = vld [vmem:[%s315_s21 + $0x8] sm:$0xff] }
  0x12   : > { %v335_v10 = vpack.c.bf16 %v1142_v9, %v1140_v7 }
  0x13   : > { %969 = vmatmul.mubr.msk.bf16.vlgmr.msra.gmra.mrb[0].mxu1 %vm355_vm1, %v404_v8 }
  0x14   : > { %961 = vmatmul.mubr.msk.bf16.vlgmr.msra.gmra.mrb[0].mxu0 %vm355_vm1, %v335_v10  ;;  %980 = vmatprep.mubr.msk.bf16.mxu1 %vm1052_vm0, %v1051_v1 }
  0x15   : > { %974 = vmatprep.mubr.msk.bf16.mxu0 %vm1052_vm0, %v1051_v1 }
  0xe6   : > { %v461_v13 = vpop.f32.mrb[0].mxu1 }
  0xe7   : > { %v970_v14 = vpop.f32.mrb[1].mxu1  ;;  %v393_v15 = vpop.f32.mrb[0].mxu0  ;;  %v462_v19 = vadd.f32 %v920_v12, %v461_v13 }
  0xe8   : > { %v464_v16 = vpop.f32.mrb[2].mxu1  ;;  %v394_v17 = vadd.f32 %v916_v11, %v393_v15  ;;  %v962_v18 = vpop.f32.mrb[1].mxu0 }
  0xe9   : > { %v465_v20 = vadd.f32 %v920_v12, %v464_v16  ;;  %v971_v21 = vpop.f32.mrb[3].mxu1  ;;  %v396_v22 = vpop.f32.mrb[2].mxu0 }
  0xea   : > { %v397_v23 = vadd.f32 %v916_v11, %v396_v22  ;;  %v963_v24 = vpop.f32.mrb[3].mxu0  ;;  %v1025_v22 = vld [vmem:[%s1219_s6] sm:$0xff]  }
  0xeb   : > { %v1159_v25 = vpack.c.bf16 %v465_v20, %v462_v19 }
  0xec   : > { %v472_v26 = vpack.c.bf16 %v397_v23, %v394_v17  ;;  %v1026_v23 = vld [vmem:[%s1219_s6 + $0x8] sm:$0xff]  }
  0xed   : > { %601 = vrot.lane.b32.xlu0 %v1159_v25, %s1053_s26  ;;  %v479_v27 = vsel %vm474_vm2, %v1159_v25, 0 }
  0xee   : > { %973 = vmatpush3.bf16.xpose.msra.mxu0 %v479_v27 }
  0xef   : > { %984 = vmatprep.subr.bf16.mxu0 %v1051_v1 }
  0xf1   : > { %599 = vrot.lane.b32.xlu0 %v472_v26, %s1053_s26 }
  0xf5   : > { %975 = vmatmul.mubr.msk.bf16.vlgmr.msra.gmra.mrb[4].mxu0 %vm474_vm2, %v472_v26 }
  0xf6   : > { %986 = vmatprep.mubr.msk.bf16.mxu0 %vm1052_vm0, %v1051_v1 }
 0x15f   : > { %v602_v28 = vpop.permute.xlu0 %601 }
 0x160   : > { %v607_v29 = vsel %vm474_vm2, %v602_v28, 0 }
 0x161   : > { %985 = vmatpush3.bf16.xpose.msra.mxu0 %v607_v29 }
 0x162   : > { %996 = vmatprep.subr.bf16.mxu0 %v1051_v1 }
 0x163   : > { %v600_v30 = vpop.permute.xlu0 %599 }
 0x168   : > { %987 = vmatmul.mubr.msk.bf16.vlgmr.msra.gmra.mrb[8].mxu0 %vm474_vm2, %v600_v30 }
 0x169   : > { %998 = vmatprep.mubr.msk.bf16.mxu0 %vm1052_vm0, %v1051_v1  ;;  %997 = vmatpush3.bf16.msra.mxu0 %v1026_v23 }
 0x1c8   : > { %v515_v31 = vpop.f32.mrb[4].mxu0 }
 0x1c9   : > { %v522_v32 = vmul.f32 0.25, %v515_v31  ;;  %v976_v33 = vpop.f32.mrb[5].mxu0 }
 0x1ca   : > { %v518_v34 = vpop.f32.mrb[6].mxu0 }
 0x1cb   : > { %v523_v35 = vmul.f32 0.25, %v518_v34  ;;  %v977_v36 = vpop.f32.mrb[7].mxu0  ;;  %v526_v37 = vsel %vm474_vm2, %v522_v32, -inf }
 0x1cc   : > { %527 = vmax.xlane.f32.xlu1 %v526_v37 }
 0x1cd   : > { %v529_v38 = vsel %vm474_vm2, %v523_v35, -inf }
 0x1d0   : > { %530 = vmax.xlane.f32.xlu1 %v529_v38  ;;  %v932_v38 = vld [vmem:[%s1220_s7] ss:$0 sm:$0xff] }
 0x23b   : > { %v643_v39 = vpop.f32.mrb[8].mxu0 }
 0x23c   : > { %v650_v40 = vmul.f32 0.25, %v643_v39  ;;  %v988_v41 = vpop.f32.mrb[9].mxu0 }
 0x23d   : > { %v646_v42 = vpop.f32.mrb[10].mxu0 }
 0x23e   : > { %v651_v43 = vmul.f32 0.25, %v646_v42  ;;  %v989_v44 = vpop.f32.mrb[11].mxu0  ;;  %v654_v45 = vsel %vm474_vm2, %v650_v40, -inf }
 0x23f   : > { %655 = vmax.xlane.f32.xlu0 %v654_v45 }
 0x240   : > { %v657_v46 = vsel %vm474_vm2, %v651_v43, -inf }
 0x241   : > { %658 = vmax.xlane.f32.xlu1 %v657_v46 }
 0x255   : > { %677 = vrot.lane.b32.xlu0 %v1159_v25, %s1054_s28 }
 0x259   : > { %v528_v47 = vpop.xlane.xlu1 %527 }
 0x25a   : > { %v532_v48 = vsub.f32 %v522_v32, %v528_v47 }
 0x25c   : > { %v534_v49 = vmul.f32 1.442695, %v532_v48 }
 0x25d   : > { %v531_v50 = vpop.xlane.xlu1 %530 }
 0x25e   : > { %1027 = vpow2.f32 %v534_v49  ;;  %v533_v51 = vsub.f32 %v523_v35, %v531_v50 }
 0x260   : > { %v536_v52 = vmul.f32 1.442695, %v533_v51 }
 0x262   : > { %1029 = vpow2.f32 %v536_v52 }
 0x268   : > { %v1028_v53 = vpop.eup %1027 }
 0x269   : > { %v538_v54 = vsel %vm474_vm2, %v1028_v53, 0.0 }
 0x26a   : > { %539 = vadd.xlane.f32.xlu1 %v538_v54 }
 0x26c   : > { %v1030_v55 = vpop.eup %1029 }
 0x26d   : > { %v541_v56 = vsel %vm474_vm2, %v1030_v55, 0.0 }
 0x26e   : > { %542 = vadd.xlane.f32.xlu1 %v541_v56 }
 0x2cc   : > { %v656_v57 = vpop.xlane.xlu0 %655 }
 0x2cd   : > { %v660_v58 = vsub.f32 %v650_v40, %v656_v57 }
 0x2ce   : > { %v659_v59 = vpop.xlane.xlu1 %658 }
 0x2cf   : > { %v662_v60 = vmul.f32 1.442695, %v660_v58  ;;  %v661_v61 = vsub.f32 %v651_v43, %v659_v59 }
 0x2d0   : > { %v678_v16 = vpop.permute.xlu0 %677 }
 0x2d1   : > { %1031 = vpow2.f32 %v662_v60  ;;  %v664_v62 = vmul.f32 1.442695, %v661_v61 }
 0x2d3   : > { %1033 = vpow2.f32 %v664_v62 }
 0x2db   : > { %v1032_v63 = vpop.eup %1031 }
 0x2dc   : > { %v666_v0 = vsel %vm474_vm2, %v1032_v63, 0.0 }
 0x2dd   : > { %v1034_v2 = vpop.eup %1033  ;;  %667 = vadd.xlane.f32.xlu1 %v666_v0 }
 0x2de   : > { %v669_v3 = vsel %vm474_vm2, %v1034_v2, 0.0 }
 0x2e1   : > { %670 = vadd.xlane.f32.xlu1 %v669_v3 }
 0x2f2   : > { %550 = vrot.lane.b32.xlu1 %v1159_v25, %s1055_s29 }
 0x2f7   : > { %v540_v4 = vpop.xlane.xlu1 %539 }
 0x2fb   : > { %v543_v5 = vpop.xlane.xlu1 %542 }
 0x2fc   : > { %1035 = vrcp.f32 %v543_v5 }
 0x2fd   : > { %1037 = vrcp.f32 %v540_v4 }
 0x306   : > { %v1036_v8 = vpop.eup %1035 }
 0x307   : > { %v1038_v11 = vpop.eup %1037  ;;  %v547_v12 = vmul.f32 %v1036_v8, %v1030_v55 }
 0x308   : > { %v546_v13 = vmul.f32 %v1038_v11, %v1028_v53 }
 0x30a   : > { %v548_v15 = vpack.c.bf16 %v547_v12, %v546_v13 }
 0x36a   : > { %v668_v6 = vpop.xlane.xlu1 %667 }
 0x36b   : > { %1039 = vrcp.f32 %v668_v6 }
 0x36e   : > { %v671_v10 = vpop.xlane.xlu1 %670 }
 0x36f   : > { %1041 = vrcp.f32 %v671_v10 }
 0x372   : > { %v551_v14 = vpop.permute.xlu1 %550 }
 0x373   : > { %979 = vmatpush3.bf16.msra.mxu1 %v551_v14 }
 0x374   : > { %990 = vmatprep.subr.bf16.mxu1 %v1051_v1 }
 0x375   : > { %v1040_v17 = vpop.eup %1039 }
 0x376   : > { %981 = vmatmul.mubr.msk.bf16.vlgmr.msra.gmra.mrb[4].mxu1 %vm474_vm2, %v548_v15  ;;  %v674_v19 = vmul.f32 %v1040_v17, %v1032_v63 }
 0x377   : > { %991 = vmatpush3.bf16.msra.mxu1 %v678_v16  ;;  %992 = vmatprep.mubr.msk.bf16.mxu1 %vm1052_vm0, %v1051_v1 }
 0x378   : > { %1002 = vmatprep.subr.bf16.mxu1 %v1051_v1 }
 0x379   : > { %v1042_v18 = vpop.eup %1041 }
 0x37a   : > { %v675_v20 = vmul.f32 %v1042_v18, %v1034_v2 }
 0x37c   : > { %v676_v21 = vpack.c.bf16 %v675_v20, %v674_v19 }
 0x37e   : > { %993 = vmatmul.mubr.msk.bf16.vlgmr.msra.gmra.mrb[8].mxu1 %vm474_vm2, %v676_v21 }
 0x37f   : > { %1004 = vmatprep.mubr.msk.bf16.mxu1 %vm1052_vm0, %v1051_v1  ;;  %1003 = vmatpush3.bf16.msra.mxu1 %v1025_v22 }
 0x449   : > { %v590_v24 = vpop.f32.mrb[4].mxu1 }
 0x44a   : > { %v982_v25 = vpop.f32.mrb[5].mxu1 }
 0x44b   : > { %v593_v26 = vpop.f32.mrb[6].mxu1 }
 0x44c   : > { %v597_v27 = vpack.c.bf16 %v593_v26, %v590_v24  ;;  %v983_v28 = vpop.f32.mrb[7].mxu1 }
 0x44e   : > { %1005 = vmatmul.mubr.msk.bf16.vlgmr.msra.gmra.mrb[12].mxu1 %vm474_vm2, %v597_v27 }
 0x451   : > { %v717_v29 = vpop.f32.mrb[8].mxu1 }
 0x452   : > { %v994_v30 = vpop.f32.mrb[9].mxu1 }
 0x453   : > { %v720_v1 = vpop.f32.mrb[10].mxu1 }
 0x454   : > { %v724_v31 = vpack.c.bf16 %v720_v1, %v717_v29  ;;  %v995_v32 = vpop.f32.mrb[11].mxu1 }
 0x456   : > { %999 = vmatmul.mubr.msk.bf16.vlgmr.msra.gmra.mrb[12].mxu0 %vm474_vm2, %v724_v31 }
 0x521   : > { %v818_v33 = vpop.f32.mrb[12].mxu1 }
 0x522   : > { %v1006_v34 = vpop.f32.mrb[13].mxu1 }
 0x523   : > { %v821_v35 = vpop.f32.mrb[14].mxu1 }
 0x524   : > { %v1007_v36 = vpop.f32.mrb[15].mxu1 }
 0x529   : > { %v768_v37 = vpop.f32.mrb[12].mxu0 }
 0x52a   : > { %v819_v39 = vadd.f32 %v818_v33, %v768_v37  ;;  %v1000_v40 = vpop.f32.mrb[13].mxu0 }
 0x52b   : > { %v771_v41 = vpop.f32.mrb[14].mxu0 }
 0x52c   : > { %v832_v42 = vadd.f32 %v932_v38, %v819_v39  ;;  %v822_v43 = vadd.f32 %v821_v35, %v771_v41  ;;  %v1001_v44 = vpop.f32.mrb[15].mxu0 }
 0x52e   : > { %v834_v45 = vadd.f32 %v832_v42, %v1140_v7  ;;  %v833_v46 = vadd.f32 %v932_v38, %v822_v43 }
 0x530   : > { %836 = vst.msk [vmem:[%s325_s17] sm:$0xff] %vm355_vm1, %v834_v45  ;;  %v835_v47 = vadd.f32 %v833_v46, %v1142_v9 }
 0x532   : > { %837 = vst.msk [vmem:[%s325_s17 + $0x8] sm:$0xff] %vm355_vm1, %v835_v47 }
 0x533 PF: > { %s18_s27 = sadd.s32 1, %s1049_s27  }
 0x534   : > { %p15_p4 = scmp.ge.s32.totalorder %s18_s27, 4  }
 0x536   :  { %17 = sbr.rel (!%p15_p4) target bundleno = 1 (0x1), region = 85 }

// kernel: stylespeech_forward.13
= control target key start
LH: loop header
LB: loop body
LE: loop exit
PB: predicated region body
PF: predicated region fallthrough
CT: control target
= control target key end

     0   :  { %s569_s21 = smov 0   ;;  %s617_s0 = inlined_call_operand.vmem [shape: f32[2,16,32], index: 0, kind: input, shape index: {}]   ;;  %s618_s1 = inlined_call_operand.vmem [shape: f32[16,32], index: 1, kind: input, shape index: {}]   ;;  %s619_s2 = inlined_call_operand.vmem [shape: bf16[32,16], index: 2, kind: input, shape index: {}]   ;;  %s620_s3 = inlined_call_operand.vmem [shape: f32[1,16], index: 3, kind: input, shape index: {}]   ;;  %s621_s4 = inlined_call_operand.vmem [shape: bf16[16,32], index: 4, kind: input, shape index: {}]   ;;  %s622_s5 = inlined_call_operand.vmem [shape: f32[1,32], index: 5, kind: input, shape index: {}]   ;;  %s623_s6 = inlined_call_operand.vmem [shape: f32[2,16,32], index: 6, kind: output, shape index: {}]  }
   0x1 LB: > { %s464_s22 = sadd.s32 4294967295, %s530_s21   ;;  %p468_p0 = scmp.ge.s32.totalorder %s530_s21, 1  ;;  %s530_s21 = sphi %s569_s21, %s16_s21  }
   0x2   : > { %p212_p1 = scmp.lt.s32.totalorder %s530_s21, 3 }
   0x4   : > { %p213_p2 = pnand %p468_p0, %p212_p1 }
   0x5   : > { %v513_v0 = vld [vmem:[%s619_s2] sm:$0xff] (!%p213_p2)   ;;  %v532_v1 = vmov (!%p213_p2), 0.0   ;;  %v514_v2 = vld [vmem:[%s619_s2 + $0x8] sm:$0xff] (!%p213_p2)   ;;  %vm533_vm0 = vmmov (!%p213_p2), 0   ;;  %p242_p3 = scmp.lt.s32.totalorder (!%p213_p2), %s464_s22, 1  ;;  %vm279_vm1 = vcmask (!%p213_p2), 261120  }
   0x6   : > { %216 = sbr.rel (%p213_p2) target bundleno = 490 (0x1ea), region = 44  ;;  %489 = vmatprep.subr.bf16.mxu0 (!%p213_p2), %v532_v1  ;;  %497 = vmatprep.subr.bf16.mxu1 (!%p213_p2), %v532_v1  ;;  %v515_v6 = vld [vmem:[%s621_s4] sm:$0xff] (!%p213_p2)   ;;  %vm358_vm2 = vcmask (!%p213_p2), 130048   ;;  %v404_v39 = vld [vmem:[%s618_s1 + $0x8] sm:$0xff] (!%p213_p2) }
   0x7   : > { %490 = vmatpush3.bf16.msra.mxu0 (!%p213_p2), %v513_v0  ;;  %493 = vmatprep.mubr.msk.bf16.mxu0 (!%p213_p2), %vm533_vm0, %v532_v1  ;;  %v473_v7 = vld [vmem:[%s620_s3] ss:$0 sm:$0xff] (!%p213_p2) }
   0x8   : > { %491 = vmatprep.subr.bf16.mxu0 (!%p213_p2), %v532_v1  ;;  %499 = vmatprep.mubr.msk.bf16.mxu1 (!%p213_p2), %vm533_vm0, %v532_v1  ;;  %v477_v33 = vld [vmem:[%s622_s5] ss:$0 sm:$0xff] (!%p213_p2) }
   0x9   : > { %498 = vmatpush3.bf16.msra.mxu1 (!%p213_p2), %v515_v6  ;;  %v403_v35 = vld [vmem:[%s618_s1] sm:$0xff] (!%p213_p2) }
   0xb   : > { %492 = vmatpush3.bf16.msra.mxu0 (!%p213_p2), %v514_v2 }
   0xd   : > { %s625_s22 = smov (!%p242_p3, %s464_s22), 1 }
   0xe   : > { %s482_s27 = sshll.u32 %s625_s22, 4 }
   0xf   : > { %s246_s30 = scalar_lea.vmem %s617_s0, %s482_s27  ;;  %s251_s17 = scalar_lea.vmem %s623_s6, %s482_s27 }
  0x10   : > { %v253_v3 = vld [vmem:[%s246_s30] sm:$0xff]  ;;  %v254_v4 = vld [vmem:[%s246_s30 + $0x8] sm:$0xff] }
  0x11   : > { %v259_v5 = vpack.c.bf16 %v254_v4, %v253_v3 }
  0x13   : > { %494 = vmatmul.mubr.msk.bf16.vlgmr.msra.gmra.mrb[0].mxu0 %vm279_vm1, %v259_v5 }
  0xe6   : > { %v317_v8 = vpop.f32.mrb[0].mxu0 }
  0xe7   : > { %v318_v9 = vadd.f32 %v473_v7, %v317_v8  ;;  %v495_v10 = vpop.f32.mrb[1].mxu0 }
  0xe8   : > { %v320_v11 = vpop.f32.mrb[2].mxu0 }
  0xe9   : > { %v324_v12 = vmin.f32 %v318_v9, 20.0  ;;  %v321_v13 = vadd.f32 %v473_v7, %v320_v11  ;;  %v496_v14 = vpop.f32.mrb[3].mxu0 }
  0xeb   : > { %v326_v15 = vmul.f32 1.442695, %v324_v12  ;;  %v325_v16 = vmin.f32 %v321_v13, 20.0 }
  0xed   : > { %516 = vpow2.f32 %v326_v15  ;;  %v328_v17 = vmul.f32 1.442695, %v325_v16 }
  0xef   : > { %518 = vpow2.f32 %v328_v17 }
  0xf7   : > { %v517_v18 = vpop.eup %516 }
  0xf8   : > { %v330_v19 = vadd.f32 2.0, %v517_v18 }
  0xf9   : > { %v519_v20 = vpop.eup %518 }
  0xfa   : > { %v332_v21 = vmul.f32 %v517_v18, %v330_v19  ;;  %v331_v22 = vadd.f32 2.0, %v519_v20 }
  0xfc   : > { %v336_v23 = vadd.f32 2.0, %v332_v21  ;;  %v333_v24 = vmul.f32 %v519_v20, %v331_v22  ;;  %v334_v27 = vmul.f32 %v332_v21, %v318_v9 }
  0xfe   : > { %520 = vrcp.f32 %v336_v23  ;;  %v337_v25 = vadd.f32 2.0, %v333_v24  ;;  %v335_v28 = vmul.f32 %v333_v24, %v321_v13 }
 0x100   : > { %522 = vrcp.f32 %v337_v25 }
 0x108   : > { %v521_v26 = vpop.eup %520 }
 0x109   : > { %v340_v30 = vmul.f32 %v521_v26, %v334_v27 }
 0x10a   : > { %v523_v29 = vpop.eup %522 }
 0x10b   : > { %v341_v31 = vmul.f32 %v523_v29, %v335_v28 }
 0x10d   : > { %v344_v32 = vpack.c.bf16 %v341_v31, %v340_v30 }
 0x10f   : > { %500 = vmatmul.mubr.msk.bf16.vlgmr.msra.gmra.mrb[0].mxu1 %vm358_vm2, %v344_v32 }
 0x1e2   : > { %v396_v34 = vpop.f32.mrb[0].mxu1 }
 0x1e3   : > { %v397_v36 = vadd.f32 %v477_v33, %v396_v34  ;;  %v501_v37 = vpop.f32.mrb[1].mxu1 }
 0x1e4   : > { %v399_v38 = vpop.f32.mrb[2].mxu1 }
 0x1e5   : > { %v405_v40 = vadd.f32 %v403_v35, %v397_v36  ;;  %v400_v41 = vadd.f32 %v477_v33, %v399_v38  ;;  %v502_v42 = vpop.f32.mrb[3].mxu1 }
 0x1e7   : > { %407 = vst.msk [vmem:[%s251_s17] sm:$0xff] %vm279_vm1, %v405_v40  ;;  %v406_v43 = vadd.f32 %v404_v39, %v400_v41 }
 0x1e9   : > { %408 = vst.msk [vmem:[%s251_s17 + $0x8] sm:$0xff] %vm279_vm1, %v406_v43 }
 0x1ea PF: > { %s16_s21 = sadd.s32 1, %s530_s21  }
 0x1eb   : > { %p13_p4 = scmp.ge.s32.totalorder %s16_s21, 4  }
 0x1ed   :  { %15 = sbr.rel (!%p13_p4) target bundleno = 1 (0x1), region = 74 }

// kernel: stylespeech_forward.15
= control target key start
LH: loop header
LB: loop body
LE: loop exit
PB: predicated region body
PF: predicated region fallthrough
CT: control target
= control target key end

     0   :  { %10 = vsyncpa [#allocation3], 0  ;;  %s757_s0 = inlined_call_operand.vmem [shape: f32[2,16,32], index: 0, kind: input, shape index: {}]   ;;  %s758_s1 = inlined_call_operand.vmem [shape: bf16[32,32], index: 1, kind: input, shape index: {}]   ;;  %s759_s2 = inlined_call_operand.vmem [shape: f32[1,32], index: 2, kind: input, shape index: {}]   ;;  %s760_s3 = inlined_call_operand.vmem [shape: bf16[32,16], index: 3, kind: input, shape index: {}]   ;;  %s761_s4 = inlined_call_operand.vmem [shape: f32[1,16], index: 4, kind: input, shape index: {}]   ;;  %s762_s5 = inlined_call_operand.hbm [shape: f32[2,16,16], index: 5, kind: output, shape index: {}]  }
   0x1   :  { %12 = vsyncpa [#allocation3 + $0x1], 0  ;;  %s634_s18 = smov 0   ;;  %s636_s19 = smov 0  }
   0x2   :  { %s638_s20 = smov 0   ;;  %s640_s21 = smov 0  }
   0x3 LB: > { %s655_s22 = sadd.s32 4294967295, %s597_s21   ;;  %s444_s23 = sadd.s32 4294967294, %s597_s21   ;;  %s597_s21 = sphi %s640_s21, %s768_s21   ;;  %s593_s20 = sphi %s638_s20, %s767_s20   ;;  %s589_s19 = sphi %s636_s19, %s766_s19   ;;  %s585_s18 = sphi %s634_s18, %s765_s18  }
   0x4   : > { %s659_s24 = sadd.s32 1, %s597_s21   ;;  %s135_s25 = sadd.s32 1, %s593_s20 }
   0x5   : > { %s132_s26 = ssub.s32 %s597_s21, %s659_s24  ;;  %p145_p0 = scmp.ne.s32.totalorder %s593_s20, %s589_s19 }
   0x6   : > { %p133_p1 = scmp.eq.s32.totalorder %s132_s26, 0  ;;  %p146_p2 = scmp.eq.s32.totalorder %s655_s22, 1 }
   0x7   : > { %p151_p3 = scmp.ne.s32.totalorder %s589_s19, %s585_s18  ;;  %p152_p4 = scmp.eq.s32.totalorder %s444_s23, 1 }
   0x8   : > { %s670_s27 = scalar_select %p133_p1, %s593_s20, %s135_s25  }
   0x9   : > { %p672_p5 = por %p146_p2, %p145_p0  ;;  %p676_p6 = por %p152_p4, %p151_p3 }
   0xa   : > { %p447_p7 = scmp.ge.s32.totalorder %s597_s21, 1  ;;  %p190_p8 = scmp.lt.s32.totalorder %s597_s21, 3 }
   0xc   : > { %p191_p9 = pnand %p447_p7, %p190_p8 }
   0xd   : > { %v531_v0 = vld [vmem:[%s758_s1] sm:$0xff] (!%p191_p9)   ;;  %v599_v1 = vmov (!%p191_p9), 0.0   ;;  %v532_v2 = vld [vmem:[%s758_s1 + $0x8] sm:$0xff] (!%p191_p9)   ;;  %vm600_vm0 = vmmov (!%p191_p9), 0   ;;  %p218_p10 = scmp.lt.s32.totalorder (!%p191_p9), %s655_s22, 1  ;;  %vm250_vm1 = vcmask (!%p191_p9), 261120  }
   0xe   : > { %194 = sbr.rel (%p191_p9) target bundleno = 479 (0x1df), region = 40  ;;  %472 = vmatprep.subr.bf16.mxu0 (!%p191_p9), %v599_v1  ;;  %480 = vmatprep.subr.bf16.mxu1 (!%p191_p9), %v599_v1  ;;  %v533_v6 = vld [vmem:[%s760_s3] sm:$0xff] (!%p191_p9)   ;;  %v534_v7 = vld [vmem:[%s760_s3 + $0x8] sm:$0xff] (!%p191_p9)   ;;  %s215_s26 = sand.u32 (!%p191_p9), 1, %s589_s19   ;;  %vm365_vm2 = vcmask (!%p191_p9), 130048  }
   0xf   : > { %473 = vmatpush3.bf16.msra.mxu0 (!%p191_p9), %v531_v0  ;;  %476 = vmatprep.mubr.msk.bf16.mxu0 (!%p191_p9), %vm600_vm0, %v599_v1  ;;  %v451_v8 = vld [vmem:[%s759_s2] ss:$0 sm:$0xff] (!%p191_p9)  ;;  %s448_s30 = sshll.u32 (!%p191_p9), %s215_s26, 4  ;;  %s601_s15 = smov (!%p191_p9), [#allocation2]  }
  0x10   : > { %474 = vmatprep.subr.bf16.mxu0 (!%p191_p9), %v599_v1  ;;  %484 = vmatprep.mubr.msk.bf16.mxu1 (!%p191_p9), %vm600_vm0, %v599_v1  ;;  %v455_v18 = vld [vmem:[%s761_s4] ss:$0 sm:$0xff] (!%p191_p9)  ;;  %s217_s8 = scalar_lea.vmem (!%p191_p9), [#allocation2], %s448_s30  ;;  %s539_s16 = sshll.u32 (!%p191_p9), %s601_s15, 4  ;;  %s540_s16 = int_to_ptr.vmem [resolvable:$false] %s539_s16 }
  0x11   : > { %481 = vmatpush3.bf16.msra.mxu1 (!%p191_p9), %v533_v6  ;;  %s541_s17 = scalar_lea.vmem (!%p191_p9), %s540_s16, 512 }
  0x12   : > { %482 = vmatprep.subr.bf16.mxu1 (!%p191_p9), %v599_v1 }
  0x13   : > { %475 = vmatpush3.bf16.msra.mxu0 (!%p191_p9), %v532_v2 }
  0x15   : > { %s219_s9 = scalar_select %p218_p10, %s655_s22, 1  ;;  %483 = vmatpush3.bf16.msra.mxu1 %v534_v7 }
  0x17   : > { %s464_s10 = sshll.u32 %s219_s9, 4  ;;  %s382_s9 = sshll.u32 %s217_s8, 4  ;;  %s709_s9 = int_to_ptr.vmem [resolvable:$true] %s382_s9 }
  0x18   : > { %s222_s13 = scalar_lea.vmem %s757_s0, %s464_s10  ;;  %s465_s10 = sshll.u32 %s655_s22, 8 }
  0x19   : > { %v224_v3 = vld [vmem:[%s222_s13] sm:$0xff]  ;;  %v225_v4 = vld [vmem:[%s222_s13 + $0x8] sm:$0xff]  ;;  %s714_s13 = scalar_lea.hbm %s762_s5, %s465_s10  ;;  %s716_s22 = scalar_lea.sflag [#allocation3], %s215_s26 }
  0x1a   : > { %v230_v5 = vpack.c.bf16 %v225_v4, %v224_v3  ;;  %s535_s14 = scalar_lea.vmem %s709_s9, 256  ;;  %p542_p0 = scmp.lt.s32.totalorder %s709_s9, %s540_s16 }
  0x1b   : > { %p536_p11 = scmp.ne.s32.totalorder %s709_s9, %s535_s14  ;;  %p543_p1 = scmp.lt.s32.totalorder %s541_s17, %s535_s14 }
  0x1c   : > { %477 = vmatmul.mubr.msk.bf16.vlgmr.msra.gmra.mrb[0].mxu0 %vm250_vm1, %v230_v5 }
  0x1d   : > { %p537_p12 = pnand %p536_p11, %p672_p5  ;;  %p544_p2 = por %p543_p1, %p542_p0 }
  0x1f   : > { %p538_p13 = pneg %p537_p12 }
  0x21   : > { %p545_p3 = pnand %p544_p2, %p538_p13 }
  0xef   : > { %v288_v9 = vpop.f32.mrb[0].mxu0 }
  0xf0   : > { %v289_v10 = vadd.f32 %v451_v8, %v288_v9  ;;  %v478_v11 = vpop.f32.mrb[1].mxu0 }
  0xf1   : > { %v291_v12 = vpop.f32.mrb[2].mxu0 }
  0xf2   : > { %v292_v13 = vadd.f32 %v451_v8, %v291_v12  ;;  %v479_v14 = vpop.f32.mrb[3].mxu0  ;;  %v295_v15 = vmax.f32 %v289_v10, 0.0 }
  0xf4   : > { %v296_v16 = vmax.f32 %v292_v13, 0.0 }
  0xf6   : > { %v301_v17 = vpack.c.bf16 %v296_v16, %v295_v15 }
  0xf8   : > { %485 = vmatmul.mubr.msk.bf16.vlgmr.msra.gmra.mrb[0].mxu1 %vm250_vm1, %v301_v17 }
 0x1cb   : > { %v358_v19 = vpop.f32.mrb[0].mxu1 }
 0x1cc   : > { %v359_v20 = vadd.f32 %v455_v18, %v358_v19  ;;  %v486_v21 = vpop.f32.mrb[1].mxu1 }
 0x1cd   : > { %v361_v22 = vpop.f32.mrb[2].mxu1 }
 0x1ce   : > { %366 = vst.msk [vmem:[%s217_s8] sm:$0xff] %vm365_vm2, %v359_v20  ;;  %v362_v23 = vadd.f32 %v455_v18, %v361_v22  ;;  %v487_v24 = vpop.f32.mrb[3].mxu1 }
 0x1d0   : > { %367 = vst.msk [vmem:[%s217_s8 + $0x8] sm:$0xff] %vm365_vm2, %v362_v23 }
 0x1d1   : > { %548 = shalt.err (!%p545_p3)
}
 0x1d2   : > { %s549_s23 = scalar_lea.hbm %s714_s13, 256  ;;  %s553_s30 = scalar_lea.hbm %s762_s5, 512 }
 0x1d3   : > { %p550_p4 = scmp.ne.s32.totalorder %s714_s13, %s549_s23  ;;  %p554_p9 = scmp.lt.u32.totalorder %s714_s13, %s762_s5 }
 0x1d4   : > { %p555_p10 = scmp.lt.u32.totalorder %s553_s30, %s549_s23  ;;  %p557_p12 = scmp.lt.u32.totalorder %s549_s23, %s714_s13 }
 0x1d5   : > { %p551_p7 = pnand %p550_p4, %p672_p5 }
 0x1d6   : > { %p556_p11 = por %p555_p10, %p554_p9 }
 0x1d7   : > { %p552_p8 = pneg %p551_p7 }
 0x1d8   : > { %p558_p13 = por %p557_p12, %p556_p11 }
 0x1da   : > { %p559_p0 = pnand %p558_p13, %p552_p8 }
 0x1dc   : > { %562 = shalt.err (!%p559_p0)
}
 0x1dd   : > { %s602_s8 = smov 128   ;;  %s603_s10 = smov 8  }
 0x1de   : > { %488 = dma.vmem_to_hbm [thread:$0]  (%p672_p5), %s709_s9, 256, %s714_s13, %s716_s22, %s602_s8, %s602_s8, %s603_s10  }
 0x1df PF: > { %p494_p1 = scmp.ge.s32.totalorder %s597_s21, 2  ;;  %s397_s11 = sand.u32 1, %s585_s18  }
 0x1e0   : > { %s398_s12 = scalar_lea.sflag [#allocation3], %s397_s11 }
 0x1e1   : > { %p491_p2 = pnand %p494_p1, %p676_p6 }
 0x1e3   : > { %580 = dma.done.wait (!%p491_p2), %s398_s12, 256  }
 0x1e4   : > { %582 = vsyncadd (!%p491_p2), %s398_s12, 4294967040  ;;  %p15_p3 = scmp.ge.s32.totalorder %s659_s24, 4   ;;  %s765_s18 = smov %s589_s19 }
 0x1e5   : > { %s766_s19 = smov %s593_s20  ;;  %s767_s20 = smov %s670_s27 }
 0x1e6   : > { %s768_s21 = smov %s659_s24  ;;  %17 = sbr.rel (!%p15_p3) target bundleno = 3 (0x3), region = 75 }
 0x1ed   :  { %403 = vsyncpa [#allocation3], 1 }
 0x1ee   :  { %405 = vsyncpa [#allocation3 + $0x1], 1 }

// kernel: stylespeech_forward.14
= control target key start
LH: loop header
LB: loop body
LE: loop exit
PB: predicated region body
PF: predicated region fallthrough
CT: control target
= control target key end

     0   :  { %s2629_s21 = smov 0   ;;  %s2631_s22 = smov 0   ;;  %s2989_s0 = inlined_call_operand.vmem [shape: f32[2,16,32], index: 0, kind: input, shape index: {}]   ;;  %s2990_s1 = inlined_call_operand.vmem [shape: f32[2,16,32], index: 1, kind: input, shape index: {}]   ;;  %s2991_s2 = inlined_call_operand.vmem [shape: f32[2,16,1], index: 2, kind: input, shape index: {}]   ;;  %s2992_s3 = inlined_call_operand.vmem [shape: f32[2,1,16], index: 3, kind: input, shape index: {}]   ;;  %s2993_s4 = inlined_call_operand.vmem [shape: f32[2,4,1,64], index: 4, kind: input, shape index: {}]   ;;  %s2994_s5 = inlined_call_operand.vmem [shape: f32[2,4,1,64], index: 5, kind: input, shape index: {}]   ;;  %s2995_s6 = inlined_call_operand.vmem [shape: bf16[4,32,32], index: 6, kind: input, shape index: {}]   ;;  %s2996_s7 = inlined_call_operand.vmem [shape: f32[4,1,32], index: 7, kind: input, shape index: {}]   ;;  %s2997_s8 = inlined_call_operand.vmem [shape: bf16[4,32,64], index: 8, kind: input, shape index: {}]   ;;  %s2998_s9 = inlined_call_operand.vmem [shape: f32[4,1,64], index: 9, kind: input, shape index: {}]   ;;  %s2999_s10 = inlined_call_operand.vmem [shape: bf16[4,32,32], index: 10, kind: input, shape index: {}]   ;;  %s3000_s11 = inlined_call_operand.vmem [shape: f32[4,1,32], index: 11, kind: input, shape index: {}]   ;;  %s3001_s12 = inlined_call_operand.vmem [shape: bf16[4,288,64], index: 12, kind: input, shape index: {}]   ;;  %s3002_s13 = inlined_call_operand.vmem [shape: f32[4,1,64], index: 13, kind: input, shape index: {}]   ;;  %s3003_s14 = inlined_call_operand.vmem [shape: bf16[4,64,32], index: 14, kind: input, shape index: {}]   ;;  %s3004_s15 = inlined_call_operand.vmem [shape: f32[4,1,32], index: 15, kind: input, shape index: {}]   ;;  %s3005_s16 = inlined_call_operand.vmem [shape: f32[2,4,16,32], index: 16, kind: output, shape index: {}]  }
   0x1   :  { %3014 = sst [smem:[#allocation12_spill]] %s2989_s0  ;;  %s2633_s23 = smov 0  }
   0x2   :  { %3015 = sst [smem:[#allocation13_spill]] %s2990_s1  ;;  %s2635_s24 = smov 0  }
   0x3   :  { %3016 = sst [smem:[#allocation14_spill]] %s2991_s2  ;;  %s2637_s25 = smov 0  }
   0x4   :  { %3017 = sst [smem:[#allocation15_spill]] %s2992_s3 }
   0x5   :  { %3018 = sst [smem:[#allocation16_spill]] %s2993_s4 }
   0x6   :  { %3019 = sst [smem:[#allocation17_spill]] %s2994_s5 }
   0x7   :  { %3020 = sst [smem:[#allocation18_spill]] %s2995_s6 }
   0x8   :  { %3021 = sst [smem:[#allocation19_spill]] %s2997_s8 }
   0x9   :  { %3022 = sst [smem:[#allocation20_spill]] %s2999_s10 }
   0xa   :  { %3023 = sst [smem:[#allocation21_spill]] %s3002_s13 }
   0xb   :  { %3024 = sst [smem:[#allocation22_spill]] %s3003_s14 }
   0xc   :  { %3025 = sst [smem:[#allocation23_spill]] %s3005_s16 }
   0xd LB: > { %3026 = sst [smem:[#allocation3_spill]] %s2518_s21  ;;  %s35_s26 = sadd.s32 1, %s2526_s23  ;;  %s2534_s25 = sphi %s2637_s25, %s26_s25   ;;  %s2530_s24 = sphi %s2635_s24, %s3066_s24   ;;  %s2526_s23 = sphi %s2633_s23, %s3065_s23   ;;  %s2522_s22 = sphi %s2631_s22, %s3064_s22   ;;  %s2518_s21 = sphi %s2629_s21, %s3063_s21  }
   0xe   : > { %3027 = sst [smem:[#allocation4_spill]] %s2526_s23  ;;  %s38_s27 = sadd.s32 1, %s2530_s24 }
   0xf   : > { %3028 = sst [smem:[#allocation5_spill]] %s2530_s24  ;;  %p36_p0 = scmp.ge.s32.totalorder %s35_s26, 4 }
  0x10   : > { %3029 = sst [smem:[#allocation6_spill]] %s2534_s25  ;;  %p2158_p1 = scmp.ge.s32.totalorder %s2534_s25, 1 }
  0x11   : > { %p622_p2 = scmp.lt.s32.totalorder %s2534_s25, 9  ;;  %s3068_s26 = smov (%p36_p0, %s35_s26), 0 }
  0x12   : > { %3030 = sst [smem:[#allocation7_spill]] %s3068_s26  ;;  %s3070_s27 = smov (!%p36_p0, %s38_s27), %s2530_s24 }
  0x13   : > { %p623_p3 = pnand %p2158_p1, %p622_p2  ;;  %p40_p4 = scmp.ge.s32.totalorder %s3070_s27, 2 }
  0x15   : > { %s3072_s27 = smov (%p40_p4, %s3070_s27), 0  ;;  %626 = sbr.rel (%p623_p3) target bundleno = 2638 (0xa4e), region = 84 }
  0x16   : > { %3031 = sst [smem:[#allocation8_spill]] %s3072_s27 }
  0x1c   : > { %p743_p5 = scmp.lt.s32.totalorder %s2522_s22, 1  ;;  %p763_p6 = scmp.lt.s32.totalorder %s2518_s21, 3 }
  0x1d   : > { %s3033_s20 = sld [smem:[#allocation12_spill]]  ;;  %s3034_s1 = sld [smem:[#allocation13_spill]] }
  0x1e   : > { %s3074_s22 = smov (!%p743_p5, %s2522_s22), 1  ;;  %s3036_s2 = sld [smem:[#allocation14_spill]] }
  0x1f   : > { %s2665_s28 = scalar_select %p763_p6, %s2518_s21, 3 }
  0x20   : > { %s2228_s29 = sshll.u32 %s3074_s22, 4  ;;  %s2165_s30 = sshll.u32 %s3074_s22, 2 }
  0x21   : > { %s2687_s0 = sadd.s32 %s2165_s30, %s2665_s28  ;;  %s2231_s18 = sshll.u32 %s2665_s28, 4 }
  0x22   : > { %3038 = sst [smem:[#allocation11_spill]] %s2687_s0  ;;  %s3041_s6 = sld [smem:[#allocation18_spill]] }
  0x23   : > { %s747_s27 = scalar_lea.vmem %s3033_s20, %s2228_s29  ;;  %s2678_s23 = scalar_lea.vmem %s3034_s1, %s2228_s29 }
  0x24   : > { %3035 = sst [smem:[#allocation9_spill]] %s2678_s23  ;;  %s2683_s16 = scalar_lea.vmem %s3036_s2, %s2228_s29 }
  0x25   : > { %3037 = sst [smem:[#allocation10_spill]] %s2683_s16  ;;  %s3042_s8 = sld [smem:[#allocation19_spill]] }
  0x26   : > { %s3043_s10 = sld [smem:[#allocation20_spill]]  ;;  %s2234_s3 = sshll.u32 %s2665_s28, 5 }
  0x27   : > { %s814_s19 = scalar_lea.vmem %s3004_s15, %s2665_s28  ;;  %s2176_s25 = sshll.u32 %s2665_s28, 1 }
  0x28   : > { %s2701_s29 = scalar_lea.vmem %s3041_s6, %s2231_s18  ;;  %s2355_s6 = smul.u32 144, %s2665_s28 }
  0x29   : > { %s2177_s1 = sshll.u32 %s3074_s22, 3  ;;  %s3046_s13 = sld [smem:[#allocation23_spill]] }
  0x2a   : > { %s2736_s4 = scalar_lea.vmem %s3001_s12, %s2355_s6  ;;  %s821_s5 = sadd.s32 %s2177_s1, %s2176_s25 }
  0x2b   : > { %s787_s14 = scalar_lea.vmem %s3042_s8, %s2231_s18  ;;  %s2178_s2 = sshll.u32 %s821_s5, 3 }
  0x2c   : > { %s2717_s26 = scalar_lea.vmem %s3043_s10, %s2231_s18  ;;  %s3045_s10 = sld [smem:[#allocation22_spill]] }
  0x2d   : > { %s3047_s8 = sld [smem:[#allocation3_spill]] }
  0x2f   : > { %s2748_s0 = scalar_lea.vmem %s3046_s13, %s2178_s2 }
  0x32   : > { %s2741_s21 = scalar_lea.vmem %s3045_s10, %s2234_s3 }
  0x33   : > { %p2179_p7 = scmp.ne.s32.totalorder %s3047_s8, 0 }
  0x34   : > { %v829_v0 = vld [vmem:[%s747_s27] sm:$0xff] (!%p2179_p7)  ;;  %vm831_vm0 = vcmask (!%p2179_p7), 261120   ;;  %v830_v1 = vld [vmem:[%s747_s27 + $0x8] sm:$0xff] (!%p2179_p7) }
  0x35   : > { %828 = sbr.rel (%p2179_p7) target bundleno = 60 (0x3c), region = 88  ;;  %832 = vst.msk [vmem:[#allocation2] sm:$0xff] (!%p2179_p7), %vm831_vm0, %v829_v0  ;;  %833 = vst.msk [vmem:[#allocation2 + $0x8] sm:$0xff] (!%p2179_p7), %vm831_vm0, %v830_v1 }
  0x3c PF: > { %v2436_v2 = vld [vmem:[%s787_s14] sm:$0xff]   ;;  %s3048_s6 = sld [smem:[#allocation9_spill]]  ;;  %v2536_v3 = vmov 0.0   ;;  %v2437_v4 = vld [vmem:[%s787_s14 + $0x8] sm:$0xff]   ;;  %vm2537_vm1 = vmmov 0   ;;  %vm865_vm2 = vcmask 261120   ;;  %s3049_s10 = scalar_lea.vmem %s2998_s9, %s2665_s28 }
  0x3d   : > { %2291 = vmatprep.subr.bf16.mxu1 %v2536_v3  ;;  %2283 = vmatprep.subr.bf16.mxu0 %v2536_v3  ;;  %v2438_v5 = vld [vmem:[%s2701_s29] sm:$0xff]   ;;  %v2439_v8 = vld [vmem:[%s2701_s29 + $0x8] sm:$0xff]   ;;  %s3050_s16 = scalar_lea.vmem %s2996_s7, %s2665_s28  ;;  %vm984_vm3 = vcmask 130048   ;;  %s2538_s27 = smov 112   ;;  %vm1453_vm4 = vcmask 1043456   ;;  %vm1507_vm5 = vcmask 1042432  }
  0x3e   : > { %2292 = vmatpush3.bf16.msra.mxu1 %v2436_v2  ;;  %2295 = vmatprep.mubr.msk.bf16.mxu1 %vm2537_vm1, %v2536_v3  ;;  %v2762_v9 = vld [vmem:[#allocation2] sm:$0xff]  ;;  %v2765_v11 = vld [vmem:[#allocation2 + $0x8] sm:$0xff]  ;;  %s3051_s3 = sld [smem:[#allocation15_spill]]  ;;  %s2540_s20 = smov 96   ;;  %vm1464_vm6 = vcmask 1046528   ;;  %vm1519_vm7 = vcmask 1041408  }
  0x3f   : > { %2293 = vmatprep.subr.bf16.mxu1 %v2536_v3  ;;  %2287 = vmatprep.mubr.msk.bf16.mxu0 %vm2537_vm1, %v2536_v3  ;;  %v845_v12 = vpack.c.bf16 %v2765_v11, %v2762_v9  ;;  %v2184_v13 = vld [vmem:[%s3049_s10] ss:$0 sm:$0xff]  ;;  %s3054_s25 = scalar_lea.vmem %s3000_s11, %s2665_s28  ;;  %s3055_s2 = sld [smem:[#allocation11_spill]]  ;;  %vm1476_vm8 = vcmask 1045504   ;;  %vm1531_vm9 = vcmask 1040384   ;;  %vm1488_vm10 = vcmask 1044480  }
  0x40   : > { %2284 = vmatpush3.bf16.msra.mxu0 %v2438_v5  ;;  %v2180_v15 = vld [vmem:[%s3050_s16] ss:$0 sm:$0xff]  ;;  %s2542_s5 = smov 32   ;;  %s2543_s10 = smov 64   ;;  %vm1545_vm11 = vcmask 523264   ;;  %vm1548_vm12 = vcmask 785408  }
  0x41   : > { %2285 = vmatprep.subr.bf16.mxu0 %v2536_v3  ;;  %s3058_s14 = sld [smem:[#allocation21_spill]]  ;;  %s3060_s24 = sld [smem:[#allocation17_spill]] }
  0x42   : > { %v836_v6 = vld [vmem:[%s3048_s6] sm:$0xff]  ;;  %v837_v7 = vld [vmem:[%s3048_s6 + $0x8] sm:$0xff]  ;;  %2294 = vmatpush3.bf16.msra.mxu1 %v2437_v4  ;;  %s3056_s6 = sld [smem:[#allocation16_spill]] }
  0x43   : > { %v914_v10 = vpack.c.bf16 %v837_v7, %v836_v6  ;;  %2305 = vmatprep.subr.bf16.mxu1 %v2536_v3 }
  0x44   : > { %2286 = vmatpush3.bf16.msra.mxu0 %v2439_v8  ;;  %s3052_s23 = scalar_lea.vmem %s3051_s3, %s3074_s22  ;;  %s2539_s22 = smov 80  }
  0x45   : > { %2296 = vmatmul.mubr.msk.bf16.vlgmr.msra.gmra.mrb[0].mxu1 %vm865_vm2, %v914_v10  ;;  %2299 = vmatprep.subr.bf16.mxu0 %v2536_v3  ;;  %v2189_v34 = vld [vmem:[%s3052_s23] ss:$0 sm:$0xff] }
  0x46   : > { %2307 = vmatprep.mubr.msk.bf16.mxu1 %vm2537_vm1, %v2536_v3 }
  0x47   : > { %2288 = vmatmul.mubr.msk.bf16.vlgmr.msra.gmra.mrb[0].mxu0 %vm865_vm2, %v845_v12  ;;  %s3059_s16 = scalar_lea.vmem %s3058_s14, %s2665_s28  ;;  %s3061_s29 = scalar_lea.vmem %s3060_s24, %s3055_s2 }
  0x48   : > { %2301 = vmatprep.mubr.msk.bf16.mxu0 %vm2537_vm1, %v2536_v3  ;;  %s3057_s1 = scalar_lea.vmem %s3056_s6, %s3055_s2 }
 0x118   : > { %v971_v14 = vpop.f32.mrb[0].mxu1 }
 0x119   : > { %v2297_v16 = vpop.f32.mrb[1].mxu1  ;;  %v972_v19 = vadd.f32 %v2184_v13, %v971_v14 }
 0x11a   : > { %v974_v17 = vpop.f32.mrb[2].mxu1  ;;  %v903_v18 = vpop.f32.mrb[0].mxu0 }
 0x11b   : > { %v975_v20 = vadd.f32 %v2184_v13, %v974_v17  ;;  %v2298_v21 = vpop.f32.mrb[3].mxu1  ;;  %v904_v22 = vadd.f32 %v2180_v15, %v903_v18  ;;  %v2289_v23 = vpop.f32.mrb[1].mxu0 }
 0x11c   : > { %v906_v24 = vpop.f32.mrb[2].mxu0 }
 0x11d   : > { %v2787_v25 = vpack.c.bf16 %v975_v20, %v972_v19  ;;  %v907_v26 = vadd.f32 %v2180_v15, %v906_v24  ;;  %v2290_v27 = vpop.f32.mrb[3].mxu0 }
 0x11f   : > { %1117 = vrot.lane.b32.xlu0 %v2787_v25, %s2538_s27  ;;  %v982_v28 = vpack.c.bf16 %v907_v26, %v904_v22  ;;  %v989_v29 = vsel %vm984_vm3, %v2787_v25, 0 }
 0x120   : > { %2300 = vmatpush3.bf16.xpose.msra.mxu0 %v989_v29  ;;  %v2440_v29 = vld [vmem:[%s2717_s26] sm:$0xff]  }
 0x121   : > { %2311 = vmatprep.subr.bf16.mxu0 %v2536_v3 }
 0x123   : > { %1115 = vrot.lane.b32.xlu0 %v982_v28, %s2538_s27 }
 0x127   : > { %2302 = vmatmul.mubr.msk.bf16.vlgmr.msra.gmra.mrb[4].mxu0 %vm984_vm3, %v982_v28 }
 0x128   : > { %2313 = vmatprep.mubr.msk.bf16.mxu0 %vm2537_vm1, %v2536_v3 }
 0x191   : > { %v1118_v30 = vpop.permute.xlu0 %1117 }
 0x192   : > { %v1123_v31 = vsel %vm984_vm3, %v1118_v30, 0  ;;  %v2441_v30 = vld [vmem:[%s2717_s26 + $0x8] sm:$0xff]   ;;  %s3053_s26 = sld [smem:[#allocation10_spill]] }
 0x193   : > { %2312 = vmatpush3.bf16.xpose.msra.mxu0 %v1123_v31 }
 0x194   : > { %2323 = vmatprep.subr.bf16.mxu0 %v2536_v3 }
 0x195   : > { %v1116_v32 = vpop.permute.xlu0 %1115 }
 0x19a   : > { %2314 = vmatmul.mubr.msk.bf16.vlgmr.msra.gmra.mrb[8].mxu0 %vm984_vm3, %v1116_v32 }
 0x19b   : > { %2325 = vmatprep.mubr.msk.bf16.mxu0 %vm2537_vm1, %v2536_v3  ;;  %2324 = vmatpush3.bf16.msra.mxu0 %v2441_v30 }
 0x1fa   : > { %v1025_v33 = vpop.f32.mrb[4].mxu0 }
 0x1fb   : > { %v1032_v35 = vmul.f32 0.25, %v1025_v33  ;;  %v2303_v36 = vpop.f32.mrb[5].mxu0 }
 0x1fc   : > { %v1028_v37 = vpop.f32.mrb[6].mxu0 }
 0x1fd   : > { %v1033_v38 = vmul.f32 0.25, %v1028_v37  ;;  %v2304_v39 = vpop.f32.mrb[7].mxu0  ;;  %v1040_v40 = vadd.f32 %v2189_v34, %v1032_v35 }
 0x1ff   : > { %v1042_v41 = vsel %vm984_vm3, %v1040_v40, -inf  ;;  %v1041_v42 = vadd.f32 %v2189_v34, %v1033_v38 }
 0x200   : > { %1043 = vmax.xlane.f32.xlu1 %v1042_v41  ;;  %v2541_v41 = vmov 0  }
 0x201   : > { %v1045_v43 = vsel %vm984_vm3, %v1041_v42, -inf  ;;  %2404 = vset.pattern.permute.xlu1 %v2541_v41  ;;  %2405 = vset.pattern.permute.xlu0 %v2541_v41 }
 0x204   : > { %1046 = vmax.xlane.f32.xlu1 %v1045_v43 }
 0x26d   : > { %v1159_v44 = vpop.f32.mrb[8].mxu0 }
 0x26e   : > { %v1166_v45 = vmul.f32 0.25, %v1159_v44  ;;  %v2315_v46 = vpop.f32.mrb[9].mxu0 }
 0x26f   : > { %v1162_v47 = vpop.f32.mrb[10].mxu0 }
 0x270   : > { %v1167_v48 = vmul.f32 0.25, %v1162_v47  ;;  %v2316_v49 = vpop.f32.mrb[11].mxu0  ;;  %v1168_v50 = vadd.f32 %v2189_v34, %v1166_v45  ;;  %v2197_v47 = vld [vmem:[%s3054_s25] ss:$0 sm:$0xff] }
 0x272   : > { %v1170_v51 = vsel %vm984_vm3, %v1168_v50, -inf  ;;  %v1169_v52 = vadd.f32 %v2189_v34, %v1167_v48 }
 0x273   : > { %1171 = vmax.xlane.f32.xlu0 %v1170_v51 }
 0x274   : > { %v1173_v53 = vsel %vm984_vm3, %v1169_v52, -inf }
 0x275   : > { %1174 = vmax.xlane.f32.xlu1 %v1173_v53 }
 0x289   : > { %1193 = vrot.lane.b32.xlu0 %v2787_v25, %s2539_s22 }
 0x28d   : > { %v1044_v54 = vpop.xlane.xlu1 %1043 }
 0x28e   : > { %v1048_v55 = vsub.f32 %v1040_v40, %v1044_v54 }
 0x290   : > { %v1050_v56 = vmul.f32 1.442695, %v1048_v55 }
 0x291   : > { %v1047_v57 = vpop.xlane.xlu1 %1046 }
 0x292   : > { %2464 = vpow2.f32 %v1050_v56  ;;  %v1049_v58 = vsub.f32 %v1041_v42, %v1047_v57 }
 0x294   : > { %v1052_v59 = vmul.f32 1.442695, %v1049_v58 }
 0x296   : > { %2466 = vpow2.f32 %v1052_v59  ;;  %v838_v59 = vld [vmem:[%s3053_s26] sm:$0xff] }
 0x29c   : > { %v2465_v60 = vpop.eup %2464 }
 0x29d   : > { %v1054_v61 = vsel %vm984_vm3, %v2465_v60, 0.0 }
 0x29e   : > { %1055 = vadd.xlane.f32.xlu1 %v1054_v61 }
 0x2a0   : > { %v2467_v62 = vpop.eup %2466 }
 0x2a1   : > { %v1057_v63 = vsel %vm984_vm3, %v2467_v62, 0.0 }
 0x2a2   : > { %1058 = vadd.xlane.f32.xlu1 %v1057_v63 }
 0x300   : > { %v1172_v0 = vpop.xlane.xlu0 %1171 }
 0x301   : > { %v1176_v1 = vsub.f32 %v1168_v50, %v1172_v0 }
 0x302   : > { %v1175_v2 = vpop.xlane.xlu1 %1174 }
 0x303   : > { %v1178_v4 = vmul.f32 1.442695, %v1176_v1  ;;  %v1177_v5 = vsub.f32 %v1169_v52, %v1175_v2 }
 0x304   : > { %v1194_v23 = vpop.permute.xlu0 %1193 }
 0x305   : > { %2468 = vpow2.f32 %v1178_v4  ;;  %v1180_v6 = vmul.f32 1.442695, %v1177_v5 }
 0x307   : > { %2470 = vpow2.f32 %v1180_v6  ;;  %v2198_v6 = vld [vmem:[%s3057_s1] ss:$0 sm:$0xff] }
 0x30f   : > { %v2469_v7 = vpop.eup %2468 }
 0x310   : > { %v1182_v8 = vsel %vm984_vm3, %v2469_v7, 0.0 }
 0x311   : > { %v2471_v10 = vpop.eup %2470  ;;  %1183 = vadd.xlane.f32.xlu1 %v1182_v8  ;;  %v2443_v8 = vld [vmem:[%s2736_s4 + $0x88] sm:$0xff]  }
 0x312   : > { %v1185_v12 = vsel %vm984_vm3, %v2471_v10, 0.0 }
 0x315   : > { %1186 = vadd.xlane.f32.xlu1 %v1185_v12  ;;  %v2445_v12 = vld [vmem:[%s2736_s4] sm:$0xff]  }
 0x326   : > { %1066 = vrot.lane.b32.xlu1 %v2787_v25, %s2540_s20 }
 0x32b   : > { %v1056_v13 = vpop.xlane.xlu1 %1055 }
 0x32f   : > { %v1059_v14 = vpop.xlane.xlu1 %1058 }
 0x330   : > { %2472 = vrcp.f32 %v1059_v14  ;;  %v2447_v14 = vld [vmem:[%s2736_s4 + $0x8] sm:$0xff]  }
 0x331   : > { %2474 = vrcp.f32 %v1056_v13  ;;  %v2446_v13 = vld [vmem:[%s2736_s4 + $0x48] sm:$0xff]  }
 0x33a   : > { %v2473_v16 = vpop.eup %2472 }
 0x33b   : > { %v2475_v18 = vpop.eup %2474  ;;  %v1063_v19 = vmul.f32 %v2473_v16, %v2467_v62 }
 0x33c   : > { %v1062_v20 = vmul.f32 %v2475_v18, %v2465_v60  ;;  %v839_v60 = vld [vmem:[%s3053_s26 + $0x8] sm:$0xff] }
 0x33e   : > { %v1064_v22 = vpack.c.bf16 %v1063_v19, %v1062_v20 }
 0x39e   : > { %v1184_v15 = vpop.xlane.xlu1 %1183 }
 0x39f   : > { %2476 = vrcp.f32 %v1184_v15 }
 0x3a2   : > { %v1187_v17 = vpop.xlane.xlu1 %1186 }
 0x3a3   : > { %2478 = vrcp.f32 %v1187_v17 }
 0x3a6   : > { %v1067_v21 = vpop.permute.xlu1 %1066 }
 0x3a7   : > { %2306 = vmatpush3.bf16.msra.mxu1 %v1067_v21 }
 0x3a8   : > { %2317 = vmatprep.subr.bf16.mxu1 %v2536_v3 }
 0x3a9   : > { %v2477_v24 = vpop.eup %2476 }
 0x3aa   : > { %2308 = vmatmul.mubr.msk.bf16.vlgmr.msra.gmra.mrb[4].mxu1 %vm984_vm3, %v1064_v22  ;;  %v1190_v26 = vmul.f32 %v2477_v24, %v2469_v7  ;;  %v2442_v7 = vld [vmem:[%s2736_s4 + $0x80] sm:$0xff]  }
 0x3ab   : > { %2318 = vmatpush3.bf16.msra.mxu1 %v1194_v23  ;;  %2319 = vmatprep.mubr.msk.bf16.mxu1 %vm2537_vm1, %v2536_v3 }
 0x3ac   : > { %2329 = vmatprep.subr.bf16.mxu1 %v2536_v3 }
 0x3ad   : > { %v2479_v25 = vpop.eup %2478 }
 0x3ae   : > { %v1191_v27 = vmul.f32 %v2479_v25, %v2471_v10  ;;  %v2444_v10 = vld [vmem:[%s2736_s4 + $0x40] sm:$0xff]  }
 0x3af   : > { %2253 = vmatprep.subr.bf16.mxu0 %v2444_v10 }
 0x3b0   : > { %v1192_v28 = vpack.c.bf16 %v1191_v27, %v1190_v26 }
 0x3b2   : > { %2320 = vmatmul.mubr.msk.bf16.vlgmr.msra.gmra.mrb[8].mxu1 %vm984_vm3, %v1192_v28 }
 0x3b3   : > { %2331 = vmatprep.mubr.msk.bf16.mxu1 %vm2537_vm1, %v2536_v3  ;;  %2330 = vmatpush3.bf16.msra.mxu1 %v2440_v29 }
 0x3b4   : > { %2335 = vmatprep.subr.bf16.mxu1 %v2536_v3 }
 0x47d   : > { %v1106_v31 = vpop.f32.mrb[4].mxu1 }
 0x47e   : > { %v2309_v32 = vpop.f32.mrb[5].mxu1 }
 0x47f   : > { %v1109_v33 = vpop.f32.mrb[6].mxu1 }
 0x480   : > { %v1113_v34 = vpack.c.bf16 %v1109_v33, %v1106_v31  ;;  %v2310_v35 = vpop.f32.mrb[7].mxu1 }
 0x481   : > { %v2449_v35 = vld [vmem:[%s2736_s4 + $0x10] sm:$0xff]  }
 0x482   : > { %2332 = vmatmul.mubr.msk.bf16.vlgmr.msra.gmra.mrb[12].mxu1 %vm984_vm3, %v1113_v34  ;;  %v2448_v34 = vld [vmem:[%s2736_s4 + $0x50] sm:$0xff]  }
 0x483   : > { %2339 = vmatprep.mubr.msk.bf16.mxu1 %vm2537_vm1, %v2536_v3  ;;  %2336 = vmatpush3.bf16.msra.mxu1 %v2442_v7 }
 0x484   : > { %2337 = vmatprep.subr.bf16.mxu1 %v2536_v3 }
 0x485   : > { %v1233_v36 = vpop.f32.mrb[8].mxu1 }
 0x486   : > { %v2321_v37 = vpop.f32.mrb[9].mxu1 }
 0x487   : > { %v1236_v38 = vpop.f32.mrb[10].mxu1  ;;  %2338 = vmatpush3.bf16.msra.mxu1 %v2443_v8 }
 0x488   : > { %v1240_v39 = vpack.c.bf16 %v1236_v38, %v1233_v36  ;;  %v2322_v40 = vpop.f32.mrb[11].mxu1  ;;  %2343 = vmatprep.subr.bf16.mxu1 %v2536_v3 }
 0x489   : > { %v2451_v40 = vld [vmem:[%s2736_s4 + $0x18] sm:$0xff]  }
 0x48a   : > { %2326 = vmatmul.mubr.msk.bf16.vlgmr.msra.gmra.mrb[12].mxu0 %vm984_vm3, %v1240_v39  ;;  %v2450_v39 = vld [vmem:[%s2736_s4 + $0x58] sm:$0xff]  }
 0x48b   : > { %2254 = vmatpush3.bf16.msra.mxu0 %v2445_v12 }
 0x48c   : > { %2255 = vmatprep.subr.bf16.mxu0 %v2446_v13 }
 0x48f   : > { %2256 = vmatpush3.bf16.msra.mxu0 %v2447_v14 }
 0x490   : > { %2257 = vmatprep.subr.bf16.mxu0 %v2448_v34 }
 0x493   : > { %2258 = vmatpush3.bf16.msra.mxu0 %v2449_v35 }
 0x494   : > { %2259 = vmatprep.subr.bf16.mxu0 %v2450_v39 }
 0x497   : > { %2260 = vmatpush3.bf16.msra.mxu0 %v2451_v40 }
 0x555   : > { %v1334_v42 = vpop.f32.mrb[12].mxu1 }
 0x556   : > { %v2333_v43 = vpop.f32.mrb[13].mxu1 }
 0x557   : > { %v1337_v44 = vpop.f32.mrb[14].mxu1 }
 0x558   : > { %v2334_v45 = vpop.f32.mrb[15].mxu1 }
 0x55d   : > { %v1284_v46 = vpop.f32.mrb[12].mxu0 }
 0x55e   : > { %v1335_v48 = vadd.f32 %v1334_v42, %v1284_v46  ;;  %v2327_v49 = vpop.f32.mrb[13].mxu0 }
 0x55f   : > { %v1287_v50 = vpop.f32.mrb[14].mxu0 }
 0x560   : > { %v1348_v51 = vadd.f32 %v2197_v47, %v1335_v48  ;;  %v1338_v52 = vadd.f32 %v1337_v44, %v1287_v50  ;;  %v2328_v53 = vpop.f32.mrb[15].mxu0 }
 0x561   : > { %v2453_v53 = vld [vmem:[%s2736_s4 + $0x20] sm:$0xff]  }
 0x562   : > { %v1349_v54 = vadd.f32 %v2197_v47, %v1338_v52  ;;  %v1350_v55 = vadd.f32 %v1348_v51, %v2762_v9  ;;  %v2452_v52 = vld [vmem:[%s2736_s4 + $0x60] sm:$0xff]  }
 0x563   : > { %2261 = vmatprep.subr.bf16.mxu0 %v2452_v52 }
 0x564   : > { %v1353_v56 = vsel %vm865_vm2, %v1350_v55, 0.0  ;;  %v1351_v57 = vadd.f32 %v1349_v54, %v2765_v11  ;;  %2262 = vmatpush3.bf16.msra.mxu0 %v2453_v53 }
 0x565   : > { %1354 = vadd.xlane.f32.xlu1 %v1353_v56 }
 0x566   : > { %v1356_v58 = vsel %vm865_vm2, %v1351_v57, 0.0 }
 0x567   : > { %1357 = vadd.xlane.f32.xlu0 %v1356_v58 }
 0x576   : > { %1395 = vperm.xlu1 %2404, %v838_v59  }
 0x57d   : > { %1400 = vperm.xlu0 %2405, %v839_v60  }
 0x5f2   : > { %v1355_v61 = vpop.xlane.xlu1 %1354 }
 0x5f3   : > { %v1360_v62 = vmul.f32 0.03125, %v1355_v61 }
 0x5f4   : > { %v1358_v63 = vpop.xlane.xlu0 %1357 }
 0x5f5   : > { %v1362_v0 = vsub.f32 %v1350_v55, %v1360_v62  ;;  %v1361_v9 = vmul.f32 0.03125, %v1358_v63  ;;  %v2454_v62 = vld [vmem:[%s2736_s4 + $0x68] sm:$0xff]  }
 0x5f6   : > { %v2859_v15 = vpop.permute.xlu1 %1395  ;;  %v2455_v63 = vld [vmem:[%s2736_s4 + $0x28] sm:$0xff]   ;;  %2263 = vmatprep.subr.bf16.mxu0 %v2454_v62 }
 0x5f7   : > { %v1363_v1 = vsub.f32 %v1351_v57, %v1361_v9  ;;  %v1364_v11 = vmul.f32 %v1362_v0, %v1362_v0  ;;  %2264 = vmatpush3.bf16.msra.mxu0 %v2455_v63 }
 0x5f9   : > { %v1366_v2 = vsel %vm865_vm2, %v1364_v11, 0.0  ;;  %v1365_v4 = vmul.f32 %v1363_v1, %v1363_v1 }
 0x5fa   : > { %1367 = vadd.xlane.f32.xlu1 %v1366_v2 }
 0x5fb   : > { %v1369_v5 = vsel %vm865_vm2, %v1365_v4, 0.0 }
 0x5fc   : > { %v2864_v31 = vpop.permute.xlu0 %1400 }
 0x5fe   : > { %1370 = vadd.xlane.f32.xlu1 %v1369_v5  ;;  %v2456_v5 = vld [vmem:[%s2736_s4 + $0x70] sm:$0xff]  }
 0x5ff   : > { %2265 = vmatprep.subr.bf16.mxu0 %v2456_v5  ;;  %v2460_v5 = vld [vmem:[%s2741_s21] sm:$0xff]  }
 0x60f   : > { %1388 = vrot.lane.b32.xlu1 %v2198_v6, %s2540_s20 }
 0x687   : > { %v1368_v16 = vpop.xlane.xlu1 %1367 }
 0x688   : > { %v1372_v17 = vmul.f32 0.03125, %v1368_v16 }
 0x68a   : > { %v1374_v18 = vadd.f32 1e-05, %v1372_v17 }
 0x68b   : > { %v1371_v19 = vpop.xlane.xlu1 %1370 }
 0x68c   : > { %2480 = vrsqrt.f32 %v1374_v18  ;;  %v1373_v20 = vmul.f32 0.03125, %v1371_v19  ;;  %v2458_v18 = vld [vmem:[%s2736_s4 + $0x78] sm:$0xff]  }
 0x68d   : > { %v2459_v19 = vld [vmem:[%s2736_s4 + $0x38] sm:$0xff]  }
 0x68e   : > { %v1375_v21 = vadd.f32 1e-05, %v1373_v20 }
 0x68f   : > { %v1389_v24 = vpop.permute.xlu1 %1388 }
 0x690   : > { %2482 = vrsqrt.f32 %v1375_v21 }
 0x696   : > { %v2481_v22 = vpop.eup %2480 }
 0x697   : > { %v1378_v23 = vmul.f32 %v2481_v22, %v1362_v0 }
 0x699   : > { %v1386_v25 = vmul.f32 %v2198_v6, %v1378_v23 }
 0x69a   : > { %v2483_v26 = vpop.eup %2482 }
 0x69b   : > { %v1379_v27 = vmul.f32 %v2483_v26, %v1363_v1  ;;  %v1391_v28 = vadd.f32 %v1389_v24, %v1386_v25 }
 0x69d   : > { %v1387_v29 = vmul.f32 %v2198_v6, %v1379_v27  ;;  %v2862_v30 = vmul.f32 %v2859_v15, %v1391_v28  ;;  %v2457_v6 = vld [vmem:[%s2736_s4 + $0x30] sm:$0xff]  }
 0x69e   : > { %2266 = vmatpush3.bf16.msra.mxu0 %v2457_v6  ;;  %v2461_v6 = vld [vmem:[%s2741_s21 + $0x8] sm:$0xff]  }
 0x69f   : > { %v1392_v32 = vadd.f32 %v1389_v24, %v1387_v29  ;;  %v1454_v33 = vrot.slane %v2862_v30, 4  ;;  %2267 = vmatprep.subr.bf16.mxu0 %v2458_v18 }
 0x6a1   : > { %v2870_v36 = vmul.f32 %v2864_v31, %v1392_v32  ;;  %v2873_v37 = vsel %vm1453_vm4, 0.0, %v1454_v33 }
 0x6a2   : > { %v1508_v43 = vrot.slane %v2873_v37, 5  ;;  %v1465_v51 = vrot.slane %v2873_v37, 1  ;;  %v1520_v59 = vrot.slane %v2873_v37, 6  ;;  %v1477_v7 = vrot.slane %v2873_v37, 2  ;;  %2268 = vmatpush3.bf16.msra.mxu0 %v2459_v19 }
 0x6a3   : > { %v1455_v38 = vrot.slane %v2870_v36, 4  ;;  %v1532_v16 = vrot.slane %v2873_v37, 7  ;;  %v1489_v24 = vrot.slane %v2873_v37, 3  ;;  %v1500_v39 = vrot.slane %v2873_v37, 4 }
 0x6a5   : > { %v2879_v41 = vsel %vm1453_vm4, %v1454_v33, %v1455_v38  ;;  %v2882_v42 = vsel %vm1453_vm4, %v1455_v38, 0.0 }
 0x6a6   : > { %v1559_v44 = vpack.c.bf16 %v2882_v42, %v2879_v41  ;;  %v1509_v45 = vrot.slane %v2879_v41, 5  ;;  %v1511_v46 = vrot.slane %v2882_v42, 5  ;;  %v1466_v47 = vrot.slane %v2879_v41, 1 }
 0x6a7   : > { %v1468_v48 = vrot.slane %v2882_v42, 1  ;;  %v1521_v57 = vrot.slane %v2879_v41, 6  ;;  %v1523_v58 = vrot.slane %v2882_v42, 6  ;;  %v1503_v60 = vrot.slane %v2882_v42, 4 }
 0x6a8   : > { %2340 = vmatmul.mubr.msk.bf16.vlgmr.msra.gmra.mrb[16].mxu1 %vm865_vm2, %v1559_v44  ;;  %v1510_v49 = vsel %vm1507_vm5, %v1508_v43, %v1509_v45  ;;  %v1512_v50 = vsel %vm1507_vm5, %v1509_v45, %v1511_v46  ;;  %v1467_v55 = vsel %vm1464_vm6, %v1465_v51, %v1466_v47  ;;  %v1501_v61 = vrot.slane %v2879_v41, 4 }
 0x6a9   : > { %v2406_v54 = vpack.i.bf16 %v1512_v50, %v1510_v49  ;;  %2351 = vmatprep.mubr.msk.bf16.mxu1 %vm2537_vm1, %v2536_v3  ;;  %v1469_v56 = vsel %vm1464_vm6, %v1466_v47, %v1468_v48  ;;  %v1478_v9 = vrot.slane %v2879_v41, 2  ;;  %v1522_v1 = vsel %vm1519_vm7, %v1520_v59, %v1521_v57  ;;  %2344 = vmatpush3.bf16.msra.mxu1 %v2460_v5 }
 0x6aa   : > { %v2411_v0 = vpack.i.bf16 %v1469_v56, %v1467_v55  ;;  %v1524_v11 = vsel %vm1519_vm7, %v1521_v57, %v1523_v58  ;;  %v1480_v2 = vrot.slane %v2882_v42, 2  ;;  %v1504_v4 = vsel %vm1453_vm4, %v1501_v61, %v1503_v60  ;;  %2345 = vmatprep.subr.bf16.mxu1 %v2536_v3 }
 0x6ab   : > { %2407 = vrot.lane.b32.xlu1 %v2406_v54, %s2542_s5  ;;  %v2416_v8 = vpack.i.bf16 %v1524_v11, %v1522_v1  ;;  %v1479_v10 = vsel %vm1476_vm8, %v1477_v7, %v1478_v9  ;;  %v1533_v13 = vrot.slane %v2879_v41, 7  ;;  %v1535_v14 = vrot.slane %v2882_v42, 7  ;;  %v2462_v7 = vld [vmem:[%s2741_s21 + $0x10] sm:$0xff]  }
 0x6ac   : > { %v1481_v12 = vsel %vm1476_vm8, %v1478_v9, %v1480_v2  ;;  %v1490_v22 = vrot.slane %v2879_v41, 3  ;;  %v1492_v23 = vrot.slane %v2882_v42, 3  ;;  %v1502_v43 = vsel %vm1453_vm4, %v1500_v39, %v1501_v61 }
 0x6ad   : > { %v2421_v17 = vpack.i.bf16 %v1481_v12, %v1479_v10  ;;  %v1534_v20 = vsel %vm1531_vm9, %v1532_v16, %v1533_v13  ;;  %v1536_v21 = vsel %vm1531_vm9, %v1533_v13, %v1535_v14  ;;  %2346 = vmatpush3.bf16.msra.mxu1 %v2461_v6  ;;  %v2199_v12 = vld [vmem:[%s3059_s16] ss:$0 sm:$0xff] }
 0x6ae   : > { %v2426_v25 = vpack.i.bf16 %v1536_v21, %v1534_v20  ;;  %v1491_v26 = vsel %vm1488_vm10, %v1489_v24, %v1490_v22  ;;  %v1493_v27 = vsel %vm1488_vm10, %v1490_v22, %v1492_v23  ;;  %2347 = vmatprep.subr.bf16.mxu1 %v2536_v3 }
 0x6af   : > { %2412 = vrot.lane.b32.xlu1 %v2411_v0, %s2542_s5  ;;  %v2431_v28 = vpack.i.bf16 %v1493_v27, %v1491_v26 }
 0x6b1   : > { %2348 = vmatpush3.bf16.msra.mxu1 %v2462_v7 }
 0x6b2   : > { %2349 = vmatprep.subr.bf16.mxu1 %v2536_v3 }
 0x6b3   : > { %2417 = vrot.lane.b32.xlu1 %v2416_v8, %s2543_s10  ;;  %v2463_v8 = vld [vmem:[%s2741_s21 + $0x18] sm:$0xff]  }
 0x6b5   : > { %2350 = vmatpush3.bf16.msra.mxu1 %v2463_v8 }
 0x6b7   : > { %2422 = vrot.lane.b32.xlu1 %v2421_v17, %s2543_s10 }
 0x6bb   : > { %2427 = vrot.lane.b32.xlu1 %v2426_v25, %s2540_s20 }
 0x6bf   : > { %2432 = vrot.lane.b32.xlu1 %v2431_v28, %s2540_s20 }
 0x71d   : > { %v2408_v29 = vpop.permute.xlu1 %2407 }
 0x71e   : > { %v2410_v34 = vunpack.i.h.bf16 %v2408_v29  ;;  %v2409_v35 = vunpack.i.l.bf16 %v2408_v29 }
 0x720   : > { %v1551_v44 = vsel %vm865_vm2, %v1502_v43, %v2409_v35  ;;  %v1552_v45 = vsel %vm865_vm2, %v1504_v4, %v2410_v34 }
 0x721   : > { %v2413_v32 = vpop.permute.xlu1 %2412 }
 0x722   : > { %v2415_v47 = vunpack.i.h.bf16 %v2413_v32  ;;  %v2414_v48 = vunpack.i.l.bf16 %v2413_v32 }
 0x724   : > { %v1544_v59 = vsel %vm865_vm2, %v2879_v41, %v2415_v47  ;;  %v1543_v60 = vsel %vm865_vm2, %v2873_v37, %v2414_v48 }
 0x725   : > { %v2418_v33 = vpop.permute.xlu1 %2417 }
 0x726   : > { %v2420_v40 = vunpack.i.h.bf16 %v2418_v33  ;;  %v2419_v42 = vunpack.i.l.bf16 %v2418_v33 }
 0x728   : > { %v1554_v51 = vsel %vm1545_vm11, %v1552_v45, %v2420_v40  ;;  %v1553_v52 = vsel %vm1545_vm11, %v1551_v44, %v2419_v42 }
 0x729   : > { %v2423_v38 = vpop.permute.xlu1 %2422 }
 0x72a   : > { %v2425_v53 = vunpack.i.h.bf16 %v2423_v38  ;;  %v2424_v54 = vunpack.i.l.bf16 %v2423_v38 }
 0x72c   : > { %v1546_v63 = vsel %vm1545_vm11, %v1543_v60, %v2424_v54  ;;  %v1547_v0 = vsel %vm1545_vm11, %v1544_v59, %v2425_v53 }
 0x72d   : > { %v2428_v46 = vpop.permute.xlu1 %2427 }
 0x72e   : > { %v2430_v49 = vunpack.i.h.bf16 %v2428_v46  ;;  %v2429_v50 = vunpack.i.l.bf16 %v2428_v46  ;;  %v2219_v46 = vld [vmem:[%s814_s19] ss:$0 sm:$0xff] }
 0x730   : > { %v1555_v55 = vsel %vm1548_vm12, %v1553_v52, %v2429_v50  ;;  %v1556_v56 = vsel %vm1548_vm12, %v1554_v51, %v2430_v49 }
 0x731   : > { %v2433_v57 = vpop.permute.xlu1 %2432  ;;  %v1558_v58 = vpack.c.bf16 %v1556_v56, %v1555_v55 }
 0x732   : > { %v2435_v61 = vunpack.i.h.bf16 %v2433_v57  ;;  %v2434_v62 = vunpack.i.l.bf16 %v2433_v57 }
 0x733   : > { %1709 = vmatprep.mubr.bf16.mxu0 %v1558_v58 }
 0x734   : > { %v1549_v9 = vsel %vm1548_vm12, %v1546_v63, %v2434_v62  ;;  %v1550_v1 = vsel %vm1548_vm12, %v1547_v0, %v2435_v61 }
 0x735   : > { %v1557_v11 = vpack.c.bf16 %v1550_v1, %v1549_v9 }
 0x737   : > { %1710 = vmatmul.mubr.bf16.vlgmr.msra.gmra.mrb[16].mxu0 %v1557_v11 }
 0x77b   : > { %v1752_v41 = vpop.f32.mrb[16].mxu1 }
 0x77c   : > { %v2341_v2 = vpop.f32.mrb[17].mxu1 }
 0x77d   : > { %v1755_v37 = vpop.f32.mrb[18].mxu1 }
 0x77e   : > { %v2342_v4 = vpop.f32.mrb[19].mxu1 }
 0x80a   : > { %v2269_v10 = vpop.f32.mrb[16].mxu0 }
 0x80b   : > { %v2270_v13 = vpop.f32.mrb[17].mxu0 }
 0x80c   : > { %v2271_v14 = vadd.f32 %v2270_v13, %v2269_v10  ;;  %v2272_v16 = vpop.f32.mrb[18].mxu0 }
 0x80d   : > { %v2273_v17 = vpop.f32.mrb[19].mxu0 }
 0x80e   : > { %v1712_v18 = vadd.f32 %v2271_v14, %v2199_v12  ;;  %v2274_v19 = vadd.f32 %v2273_v17, %v2272_v16 }
 0x810   : > { %v1753_v20 = vadd.f32 %v1752_v41, %v1712_v18  ;;  %v1715_v21 = vadd.f32 %v2274_v19, %v2199_v12 }
 0x812   : > { %v1759_v22 = vmin.f32 %v1753_v20, 20.0  ;;  %v1756_v23 = vadd.f32 %v1755_v37, %v1715_v21 }
 0x814   : > { %v1761_v24 = vmul.f32 1.442695, %v1759_v22  ;;  %v1760_v25 = vmin.f32 %v1756_v23, 20.0 }
 0x816   : > { %2484 = vpow2.f32 %v1761_v24  ;;  %v1763_v3 = vmul.f32 1.442695, %v1760_v25 }
 0x818   : > { %2486 = vpow2.f32 %v1763_v3 }
 0x820   : > { %v2485_v26 = vpop.eup %2484 }
 0x821   : > { %v1765_v27 = vadd.f32 2.0, %v2485_v26 }
 0x822   : > { %v2487_v28 = vpop.eup %2486 }
 0x823   : > { %v1767_v29 = vmul.f32 %v2485_v26, %v1765_v27  ;;  %v1766_v32 = vadd.f32 2.0, %v2487_v28 }
 0x825   : > { %v1771_v33 = vadd.f32 2.0, %v1767_v29  ;;  %v1768_v34 = vmul.f32 %v2487_v28, %v1766_v32  ;;  %v1769_v39 = vmul.f32 %v1767_v29, %v1753_v20 }
 0x827   : > { %2488 = vrcp.f32 %v1771_v33  ;;  %v1772_v35 = vadd.f32 2.0, %v1768_v34  ;;  %v1770_v40 = vmul.f32 %v1768_v34, %v1756_v23 }
 0x829   : > { %2490 = vrcp.f32 %v1772_v35 }
 0x831   : > { %v2489_v38 = vpop.eup %2488 }
 0x832   : > { %v1775_v43 = vmul.f32 %v2489_v38, %v1769_v39 }
 0x833   : > { %v2491_v42 = vpop.eup %2490 }
 0x834   : > { %v1776_v44 = vmul.f32 %v2491_v42, %v1770_v40 }
 0x836   : > { %v1777_v45 = vpack.c.bf16 %v1776_v44, %v1775_v43 }
 0x838   : > { %2352 = vmatmul.mubr.msk.bf16.vlgmr.msra.gmra.mrb[20].mxu1 %vm1545_vm11, %v1777_v45 }
 0x90b   : > { %v1845_v47 = vpop.f32.mrb[20].mxu1 }
 0x90c   : > { %v1846_v48 = vadd.f32 %v2219_v46, %v1845_v47  ;;  %v2353_v49 = vpop.f32.mrb[21].mxu1 }
 0x90d   : > { %v1848_v50 = vpop.f32.mrb[22].mxu1 }
 0x90e   : > { %v1849_v51 = vadd.f32 %v2219_v46, %v1848_v50  ;;  %v2354_v52 = vpop.f32.mrb[23].mxu1  ;;  %v1852_v53 = vadd.f32 %v1846_v48, %v2862_v30 }
 0x910   : > { %v1855_v54 = vsel %vm865_vm2, %v1852_v53, 0.0  ;;  %v1853_v55 = vadd.f32 %v1849_v51, %v2870_v36  ;;  %v2225_v36 = vld [vmem:[%s3061_s29] ss:$0 sm:$0xff] }
 0x911   : > { %1856 = vadd.xlane.f32.xlu1 %v1855_v54 }
 0x912   : > { %v1858_v56 = vsel %vm865_vm2, %v1853_v55, 0.0 }
 0x913   : > { %1859 = vadd.xlane.f32.xlu0 %v1858_v56 }
 0x99e   : > { %v1857_v57 = vpop.xlane.xlu1 %1856 }
 0x99f   : > { %v1861_v58 = vmul.f32 0.03125, %v1857_v57 }
 0x9a0   : > { %v1860_v59 = vpop.xlane.xlu0 %1859 }
 0x9a1   : > { %v1863_v60 = vsub.f32 %v1852_v53, %v1861_v58  ;;  %v1862_v61 = vmul.f32 0.03125, %v1860_v59 }
 0x9a3   : > { %v1864_v62 = vsub.f32 %v1853_v55, %v1862_v61  ;;  %v1865_v63 = vmul.f32 %v1863_v60, %v1863_v60 }
 0x9a5   : > { %v1867_v0 = vsel %vm865_vm2, %v1865_v63, 0.0  ;;  %v1866_v9 = vmul.f32 %v1864_v62, %v1864_v62 }
 0x9a6   : > { %1868 = vadd.xlane.f32.xlu0 %v1867_v0 }
 0x9a7   : > { %v1870_v30 = vsel %vm865_vm2, %v1866_v9, 0.0 }
 0x9a8   : > { %1871 = vadd.xlane.f32.xlu1 %v1870_v30 }
 0x9bc   : > { %1889 = vrot.lane.b32.xlu0 %v2225_v36, %s2540_s20 }
 0xa33   : > { %v1869_v1 = vpop.xlane.xlu0 %1868 }
 0xa34   : > { %v1873_v11 = vmul.f32 0.03125, %v1869_v1 }
 0xa35   : > { %v1872_v41 = vpop.xlane.xlu1 %1871 }
 0xa36   : > { %v1875_v2 = vadd.f32 1e-05, %v1873_v11  ;;  %v1874_v37 = vmul.f32 0.03125, %v1872_v41 }
 0xa37   : > { %v1890_v8 = vpop.permute.xlu0 %1889 }
 0xa38   : > { %2492 = vrsqrt.f32 %v1875_v2  ;;  %v1876_v4 = vadd.f32 1e-05, %v1874_v37 }
 0xa3a   : > { %2494 = vrsqrt.f32 %v1876_v4 }
 0xa42   : > { %v2493_v5 = vpop.eup %2492 }
 0xa43   : > { %v1879_v6 = vmul.f32 %v2493_v5, %v1863_v60 }
 0xa44   : > { %v2495_v7 = vpop.eup %2494 }
 0xa45   : > { %v1880_v10 = vmul.f32 %v2495_v7, %v1864_v62  ;;  %v1887_v12 = vmul.f32 %v2225_v36, %v1879_v6 }
 0xa47   : > { %v1888_v13 = vmul.f32 %v2225_v36, %v1880_v10  ;;  %v1892_v14 = vadd.f32 %v1890_v8, %v1887_v12 }
 0xa49   : > { %v1893_v16 = vadd.f32 %v1890_v8, %v1888_v13  ;;  %v1894_v17 = vmul.f32 %v1892_v14, %v2859_v15 }
 0xa4b   : > { %v1895_v18 = vmul.f32 %v1893_v16, %v2864_v31  ;;  %1896 = vst.msk [vmem:[#allocation2] sm:$0xff] %vm865_vm2, %v1894_v17  ;;  %1898 = vst.msk [vmem:[%s2748_s0] sm:$0xff] %vm865_vm2, %v1894_v17 }
 0xa4d   : > { %1897 = vst.msk [vmem:[#allocation2 + $0x8] sm:$0xff] %vm865_vm2, %v1895_v18  ;;  %1899 = vst.msk [vmem:[%s2748_s0 + $0x8] sm:$0xff] %vm865_vm2, %v1895_v18 }
 0xa4e PF: > { %s3062_s3 = sld [smem:[#allocation6_spill]]  ;;  %s3063_s21 = sld [smem:[#allocation4_spill]] }
 0xa4f   : > { %s3064_s22 = sld [smem:[#allocation5_spill]]  ;;  %s3065_s23 = sld [smem:[#allocation7_spill]] }
 0xa50   : > { %s3066_s24 = sld [smem:[#allocation8_spill]] }
 0xa54   : > { %s26_s25 = sadd.s32 1, %s3062_s3  }
 0xa55   : > { %p23_p8 = scmp.ge.s32.totalorder %s26_s25, 10  }
 0xa57   :  { %25 = sbr.rel (!%p23_p8) target bundleno = 13 (0xd), region = 163 }

</bundles_post_ra>
